<compile_context>
chip_gen: v7x
topology: tpu7x:2x2x1
jax: 0.10.0
libtpu: 0.0.40
codegen_flags: <defaults>
</compile_context>

<pallas_src>
import functools

import jax
import jax.numpy as jnp
from jax.experimental import pallas as pl
from jax.experimental.pallas import tpu as pltpu


# ---------------------------------------------------------------------------
# Fused kernel: 1x1 conv + PixelShuffle in one HBM pass.
# ---------------------------------------------------------------------------
def _fused_conv_shuffle_kernel(x_ref, w_ref, b_ref, o_ref, *, patch_size, out_chans):
    # x_ref: (1, C_in, k, W)            k image rows of one batch element
    # w_ref: (C_out, C_in)              C_out = out_chans * p**2, rows ordered
    #                                   c = oc*p*p + ph*p + pw (PixelShuffle order)
    # b_ref: (C_out, 1)                 f32 bias
    # o_ref: (1, out_chans, k*p, W*p)   final (already shuffled) output rows
    p = patch_size
    k = x_ref.shape[2]
    w_px = x_ref.shape[3]
    wmat = w_ref[...]
    bias = b_ref[...]
    for r in range(k):                                        # static unroll
        xr = x_ref[0, :, r, :]                                # (C_in, W)
        yr = jnp.dot(wmat, xr, preferred_element_type=jnp.float32) + bias
        # depth-to-space for this input row, entirely in VMEM:
        #   rows (oc, ph, pw) x lanes (w)  ->  rows (oc, ph) x lanes (w*p + pw)
        y3 = yr.reshape(out_chans * p, p, w_px)               # ((oc,ph), pw, w)
        y3 = jnp.swapaxes(y3, 1, 2)                           # ((oc,ph), w, pw)  XLU
        zr = y3.reshape(out_chans, p, w_px * p)               # (oc, ph, w*p+pw)
        o_ref[0, :, r * p:(r + 1) * p, :] = zr.astype(o_ref.dtype)


def _resident_spec(shape):
    """BlockSpec for grid-invariant operands (weight/bias): single-buffered."""
    index_map = lambda bi, si: (0,) * len(shape)
    if hasattr(pl, "Buffered"):
        try:
            return pl.BlockSpec(shape, index_map, pipeline_mode=pl.Buffered(1))
        except TypeError:
            pass
    return pl.BlockSpec(shape, index_map)


def _pick_row_tile(h, batch, c_in, w_px, itemsize, *, min_steps=4,
                   max_block_bytes=4 << 20):
    """Rows per tile: multiple of 8 dividing H (sublane rule), sized so the
    input block fits easily in VMEM and the grid has >= min_steps steps."""
    if h % 8 != 0:
        return h                       # full-extent block (legal for any size)
    cands = [k for k in range(8, h + 1, 8) if h % k == 0]
    fits = [k for k in cands if c_in * k * w_px * itemsize <= max_block_bytes]
    if not fits:
        return 8
    good = [k for k in fits if batch * (h // k) >= min_steps]
    return max(good) if good else min(fits)


def _patch_unembed_fused(x, wmat, bias_col, *, patch_size, out_chans):
    B, c_in, H, W = x.shape
    p = patch_size
    c_out = wmat.shape[0]
    k = _pick_row_tile(H, B, c_in, W, x.dtype.itemsize)
    grid = (B, H // k)
    out_dtype = x.dtype

    flops = 2 * B * H * W * c_in * c_out
    bytes_accessed = int(
        x.size * x.dtype.itemsize + wmat.size * wmat.dtype.itemsize
        + bias_col.size * 4
        + B * out_chans * H * p * W * p * jnp.dtype(out_dtype).itemsize)

    kern = functools.partial(_fused_conv_shuffle_kernel,
                             patch_size=p, out_chans=out_chans)
    return pl.pallas_call(
        kern,
        out_shape=jax.ShapeDtypeStruct((B, out_chans, H * p, W * p), out_dtype),
        grid_spec=pltpu.PrefetchScalarGridSpec(
            num_scalar_prefetch=0,
            grid=grid,
            in_specs=[
                pl.BlockSpec((1, c_in, k, W), lambda bi, si: (bi, 0, si, 0)),
                _resident_spec((c_out, c_in)),
                _resident_spec((c_out, 1)),
            ],
            out_specs=pl.BlockSpec((1, out_chans, k * p, W * p),
                                   lambda bi, si: (bi, 0, si, 0)),
        ),
        compiler_params=pltpu.CompilerParams(
            dimension_semantics=("parallel", "parallel")),
        cost_estimate=pl.CostEstimate(flops=flops, transcendentals=0,
                                      bytes_accessed=bytes_accessed),
    )(x, wmat, bias_col)


# ---------------------------------------------------------------------------
# Fallback: conv-only Pallas kernel (spatial on lanes) + XLA PixelShuffle.
# ---------------------------------------------------------------------------
def _conv1x1_kernel(x_ref, w_ref, b_ref, o_ref):
    # x_ref: (1, C_in, T), w_ref: (C_out, C_in), b_ref: (C_out, 1), o_ref: (1, C_out, T)
    y = jnp.dot(w_ref[...], x_ref[0], preferred_element_type=jnp.float32)
    o_ref[0] = (y + b_ref[...]).astype(o_ref.dtype)


def _pick_spatial_tile(hw, batch, *, min_steps=4, max_tile=4096):
    """hw is a multiple of 128; largest 128-multiple divisor with enough steps."""
    divs = [t for t in range(128, min(hw, max_tile) + 1, 128) if hw % t == 0]
    if not divs:
        return hw
    good = [t for t in divs if batch * (hw // t) >= min_steps]
    return max(good) if good else min(divs)


def _patch_unembed_unfused(x, wmat, bias_col, *, patch_size, out_chans):
    B, c_in, H, W = x.shape
    p = patch_size
    c_out = wmat.shape[0]
    hw = H * W
    x_flat = x.reshape(B, c_in, hw)                     # free reshape, no transpose
    pad = (-hw) % 128                                   # keep blocks lane-aligned
    if pad:
        x_flat = jnp.pad(x_flat, ((0, 0), (0, 0), (0, pad)))
    hwp = hw + pad
    t = _pick_spatial_tile(hwp, B)
    grid = (B, hwp // t)

    flops = 2 * B * hw * c_in * c_out
    bytes_accessed = int(x.size * x.dtype.itemsize + wmat.size * wmat.dtype.itemsize
                         + bias_col.size * 4 + B * c_out * hw * x.dtype.itemsize)

    y = pl.pallas_call(
        _conv1x1_kernel,
        out_shape=jax.ShapeDtypeStruct((B, c_out, hwp), x.dtype),
        grid_spec=pltpu.PrefetchScalarGridSpec(
            num_scalar_prefetch=0,
            grid=grid,
            in_specs=[
                pl.BlockSpec((1, c_in, t), lambda bi, si: (bi, 0, si)),
                pl.BlockSpec((c_out, c_in), lambda bi, si: (0, 0)),
                pl.BlockSpec((c_out, 1), lambda bi, si: (0, 0)),
            ],
            out_specs=pl.BlockSpec((1, c_out, t), lambda bi, si: (bi, 0, si)),
        ),
        compiler_params=pltpu.CompilerParams(
            dimension_semantics=("parallel", "parallel")),
        cost_estimate=pl.CostEstimate(flops=flops, transcendentals=0,
                                      bytes_accessed=bytes_accessed),
    )(x_flat, wmat, bias_col)

    y = y[:, :, :hw].reshape(B, out_chans, p, p, H, W)
    return y.transpose(0, 1, 4, 2, 5, 3).reshape(B, out_chans, H * p, W * p)


# ---------------------------------------------------------------------------
# Public entry point.
# ---------------------------------------------------------------------------
def patch_unembed_pallas(x, weight, bias, *, patch_size, out_chans):
    """x: (B, embed_dim, H, W); weight: Conv2d 1x1 weight (C_out, C_in[,1,1]);
    bias: (C_out,). Returns (B, out_chans, H*patch_size, W*patch_size)."""
    c_out = out_chans * patch_size ** 2
    wmat = jnp.asarray(weight)
    if wmat.ndim == 4:
        assert wmat.shape[2:] == (1, 1), "expected a 1x1 Conv2d weight"
        wmat = wmat[:, :, 0, 0]
    assert wmat.shape == (c_out, x.shape[1]), (wmat.shape, (c_out, x.shape[1]))
    wmat = wmat.astype(x.dtype)                          # keep model dtype end-to-end
    bias_col = jnp.asarray(bias).reshape(c_out, 1).astype(jnp.float32)

    try:
        out = _patch_unembed_fused(x, wmat, bias_col,
                                   patch_size=patch_size, out_chans=out_chans)
        return jax.block_until_ready(out)   # surface Mosaic lowering errors here
    except Exception:
        # TODO(synk): some jaxlib/Mosaic versions cannot lower the in-kernel
        # minor-dim relayout (reshape + swapaxes) used for the fused
        # PixelShuffle; fall back to conv-in-Pallas + XLA depth-to-space.
        pass
    return _patch_unembed_unfused(x, wmat, bias_col,
                                  patch_size=patch_size, out_chans=out_chans)


def patch_unembed_ref(x, weight, bias, *, patch_size, out_chans):
    """Pure-JAX reference mirroring the PyTorch forward (kernel_size=1)."""
    w = jnp.asarray(weight)
    if w.ndim == 4:
        w = w[:, :, 0, 0]
    B, _, H, W = x.shape
    y = jnp.einsum("oc,bchw->bohw", w, x) + jnp.asarray(bias)[None, :, None, None]
    y = y.reshape(B, out_chans, patch_size, patch_size, H, W)
    return y.transpose(0, 1, 4, 2, 5, 3).reshape(
        B, out_chans, H * patch_size, W * patch_size)


if __name__ == "__main__":
    # PatchUnEmbed(patch_size=4, out_chans=3, embed_dim=96, kernel_size=None -> 1)
    B, embed_dim, H, W = 2, 96, 16, 16
    patch_size, out_chans = 4, 3
    c_out = out_chans * patch_size ** 2                  # 48

    key = jax.random.PRNGKey(0)
    k1, k2, k3 = jax.random.split(key, 3)
    x = jax.random.normal(k1, (B, embed_dim, H, W), jnp.float32)
    weight = 0.1 * jax.random.normal(k2, (c_out, embed_dim, 1, 1), jnp.float32)
    bias = 0.1 * jax.random.normal(k3, (c_out,), jnp.float32)

    out = patch_unembed_pallas(x, weight, bias,
                               patch_size=patch_size, out_chans=out_chans)
    out = jax.block_until_ready(out)

    ref = patch_unembed_ref(x, weight, bias,
                            patch_size=patch_size, out_chans=out_chans)
    assert out.shape == (B, out_chans, H * patch_size, W * patch_size), out.shape
    assert jnp.allclose(out, ref, atol=2e-3, rtol=2e-3), float(
        jnp.max(jnp.abs(out - ref)))

    print("KERNEL_OK")
</pallas_src>

<mosaic_0001>
module attributes {stable_mosaic.version = 11 : i64} {
  func.func @_fused_conv_shuffle_kernel(%arg0: i32, %arg1: i32, %arg2: memref<1x96x8x16xf32, #tpu.memory_space<vmem>>, %arg3: memref<48x96xf32, #tpu.memory_space<vmem>>, %arg4: memref<48x1xf32, #tpu.memory_space<vmem>>, %arg5: memref<1x3x32x64xf32, #tpu.memory_space<vmem>>) attributes {dimension_semantics = [#tpu.dimension_semantics<parallel>, #tpu.dimension_semantics<parallel>], iteration_bounds = array<i64: 2, 2>, scalar_prefetch = 0 : i64, scratch_operands = 0 : i64, tpu.core_type = #tpu.core_type<tc>, window_params = [{transform_indices = @transform_0, window_bounds = array<i64: 1, 96, 8, 16>}, {pipeline_mode = #tpu.pipeline_mode<synchronous>, transform_indices = @transform_1, window_bounds = array<i64: 48, 96>}, {pipeline_mode = #tpu.pipeline_mode<synchronous>, transform_indices = @transform_2, window_bounds = array<i64: 48, 1>}, {transform_indices = @transform_3, window_bounds = array<i64: 1, 3, 32, 64>}]} {
    %c0 = arith.constant 0 : index
    %c0_0 = arith.constant 0 : index
    %0 = vector.load %arg3[%c0, %c0_0] : memref<48x96xf32, #tpu.memory_space<vmem>>, vector<48x96xf32>
    %c0_1 = arith.constant 0 : index
    %c0_2 = arith.constant 0 : index
    %1 = vector.load %arg4[%c0_1, %c0_2] : memref<48x1xf32, #tpu.memory_space<vmem>>, vector<48x1xf32>
    %c0_3 = arith.constant 0 : index
    %c0_4 = arith.constant 0 : index
    %c0_5 = arith.constant 0 : index
    %c0_6 = arith.constant 0 : index
    %2 = vector.load %arg2[%c0_3, %c0_4, %c0_5, %c0_6] : memref<1x96x8x16xf32, #tpu.memory_space<vmem>>, vector<1x96x1x16xf32>
    %3 = vector.shape_cast %2 : vector<1x96x1x16xf32> to vector<96x16xf32>
    %cst = arith.constant dense<0.000000e+00> : vector<48x16xf32>
    %4 = tpu.matmul %0, %3, %cst {dimension_numbers = #tpu.dot_dimension_numbers<[1], [0], [0], [1], [0, 0, 1, 1], [], []>} : vector<48x96xf32>, vector<96x16xf32>, vector<48x16xf32> -> vector<48x16xf32>
    %5 = vector.broadcast %1 : vector<48x1xf32> to vector<48x16xf32>
    %6 = arith.addf %4, %5 : vector<48x16xf32>
    %7 = vector.shape_cast %6 : vector<48x16xf32> to vector<12x4x16xf32>
    %8 = tpu.transpose %7, [0, 2, 1] : vector<12x4x16xf32> -> vector<12x16x4xf32>
    %9 = vector.shape_cast %8 : vector<12x16x4xf32> to vector<3x4x64xf32>
    %c0_7 = arith.constant 0 : index
    %c0_8 = arith.constant 0 : index
    %c0_9 = arith.constant 0 : index
    %c0_10 = arith.constant 0 : index
    %10 = vector.load %arg5[%c0_7, %c0_8, %c0_9, %c0_10] : memref<1x3x32x64xf32, #tpu.memory_space<vmem>>, vector<1x3x4x64xf32>
    %11 = vector.shape_cast %10 : vector<1x3x4x64xf32> to vector<3x4x64xf32>
    %12 = vector.shape_cast %9 : vector<3x4x64xf32> to vector<1x3x4x64xf32>
    tpu.vector_store %arg5[%c0_7, %c0_8, %c0_9, %c0_10], %12 {strides = array<i32>} : memref<1x3x32x64xf32, #tpu.memory_space<vmem>>, vector<1x3x4x64xf32>,
    %c0_11 = arith.constant 0 : index
    %c0_12 = arith.constant 0 : index
    %c1 = arith.constant 1 : index
    %c0_13 = arith.constant 0 : index
    %13 = vector.load %arg2[%c0_11, %c0_12, %c1, %c0_13] : memref<1x96x8x16xf32, #tpu.memory_space<vmem>>, vector<1x96x1x16xf32>
    %14 = vector.shape_cast %13 : vector<1x96x1x16xf32> to vector<96x16xf32>
    %cst_14 = arith.constant dense<0.000000e+00> : vector<48x16xf32>
    %15 = tpu.matmul %0, %14, %cst_14 {dimension_numbers = #tpu.dot_dimension_numbers<[1], [0], [0], [1], [0, 0, 1, 1], [], []>} : vector<48x96xf32>, vector<96x16xf32>, vector<48x16xf32> -> vector<48x16xf32>
    %16 = vector.broadcast %1 : vector<48x1xf32> to vector<48x16xf32>
    %17 = arith.addf %15, %16 : vector<48x16xf32>
    %18 = vector.shape_cast %17 : vector<48x16xf32> to vector<12x4x16xf32>
    %19 = tpu.transpose %18, [0, 2, 1] : vector<12x4x16xf32> -> vector<12x16x4xf32>
    %20 = vector.shape_cast %19 : vector<12x16x4xf32> to vector<3x4x64xf32>
    %c0_15 = arith.constant 0 : index
    %c0_16 = arith.constant 0 : index
    %c4 = arith.constant 4 : index
    %c0_17 = arith.constant 0 : index
    %21 = vector.load %arg5[%c0_15, %c0_16, %c4, %c0_17] : memref<1x3x32x64xf32, #tpu.memory_space<vmem>>, vector<1x3x4x64xf32>
    %22 = vector.shape_cast %21 : vector<1x3x4x64xf32> to vector<3x4x64xf32>
    %23 = vector.shape_cast %20 : vector<3x4x64xf32> to vector<1x3x4x64xf32>
    tpu.vector_store %arg5[%c0_15, %c0_16, %c4, %c0_17], %23 {strides = array<i32>} : memref<1x3x32x64xf32, #tpu.memory_space<vmem>>, vector<1x3x4x64xf32>,
    %c0_18 = arith.constant 0 : index
    %c0_19 = arith.constant 0 : index
    %c2 = arith.constant 2 : index
    %c0_20 = arith.constant 0 : index
    %24 = vector.load %arg2[%c0_18, %c0_19, %c2, %c0_20] : memref<1x96x8x16xf32, #tpu.memory_space<vmem>>, vector<1x96x1x16xf32>
    %25 = vector.shape_cast %24 : vector<1x96x1x16xf32> to vector<96x16xf32>
    %cst_21 = arith.constant dense<0.000000e+00> : vector<48x16xf32>
    %26 = tpu.matmul %0, %25, %cst_21 {dimension_numbers = #tpu.dot_dimension_numbers<[1], [0], [0], [1], [0, 0, 1, 1], [], []>} : vector<48x96xf32>, vector<96x16xf32>, vector<48x16xf32> -> vector<48x16xf32>
    %27 = vector.broadcast %1 : vector<48x1xf32> to vector<48x16xf32>
    %28 = arith.addf %26, %27 : vector<48x16xf32>
    %29 = vector.shape_cast %28 : vector<48x16xf32> to vector<12x4x16xf32>
    %30 = tpu.transpose %29, [0, 2, 1] : vector<12x4x16xf32> -> vector<12x16x4xf32>
    %31 = vector.shape_cast %30 : vector<12x16x4xf32> to vector<3x4x64xf32>
    %c0_22 = arith.constant 0 : index
    %c0_23 = arith.constant 0 : index
    %c8 = arith.constant 8 : index
    %c0_24 = arith.constant 0 : index
    %32 = vector.load %arg5[%c0_22, %c0_23, %c8, %c0_24] : memref<1x3x32x64xf32, #tpu.memory_space<vmem>>, vector<1x3x4x64xf32>
    %33 = vector.shape_cast %32 : vector<1x3x4x64xf32> to vector<3x4x64xf32>
    %34 = vector.shape_cast %31 : vector<3x4x64xf32> to vector<1x3x4x64xf32>
    tpu.vector_store %arg5[%c0_22, %c0_23, %c8, %c0_24], %34 {strides = array<i32>} : memref<1x3x32x64xf32, #tpu.memory_space<vmem>>, vector<1x3x4x64xf32>,
    %c0_25 = arith.constant 0 : index
    %c0_26 = arith.constant 0 : index
    %c3 = arith.constant 3 : index
    %c0_27 = arith.constant 0 : index
    %35 = vector.load %arg2[%c0_25, %c0_26, %c3, %c0_27] : memref<1x96x8x16xf32, #tpu.memory_space<vmem>>, vector<1x96x1x16xf32>
    %36 = vector.shape_cast %35 : vector<1x96x1x16xf32> to vector<96x16xf32>
    %cst_28 = arith.constant dense<0.000000e+00> : vector<48x16xf32>
    %37 = tpu.matmul %0, %36, %cst_28 {dimension_numbers = #tpu.dot_dimension_numbers<[1], [0], [0], [1], [0, 0, 1, 1], [], []>} : vector<48x96xf32>, vector<96x16xf32>, vector<48x16xf32> -> vector<48x16xf32>
    %38 = vector.broadcast %1 : vector<48x1xf32> to vector<48x16xf32>
    %39 = arith.addf %37, %38 : vector<48x16xf32>
    %40 = vector.shape_cast %39 : vector<48x16xf32> to vector<12x4x16xf32>
    %41 = tpu.transpose %40, [0, 2, 1] : vector<12x4x16xf32> -> vector<12x16x4xf32>
    %42 = vector.shape_cast %41 : vector<12x16x4xf32> to vector<3x4x64xf32>
    %c0_29 = arith.constant 0 : index
    %c0_30 = arith.constant 0 : index
    %c12 = arith.constant 12 : index
    %c0_31 = arith.constant 0 : index
    %43 = vector.load %arg5[%c0_29, %c0_30, %c12, %c0_31] : memref<1x3x32x64xf32, #tpu.memory_space<vmem>>, vector<1x3x4x64xf32>
    %44 = vector.shape_cast %43 : vector<1x3x4x64xf32> to vector<3x4x64xf32>
    %45 = vector.shape_cast %42 : vector<3x4x64xf32> to vector<1x3x4x64xf32>
    tpu.vector_store %arg5[%c0_29, %c0_30, %c12, %c0_31], %45 {strides = array<i32>} : memref<1x3x32x64xf32, #tpu.memory_space<vmem>>, vector<1x3x4x64xf32>,
    %c0_32 = arith.constant 0 : index
    %c0_33 = arith.constant 0 : index
    %c4_34 = arith.constant 4 : index
    %c0_35 = arith.constant 0 : index
    %46 = vector.load %arg2[%c0_32, %c0_33, %c4_34, %c0_35] : memref<1x96x8x16xf32, #tpu.memory_space<vmem>>, vector<1x96x1x16xf32>
    %47 = vector.shape_cast %46 : vector<1x96x1x16xf32> to vector<96x16xf32>
    %cst_36 = arith.constant dense<0.000000e+00> : vector<48x16xf32>
    %48 = tpu.matmul %0, %47, %cst_36 {dimension_numbers = #tpu.dot_dimension_numbers<[1], [0], [0], [1], [0, 0, 1, 1], [], []>} : vector<48x96xf32>, vector<96x16xf32>, vector<48x16xf32> -> vector<48x16xf32>
    %49 = vector.broadcast %1 : vector<48x1xf32> to vector<48x16xf32>
    %50 = arith.addf %48, %49 : vector<48x16xf32>
    %51 = vector.shape_cast %50 : vector<48x16xf32> to vector<12x4x16xf32>
    %52 = tpu.transpose %51, [0, 2, 1] : vector<12x4x16xf32> -> vector<12x16x4xf32>
    %53 = vector.shape_cast %52 : vector<12x16x4xf32> to vector<3x4x64xf32>
    %c0_37 = arith.constant 0 : index
    %c0_38 = arith.constant 0 : index
    %c16 = arith.constant 16 : index
    %c0_39 = arith.constant 0 : index
    %54 = vector.load %arg5[%c0_37, %c0_38, %c16, %c0_39] : memref<1x3x32x64xf32, #tpu.memory_space<vmem>>, vector<1x3x4x64xf32>
    %55 = vector.shape_cast %54 : vector<1x3x4x64xf32> to vector<3x4x64xf32>
    %56 = vector.shape_cast %53 : vector<3x4x64xf32> to vector<1x3x4x64xf32>
    tpu.vector_store %arg5[%c0_37, %c0_38, %c16, %c0_39], %56 {strides = array<i32>} : memref<1x3x32x64xf32, #tpu.memory_space<vmem>>, vector<1x3x4x64xf32>,
    %c0_40 = arith.constant 0 : index
    %c0_41 = arith.constant 0 : index
    %c5 = arith.constant 5 : index
    %c0_42 = arith.constant 0 : index
    %57 = vector.load %arg2[%c0_40, %c0_41, %c5, %c0_42] : memref<1x96x8x16xf32, #tpu.memory_space<vmem>>, vector<1x96x1x16xf32>
    %58 = vector.shape_cast %57 : vector<1x96x1x16xf32> to vector<96x16xf32>
    %cst_43 = arith.constant dense<0.000000e+00> : vector<48x16xf32>
    %59 = tpu.matmul %0, %58, %cst_43 {dimension_numbers = #tpu.dot_dimension_numbers<[1], [0], [0], [1], [0, 0, 1, 1], [], []>} : vector<48x96xf32>, vector<96x16xf32>, vector<48x16xf32> -> vector<48x16xf32>
    %60 = vector.broadcast %1 : vector<48x1xf32> to vector<48x16xf32>
    %61 = arith.addf %59, %60 : vector<48x16xf32>
    %62 = vector.shape_cast %61 : vector<48x16xf32> to vector<12x4x16xf32>
    %63 = tpu.transpose %62, [0, 2, 1] : vector<12x4x16xf32> -> vector<12x16x4xf32>
    %64 = vector.shape_cast %63 : vector<12x16x4xf32> to vector<3x4x64xf32>
    %c0_44 = arith.constant 0 : index
    %c0_45 = arith.constant 0 : index
    %c20 = arith.constant 20 : index
    %c0_46 = arith.constant 0 : index
    %65 = vector.load %arg5[%c0_44, %c0_45, %c20, %c0_46] : memref<1x3x32x64xf32, #tpu.memory_space<vmem>>, vector<1x3x4x64xf32>
    %66 = vector.shape_cast %65 : vector<1x3x4x64xf32> to vector<3x4x64xf32>
    %67 = vector.shape_cast %64 : vector<3x4x64xf32> to vector<1x3x4x64xf32>
    tpu.vector_store %arg5[%c0_44, %c0_45, %c20, %c0_46], %67 {strides = array<i32>} : memref<1x3x32x64xf32, #tpu.memory_space<vmem>>, vector<1x3x4x64xf32>,
    %c0_47 = arith.constant 0 : index
    %c0_48 = arith.constant 0 : index
    %c6 = arith.constant 6 : index
    %c0_49 = arith.constant 0 : index
    %68 = vector.load %arg2[%c0_47, %c0_48, %c6, %c0_49] : memref<1x96x8x16xf32, #tpu.memory_space<vmem>>, vector<1x96x1x16xf32>
    %69 = vector.shape_cast %68 : vector<1x96x1x16xf32> to vector<96x16xf32>
    %cst_50 = arith.constant dense<0.000000e+00> : vector<48x16xf32>
    %70 = tpu.matmul %0, %69, %cst_50 {dimension_numbers = #tpu.dot_dimension_numbers<[1], [0], [0], [1], [0, 0, 1, 1], [], []>} : vector<48x96xf32>, vector<96x16xf32>, vector<48x16xf32> -> vector<48x16xf32>
    %71 = vector.broadcast %1 : vector<48x1xf32> to vector<48x16xf32>
    %72 = arith.addf %70, %71 : vector<48x16xf32>
    %73 = vector.shape_cast %72 : vector<48x16xf32> to vector<12x4x16xf32>
    %74 = tpu.transpose %73, [0, 2, 1] : vector<12x4x16xf32> -> vector<12x16x4xf32>
    %75 = vector.shape_cast %74 : vector<12x16x4xf32> to vector<3x4x64xf32>
    %c0_51 = arith.constant 0 : index
    %c0_52 = arith.constant 0 : index
    %c24 = arith.constant 24 : index
    %c0_53 = arith.constant 0 : index
    %76 = vector.load %arg5[%c0_51, %c0_52, %c24, %c0_53] : memref<1x3x32x64xf32, #tpu.memory_space<vmem>>, vector<1x3x4x64xf32>
    %77 = vector.shape_cast %76 : vector<1x3x4x64xf32> to vector<3x4x64xf32>
    %78 = vector.shape_cast %75 : vector<3x4x64xf32> to vector<1x3x4x64xf32>
    tpu.vector_store %arg5[%c0_51, %c0_52, %c24, %c0_53], %78 {strides = array<i32>} : memref<1x3x32x64xf32, #tpu.memory_space<vmem>>, vector<1x3x4x64xf32>,
    %c0_54 = arith.constant 0 : index
    %c0_55 = arith.constant 0 : index
    %c7 = arith.constant 7 : index
    %c0_56 = arith.constant 0 : index
    %79 = vector.load %arg2[%c0_54, %c0_55, %c7, %c0_56] : memref<1x96x8x16xf32, #tpu.memory_space<vmem>>, vector<1x96x1x16xf32>
    %80 = vector.shape_cast %79 : vector<1x96x1x16xf32> to vector<96x16xf32>
    %cst_57 = arith.constant dense<0.000000e+00> : vector<48x16xf32>
    %81 = tpu.matmul %0, %80, %cst_57 {dimension_numbers = #tpu.dot_dimension_numbers<[1], [0], [0], [1], [0, 0, 1, 1], [], []>} : vector<48x96xf32>, vector<96x16xf32>, vector<48x16xf32> -> vector<48x16xf32>
    %82 = vector.broadcast %1 : vector<48x1xf32> to vector<48x16xf32>
    %83 = arith.addf %81, %82 : vector<48x16xf32>
    %84 = vector.shape_cast %83 : vector<48x16xf32> to vector<12x4x16xf32>
    %85 = tpu.transpose %84, [0, 2, 1] : vector<12x4x16xf32> -> vector<12x16x4xf32>
    %86 = vector.shape_cast %85 : vector<12x16x4xf32> to vector<3x4x64xf32>
    %c0_58 = arith.constant 0 : index
    %c0_59 = arith.constant 0 : index
    %c28 = arith.constant 28 : index
    %c0_60 = arith.constant 0 : index
    %87 = vector.load %arg5[%c0_58, %c0_59, %c28, %c0_60] : memref<1x3x32x64xf32, #tpu.memory_space<vmem>>, vector<1x3x4x64xf32>
    %88 = vector.shape_cast %87 : vector<1x3x4x64xf32> to vector<3x4x64xf32>
    %89 = vector.shape_cast %86 : vector<3x4x64xf32> to vector<1x3x4x64xf32>
    tpu.vector_store %arg5[%c0_58, %c0_59, %c28, %c0_60], %89 {strides = array<i32>} : memref<1x3x32x64xf32, #tpu.memory_space<vmem>>, vector<1x3x4x64xf32>,
    return
  }
  func.func @transform_0(%arg0: i32, %arg1: i32) -> (i32, i32, i32, i32) {
    %c0_i32 = arith.constant 0 : i32
    %c0_i32_0 = arith.constant 0 : i32
    %c0_i32_1 = arith.constant 0 : i32
    return %arg0, %c0_i32, %arg1, %c0_i32_0 : i32, i32, i32, i32
  }
  func.func @transform_1(%arg0: i32, %arg1: i32) -> (i32, i32) {
    %c0_i32 = arith.constant 0 : i32
    %c0_i32_0 = arith.constant 0 : i32
    %c0_i32_1 = arith.constant 0 : i32
    return %c0_i32, %c0_i32_0 : i32, i32
  }
  func.func @transform_2(%arg0: i32, %arg1: i32) -> (i32, i32) {
    %c0_i32 = arith.constant 0 : i32
    %c0_i32_0 = arith.constant 0 : i32
    %c0_i32_1 = arith.constant 0 : i32
    return %c0_i32, %c0_i32_0 : i32, i32
  }
  func.func @transform_3(%arg0: i32, %arg1: i32) -> (i32, i32, i32, i32) {
    %c0_i32 = arith.constant 0 : i32
    %c0_i32_0 = arith.constant 0 : i32
    %c0_i32_1 = arith.constant 0 : i32
    return %arg0, %c0_i32, %arg1, %c0_i32_0 : i32, i32, i32, i32
  }
}

module attributes {stable_mosaic.version = 11 : i64} {
  func.func @_conv1x1_kernel(%arg0: i32, %arg1: i32, %arg2: memref<1x96x128xf32, #tpu.memory_space<vmem>>, %arg3: memref<48x96xf32, #tpu.memory_space<vmem>>, %arg4: memref<48x1xf32, #tpu.memory_space<vmem>>, %arg5: memref<1x48x128xf32, #tpu.memory_space<vmem>>) attributes {dimension_semantics = [#tpu.dimension_semantics<parallel>, #tpu.dimension_semantics<parallel>], iteration_bounds = array<i64: 2, 2>, scalar_prefetch = 0 : i64, scratch_operands = 0 : i64, tpu.core_type = #tpu.core_type<tc>, window_params = [{transform_indices = @transform_0, window_bounds = array<i64: 1, 96, 128>}, {pipeline_mode = #tpu.pipeline_mode<synchronous>, transform_indices = @transform_1, window_bounds = array<i64: 48, 96>}, {pipeline_mode = #tpu.pipeline_mode<synchronous>, transform_indices = @transform_2, window_bounds = array<i64: 48, 1>}, {transform_indices = @transform_3, window_bounds = array<i64: 1, 48, 128>}]} {
    %c0 = arith.constant 0 : index
    %c0_0 = arith.constant 0 : index
    %0 = vector.load %arg3[%c0, %c0_0] : memref<48x96xf32, #tpu.memory_space<vmem>>, vector<48x96xf32>
    %c0_1 = arith.constant 0 : index
    %c0_2 = arith.constant 0 : index
    %c0_3 = arith.constant 0 : index
    %1 = vector.load %arg2[%c0_1, %c0_2, %c0_3] : memref<1x96x128xf32, #tpu.memory_space<vmem>>, vector<1x96x128xf32>
    %2 = vector.shape_cast %1 : vector<1x96x128xf32> to vector<96x128xf32>
    %cst = arith.constant dense<0.000000e+00> : vector<48x128xf32>
    %3 = tpu.matmul %0, %2, %cst {dimension_numbers = #tpu.dot_dimension_numbers<[1], [0], [0], [1], [0, 0, 1, 1], [], []>} : vector<48x96xf32>, vector<96x128xf32>, vector<48x128xf32> -> vector<48x128xf32>
    %c0_4 = arith.constant 0 : index
    %c0_5 = arith.constant 0 : index
    %4 = vector.load %arg4[%c0_4, %c0_5] : memref<48x1xf32, #tpu.memory_space<vmem>>, vector<48x1xf32>
    %5 = vector.broadcast %4 : vector<48x1xf32> to vector<48x128xf32>
    %6 = arith.addf %3, %5 : vector<48x128xf32>
    %c0_6 = arith.constant 0 : index
    %c0_7 = arith.constant 0 : index
    %c0_8 = arith.constant 0 : index
    %7 = vector.load %arg5[%c0_6, %c0_7, %c0_8] : memref<1x48x128xf32, #tpu.memory_space<vmem>>, vector<1x48x128xf32>
    %8 = vector.shape_cast %7 : vector<1x48x128xf32> to vector<48x128xf32>
    %9 = vector.shape_cast %6 : vector<48x128xf32> to vector<1x48x128xf32>
    tpu.vector_store %arg5[%c0_6, %c0_7, %c0_8], %9 {strides = array<i32>} : memref<1x48x128xf32, #tpu.memory_space<vmem>>, vector<1x48x128xf32>,
    return
  }
  func.func @transform_0(%arg0: i32, %arg1: i32) -> (i32, i32, i32) {
    %c0_i32 = arith.constant 0 : i32
    %c0_i32_0 = arith.constant 0 : i32
    return %arg0, %c0_i32, %arg1 : i32, i32, i32
  }
  func.func @transform_1(%arg0: i32, %arg1: i32) -> (i32, i32) {
    %c0_i32 = arith.constant 0 : i32
    %c0_i32_0 = arith.constant 0 : i32
    %c0_i32_1 = arith.constant 0 : i32
    return %c0_i32, %c0_i32_0 : i32, i32
  }
  func.func @transform_2(%arg0: i32, %arg1: i32) -> (i32, i32) {
    %c0_i32 = arith.constant 0 : i32
    %c0_i32_0 = arith.constant 0 : i32
    %c0_i32_1 = arith.constant 0 : i32
    return %c0_i32, %c0_i32_0 : i32, i32
  }
  func.func @transform_3(%arg0: i32, %arg1: i32) -> (i32, i32, i32) {
    %c0_i32 = arith.constant 0 : i32
    %c0_i32_0 = arith.constant 0 : i32
    return %arg0, %c0_i32, %arg1 : i32, i32, i32
  }
}

</mosaic_0001>

<bundles_post_ra>
// kernel: tpu_custom_call.1
= control target key start
LH: loop header
LB: loop body
LE: loop exit
PB: predicated region body
PF: predicated region fallthrough
CT: control target
= control target key end

     0   :  { %s20601_s0 = inlined_call_operand.vmem [shape: f32[2,96,16,16], index: 0, kind: input, shape index: {}]   ;;  %s20602_s1 = inlined_call_operand.vmem [shape: f32[48,96], index: 1, kind: input, shape index: {}]   ;;  %s20603_s2 = inlined_call_operand.vmem [shape: f32[48,1], index: 2, kind: input, shape index: {}]   ;;  %s20604_s3 = inlined_call_operand.hbm [shape: f32[2,3,64,64], index: 3, kind: output, shape index: {}]  }
   0x1   :  { %21046 = sst [smem:[#allocation155_spill]] %s20601_s0 }
   0x2   :  { %21047 = sst [smem:[#allocation156_spill]] %s20602_s1 }
   0x3   :  { %21048 = sst [smem:[#allocation157_spill]] %s20603_s2 }
   0x4   :  { %8 = vsyncpa [#allocation4], 0 }
   0x5   :  { %10 = vsyncpa [#allocation4 + $0x1], 0  ;;  %s13755_s12 = smov 0   ;;  %s13757_s13 = smov 0  }
   0x6   :  { %s13759_s14 = smov 0   ;;  %s13761_s15 = smov 0  }
   0x7   :  { %s13763_s16 = smov 0   ;;  %s13765_s17 = smov 0  }
   0x8   :  { %s13767_s18 = smov 0   ;;  %s13769_s19 = smov 0  }
   0x9 LB: > { %s12855_s20 = sadd.s32 4294967295, %s13707_s19   ;;  %s12856_s21 = sadd.s32 4294967294, %s13707_s19   ;;  %s13707_s19 = sphi %s13769_s19, %s16_s19   ;;  %s13703_s18 = sphi %s13767_s18, %s21939_s18   ;;  %s13699_s17 = sphi %s13765_s17, %s21938_s17   ;;  %s13695_s16 = sphi %s13763_s16, %s21937_s16   ;;  %s13691_s15 = sphi %s13761_s15, %s21936_s15   ;;  %s13687_s14 = sphi %s13759_s14, %s21935_s14   ;;  %s13683_s13 = sphi %s13757_s13, %s21934_s13   ;;  %s13679_s12 = sphi %s13755_s12, %s21933_s12  }
   0xa   : > { %s25_s22 = sadd.s32 1, %s13699_s17  ;;  %s28_s23 = sadd.s32 1, %s13703_s18 }
   0xb   : > { %p26_p0 = scmp.ge.s32.totalorder %s25_s22, 2  ;;  %p44_p1 = scmp.ne.s32.totalorder %s13687_s14, %s13683_s13 }
   0xc   : > { %p45_p2 = scmp.eq.s32.totalorder %s13707_s19, 0  ;;  %p118_p5 = scmp.eq.s32.totalorder %s12855_s20, 3 }
   0xd   : > { %s21941_s22 = smov (%p26_p0, %s25_s22), 0  ;;  %s21943_s23 = smov (!%p26_p0, %s28_s23), %s13703_s18 }
   0xe   : > { %s33_s24 = ssub.s32 %s13699_s17, %s21941_s22  ;;  %p13807_p3 = por %p45_p2, %p44_p1 }
   0xf   : > { %p30_p4 = scmp.ge.s32.totalorder %s21943_s23, 2  ;;  %p123_p6 = scmp.ne.s32.totalorder %s13683_s13, %s13679_s12 }
  0x10   : > { %p124_p7 = scmp.eq.s32.totalorder %s12856_s21, 3  ;;  %p13815_p8 = por %p118_p5, %p44_p1 }
  0x11   : > { %s21945_s23 = smov (%p30_p4, %s21943_s23), 0  ;;  %s37_s30 = sadd.s32 1, %s13687_s14 }
  0x12   : > { %p13819_p9 = por %p124_p7, %p123_p6  ;;  %s32_s28 = ssub.s32 %s13703_s18, %s21945_s23 }
  0x13   : > { %s34_s29 = sor.u32 %s33_s24, %s32_s28  ;;  %p12858_p11 = scmp.ge.s32.totalorder %s13707_s19, 4 }
  0x14   : > { %p35_p10 = scmp.eq.s32.totalorder %s34_s29, 0 }
  0x15   : > { %146 = sbr.rel (%p12858_p11) target bundleno = 85 (0x55), region = 24 }
  0x16   : > { %s13827_s4 = scalar_select %p35_p10, %s13687_s14, %s37_s30  }
  0x1c   : > { %149 = sbr.rel (!%p13807_p3) target bundleno = 85 (0x55), region = 28  ;;  %s151_s5 = sand.u32 (%p13807_p3), 1, %s13687_s14  }
  0x1d   : > { %s13514_s6 = smul.u32 (%p13807_p3), 192, %s13703_s18  ;;  %s21052_s0 = sld [smem:[#allocation155_spill]] (%p13807_p3) }
  0x1e   : > { %s13513_s7 = smul.u32 (%p13807_p3), 768, %s151_s5 }
  0x1f   : > { %s155_s8 = sadd.s32 (%p13807_p3), %s13699_s17, %s13514_s6 }
  0x20   : > { %s12859_s9 = sshll.u32 (%p13807_p3), %s155_s8, 3  ;;  %s13843_s21 = scalar_lea.vmem (%p13807_p3), [#allocation2], %s13513_s7 }
  0x23   : > { %s13838_s20 = scalar_lea.vmem %s21052_s0, %s12859_s9 }
  0x24   : > { %v375_v0 = vld [vmem:[%s13838_s20] sm:$0xff]  ;;  %v377_v1 = vld [vmem:[%s13838_s20 + $0x10] sm:$0xff] }
  0x25   : > { %v379_v2 = vld [vmem:[%s13838_s20 + $0x20] sm:$0xff]  ;;  %376 = vst [vmem:[%s13843_s21] sm:$0xff] %v375_v0  ;;  %378 = vst [vmem:[%s13843_s21 + $0x8] sm:$0xff] %v377_v1  ;;  %v381_v3 = vld [vmem:[%s13838_s20 + $0x30] sm:$0xff] }
  0x26   : > { %380 = vst [vmem:[%s13843_s21 + $0x10] sm:$0xff] %v379_v2  ;;  %v383_v4 = vld [vmem:[%s13838_s20 + $0x40] sm:$0xff]  ;;  %v385_v5 = vld [vmem:[%s13838_s20 + $0x50] sm:$0xff]  ;;  %382 = vst [vmem:[%s13843_s21 + $0x18] sm:$0xff] %v381_v3 }
  0x27   : > { %384 = vst [vmem:[%s13843_s21 + $0x20] sm:$0xff] %v383_v4  ;;  %386 = vst [vmem:[%s13843_s21 + $0x28] sm:$0xff] %v385_v5  ;;  %v387_v6 = vld [vmem:[%s13838_s20 + $0x60] sm:$0xff]  ;;  %v389_v7 = vld [vmem:[%s13838_s20 + $0x70] sm:$0xff] }
  0x28   : > { %v391_v8 = vld [vmem:[%s13838_s20 + $0x80] sm:$0xff]  ;;  %388 = vst [vmem:[%s13843_s21 + $0x30] sm:$0xff] %v387_v6  ;;  %390 = vst [vmem:[%s13843_s21 + $0x38] sm:$0xff] %v389_v7  ;;  %v393_v9 = vld [vmem:[%s13838_s20 + $0x90] sm:$0xff] }
  0x29   : > { %392 = vst [vmem:[%s13843_s21 + $0x40] sm:$0xff] %v391_v8  ;;  %v395_v10 = vld [vmem:[%s13838_s20 + $0xa0] sm:$0xff]  ;;  %v397_v11 = vld [vmem:[%s13838_s20 + $0xb0] sm:$0xff]  ;;  %394 = vst [vmem:[%s13843_s21 + $0x48] sm:$0xff] %v393_v9 }
  0x2a   : > { %396 = vst [vmem:[%s13843_s21 + $0x50] sm:$0xff] %v395_v10  ;;  %398 = vst [vmem:[%s13843_s21 + $0x58] sm:$0xff] %v397_v11  ;;  %v399_v12 = vld [vmem:[%s13838_s20 + $0xc0] sm:$0xff]  ;;  %v401_v13 = vld [vmem:[%s13838_s20 + $0xd0] sm:$0xff] }
  0x2b   : > { %v403_v14 = vld [vmem:[%s13838_s20 + $0xe0] sm:$0xff]  ;;  %400 = vst [vmem:[%s13843_s21 + $0x60] sm:$0xff] %v399_v12  ;;  %402 = vst [vmem:[%s13843_s21 + $0x68] sm:$0xff] %v401_v13  ;;  %v405_v15 = vld [vmem:[%s13838_s20 + $0xf0] sm:$0xff] }
  0x2c   : > { %404 = vst [vmem:[%s13843_s21 + $0x70] sm:$0xff] %v403_v14  ;;  %v407_v16 = vld [vmem:[%s13838_s20 + $0x100] sm:$0xff]  ;;  %v409_v17 = vld [vmem:[%s13838_s20 + $0x110] sm:$0xff]  ;;  %406 = vst [vmem:[%s13843_s21 + $0x78] sm:$0xff] %v405_v15 }
  0x2d   : > { %408 = vst [vmem:[%s13843_s21 + $0x80] sm:$0xff] %v407_v16  ;;  %410 = vst [vmem:[%s13843_s21 + $0x88] sm:$0xff] %v409_v17  ;;  %v411_v18 = vld [vmem:[%s13838_s20 + $0x120] sm:$0xff]  ;;  %v413_v19 = vld [vmem:[%s13838_s20 + $0x130] sm:$0xff] }
  0x2e   : > { %v415_v20 = vld [vmem:[%s13838_s20 + $0x140] sm:$0xff]  ;;  %412 = vst [vmem:[%s13843_s21 + $0x90] sm:$0xff] %v411_v18  ;;  %414 = vst [vmem:[%s13843_s21 + $0x98] sm:$0xff] %v413_v19  ;;  %v417_v21 = vld [vmem:[%s13838_s20 + $0x150] sm:$0xff] }
  0x2f   : > { %416 = vst [vmem:[%s13843_s21 + $0xa0] sm:$0xff] %v415_v20  ;;  %v419_v22 = vld [vmem:[%s13838_s20 + $0x160] sm:$0xff]  ;;  %v421_v23 = vld [vmem:[%s13838_s20 + $0x170] sm:$0xff]  ;;  %418 = vst [vmem:[%s13843_s21 + $0xa8] sm:$0xff] %v417_v21 }
  0x30   : > { %420 = vst [vmem:[%s13843_s21 + $0xb0] sm:$0xff] %v419_v22  ;;  %422 = vst [vmem:[%s13843_s21 + $0xb8] sm:$0xff] %v421_v23  ;;  %v423_v24 = vld [vmem:[%s13838_s20 + $0x180] sm:$0xff]  ;;  %v425_v25 = vld [vmem:[%s13838_s20 + $0x190] sm:$0xff] }
  0x31   : > { %v427_v26 = vld [vmem:[%s13838_s20 + $0x1a0] sm:$0xff]  ;;  %424 = vst [vmem:[%s13843_s21 + $0xc0] sm:$0xff] %v423_v24  ;;  %426 = vst [vmem:[%s13843_s21 + $0xc8] sm:$0xff] %v425_v25  ;;  %v429_v27 = vld [vmem:[%s13838_s20 + $0x1b0] sm:$0xff] }
  0x32   : > { %428 = vst [vmem:[%s13843_s21 + $0xd0] sm:$0xff] %v427_v26  ;;  %v431_v28 = vld [vmem:[%s13838_s20 + $0x1c0] sm:$0xff]  ;;  %v433_v29 = vld [vmem:[%s13838_s20 + $0x1d0] sm:$0xff]  ;;  %430 = vst [vmem:[%s13843_s21 + $0xd8] sm:$0xff] %v429_v27 }
  0x33   : > { %432 = vst [vmem:[%s13843_s21 + $0xe0] sm:$0xff] %v431_v28  ;;  %434 = vst [vmem:[%s13843_s21 + $0xe8] sm:$0xff] %v433_v29  ;;  %v435_v30 = vld [vmem:[%s13838_s20 + $0x1e0] sm:$0xff]  ;;  %v437_v31 = vld [vmem:[%s13838_s20 + $0x1f0] sm:$0xff] }
  0x34   : > { %v439_v32 = vld [vmem:[%s13838_s20 + $0x200] sm:$0xff]  ;;  %436 = vst [vmem:[%s13843_s21 + $0xf0] sm:$0xff] %v435_v30  ;;  %438 = vst [vmem:[%s13843_s21 + $0xf8] sm:$0xff] %v437_v31  ;;  %v441_v33 = vld [vmem:[%s13838_s20 + $0x210] sm:$0xff] }
  0x35   : > { %440 = vst [vmem:[%s13843_s21 + $0x100] sm:$0xff] %v439_v32  ;;  %v443_v34 = vld [vmem:[%s13838_s20 + $0x220] sm:$0xff]  ;;  %v445_v35 = vld [vmem:[%s13838_s20 + $0x230] sm:$0xff]  ;;  %442 = vst [vmem:[%s13843_s21 + $0x108] sm:$0xff] %v441_v33 }
  0x36   : > { %444 = vst [vmem:[%s13843_s21 + $0x110] sm:$0xff] %v443_v34  ;;  %446 = vst [vmem:[%s13843_s21 + $0x118] sm:$0xff] %v445_v35  ;;  %v447_v36 = vld [vmem:[%s13838_s20 + $0x240] sm:$0xff]  ;;  %v449_v37 = vld [vmem:[%s13838_s20 + $0x250] sm:$0xff] }
  0x37   : > { %v451_v38 = vld [vmem:[%s13838_s20 + $0x260] sm:$0xff]  ;;  %448 = vst [vmem:[%s13843_s21 + $0x120] sm:$0xff] %v447_v36  ;;  %450 = vst [vmem:[%s13843_s21 + $0x128] sm:$0xff] %v449_v37  ;;  %v453_v39 = vld [vmem:[%s13838_s20 + $0x270] sm:$0xff] }
  0x38   : > { %452 = vst [vmem:[%s13843_s21 + $0x130] sm:$0xff] %v451_v38  ;;  %v455_v40 = vld [vmem:[%s13838_s20 + $0x280] sm:$0xff]  ;;  %v457_v41 = vld [vmem:[%s13838_s20 + $0x290] sm:$0xff]  ;;  %454 = vst [vmem:[%s13843_s21 + $0x138] sm:$0xff] %v453_v39 }
  0x39   : > { %456 = vst [vmem:[%s13843_s21 + $0x140] sm:$0xff] %v455_v40  ;;  %458 = vst [vmem:[%s13843_s21 + $0x148] sm:$0xff] %v457_v41  ;;  %v459_v42 = vld [vmem:[%s13838_s20 + $0x2a0] sm:$0xff]  ;;  %v461_v43 = vld [vmem:[%s13838_s20 + $0x2b0] sm:$0xff] }
  0x3a   : > { %v463_v44 = vld [vmem:[%s13838_s20 + $0x2c0] sm:$0xff]  ;;  %460 = vst [vmem:[%s13843_s21 + $0x150] sm:$0xff] %v459_v42  ;;  %462 = vst [vmem:[%s13843_s21 + $0x158] sm:$0xff] %v461_v43  ;;  %v465_v45 = vld [vmem:[%s13838_s20 + $0x2d0] sm:$0xff] }
  0x3b   : > { %464 = vst [vmem:[%s13843_s21 + $0x160] sm:$0xff] %v463_v44  ;;  %v467_v46 = vld [vmem:[%s13838_s20 + $0x2e0] sm:$0xff]  ;;  %v469_v47 = vld [vmem:[%s13838_s20 + $0x2f0] sm:$0xff]  ;;  %466 = vst [vmem:[%s13843_s21 + $0x168] sm:$0xff] %v465_v45 }
  0x3c   : > { %468 = vst [vmem:[%s13843_s21 + $0x170] sm:$0xff] %v467_v46  ;;  %470 = vst [vmem:[%s13843_s21 + $0x178] sm:$0xff] %v469_v47  ;;  %v471_v48 = vld [vmem:[%s13838_s20 + $0x300] sm:$0xff]  ;;  %v473_v49 = vld [vmem:[%s13838_s20 + $0x310] sm:$0xff] }
  0x3d   : > { %v475_v50 = vld [vmem:[%s13838_s20 + $0x320] sm:$0xff]  ;;  %472 = vst [vmem:[%s13843_s21 + $0x180] sm:$0xff] %v471_v48  ;;  %474 = vst [vmem:[%s13843_s21 + $0x188] sm:$0xff] %v473_v49  ;;  %v477_v51 = vld [vmem:[%s13838_s20 + $0x330] sm:$0xff] }
  0x3e   : > { %476 = vst [vmem:[%s13843_s21 + $0x190] sm:$0xff] %v475_v50  ;;  %v479_v52 = vld [vmem:[%s13838_s20 + $0x340] sm:$0xff]  ;;  %v481_v53 = vld [vmem:[%s13838_s20 + $0x350] sm:$0xff]  ;;  %478 = vst [vmem:[%s13843_s21 + $0x198] sm:$0xff] %v477_v51 }
  0x3f   : > { %480 = vst [vmem:[%s13843_s21 + $0x1a0] sm:$0xff] %v479_v52  ;;  %482 = vst [vmem:[%s13843_s21 + $0x1a8] sm:$0xff] %v481_v53  ;;  %v483_v54 = vld [vmem:[%s13838_s20 + $0x360] sm:$0xff]  ;;  %v485_v55 = vld [vmem:[%s13838_s20 + $0x370] sm:$0xff] }
  0x40   : > { %v487_v56 = vld [vmem:[%s13838_s20 + $0x380] sm:$0xff]  ;;  %484 = vst [vmem:[%s13843_s21 + $0x1b0] sm:$0xff] %v483_v54  ;;  %486 = vst [vmem:[%s13843_s21 + $0x1b8] sm:$0xff] %v485_v55  ;;  %v489_v57 = vld [vmem:[%s13838_s20 + $0x390] sm:$0xff] }
  0x41   : > { %488 = vst [vmem:[%s13843_s21 + $0x1c0] sm:$0xff] %v487_v56  ;;  %v491_v58 = vld [vmem:[%s13838_s20 + $0x3a0] sm:$0xff]  ;;  %v493_v59 = vld [vmem:[%s13838_s20 + $0x3b0] sm:$0xff]  ;;  %490 = vst [vmem:[%s13843_s21 + $0x1c8] sm:$0xff] %v489_v57 }
  0x42   : > { %492 = vst [vmem:[%s13843_s21 + $0x1d0] sm:$0xff] %v491_v58  ;;  %494 = vst [vmem:[%s13843_s21 + $0x1d8] sm:$0xff] %v493_v59  ;;  %v495_v60 = vld [vmem:[%s13838_s20 + $0x3c0] sm:$0xff]  ;;  %v497_v61 = vld [vmem:[%s13838_s20 + $0x3d0] sm:$0xff] }
  0x43   : > { %v499_v62 = vld [vmem:[%s13838_s20 + $0x3e0] sm:$0xff]  ;;  %496 = vst [vmem:[%s13843_s21 + $0x1e0] sm:$0xff] %v495_v60  ;;  %498 = vst [vmem:[%s13843_s21 + $0x1e8] sm:$0xff] %v497_v61  ;;  %v501_v63 = vld [vmem:[%s13838_s20 + $0x3f0] sm:$0xff] }
  0x44   : > { %500 = vst [vmem:[%s13843_s21 + $0x1f0] sm:$0xff] %v499_v62  ;;  %v503_v0 = vld [vmem:[%s13838_s20 + $0x400] sm:$0xff]  ;;  %v505_v1 = vld [vmem:[%s13838_s20 + $0x410] sm:$0xff]  ;;  %502 = vst [vmem:[%s13843_s21 + $0x1f8] sm:$0xff] %v501_v63 }
  0x45   : > { %504 = vst [vmem:[%s13843_s21 + $0x200] sm:$0xff] %v503_v0  ;;  %506 = vst [vmem:[%s13843_s21 + $0x208] sm:$0xff] %v505_v1  ;;  %v507_v2 = vld [vmem:[%s13838_s20 + $0x420] sm:$0xff]  ;;  %v509_v3 = vld [vmem:[%s13838_s20 + $0x430] sm:$0xff] }
  0x46   : > { %v511_v4 = vld [vmem:[%s13838_s20 + $0x440] sm:$0xff]  ;;  %508 = vst [vmem:[%s13843_s21 + $0x210] sm:$0xff] %v507_v2  ;;  %510 = vst [vmem:[%s13843_s21 + $0x218] sm:$0xff] %v509_v3  ;;  %v513_v5 = vld [vmem:[%s13838_s20 + $0x450] sm:$0xff] }
  0x47   : > { %512 = vst [vmem:[%s13843_s21 + $0x220] sm:$0xff] %v511_v4  ;;  %v515_v6 = vld [vmem:[%s13838_s20 + $0x460] sm:$0xff]  ;;  %v517_v7 = vld [vmem:[%s13838_s20 + $0x470] sm:$0xff]  ;;  %514 = vst [vmem:[%s13843_s21 + $0x228] sm:$0xff] %v513_v5 }
  0x48   : > { %516 = vst [vmem:[%s13843_s21 + $0x230] sm:$0xff] %v515_v6  ;;  %518 = vst [vmem:[%s13843_s21 + $0x238] sm:$0xff] %v517_v7  ;;  %v519_v8 = vld [vmem:[%s13838_s20 + $0x480] sm:$0xff]  ;;  %v521_v9 = vld [vmem:[%s13838_s20 + $0x490] sm:$0xff] }
  0x49   : > { %v523_v10 = vld [vmem:[%s13838_s20 + $0x4a0] sm:$0xff]  ;;  %520 = vst [vmem:[%s13843_s21 + $0x240] sm:$0xff] %v519_v8  ;;  %522 = vst [vmem:[%s13843_s21 + $0x248] sm:$0xff] %v521_v9  ;;  %v525_v11 = vld [vmem:[%s13838_s20 + $0x4b0] sm:$0xff] }
  0x4a   : > { %524 = vst [vmem:[%s13843_s21 + $0x250] sm:$0xff] %v523_v10  ;;  %v527_v12 = vld [vmem:[%s13838_s20 + $0x4c0] sm:$0xff]  ;;  %v529_v13 = vld [vmem:[%s13838_s20 + $0x4d0] sm:$0xff]  ;;  %526 = vst [vmem:[%s13843_s21 + $0x258] sm:$0xff] %v525_v11 }
  0x4b   : > { %528 = vst [vmem:[%s13843_s21 + $0x260] sm:$0xff] %v527_v12  ;;  %530 = vst [vmem:[%s13843_s21 + $0x268] sm:$0xff] %v529_v13  ;;  %v531_v14 = vld [vmem:[%s13838_s20 + $0x4e0] sm:$0xff]  ;;  %v533_v15 = vld [vmem:[%s13838_s20 + $0x4f0] sm:$0xff] }
  0x4c   : > { %v535_v16 = vld [vmem:[%s13838_s20 + $0x500] sm:$0xff]  ;;  %532 = vst [vmem:[%s13843_s21 + $0x270] sm:$0xff] %v531_v14  ;;  %534 = vst [vmem:[%s13843_s21 + $0x278] sm:$0xff] %v533_v15  ;;  %v537_v17 = vld [vmem:[%s13838_s20 + $0x510] sm:$0xff] }
  0x4d   : > { %536 = vst [vmem:[%s13843_s21 + $0x280] sm:$0xff] %v535_v16  ;;  %v539_v18 = vld [vmem:[%s13838_s20 + $0x520] sm:$0xff]  ;;  %v541_v19 = vld [vmem:[%s13838_s20 + $0x530] sm:$0xff]  ;;  %538 = vst [vmem:[%s13843_s21 + $0x288] sm:$0xff] %v537_v17 }
  0x4e   : > { %540 = vst [vmem:[%s13843_s21 + $0x290] sm:$0xff] %v539_v18  ;;  %542 = vst [vmem:[%s13843_s21 + $0x298] sm:$0xff] %v541_v19  ;;  %v543_v20 = vld [vmem:[%s13838_s20 + $0x540] sm:$0xff]  ;;  %v545_v21 = vld [vmem:[%s13838_s20 + $0x550] sm:$0xff] }
  0x4f   : > { %v547_v22 = vld [vmem:[%s13838_s20 + $0x560] sm:$0xff]  ;;  %544 = vst [vmem:[%s13843_s21 + $0x2a0] sm:$0xff] %v543_v20  ;;  %546 = vst [vmem:[%s13843_s21 + $0x2a8] sm:$0xff] %v545_v21  ;;  %v549_v23 = vld [vmem:[%s13838_s20 + $0x570] sm:$0xff] }
  0x50   : > { %548 = vst [vmem:[%s13843_s21 + $0x2b0] sm:$0xff] %v547_v22  ;;  %v551_v24 = vld [vmem:[%s13838_s20 + $0x580] sm:$0xff]  ;;  %v553_v25 = vld [vmem:[%s13838_s20 + $0x590] sm:$0xff]  ;;  %550 = vst [vmem:[%s13843_s21 + $0x2b8] sm:$0xff] %v549_v23 }
  0x51   : > { %552 = vst [vmem:[%s13843_s21 + $0x2c0] sm:$0xff] %v551_v24  ;;  %554 = vst [vmem:[%s13843_s21 + $0x2c8] sm:$0xff] %v553_v25  ;;  %v555_v26 = vld [vmem:[%s13838_s20 + $0x5a0] sm:$0xff]  ;;  %v557_v27 = vld [vmem:[%s13838_s20 + $0x5b0] sm:$0xff] }
  0x52   : > { %v559_v28 = vld [vmem:[%s13838_s20 + $0x5c0] sm:$0xff]  ;;  %556 = vst [vmem:[%s13843_s21 + $0x2d0] sm:$0xff] %v555_v26  ;;  %558 = vst [vmem:[%s13843_s21 + $0x2d8] sm:$0xff] %v557_v27  ;;  %v561_v29 = vld [vmem:[%s13838_s20 + $0x5d0] sm:$0xff] }
  0x53   : > { %560 = vst [vmem:[%s13843_s21 + $0x2e0] sm:$0xff] %v559_v28  ;;  %v563_v30 = vld [vmem:[%s13838_s20 + $0x5e0] sm:$0xff]  ;;  %v565_v31 = vld [vmem:[%s13838_s20 + $0x5f0] sm:$0xff]  ;;  %562 = vst [vmem:[%s13843_s21 + $0x2e8] sm:$0xff] %v561_v29 }
  0x54   : > { %564 = vst [vmem:[%s13843_s21 + $0x2f0] sm:$0xff] %v563_v30  ;;  %566 = vst [vmem:[%s13843_s21 + $0x2f8] sm:$0xff] %v565_v31 }
  0x55 PF: > { %p12860_p12 = scmp.ge.s32.totalorder %s13707_s19, 1  ;;  %p571_p13 = scmp.lt.s32.totalorder %s13707_s19, 5 }
  0x57   : > { %p572_p0 = pnand %p12860_p12, %p571_p13 }
  0x59   : > { %575 = sbr.rel (%p572_p0) target bundleno = 1888 (0x760), region = 66 }
  0x60   : > { %s14037_s24 = sand.u32 1, %s13683_s13   ;;  %s21053_s1 = sld [smem:[#allocation156_spill]]  ;;  %vm1023_vm0 = vcmask 785408   ;;  %vm837_vm1 = vcmask 1041409   ;;  %vm840_vm2 = vcmask 1042434   ;;  %vm843_vm3 = vcmask 1043459  }
  0x61   : > { %s13515_s29 = smul.u32 768, %s14037_s24  ;;  %vm846_vm4 = vcmask 1044484   ;;  %vm849_vm5 = vcmask 1045509   ;;  %vm852_vm6 = vcmask 1046534   ;;  %vm855_vm7 = vcmask 1047559   ;;  %s21054_s2 = sld [smem:[#allocation157_spill]] }
  0x62   : > { %s21029_s21 = smov 4   ;;  %s21024_s25 = smov 8   ;;  %vm2127_vm8 = vcmask 31744   ;;  %vm2131_vm9 = vcmask 64512   ;;  %vm2135_vm10 = vcmask 97280   ;;  %vm2139_vm11 = vcmask 130048  }
  0x63   : > { %s14045_s30 = scalar_lea.vmem [#allocation2], %s13515_s29  ;;  %s21018_s28 = smov 12   ;;  %vm2143_vm12 = vcmask 162816   ;;  %vm2147_vm13 = vcmask 195584   ;;  %vm2151_vm14 = vcmask 228352   ;;  %vm2155_vm15 = vcmask 261120  }
  0x64   : > { %v615_v33 = vld [vmem:[%s14045_s30 + $0x8] sm:$0x1]  ;;  %v616_v34 = vld [vmem:[%s14045_s30 + $0x10] sm:$0x1]  ;;  %v617_v35 = vld [vmem:[%s14045_s30 + $0x18] sm:$0x1] }
  0x65   : > { %v614_v36 = vld [vmem:[%s14045_s30] sm:$0x1]  ;;  %v619_v38 = vld [vmem:[%s14045_s30 + $0x28] sm:$0x1]  ;;  %v620_v39 = vld [vmem:[%s14045_s30 + $0x30] sm:$0x1] }
  0x66   : > { %v602_v32 = vld [vmem:[%s21053_s1] sm:$0xff]  ;;  %v621_v40 = vld [vmem:[%s14045_s30 + $0x38] sm:$0x1]  ;;  %v623_v42 = vld [vmem:[%s14045_s30 + $0x48] sm:$0x1]  ;;  %v836_v48 = vrot.slane %v615_v33, 7 }
  0x67   : > { %13081 = vmatprep.mubr.msk.f32.mxu0 %vm1023_vm0, %v602_v32  ;;  %13114 = vmatprep.mubr.msk.f32.mxu1 %vm1023_vm0, %v602_v32  ;;  %v618_v37 = vld [vmem:[%s14045_s30 + $0x20] sm:$0x1]  ;;  %v624_v43 = vld [vmem:[%s14045_s30 + $0x50] sm:$0x1]  ;;  %v625_v44 = vld [vmem:[%s14045_s30 + $0x58] sm:$0x1] }
  0x68   : > { %v622_v41 = vld [vmem:[%s14045_s30 + $0x40] sm:$0x1]  ;;  %v627_v46 = vld [vmem:[%s14045_s30 + $0x68] sm:$0x1]  ;;  %v628_v47 = vld [vmem:[%s14045_s30 + $0x70] sm:$0x1]  ;;  %v838_v56 = vsel %vm837_vm1, %v836_v48, %v614_v36 }
  0x69   : > { %v626_v45 = vld [vmem:[%s14045_s30 + $0x60] sm:$0x1]  ;;  %v839_v49 = vrot.slane %v616_v34, 6  ;;  %v842_v50 = vrot.slane %v617_v35, 5  ;;  %v629_v51 = vld [vmem:[%s14045_s30 + $0x78] sm:$0x1] }
  0x6a   : > { %v845_v52 = vrot.slane %v618_v37, 4  ;;  %v848_v53 = vrot.slane %v619_v38, 3  ;;  %v851_v54 = vrot.slane %v620_v39, 2  ;;  %v857_v55 = vrot.slane %v623_v42, 7  ;;  %v2192_v60 = vld [vmem:[%s14045_s30 + $0x9] sm:$0x1] }
  0x6b   : > { %v859_v57 = vrot.slane %v624_v43, 6  ;;  %v861_v58 = vrot.slane %v625_v44, 5  ;;  %v863_v59 = vrot.slane %v626_v45, 4  ;;  %v841_v61 = vsel %vm840_vm2, %v839_v49, %v838_v56  ;;  %v2191_v4 = vld [vmem:[%s14045_s30 + $0x1] sm:$0x1]  ;;  %s21016_s29 = smov 16  }
  0x6c   : > { %v854_v62 = vrot.slane %v621_v40, 1  ;;  %v858_v63 = vsel %vm837_vm1, %v857_v55, %v622_v41  ;;  %v865_v0 = vrot.slane %v627_v46, 3  ;;  %v844_v1 = vsel %vm843_vm3, %v842_v50, %v841_v61  ;;  %v2193_v5 = vld [vmem:[%s14045_s30 + $0x11] sm:$0x1]  ;;  %v2194_v10 = vld [vmem:[%s14045_s30 + $0x19] sm:$0x1] }
  0x6d   : > { %v860_v2 = vsel %vm840_vm2, %v859_v57, %v858_v63  ;;  %v867_v3 = vrot.slane %v628_v47, 2  ;;  %v2383_v6 = vrot.slane %v2192_v60, 7  ;;  %v847_v7 = vsel %vm846_vm4, %v845_v52, %v844_v1  ;;  %v2195_v11 = vld [vmem:[%s14045_s30 + $0x21] sm:$0x1]  ;;  %v2196_v14 = vld [vmem:[%s14045_s30 + $0x29] sm:$0x1] }
  0x6e   : > { %v862_v8 = vsel %vm843_vm3, %v861_v58, %v860_v2  ;;  %v869_v9 = vrot.slane %v629_v51, 1  ;;  %v850_v12 = vsel %vm849_vm5, %v848_v53, %v847_v7  ;;  %v2197_v15 = vld [vmem:[%s14045_s30 + $0x31] sm:$0x1]  ;;  %v2198_v16 = vld [vmem:[%s14045_s30 + $0x39] sm:$0x1]  ;;  %v2385_v28 = vrot.slane %v2193_v5, 6 }
  0x6f   : > { %v864_v13 = vsel %vm846_vm4, %v863_v59, %v862_v8  ;;  %v853_v17 = vsel %vm852_vm6, %v851_v54, %v850_v12  ;;  %v2199_v19 = vld [vmem:[%s14045_s30 + $0x41] sm:$0x1]  ;;  %v2200_v20 = vld [vmem:[%s14045_s30 + $0x49] sm:$0x1]  ;;  %v2201_v21 = vld [vmem:[%s14045_s30 + $0x51] sm:$0x1]  ;;  %v2384_v23 = vsel %vm837_vm1, %v2383_v6, %v2191_v4 }
  0x70   : > { %v866_v18 = vsel %vm849_vm5, %v865_v0, %v864_v13  ;;  %v2202_v22 = vld [vmem:[%s14045_s30 + $0x59] sm:$0x1]  ;;  %v856_v24 = vsel %vm855_vm7, %v854_v62, %v853_v17  ;;  %v2203_v26 = vld [vmem:[%s14045_s30 + $0x61] sm:$0x1]  ;;  %v2204_v27 = vld [vmem:[%s14045_s30 + $0x69] sm:$0x1]  ;;  %v2386_v37 = vsel %vm840_vm2, %v2385_v28, %v2384_v23 }
  0x71   : > { %v868_v25 = vsel %vm852_vm6, %v867_v3, %v866_v18  ;;  %v2387_v29 = vrot.slane %v2194_v10, 5  ;;  %v2205_v31 = vld [vmem:[%s14045_s30 + $0x71] sm:$0x1]  ;;  %v2389_v32 = vrot.slane %v2195_v11, 4  ;;  %v2391_v33 = vrot.slane %v2196_v14, 3  ;;  %s20857_s5 = smov 20  }
  0x72   : > { %v870_v30 = vsel %vm855_vm7, %v869_v9, %v868_v25  ;;  %v2393_v34 = vrot.slane %v2197_v15, 2  ;;  %v2206_v36 = vld [vmem:[%s14045_s30 + $0x79] sm:$0x1]  ;;  %v2395_v38 = vrot.slane %v2198_v16, 1  ;;  %v2397_v39 = vrot.slane %v2200_v20, 7  ;;  %s20871_s6 = smov 24  }
  0x73   : > { %v13321_v35 = vpack.c.bf16 %v870_v30, %v856_v24  ;;  %v631_v40 = vld [vmem:[%s14045_s30 + $0x88] sm:$0x1]  ;;  %v2388_v41 = vsel %vm843_vm3, %v2387_v29, %v2386_v37  ;;  %v2399_v42 = vrot.slane %v2201_v21, 6  ;;  %v2401_v43 = vrot.slane %v2202_v22, 5  ;;  %v630_v45 = vld [vmem:[%s14045_s30 + $0x80] sm:$0x1] }
  0x74   : > { %v2403_v44 = vrot.slane %v2203_v26, 4  ;;  %v2390_v46 = vsel %vm846_vm4, %v2389_v32, %v2388_v41  ;;  %v2398_v47 = vsel %vm837_vm1, %v2397_v39, %v2199_v19  ;;  %v2405_v48 = vrot.slane %v2204_v27, 3  ;;  %v632_v49 = vld [vmem:[%s14045_s30 + $0x90] sm:$0x1]  ;;  %v633_v50 = vld [vmem:[%s14045_s30 + $0x98] sm:$0x1] }
  0x75   : > { %13322 = vmatprep.subr.bf16.mxu0 %v13321_v35  ;;  %v2392_v51 = vsel %vm849_vm5, %v2391_v33, %v2390_v46  ;;  %v2400_v52 = vsel %vm840_vm2, %v2399_v42, %v2398_v47  ;;  %v2407_v53 = vrot.slane %v2205_v31, 2  ;;  %v634_v54 = vld [vmem:[%s14045_s30 + $0xa0] sm:$0x1]  ;;  %v635_v55 = vld [vmem:[%s14045_s30 + $0xa8] sm:$0x1]  ;;  %v871_v56 = vrot.slane %v631_v40, 7 }
  0x76   : > { %13324 = vmatpush3.bf16.msra.mxu0 %v13321_v35  ;;  %v2394_v57 = vsel %vm852_vm6, %v2393_v34, %v2392_v51  ;;  %v2402_v58 = vsel %vm843_vm3, %v2401_v43, %v2400_v52  ;;  %v2409_v59 = vrot.slane %v2206_v36, 1  ;;  %v636_v60 = vld [vmem:[%s14045_s30 + $0xb0] sm:$0x1]  ;;  %v637_v61 = vld [vmem:[%s14045_s30 + $0xb8] sm:$0x1]  ;;  %v873_v7 = vrot.slane %v632_v49, 6 }
  0x77   : > { %v2396_v62 = vsel %vm855_vm7, %v2395_v38, %v2394_v57  ;;  %v2404_v63 = vsel %vm846_vm4, %v2403_v44, %v2402_v58  ;;  %v638_v0 = vld [vmem:[%s14045_s30 + $0xc0] sm:$0x1]  ;;  %v639_v1 = vld [vmem:[%s14045_s30 + $0xc8] sm:$0x1]  ;;  %v640_v2 = vld [vmem:[%s14045_s30 + $0xd0] sm:$0x1]  ;;  %v872_v4 = vsel %vm837_vm1, %v871_v56, %v630_v45 }
  0x78   : > { %v641_v3 = vld [vmem:[%s14045_s30 + $0xd8] sm:$0x1]  ;;  %v2406_v5 = vsel %vm849_vm5, %v2405_v48, %v2404_v63  ;;  %v642_v6 = vld [vmem:[%s14045_s30 + $0xe0] sm:$0x1]  ;;  %v875_v8 = vrot.slane %v633_v50, 5  ;;  %v877_v9 = vrot.slane %v634_v54, 4  ;;  %v874_v17 = vsel %vm840_vm2, %v873_v7, %v872_v4 }
  0x79   : > { %v2408_v10 = vsel %vm852_vm6, %v2407_v53, %v2406_v5  ;;  %v643_v11 = vld [vmem:[%s14045_s30 + $0xe8] sm:$0x1]  ;;  %v879_v12 = vrot.slane %v635_v55, 3  ;;  %v881_v13 = vrot.slane %v636_v60, 2  ;;  %v883_v14 = vrot.slane %v637_v61, 1  ;;  %s20967_s7 = smov 32  }
  0x7a   : > { %v2410_v15 = vsel %vm855_vm7, %v2409_v59, %v2408_v10  ;;  %v644_v16 = vld [vmem:[%s14045_s30 + $0xf0] sm:$0x1]  ;;  %v885_v18 = vrot.slane %v639_v1, 7  ;;  %v887_v19 = vrot.slane %v640_v2, 6  ;;  %v2208_v20 = vld [vmem:[%s14045_s30 + $0x89] sm:$0x1]  ;;  %v876_v23 = vsel %vm843_vm3, %v875_v8, %v874_v17 }
  0x7b   : > { %v13345_v21 = vpack.c.bf16 %v2410_v15, %v2396_v62  ;;  %v645_v22 = vld [vmem:[%s14045_s30 + $0xf8] sm:$0x1]  ;;  %v889_v24 = vrot.slane %v641_v3, 5  ;;  %v891_v25 = vrot.slane %v642_v6, 4  ;;  %v2207_v26 = vld [vmem:[%s14045_s30 + $0x81] sm:$0x1]  ;;  %v878_v27 = vsel %vm846_vm4, %v877_v9, %v876_v23 }
  0x7c   : > { %v886_v28 = vsel %vm837_vm1, %v885_v18, %v638_v0  ;;  %v893_v29 = vrot.slane %v643_v11, 3  ;;  %v2209_v30 = vld [vmem:[%s14045_s30 + $0x91] sm:$0x1]  ;;  %v2210_v31 = vld [vmem:[%s14045_s30 + $0x99] sm:$0x1]  ;;  %v880_v32 = vsel %vm849_vm5, %v879_v12, %v878_v27  ;;  %v895_v34 = vrot.slane %v644_v16, 2 }
  0x7d   : > { %13346 = vmatprep.subr.bf16.mxu1 %v13345_v21  ;;  %v888_v33 = vsel %vm840_vm2, %v887_v19, %v886_v28  ;;  %v2211_v35 = vld [vmem:[%s14045_s30 + $0xa1] sm:$0x1]  ;;  %v2212_v36 = vld [vmem:[%s14045_s30 + $0xa9] sm:$0x1]  ;;  %v2411_v37 = vrot.slane %v2208_v20, 7  ;;  %v882_v38 = vsel %vm852_vm6, %v881_v13, %v880_v32  ;;  %v897_v40 = vrot.slane %v645_v22, 1 }
  0x7e   : > { %13348 = vmatpush3.bf16.msra.mxu1 %v13345_v21  ;;  %v890_v39 = vsel %vm843_vm3, %v889_v24, %v888_v33  ;;  %v2213_v41 = vld [vmem:[%s14045_s30 + $0xb1] sm:$0x1]  ;;  %v2214_v42 = vld [vmem:[%s14045_s30 + $0xb9] sm:$0x1]  ;;  %v884_v43 = vsel %vm855_vm7, %v883_v14, %v882_v38  ;;  %v2215_v45 = vld [vmem:[%s14045_s30 + $0xc1] sm:$0x1] }
  0x7f   : > { %v892_v44 = vsel %vm846_vm4, %v891_v25, %v890_v39  ;;  %v2216_v46 = vld [vmem:[%s14045_s30 + $0xc9] sm:$0x1]  ;;  %v2217_v47 = vld [vmem:[%s14045_s30 + $0xd1] sm:$0x1]  ;;  %v2218_v48 = vld [vmem:[%s14045_s30 + $0xd9] sm:$0x1]  ;;  %v2412_v49 = vsel %vm837_vm1, %v2411_v37, %v2207_v26 }
  0x80   : > { %v894_v50 = vsel %vm849_vm5, %v893_v29, %v892_v44  ;;  %v2219_v51 = vld [vmem:[%s14045_s30 + $0xe1] sm:$0x1]  ;;  %v2413_v52 = vrot.slane %v2209_v30, 6  ;;  %v2415_v53 = vrot.slane %v2210_v31, 5  ;;  %v2417_v54 = vrot.slane %v2211_v35, 4  ;;  %s21020_s8 = smov 36  }
  0x81   : > { %v896_v55 = vsel %vm852_vm6, %v895_v34, %v894_v50  ;;  %v2220_v56 = vld [vmem:[%s14045_s30 + $0xe9] sm:$0x1]  ;;  %v2419_v57 = vrot.slane %v2212_v36, 3  ;;  %v2421_v58 = vrot.slane %v2213_v41, 2  ;;  %v2423_v59 = vrot.slane %v2214_v42, 1  ;;  %s20981_s9 = smov 40  }
  0x82   : > { %v898_v60 = vsel %vm855_vm7, %v897_v40, %v896_v55  ;;  %v2221_v61 = vld [vmem:[%s14045_s30 + $0xf1] sm:$0x1]  ;;  %v2414_v62 = vsel %vm840_vm2, %v2413_v52, %v2412_v49  ;;  %v2425_v63 = vrot.slane %v2216_v46, 7  ;;  %v2427_v0 = vrot.slane %v2217_v47, 6  ;;  %v647_v1 = vld [vmem:[%s14045_s30 + $0x108] sm:$0x1] }
  0x83   : > { %v13325_v2 = vpack.c.bf16 %v898_v60, %v884_v43  ;;  %v2222_v3 = vld [vmem:[%s14045_s30 + $0xf9] sm:$0x1]  ;;  %v2416_v4 = vsel %vm843_vm3, %v2415_v53, %v2414_v62  ;;  %v2429_v5 = vrot.slane %v2218_v48, 5  ;;  %v2431_v6 = vrot.slane %v2219_v51, 4  ;;  %v646_v7 = vld [vmem:[%s14045_s30 + $0x100] sm:$0x1] }
  0x84   : > { %v2418_v8 = vsel %vm846_vm4, %v2417_v54, %v2416_v4  ;;  %v2426_v9 = vsel %vm837_vm1, %v2425_v63, %v2215_v45  ;;  %v2433_v10 = vrot.slane %v2220_v56, 3  ;;  %v648_v11 = vld [vmem:[%s14045_s30 + $0x110] sm:$0x1]  ;;  %v649_v12 = vld [vmem:[%s14045_s30 + $0x118] sm:$0x1]  ;;  %v2435_v15 = vrot.slane %v2221_v61, 2 }
  0x85   : > { %13326 = vmatprep.subr.bf16.mxu0 %v13325_v2  ;;  %v2420_v13 = vsel %vm849_vm5, %v2419_v57, %v2418_v8  ;;  %v2428_v14 = vsel %vm840_vm2, %v2427_v0, %v2426_v9  ;;  %v650_v16 = vld [vmem:[%s14045_s30 + $0x120] sm:$0x1]  ;;  %v651_v17 = vld [vmem:[%s14045_s30 + $0x128] sm:$0x1]  ;;  %v899_v18 = vrot.slane %v647_v1, 7  ;;  %v2437_v21 = vrot.slane %v2222_v3, 1 }
  0x86   : > { %v2422_v19 = vsel %vm852_vm6, %v2421_v58, %v2420_v13  ;;  %v2430_v20 = vsel %vm843_vm3, %v2429_v5, %v2428_v14  ;;  %13328 = vmatpush3.bf16.msra.mxu0 %v13325_v2  ;;  %v652_v22 = vld [vmem:[%s14045_s30 + $0x130] sm:$0x1]  ;;  %v653_v23 = vld [vmem:[%s14045_s30 + $0x138] sm:$0x1]  ;;  %v654_v26 = vld [vmem:[%s14045_s30 + $0x140] sm:$0x1] }
  0x87   : > { %v2424_v24 = vsel %vm855_vm7, %v2423_v59, %v2422_v19  ;;  %v2432_v25 = vsel %vm846_vm4, %v2431_v6, %v2430_v20  ;;  %v655_v27 = vld [vmem:[%s14045_s30 + $0x148] sm:$0x1]  ;;  %v656_v28 = vld [vmem:[%s14045_s30 + $0x150] sm:$0x1]  ;;  %v657_v29 = vld [vmem:[%s14045_s30 + $0x158] sm:$0x1]  ;;  %v900_v30 = vsel %vm837_vm1, %v899_v18, %v646_v7 }
  0x88   : > { %v2434_v31 = vsel %vm849_vm5, %v2433_v10, %v2432_v25  ;;  %v658_v32 = vld [vmem:[%s14045_s30 + $0x160] sm:$0x1]  ;;  %v901_v33 = vrot.slane %v648_v11, 6  ;;  %v903_v34 = vrot.slane %v649_v12, 5  ;;  %v905_v35 = vrot.slane %v650_v16, 4  ;;  %s21031_s10 = smov 44  }
  0x89   : > { %v2436_v36 = vsel %vm852_vm6, %v2435_v15, %v2434_v31  ;;  %v659_v37 = vld [vmem:[%s14045_s30 + $0x168] sm:$0x1]  ;;  %v907_v38 = vrot.slane %v651_v17, 3  ;;  %v909_v39 = vrot.slane %v652_v22, 2  ;;  %v911_v40 = vrot.slane %v653_v23, 1  ;;  %s20768_s11 = smov 48  }
  0x8a   : > { %v2438_v41 = vsel %vm855_vm7, %v2437_v21, %v2436_v36  ;;  %v660_v42 = vld [vmem:[%s14045_s30 + $0x170] sm:$0x1]  ;;  %v902_v43 = vsel %vm840_vm2, %v901_v33, %v900_v30  ;;  %v913_v44 = vrot.slane %v655_v27, 7  ;;  %v915_v45 = vrot.slane %v656_v28, 6  ;;  %v2224_v46 = vld [vmem:[%s14045_s30 + $0x109] sm:$0x1] }
  0x8b   : > { %v13349_v47 = vpack.c.bf16 %v2438_v41, %v2424_v24  ;;  %v661_v48 = vld [vmem:[%s14045_s30 + $0x178] sm:$0x1]  ;;  %v904_v49 = vsel %vm843_vm3, %v903_v34, %v902_v43  ;;  %v917_v50 = vrot.slane %v657_v29, 5  ;;  %v919_v51 = vrot.slane %v658_v32, 4  ;;  %v2223_v52 = vld [vmem:[%s14045_s30 + $0x101] sm:$0x1] }
  0x8c   : > { %v906_v53 = vsel %vm846_vm4, %v905_v35, %v904_v49  ;;  %v914_v54 = vsel %vm837_vm1, %v913_v44, %v654_v26  ;;  %v921_v55 = vrot.slane %v659_v37, 3  ;;  %v2225_v56 = vld [vmem:[%s14045_s30 + $0x111] sm:$0x1]  ;;  %v2226_v57 = vld [vmem:[%s14045_s30 + $0x119] sm:$0x1]  ;;  %v923_v60 = vrot.slane %v660_v42, 2 }
  0x8d   : > { %13350 = vmatprep.subr.bf16.mxu1 %v13349_v47  ;;  %v908_v58 = vsel %vm849_vm5, %v907_v38, %v906_v53  ;;  %v916_v59 = vsel %vm840_vm2, %v915_v45, %v914_v54  ;;  %v2227_v61 = vld [vmem:[%s14045_s30 + $0x121] sm:$0x1]  ;;  %v2228_v62 = vld [vmem:[%s14045_s30 + $0x129] sm:$0x1]  ;;  %v2439_v63 = vrot.slane %v2224_v46, 7  ;;  %v925_v2 = vrot.slane %v661_v48, 1 }
  0x8e   : > { %13352 = vmatpush3.bf16.msra.mxu1 %v13349_v47  ;;  %v910_v0 = vsel %vm852_vm6, %v909_v39, %v908_v58  ;;  %v918_v1 = vsel %vm843_vm3, %v917_v50, %v916_v59  ;;  %v2229_v3 = vld [vmem:[%s14045_s30 + $0x131] sm:$0x1]  ;;  %v2230_v4 = vld [vmem:[%s14045_s30 + $0x139] sm:$0x1]  ;;  %v2231_v7 = vld [vmem:[%s14045_s30 + $0x141] sm:$0x1] }
  0x8f   : > { %v912_v5 = vsel %vm855_vm7, %v911_v40, %v910_v0  ;;  %v920_v6 = vsel %vm846_vm4, %v919_v51, %v918_v1  ;;  %v2232_v8 = vld [vmem:[%s14045_s30 + $0x149] sm:$0x1]  ;;  %v2233_v9 = vld [vmem:[%s14045_s30 + $0x151] sm:$0x1]  ;;  %v2234_v10 = vld [vmem:[%s14045_s30 + $0x159] sm:$0x1]  ;;  %v2440_v11 = vsel %vm837_vm1, %v2439_v63, %v2223_v52 }
  0x90   : > { %v922_v12 = vsel %vm849_vm5, %v921_v55, %v920_v6  ;;  %v2235_v13 = vld [vmem:[%s14045_s30 + $0x161] sm:$0x1]  ;;  %v2441_v14 = vrot.slane %v2225_v56, 6  ;;  %v2443_v15 = vrot.slane %v2226_v57, 5  ;;  %v2445_v16 = vrot.slane %v2227_v61, 4  ;;  %s20766_s20 = smov 52  }
  0x91   : > { %v924_v17 = vsel %vm852_vm6, %v923_v60, %v922_v12  ;;  %v2236_v18 = vld [vmem:[%s14045_s30 + $0x169] sm:$0x1]  ;;  %v2447_v19 = vrot.slane %v2228_v62, 3  ;;  %v2449_v20 = vrot.slane %v2229_v3, 2  ;;  %v2451_v21 = vrot.slane %v2230_v4, 1  ;;  %s21665_s0 = smov 44  }
  0x92   : > { %v926_v22 = vsel %vm855_vm7, %v925_v2, %v924_v17  ;;  %v2237_v23 = vld [vmem:[%s14045_s30 + $0x171] sm:$0x1]  ;;  %v2442_v24 = vsel %vm840_vm2, %v2441_v14, %v2440_v11  ;;  %v2453_v25 = vrot.slane %v2232_v8, 7  ;;  %v2455_v26 = vrot.slane %v2233_v9, 6  ;;  %v663_v27 = vld [vmem:[%s14045_s30 + $0x188] sm:$0x1] }
  0x93   : > { %v13329_v28 = vpack.c.bf16 %v926_v22, %v912_v5  ;;  %v2238_v29 = vld [vmem:[%s14045_s30 + $0x179] sm:$0x1]  ;;  %v2444_v30 = vsel %vm843_vm3, %v2443_v15, %v2442_v24  ;;  %v2457_v31 = vrot.slane %v2234_v10, 5  ;;  %v2459_v32 = vrot.slane %v2235_v13, 4  ;;  %v662_v33 = vld [vmem:[%s14045_s30 + $0x180] sm:$0x1] }
  0x94   : > { %v2446_v34 = vsel %vm846_vm4, %v2445_v16, %v2444_v30  ;;  %v2454_v35 = vsel %vm837_vm1, %v2453_v25, %v2231_v7  ;;  %v2461_v36 = vrot.slane %v2236_v18, 3  ;;  %v664_v37 = vld [vmem:[%s14045_s30 + $0x190] sm:$0x1]  ;;  %v665_v38 = vld [vmem:[%s14045_s30 + $0x198] sm:$0x1]  ;;  %v2463_v41 = vrot.slane %v2237_v23, 2 }
  0x95   : > { %13330 = vmatprep.subr.bf16.mxu0 %v13329_v28  ;;  %v2448_v39 = vsel %vm849_vm5, %v2447_v19, %v2446_v34  ;;  %v2456_v40 = vsel %vm840_vm2, %v2455_v26, %v2454_v35  ;;  %v666_v42 = vld [vmem:[%s14045_s30 + $0x1a0] sm:$0x1]  ;;  %v667_v43 = vld [vmem:[%s14045_s30 + $0x1a8] sm:$0x1]  ;;  %v927_v44 = vrot.slane %v663_v27, 7  ;;  %v2465_v47 = vrot.slane %v2238_v29, 1 }
  0x96   : > { %v2450_v45 = vsel %vm852_vm6, %v2449_v20, %v2448_v39  ;;  %v2458_v46 = vsel %vm843_vm3, %v2457_v31, %v2456_v40  ;;  %13332 = vmatpush3.bf16.msra.mxu0 %v13329_v28  ;;  %v668_v48 = vld [vmem:[%s14045_s30 + $0x1b0] sm:$0x1]  ;;  %v669_v49 = vld [vmem:[%s14045_s30 + $0x1b8] sm:$0x1]  ;;  %v670_v52 = vld [vmem:[%s14045_s30 + $0x1c0] sm:$0x1] }
  0x97   : > { %v2452_v50 = vsel %vm855_vm7, %v2451_v21, %v2450_v45  ;;  %v2460_v51 = vsel %vm846_vm4, %v2459_v32, %v2458_v46  ;;  %v671_v53 = vld [vmem:[%s14045_s30 + $0x1c8] sm:$0x1]  ;;  %v672_v54 = vld [vmem:[%s14045_s30 + $0x1d0] sm:$0x1]  ;;  %v673_v55 = vld [vmem:[%s14045_s30 + $0x1d8] sm:$0x1]  ;;  %v928_v56 = vsel %vm837_vm1, %v927_v44, %v662_v33 }
  0x98   : > { %v2462_v57 = vsel %vm849_vm5, %v2461_v36, %v2460_v51  ;;  %v674_v58 = vld [vmem:[%s14045_s30 + $0x1e0] sm:$0x1]  ;;  %v929_v59 = vrot.slane %v664_v37, 6  ;;  %v931_v60 = vrot.slane %v665_v38, 5  ;;  %v933_v61 = vrot.slane %v666_v42, 4 }
  0x99   : > { %v2464_v62 = vsel %vm852_vm6, %v2463_v41, %v2462_v57  ;;  %v675_v63 = vld [vmem:[%s14045_s30 + $0x1e8] sm:$0x1]  ;;  %v935_v0 = vrot.slane %v667_v43, 3  ;;  %v937_v1 = vrot.slane %v668_v48, 2  ;;  %v939_v2 = vrot.slane %v669_v49, 1 }
  0x9a   : > { %v2466_v3 = vsel %vm855_vm7, %v2465_v47, %v2464_v62  ;;  %v676_v4 = vld [vmem:[%s14045_s30 + $0x1f0] sm:$0x1]  ;;  %v930_v5 = vsel %vm840_vm2, %v929_v59, %v928_v56  ;;  %v941_v6 = vrot.slane %v671_v53, 7  ;;  %v943_v7 = vrot.slane %v672_v54, 6  ;;  %v2240_v8 = vld [vmem:[%s14045_s30 + $0x189] sm:$0x1] }
  0x9b   : > { %v13353_v9 = vpack.c.bf16 %v2466_v3, %v2452_v50  ;;  %v677_v10 = vld [vmem:[%s14045_s30 + $0x1f8] sm:$0x1]  ;;  %v932_v11 = vsel %vm843_vm3, %v931_v60, %v930_v5  ;;  %v945_v12 = vrot.slane %v673_v55, 5  ;;  %v947_v13 = vrot.slane %v674_v58, 4  ;;  %v2239_v14 = vld [vmem:[%s14045_s30 + $0x181] sm:$0x1] }
  0x9c   : > { %v934_v15 = vsel %vm846_vm4, %v933_v61, %v932_v11  ;;  %v942_v16 = vsel %vm837_vm1, %v941_v6, %v670_v52  ;;  %v949_v17 = vrot.slane %v675_v63, 3  ;;  %v2241_v18 = vld [vmem:[%s14045_s30 + $0x191] sm:$0x1]  ;;  %v2242_v19 = vld [vmem:[%s14045_s30 + $0x199] sm:$0x1]  ;;  %v951_v22 = vrot.slane %v676_v4, 2 }
  0x9d   : > { %13354 = vmatprep.subr.bf16.mxu1 %v13353_v9  ;;  %v936_v20 = vsel %vm849_vm5, %v935_v0, %v934_v15  ;;  %v944_v21 = vsel %vm840_vm2, %v943_v7, %v942_v16  ;;  %v2243_v23 = vld [vmem:[%s14045_s30 + $0x1a1] sm:$0x1]  ;;  %v2244_v24 = vld [vmem:[%s14045_s30 + $0x1a9] sm:$0x1]  ;;  %v2467_v25 = vrot.slane %v2240_v8, 7  ;;  %v953_v28 = vrot.slane %v677_v10, 1 }
  0x9e   : > { %13356 = vmatpush3.bf16.msra.mxu1 %v13353_v9  ;;  %v938_v26 = vsel %vm852_vm6, %v937_v1, %v936_v20  ;;  %v946_v27 = vsel %vm843_vm3, %v945_v12, %v944_v21  ;;  %v2245_v29 = vld [vmem:[%s14045_s30 + $0x1b1] sm:$0x1]  ;;  %v2246_v30 = vld [vmem:[%s14045_s30 + $0x1b9] sm:$0x1]  ;;  %v2247_v33 = vld [vmem:[%s14045_s30 + $0x1c1] sm:$0x1] }
  0x9f   : > { %v940_v31 = vsel %vm855_vm7, %v939_v2, %v938_v26  ;;  %v948_v32 = vsel %vm846_vm4, %v947_v13, %v946_v27  ;;  %v2248_v34 = vld [vmem:[%s14045_s30 + $0x1c9] sm:$0x1]  ;;  %v2249_v35 = vld [vmem:[%s14045_s30 + $0x1d1] sm:$0x1]  ;;  %v2250_v36 = vld [vmem:[%s14045_s30 + $0x1d9] sm:$0x1]  ;;  %v2468_v37 = vsel %vm837_vm1, %v2467_v25, %v2239_v14 }
  0xa0   : > { %v950_v38 = vsel %vm849_vm5, %v949_v17, %v948_v32  ;;  %v2251_v39 = vld [vmem:[%s14045_s30 + $0x1e1] sm:$0x1]  ;;  %v2469_v40 = vrot.slane %v2241_v18, 6  ;;  %v2471_v41 = vrot.slane %v2242_v19, 5  ;;  %v2473_v42 = vrot.slane %v2243_v23, 4 }
  0xa1   : > { %v952_v43 = vsel %vm852_vm6, %v951_v22, %v950_v38  ;;  %v2252_v44 = vld [vmem:[%s14045_s30 + $0x1e9] sm:$0x1]  ;;  %v2475_v45 = vrot.slane %v2244_v24, 3  ;;  %v2477_v46 = vrot.slane %v2245_v29, 2  ;;  %v2479_v47 = vrot.slane %v2246_v30, 1 }
  0xa2   : > { %v954_v48 = vsel %vm855_vm7, %v953_v28, %v952_v43  ;;  %v2253_v49 = vld [vmem:[%s14045_s30 + $0x1f1] sm:$0x1]  ;;  %v2470_v50 = vsel %vm840_vm2, %v2469_v40, %v2468_v37  ;;  %v2481_v51 = vrot.slane %v2248_v34, 7  ;;  %v2483_v52 = vrot.slane %v2249_v35, 6  ;;  %v679_v53 = vld [vmem:[%s14045_s30 + $0x208] sm:$0x1] }
  0xa3   : > { %v13333_v54 = vpack.c.bf16 %v954_v48, %v940_v31  ;;  %v2254_v55 = vld [vmem:[%s14045_s30 + $0x1f9] sm:$0x1]  ;;  %v2472_v56 = vsel %vm843_vm3, %v2471_v41, %v2470_v50  ;;  %v2485_v57 = vrot.slane %v2250_v36, 5  ;;  %v2487_v58 = vrot.slane %v2251_v39, 4  ;;  %v678_v59 = vld [vmem:[%s14045_s30 + $0x200] sm:$0x1] }
  0xa4   : > { %v2474_v60 = vsel %vm846_vm4, %v2473_v42, %v2472_v56  ;;  %v2482_v61 = vsel %vm837_vm1, %v2481_v51, %v2247_v33  ;;  %v2489_v62 = vrot.slane %v2252_v44, 3  ;;  %v680_v63 = vld [vmem:[%s14045_s30 + $0x210] sm:$0x1]  ;;  %v681_v0 = vld [vmem:[%s14045_s30 + $0x218] sm:$0x1]  ;;  %v2491_v3 = vrot.slane %v2253_v49, 2 }
  0xa5   : > { %13334 = vmatprep.subr.bf16.mxu0 %v13333_v54  ;;  %v2476_v1 = vsel %vm849_vm5, %v2475_v45, %v2474_v60  ;;  %v2484_v2 = vsel %vm840_vm2, %v2483_v52, %v2482_v61  ;;  %v682_v4 = vld [vmem:[%s14045_s30 + $0x220] sm:$0x1]  ;;  %v683_v5 = vld [vmem:[%s14045_s30 + $0x228] sm:$0x1]  ;;  %v955_v6 = vrot.slane %v679_v53, 7  ;;  %v2493_v9 = vrot.slane %v2254_v55, 1 }
  0xa6   : > { %v2478_v7 = vsel %vm852_vm6, %v2477_v46, %v2476_v1  ;;  %v2486_v8 = vsel %vm843_vm3, %v2485_v57, %v2484_v2  ;;  %13336 = vmatpush3.bf16.msra.mxu0 %v13333_v54  ;;  %v684_v10 = vld [vmem:[%s14045_s30 + $0x230] sm:$0x1]  ;;  %v685_v11 = vld [vmem:[%s14045_s30 + $0x238] sm:$0x1]  ;;  %v686_v14 = vld [vmem:[%s14045_s30 + $0x240] sm:$0x1] }
  0xa7   : > { %v2480_v12 = vsel %vm855_vm7, %v2479_v47, %v2478_v7  ;;  %v2488_v13 = vsel %vm846_vm4, %v2487_v58, %v2486_v8  ;;  %v687_v15 = vld [vmem:[%s14045_s30 + $0x248] sm:$0x1]  ;;  %v688_v16 = vld [vmem:[%s14045_s30 + $0x250] sm:$0x1]  ;;  %v689_v17 = vld [vmem:[%s14045_s30 + $0x258] sm:$0x1]  ;;  %v956_v18 = vsel %vm837_vm1, %v955_v6, %v678_v59 }
  0xa8   : > { %v2490_v19 = vsel %vm849_vm5, %v2489_v62, %v2488_v13  ;;  %v690_v20 = vld [vmem:[%s14045_s30 + $0x260] sm:$0x1]  ;;  %v957_v21 = vrot.slane %v680_v63, 6  ;;  %v959_v22 = vrot.slane %v681_v0, 5  ;;  %v961_v23 = vrot.slane %v682_v4, 4 }
  0xa9   : > { %v2492_v24 = vsel %vm852_vm6, %v2491_v3, %v2490_v19  ;;  %v691_v25 = vld [vmem:[%s14045_s30 + $0x268] sm:$0x1]  ;;  %v963_v26 = vrot.slane %v683_v5, 3  ;;  %v965_v27 = vrot.slane %v684_v10, 2  ;;  %v967_v28 = vrot.slane %v685_v11, 1 }
  0xaa   : > { %v2494_v29 = vsel %vm855_vm7, %v2493_v9, %v2492_v24  ;;  %v692_v30 = vld [vmem:[%s14045_s30 + $0x270] sm:$0x1]  ;;  %v958_v31 = vsel %vm840_vm2, %v957_v21, %v956_v18  ;;  %v969_v32 = vrot.slane %v687_v15, 7  ;;  %v971_v33 = vrot.slane %v688_v16, 6  ;;  %v2256_v34 = vld [vmem:[%s14045_s30 + $0x209] sm:$0x1] }
  0xab   : > { %v13357_v35 = vpack.c.bf16 %v2494_v29, %v2480_v12  ;;  %v693_v36 = vld [vmem:[%s14045_s30 + $0x278] sm:$0x1]  ;;  %v960_v37 = vsel %vm843_vm3, %v959_v22, %v958_v31  ;;  %v973_v38 = vrot.slane %v689_v17, 5  ;;  %v975_v39 = vrot.slane %v690_v20, 4  ;;  %v2255_v40 = vld [vmem:[%s14045_s30 + $0x201] sm:$0x1] }
  0xac   : > { %v962_v41 = vsel %vm846_vm4, %v961_v23, %v960_v37  ;;  %v970_v42 = vsel %vm837_vm1, %v969_v32, %v686_v14  ;;  %v977_v43 = vrot.slane %v691_v25, 3  ;;  %v2257_v44 = vld [vmem:[%s14045_s30 + $0x211] sm:$0x1]  ;;  %v2258_v45 = vld [vmem:[%s14045_s30 + $0x219] sm:$0x1]  ;;  %v979_v48 = vrot.slane %v692_v30, 2 }
  0xad   : > { %13358 = vmatprep.subr.bf16.mxu1 %v13357_v35  ;;  %v964_v46 = vsel %vm849_vm5, %v963_v26, %v962_v41  ;;  %v972_v47 = vsel %vm840_vm2, %v971_v33, %v970_v42  ;;  %v2259_v49 = vld [vmem:[%s14045_s30 + $0x221] sm:$0x1]  ;;  %v2260_v50 = vld [vmem:[%s14045_s30 + $0x229] sm:$0x1]  ;;  %v2495_v51 = vrot.slane %v2256_v34, 7  ;;  %v981_v54 = vrot.slane %v693_v36, 1 }
  0xae   : > { %13360 = vmatpush3.bf16.msra.mxu1 %v13357_v35  ;;  %v966_v52 = vsel %vm852_vm6, %v965_v27, %v964_v46  ;;  %v974_v53 = vsel %vm843_vm3, %v973_v38, %v972_v47  ;;  %v2261_v55 = vld [vmem:[%s14045_s30 + $0x231] sm:$0x1]  ;;  %v2262_v56 = vld [vmem:[%s14045_s30 + $0x239] sm:$0x1]  ;;  %v2263_v59 = vld [vmem:[%s14045_s30 + $0x241] sm:$0x1] }
  0xaf   : > { %v968_v57 = vsel %vm855_vm7, %v967_v28, %v966_v52  ;;  %v976_v58 = vsel %vm846_vm4, %v975_v39, %v974_v53  ;;  %v2264_v60 = vld [vmem:[%s14045_s30 + $0x249] sm:$0x1]  ;;  %v2265_v61 = vld [vmem:[%s14045_s30 + $0x251] sm:$0x1]  ;;  %v2266_v62 = vld [vmem:[%s14045_s30 + $0x259] sm:$0x1]  ;;  %v2496_v63 = vsel %vm837_vm1, %v2495_v51, %v2255_v40 }
  0xb0   : > { %v978_v0 = vsel %vm849_vm5, %v977_v43, %v976_v58  ;;  %v2267_v1 = vld [vmem:[%s14045_s30 + $0x261] sm:$0x1]  ;;  %v2497_v2 = vrot.slane %v2257_v44, 6  ;;  %v2499_v3 = vrot.slane %v2258_v45, 5  ;;  %v2501_v4 = vrot.slane %v2259_v49, 4 }
  0xb1   : > { %v980_v5 = vsel %vm852_vm6, %v979_v48, %v978_v0  ;;  %v2268_v6 = vld [vmem:[%s14045_s30 + $0x269] sm:$0x1]  ;;  %v2503_v7 = vrot.slane %v2260_v50, 3  ;;  %v2505_v8 = vrot.slane %v2261_v55, 2  ;;  %v2507_v9 = vrot.slane %v2262_v56, 1 }
  0xb2   : > { %v982_v10 = vsel %vm855_vm7, %v981_v54, %v980_v5  ;;  %v2269_v11 = vld [vmem:[%s14045_s30 + $0x271] sm:$0x1]  ;;  %v2498_v12 = vsel %vm840_vm2, %v2497_v2, %v2496_v63  ;;  %v2509_v13 = vrot.slane %v2264_v60, 7  ;;  %v2511_v14 = vrot.slane %v2265_v61, 6  ;;  %v695_v15 = vld [vmem:[%s14045_s30 + $0x288] sm:$0x1] }
  0xb3   : > { %v13337_v16 = vpack.c.bf16 %v982_v10, %v968_v57  ;;  %v2270_v17 = vld [vmem:[%s14045_s30 + $0x279] sm:$0x1]  ;;  %v2500_v18 = vsel %vm843_vm3, %v2499_v3, %v2498_v12  ;;  %v2513_v19 = vrot.slane %v2266_v62, 5  ;;  %v2515_v20 = vrot.slane %v2267_v1, 4  ;;  %v694_v21 = vld [vmem:[%s14045_s30 + $0x280] sm:$0x1] }
  0xb4   : > { %v2502_v22 = vsel %vm846_vm4, %v2501_v4, %v2500_v18  ;;  %v2510_v23 = vsel %vm837_vm1, %v2509_v13, %v2263_v59  ;;  %v2517_v24 = vrot.slane %v2268_v6, 3  ;;  %v696_v25 = vld [vmem:[%s14045_s30 + $0x290] sm:$0x1]  ;;  %v697_v26 = vld [vmem:[%s14045_s30 + $0x298] sm:$0x1]  ;;  %v2519_v29 = vrot.slane %v2269_v11, 2 }
  0xb5   : > { %13338 = vmatprep.subr.bf16.mxu0 %v13337_v16  ;;  %v2504_v27 = vsel %vm849_vm5, %v2503_v7, %v2502_v22  ;;  %v2512_v28 = vsel %vm840_vm2, %v2511_v14, %v2510_v23  ;;  %v698_v30 = vld [vmem:[%s14045_s30 + $0x2a0] sm:$0x1]  ;;  %v699_v31 = vld [vmem:[%s14045_s30 + $0x2a8] sm:$0x1]  ;;  %v983_v32 = vrot.slane %v695_v15, 7  ;;  %v2521_v35 = vrot.slane %v2270_v17, 1 }
  0xb6   : > { %v2506_v33 = vsel %vm852_vm6, %v2505_v8, %v2504_v27  ;;  %v2514_v34 = vsel %vm843_vm3, %v2513_v19, %v2512_v28  ;;  %13340 = vmatpush3.bf16.msra.mxu0 %v13337_v16  ;;  %v700_v36 = vld [vmem:[%s14045_s30 + $0x2b0] sm:$0x1]  ;;  %v701_v37 = vld [vmem:[%s14045_s30 + $0x2b8] sm:$0x1]  ;;  %v702_v40 = vld [vmem:[%s14045_s30 + $0x2c0] sm:$0x1] }
  0xb7   : > { %v2508_v38 = vsel %vm855_vm7, %v2507_v9, %v2506_v33  ;;  %v2516_v39 = vsel %vm846_vm4, %v2515_v20, %v2514_v34  ;;  %v703_v41 = vld [vmem:[%s14045_s30 + $0x2c8] sm:$0x1]  ;;  %v704_v42 = vld [vmem:[%s14045_s30 + $0x2d0] sm:$0x1]  ;;  %v705_v43 = vld [vmem:[%s14045_s30 + $0x2d8] sm:$0x1]  ;;  %v984_v44 = vsel %vm837_vm1, %v983_v32, %v694_v21 }
  0xb8   : > { %v2518_v45 = vsel %vm849_vm5, %v2517_v24, %v2516_v39  ;;  %v706_v46 = vld [vmem:[%s14045_s30 + $0x2e0] sm:$0x1]  ;;  %v985_v47 = vrot.slane %v696_v25, 6  ;;  %v987_v48 = vrot.slane %v697_v26, 5  ;;  %v989_v49 = vrot.slane %v698_v30, 4 }
  0xb9   : > { %v2520_v50 = vsel %vm852_vm6, %v2519_v29, %v2518_v45  ;;  %v707_v51 = vld [vmem:[%s14045_s30 + $0x2e8] sm:$0x1]  ;;  %v991_v52 = vrot.slane %v699_v31, 3  ;;  %v993_v53 = vrot.slane %v700_v36, 2  ;;  %v995_v54 = vrot.slane %v701_v37, 1 }
  0xba   : > { %v2522_v55 = vsel %vm855_vm7, %v2521_v35, %v2520_v50  ;;  %v708_v56 = vld [vmem:[%s14045_s30 + $0x2f0] sm:$0x1]  ;;  %v986_v57 = vsel %vm840_vm2, %v985_v47, %v984_v44  ;;  %v997_v58 = vrot.slane %v703_v41, 7  ;;  %v999_v59 = vrot.slane %v704_v42, 6  ;;  %v2272_v60 = vld [vmem:[%s14045_s30 + $0x289] sm:$0x1] }
  0xbb   : > { %v13361_v61 = vpack.c.bf16 %v2522_v55, %v2508_v38  ;;  %v709_v62 = vld [vmem:[%s14045_s30 + $0x2f8] sm:$0x1]  ;;  %v988_v63 = vsel %vm843_vm3, %v987_v48, %v986_v57  ;;  %v1001_v0 = vrot.slane %v705_v43, 5  ;;  %v1003_v1 = vrot.slane %v706_v46, 4  ;;  %v2271_v2 = vld [vmem:[%s14045_s30 + $0x281] sm:$0x1] }
  0xbc   : > { %v990_v3 = vsel %vm846_vm4, %v989_v49, %v988_v63  ;;  %v998_v4 = vsel %vm837_vm1, %v997_v58, %v702_v40  ;;  %v1005_v5 = vrot.slane %v707_v51, 3  ;;  %v2273_v6 = vld [vmem:[%s14045_s30 + $0x291] sm:$0x1]  ;;  %v2274_v7 = vld [vmem:[%s14045_s30 + $0x299] sm:$0x1]  ;;  %v1007_v10 = vrot.slane %v708_v56, 2 }
  0xbd   : > { %13362 = vmatprep.subr.bf16.mxu1 %v13361_v61  ;;  %v992_v8 = vsel %vm849_vm5, %v991_v52, %v990_v3  ;;  %v1000_v9 = vsel %vm840_vm2, %v999_v59, %v998_v4  ;;  %v2275_v11 = vld [vmem:[%s14045_s30 + $0x2a1] sm:$0x1]  ;;  %v2276_v12 = vld [vmem:[%s14045_s30 + $0x2a9] sm:$0x1]  ;;  %v2523_v13 = vrot.slane %v2272_v60, 7  ;;  %v1009_v16 = vrot.slane %v709_v62, 1 }
  0xbe   : > { %13364 = vmatpush3.bf16.msra.mxu1 %v13361_v61  ;;  %v994_v14 = vsel %vm852_vm6, %v993_v53, %v992_v8  ;;  %v1002_v15 = vsel %vm843_vm3, %v1001_v0, %v1000_v9  ;;  %v2277_v17 = vld [vmem:[%s14045_s30 + $0x2b1] sm:$0x1]  ;;  %v2278_v18 = vld [vmem:[%s14045_s30 + $0x2b9] sm:$0x1]  ;;  %v2279_v21 = vld [vmem:[%s14045_s30 + $0x2c1] sm:$0x1] }
  0xbf   : > { %v996_v19 = vsel %vm855_vm7, %v995_v54, %v994_v14  ;;  %v1004_v20 = vsel %vm846_vm4, %v1003_v1, %v1002_v15  ;;  %v2280_v22 = vld [vmem:[%s14045_s30 + $0x2c9] sm:$0x1]  ;;  %v2281_v23 = vld [vmem:[%s14045_s30 + $0x2d1] sm:$0x1]  ;;  %v2282_v24 = vld [vmem:[%s14045_s30 + $0x2d9] sm:$0x1]  ;;  %v2524_v25 = vsel %vm837_vm1, %v2523_v13, %v2271_v2 }
  0xc0   : > { %v1006_v26 = vsel %vm849_vm5, %v1005_v5, %v1004_v20  ;;  %v2283_v27 = vld [vmem:[%s14045_s30 + $0x2e1] sm:$0x1]  ;;  %v2525_v28 = vrot.slane %v2273_v6, 6  ;;  %v2527_v29 = vrot.slane %v2274_v7, 5  ;;  %v2529_v30 = vrot.slane %v2275_v11, 4  ;;  %v14403_v51 = vld [vmem:[%s21053_s1 + $0x8] sm:$0xff] }
  0xc1   : > { %v1008_v31 = vsel %vm852_vm6, %v1007_v10, %v1006_v26  ;;  %v2284_v32 = vld [vmem:[%s14045_s30 + $0x2e9] sm:$0x1]  ;;  %v2531_v33 = vrot.slane %v2276_v12, 3  ;;  %v2533_v34 = vrot.slane %v2277_v17, 2  ;;  %v2535_v35 = vrot.slane %v2278_v18, 1  ;;  %v14418_v1 = vld [vmem:[%s21053_s1 + $0x10] sm:$0xff] }
  0xc2   : > { %v1010_v36 = vsel %vm855_vm7, %v1009_v16, %v1008_v31  ;;  %v2285_v37 = vld [vmem:[%s14045_s30 + $0x2f1] sm:$0x1]  ;;  %v2526_v38 = vsel %vm840_vm2, %v2525_v28, %v2524_v25  ;;  %v2537_v39 = vrot.slane %v2280_v22, 7  ;;  %v2539_v40 = vrot.slane %v2281_v23, 6  ;;  %v3697_v41 = vld [vmem:[%s14045_s30 + $0xa] sm:$0x1] }
  0xc3   : > { %v13341_v42 = vpack.c.bf16 %v1010_v36, %v996_v19  ;;  %v2286_v43 = vld [vmem:[%s14045_s30 + $0x2f9] sm:$0x1]  ;;  %v2528_v44 = vsel %vm843_vm3, %v2527_v29, %v2526_v38  ;;  %v2541_v45 = vrot.slane %v2282_v24, 5  ;;  %v2543_v46 = vrot.slane %v2283_v27, 4  ;;  %v3696_v47 = vld [vmem:[%s14045_s30 + $0x2] sm:$0x1] }
  0xc4   : > { %v2530_v48 = vsel %vm846_vm4, %v2529_v30, %v2528_v44  ;;  %v2538_v49 = vsel %vm837_vm1, %v2537_v39, %v2279_v21  ;;  %v2545_v50 = vrot.slane %v2284_v32, 3  ;;  %v3698_v52 = vld [vmem:[%s14045_s30 + $0x12] sm:$0x1]  ;;  %v3699_v53 = vld [vmem:[%s14045_s30 + $0x1a] sm:$0x1]  ;;  %v2547_v56 = vrot.slane %v2285_v37, 2 }
  0xc5   : > { %13342 = vmatprep.subr.bf16.mxu0 %v13341_v42  ;;  %v2532_v54 = vsel %vm849_vm5, %v2531_v33, %v2530_v48  ;;  %v2540_v55 = vsel %vm840_vm2, %v2539_v40, %v2538_v49  ;;  %v3700_v57 = vld [vmem:[%s14045_s30 + $0x22] sm:$0x1]  ;;  %v3701_v58 = vld [vmem:[%s14045_s30 + $0x2a] sm:$0x1]  ;;  %v3888_v59 = vrot.slane %v3697_v41, 7  ;;  %v2549_v62 = vrot.slane %v2286_v43, 1 }
  0xc6   : > { %v2534_v60 = vsel %vm852_vm6, %v2533_v34, %v2532_v54  ;;  %v2542_v61 = vsel %vm843_vm3, %v2541_v45, %v2540_v55  ;;  %13344 = vmatpush3.bf16.msra.mxu0 %v13341_v42  ;;  %v3702_v63 = vld [vmem:[%s14045_s30 + $0x32] sm:$0x1]  ;;  %v3703_v0 = vld [vmem:[%s14045_s30 + $0x3a] sm:$0x1]  ;;  %v3704_v4 = vld [vmem:[%s14045_s30 + $0x42] sm:$0x1] }
  0xc7   : > { %v2536_v2 = vsel %vm855_vm7, %v2535_v35, %v2534_v60  ;;  %v2544_v3 = vsel %vm846_vm4, %v2543_v46, %v2542_v61  ;;  %v3705_v5 = vld [vmem:[%s14045_s30 + $0x4a] sm:$0x1]  ;;  %v3706_v6 = vld [vmem:[%s14045_s30 + $0x52] sm:$0x1]  ;;  %v3707_v7 = vld [vmem:[%s14045_s30 + $0x5a] sm:$0x1]  ;;  %v3889_v8 = vsel %vm837_vm1, %v3888_v59, %v3696_v47 }
  0xc8   : > { %v2546_v9 = vsel %vm849_vm5, %v2545_v50, %v2544_v3  ;;  %v3708_v10 = vld [vmem:[%s14045_s30 + $0x62] sm:$0x1]  ;;  %v3890_v11 = vrot.slane %v3698_v52, 6  ;;  %v3892_v12 = vrot.slane %v3699_v53, 5  ;;  %v3894_v13 = vrot.slane %v3700_v57, 4  ;;  %v14432_v14 = vld [vmem:[%s21053_s1 + $0x18] sm:$0xff] }
  0xc9   : > { %v2548_v15 = vsel %vm852_vm6, %v2547_v56, %v2546_v9  ;;  %13082 = vmatmul.mubr.msk.f32.vlgmr.msra.gmra.mrb[0].mxu0 %vm1023_vm0, %v14403_v51  ;;  %v3709_v16 = vld [vmem:[%s14045_s30 + $0x6a] sm:$0x1]  ;;  %v3896_v17 = vrot.slane %v3701_v58, 3  ;;  %v3898_v18 = vrot.slane %v3702_v63, 2  ;;  %v3900_v19 = vrot.slane %v3703_v0, 1  ;;  %v14441_v20 = vld [vmem:[%s21053_s1 + $0x20] sm:$0xff] }
  0xca   : > { %v2550_v21 = vsel %vm855_vm7, %v2549_v62, %v2548_v15  ;;  %v3710_v22 = vld [vmem:[%s14045_s30 + $0x72] sm:$0x1]  ;;  %v3891_v23 = vsel %vm840_vm2, %v3890_v11, %v3889_v8  ;;  %v3902_v24 = vrot.slane %v3705_v5, 7  ;;  %v3904_v25 = vrot.slane %v3706_v6, 6  ;;  %v5202_v26 = vld [vmem:[%s14045_s30 + $0xb] sm:$0x1]  ;;  %13084 = vmatprep.mubr.msk.f32.mxu0 %vm1023_vm0, %v14418_v1 }
  0xcb   : > { %v13365_v27 = vpack.c.bf16 %v2550_v21, %v2536_v2  ;;  %v3711_v28 = vld [vmem:[%s14045_s30 + $0x7a] sm:$0x1]  ;;  %v3893_v29 = vsel %vm843_vm3, %v3892_v12, %v3891_v23  ;;  %v3906_v30 = vrot.slane %v3707_v7, 5  ;;  %v3908_v31 = vrot.slane %v3708_v10, 4  ;;  %v5201_v32 = vld [vmem:[%s14045_s30 + $0x3] sm:$0x1] }
  0xcc   : > { %v3895_v33 = vsel %vm846_vm4, %v3894_v13, %v3893_v29  ;;  %v3903_v34 = vsel %vm837_vm1, %v3902_v24, %v3704_v4  ;;  %v3910_v35 = vrot.slane %v3709_v16, 3  ;;  %v5203_v36 = vld [vmem:[%s14045_s30 + $0x13] sm:$0x1]  ;;  %v5204_v37 = vld [vmem:[%s14045_s30 + $0x1b] sm:$0x1]  ;;  %v3912_v40 = vrot.slane %v3710_v22, 2 }
  0xcd   : > { %13366 = vmatprep.subr.bf16.mxu1 %v13365_v27  ;;  %v3897_v38 = vsel %vm849_vm5, %v3896_v17, %v3895_v33  ;;  %v3905_v39 = vsel %vm840_vm2, %v3904_v25, %v3903_v34  ;;  %v5205_v41 = vld [vmem:[%s14045_s30 + $0x23] sm:$0x1]  ;;  %v5206_v42 = vld [vmem:[%s14045_s30 + $0x2b] sm:$0x1]  ;;  %v5393_v43 = vrot.slane %v5202_v26, 7  ;;  %13085 = vmatmul.mubr.msk.f32.gmra.mrb[2].mxu0 %vm1023_vm0, %v14432_v14  ;;  %v3914_v46 = vrot.slane %v3711_v28, 1 }
  0xce   : > { %13368 = vmatpush3.bf16.msra.mxu1 %v13365_v27  ;;  %v3899_v44 = vsel %vm852_vm6, %v3898_v18, %v3897_v38  ;;  %v3907_v45 = vsel %vm843_vm3, %v3906_v30, %v3905_v39  ;;  %v5207_v47 = vld [vmem:[%s14045_s30 + $0x33] sm:$0x1]  ;;  %v5208_v48 = vld [vmem:[%s14045_s30 + $0x3b] sm:$0x1]  ;;  %13087 = vmatprep.mubr.msk.f32.mxu0 %vm1023_vm0, %v14441_v20  ;;  %v14471_v49 = vld [vmem:[%s21053_s1 + $0x28] sm:$0xff]  ;;  %v5395_v60 = vrot.slane %v5203_v36, 6 }
  0xcf   : > { %v3901_v50 = vsel %vm855_vm7, %v3900_v19, %v3899_v44  ;;  %v3909_v52 = vsel %vm846_vm4, %v3908_v31, %v3907_v45  ;;  %v5209_v53 = vld [vmem:[%s14045_s30 + $0x43] sm:$0x1]  ;;  %v5210_v54 = vld [vmem:[%s14045_s30 + $0x4b] sm:$0x1]  ;;  %v5211_v55 = vld [vmem:[%s14045_s30 + $0x53] sm:$0x1]  ;;  %v5394_v57 = vsel %vm837_vm1, %v5393_v43, %v5201_v32 }
  0xd0   : > { %v5212_v56 = vld [vmem:[%s14045_s30 + $0x5b] sm:$0x1]  ;;  %v3911_v58 = vsel %vm849_vm5, %v3910_v35, %v3909_v52  ;;  %v5213_v59 = vld [vmem:[%s14045_s30 + $0x63] sm:$0x1]  ;;  %v5397_v61 = vrot.slane %v5204_v37, 5  ;;  %v5399_v62 = vrot.slane %v5205_v41, 4  ;;  %v5396_v7 = vsel %vm840_vm2, %v5395_v60, %v5394_v57 }
  0xd1   : > { %13115 = vmatmul.mubr.msk.f32.vlgmr.msra.gmra.mrb[0].mxu1 %vm1023_vm0, %v14403_v51  ;;  %v3913_v63 = vsel %vm852_vm6, %v3912_v40, %v3911_v58  ;;  %v5214_v0 = vld [vmem:[%s14045_s30 + $0x6b] sm:$0x1]  ;;  %v5401_v2 = vrot.slane %v5206_v42, 3  ;;  %v5403_v3 = vrot.slane %v5207_v47, 2  ;;  %v5405_v4 = vrot.slane %v5208_v48, 1  ;;  %13088 = vmatmul.mubr.msk.f32.gmra.mrb[4].mxu0 %vm1023_vm0, %v14471_v49  ;;  %v13623_v10 = vld [vmem:[%s21053_s1] sm:$0xff] }
  0xd2   : > { %v3915_v5 = vsel %vm855_vm7, %v3914_v46, %v3913_v63  ;;  %v5215_v6 = vld [vmem:[%s14045_s30 + $0x73] sm:$0x1]  ;;  %v5407_v8 = vrot.slane %v5210_v54, 7  ;;  %v5409_v51 = vrot.slane %v5211_v55, 6  ;;  %13117 = vmatprep.mubr.msk.f32.mxu1 %vm1023_vm0, %v14418_v1  ;;  %v3713_v9 = vld [vmem:[%s14045_s30 + $0x8a] sm:$0x1]  ;;  %13147 = vmatprep.mubr.msk.f32.mxu0 %vm1023_vm0, %v13623_v10  ;;  %v5398_v13 = vsel %vm843_vm3, %v5397_v61, %v5396_v7 }
  0xd3   : > { %v13369_v11 = vpack.c.bf16 %v3915_v5, %v3901_v50  ;;  %v5216_v12 = vld [vmem:[%s14045_s30 + $0x7b] sm:$0x1]  ;;  %v5411_v15 = vrot.slane %v5212_v56, 5  ;;  %v5413_v16 = vrot.slane %v5213_v59, 4  ;;  %v3712_v17 = vld [vmem:[%s14045_s30 + $0x82] sm:$0x1]  ;;  %v5400_v18 = vsel %vm846_vm4, %v5399_v62, %v5398_v13 }
  0xd4   : > { %v5408_v1 = vsel %vm837_vm1, %v5407_v8, %v5209_v53  ;;  %v5415_v19 = vrot.slane %v5214_v0, 3  ;;  %v3714_v21 = vld [vmem:[%s14045_s30 + $0x92] sm:$0x1]  ;;  %v3715_v22 = vld [vmem:[%s14045_s30 + $0x9a] sm:$0x1]  ;;  %v5402_v23 = vsel %vm849_vm5, %v5401_v2, %v5400_v18  ;;  %v5417_v25 = vrot.slane %v5215_v6, 2 }
  0xd5   : > { %13370 = vmatprep.subr.bf16.mxu0 %v13369_v11  ;;  %v5410_v24 = vsel %vm840_vm2, %v5409_v51, %v5408_v1  ;;  %13118 = vmatmul.mubr.msk.f32.gmra.mrb[2].mxu1 %vm1023_vm0, %v14432_v14  ;;  %v3716_v26 = vld [vmem:[%s14045_s30 + $0xa2] sm:$0x1]  ;;  %v3717_v27 = vld [vmem:[%s14045_s30 + $0xaa] sm:$0x1]  ;;  %v3916_v28 = vrot.slane %v3713_v9, 7  ;;  %v5404_v29 = vsel %vm852_vm6, %v5403_v3, %v5402_v23  ;;  %v5419_v31 = vrot.slane %v5216_v12, 1 }
  0xd6   : > { %v5412_v30 = vsel %vm843_vm3, %v5411_v15, %v5410_v24  ;;  %13372 = vmatpush3.bf16.msra.mxu0 %v13369_v11  ;;  %v3718_v32 = vld [vmem:[%s14045_s30 + $0xb2] sm:$0x1]  ;;  %v3719_v33 = vld [vmem:[%s14045_s30 + $0xba] sm:$0x1]  ;;  %13120 = vmatprep.mubr.msk.f32.mxu1 %vm1023_vm0, %v14441_v20  ;;  %v5406_v34 = vsel %vm855_vm7, %v5405_v4, %v5404_v29  ;;  %v3720_v35 = vld [vmem:[%s14045_s30 + $0xc2] sm:$0x1] }
  0xd7   : > { %v5414_v14 = vsel %vm846_vm4, %v5413_v16, %v5412_v30  ;;  %v3721_v36 = vld [vmem:[%s14045_s30 + $0xca] sm:$0x1]  ;;  %v3722_v37 = vld [vmem:[%s14045_s30 + $0xd2] sm:$0x1]  ;;  %v3723_v38 = vld [vmem:[%s14045_s30 + $0xda] sm:$0x1]  ;;  %v3917_v39 = vsel %vm837_vm1, %v3916_v28, %v3712_v17 }
  0xd8   : > { %v5416_v40 = vsel %vm849_vm5, %v5415_v19, %v5414_v14  ;;  %v3724_v41 = vld [vmem:[%s14045_s30 + $0xe2] sm:$0x1]  ;;  %v3918_v42 = vrot.slane %v3714_v21, 6  ;;  %v3920_v43 = vrot.slane %v3715_v22, 5  ;;  %v3922_v44 = vrot.slane %v3716_v26, 4 }
  0xd9   : > { %v5418_v20 = vsel %vm852_vm6, %v5417_v25, %v5416_v40  ;;  %v3725_v45 = vld [vmem:[%s14045_s30 + $0xea] sm:$0x1]  ;;  %v3924_v46 = vrot.slane %v3717_v27, 3  ;;  %v3926_v47 = vrot.slane %v3718_v32, 2  ;;  %v3928_v48 = vrot.slane %v3719_v33, 1  ;;  %13121 = vmatmul.mubr.msk.f32.gmra.mrb[4].mxu1 %vm1023_vm0, %v14471_v49 }
  0xda   : > { %v5420_v50 = vsel %vm855_vm7, %v5419_v31, %v5418_v20  ;;  %v3726_v52 = vld [vmem:[%s14045_s30 + $0xf2] sm:$0x1]  ;;  %v3919_v53 = vsel %vm840_vm2, %v3918_v42, %v3917_v39  ;;  %v3930_v54 = vrot.slane %v3721_v36, 7  ;;  %v3932_v55 = vrot.slane %v3722_v37, 6  ;;  %v5218_v56 = vld [vmem:[%s14045_s30 + $0x8b] sm:$0x1]  ;;  %13180 = vmatprep.mubr.msk.f32.mxu1 %vm1023_vm0, %v13623_v10 }
  0xdb   : > { %v13393_v57 = vpack.c.bf16 %v5420_v50, %v5406_v34  ;;  %v3727_v58 = vld [vmem:[%s14045_s30 + $0xfa] sm:$0x1]  ;;  %v3921_v59 = vsel %vm843_vm3, %v3920_v43, %v3919_v53  ;;  %v3934_v60 = vrot.slane %v3723_v38, 5  ;;  %v3936_v49 = vrot.slane %v3724_v41, 4  ;;  %v5217_v61 = vld [vmem:[%s14045_s30 + $0x83] sm:$0x1] }
  0xdc   : > { %v3923_v62 = vsel %vm846_vm4, %v3922_v44, %v3921_v59  ;;  %v3931_v63 = vsel %vm837_vm1, %v3930_v54, %v3720_v35  ;;  %v3938_v0 = vrot.slane %v3725_v45, 3  ;;  %v5219_v2 = vld [vmem:[%s14045_s30 + $0x93] sm:$0x1]  ;;  %v5220_v3 = vld [vmem:[%s14045_s30 + $0x9b] sm:$0x1]  ;;  %v3940_v6 = vrot.slane %v3726_v52, 2 }
  0xdd   : > { %13394 = vmatprep.subr.bf16.mxu1 %v13393_v57  ;;  %v3925_v4 = vsel %vm849_vm5, %v3924_v46, %v3923_v62  ;;  %v3933_v5 = vsel %vm840_vm2, %v3932_v55, %v3931_v63  ;;  %v5221_v7 = vld [vmem:[%s14045_s30 + $0xa3] sm:$0x1]  ;;  %v5222_v8 = vld [vmem:[%s14045_s30 + $0xab] sm:$0x1]  ;;  %v5421_v51 = vrot.slane %v5218_v56, 7  ;;  %v3942_v11 = vrot.slane %v3727_v58, 1 }
  0xde   : > { %13396 = vmatpush3.bf16.msra.mxu1 %v13393_v57  ;;  %v3927_v9 = vsel %vm852_vm6, %v3926_v47, %v3925_v4  ;;  %v3935_v10 = vsel %vm843_vm3, %v3934_v60, %v3933_v5  ;;  %v5223_v12 = vld [vmem:[%s14045_s30 + $0xb3] sm:$0x1]  ;;  %v5224_v13 = vld [vmem:[%s14045_s30 + $0xbb] sm:$0x1]  ;;  %v5225_v17 = vld [vmem:[%s14045_s30 + $0xc3] sm:$0x1] }
  0xdf   : > { %v3929_v15 = vsel %vm855_vm7, %v3928_v48, %v3927_v9  ;;  %v3937_v16 = vsel %vm846_vm4, %v3936_v49, %v3935_v10  ;;  %v5226_v18 = vld [vmem:[%s14045_s30 + $0xcb] sm:$0x1]  ;;  %v5227_v1 = vld [vmem:[%s14045_s30 + $0xd3] sm:$0x1]  ;;  %v5228_v19 = vld [vmem:[%s14045_s30 + $0xdb] sm:$0x1]  ;;  %v5422_v21 = vsel %vm837_vm1, %v5421_v51, %v5217_v61 }
  0xe0   : > { %v3939_v22 = vsel %vm849_vm5, %v3938_v0, %v3937_v16  ;;  %v5229_v23 = vld [vmem:[%s14045_s30 + $0xe3] sm:$0x1]  ;;  %v5423_v24 = vrot.slane %v5219_v2, 6  ;;  %v5425_v25 = vrot.slane %v5220_v3, 5  ;;  %v5427_v26 = vrot.slane %v5221_v7, 4 }
  0xe1   : > { %v3941_v27 = vsel %vm852_vm6, %v3940_v6, %v3939_v22  ;;  %v5230_v28 = vld [vmem:[%s14045_s30 + $0xeb] sm:$0x1]  ;;  %v5429_v29 = vrot.slane %v5222_v8, 3  ;;  %v5431_v30 = vrot.slane %v5223_v12, 2  ;;  %v5433_v31 = vrot.slane %v5224_v13, 1 }
  0xe2   : > { %v3943_v32 = vsel %vm855_vm7, %v3942_v11, %v3941_v27  ;;  %v5231_v33 = vld [vmem:[%s14045_s30 + $0xf3] sm:$0x1]  ;;  %v5424_v34 = vsel %vm840_vm2, %v5423_v24, %v5422_v21  ;;  %v5435_v14 = vrot.slane %v5226_v18, 7  ;;  %v5437_v35 = vrot.slane %v5227_v1, 6  ;;  %v3729_v36 = vld [vmem:[%s14045_s30 + $0x10a] sm:$0x1] }
  0xe3   : > { %v13373_v37 = vpack.c.bf16 %v3943_v32, %v3929_v15  ;;  %v5232_v38 = vld [vmem:[%s14045_s30 + $0xfb] sm:$0x1]  ;;  %v5426_v39 = vsel %vm843_vm3, %v5425_v25, %v5424_v34  ;;  %v5439_v40 = vrot.slane %v5228_v19, 5  ;;  %v5441_v41 = vrot.slane %v5229_v23, 4  ;;  %v3728_v42 = vld [vmem:[%s14045_s30 + $0x102] sm:$0x1] }
  0xe4   : > { %v5428_v43 = vsel %vm846_vm4, %v5427_v26, %v5426_v39  ;;  %v5436_v44 = vsel %vm837_vm1, %v5435_v14, %v5225_v17  ;;  %v5443_v20 = vrot.slane %v5230_v28, 3  ;;  %v3730_v45 = vld [vmem:[%s14045_s30 + $0x112] sm:$0x1]  ;;  %v3731_v46 = vld [vmem:[%s14045_s30 + $0x11a] sm:$0x1]  ;;  %v5445_v50 = vrot.slane %v5231_v33, 2 }
  0xe5   : > { %13374 = vmatprep.subr.bf16.mxu0 %v13373_v37  ;;  %v5430_v47 = vsel %vm849_vm5, %v5429_v29, %v5428_v43  ;;  %v5438_v48 = vsel %vm840_vm2, %v5437_v35, %v5436_v44  ;;  %v3732_v52 = vld [vmem:[%s14045_s30 + $0x122] sm:$0x1]  ;;  %v3733_v53 = vld [vmem:[%s14045_s30 + $0x12a] sm:$0x1]  ;;  %v3944_v54 = vrot.slane %v3729_v36, 7  ;;  %v5447_v57 = vrot.slane %v5232_v38, 1 }
  0xe6   : > { %v5432_v55 = vsel %vm852_vm6, %v5431_v30, %v5430_v47  ;;  %v5440_v56 = vsel %vm843_vm3, %v5439_v40, %v5438_v48  ;;  %13376 = vmatpush3.bf16.msra.mxu0 %v13373_v37  ;;  %v3734_v58 = vld [vmem:[%s14045_s30 + $0x132] sm:$0x1]  ;;  %v3735_v59 = vld [vmem:[%s14045_s30 + $0x13a] sm:$0x1]  ;;  %v3736_v61 = vld [vmem:[%s14045_s30 + $0x142] sm:$0x1] }
  0xe7   : > { %v5434_v60 = vsel %vm855_vm7, %v5433_v31, %v5432_v55  ;;  %v5442_v49 = vsel %vm846_vm4, %v5441_v41, %v5440_v56  ;;  %v3737_v62 = vld [vmem:[%s14045_s30 + $0x14a] sm:$0x1]  ;;  %v3738_v63 = vld [vmem:[%s14045_s30 + $0x152] sm:$0x1]  ;;  %v3739_v0 = vld [vmem:[%s14045_s30 + $0x15a] sm:$0x1]  ;;  %v3945_v2 = vsel %vm837_vm1, %v3944_v54, %v3728_v42 }
  0xe8   : > { %v5444_v3 = vsel %vm849_vm5, %v5443_v20, %v5442_v49  ;;  %v3740_v4 = vld [vmem:[%s14045_s30 + $0x162] sm:$0x1]  ;;  %v3946_v5 = vrot.slane %v3730_v45, 6  ;;  %v3948_v6 = vrot.slane %v3731_v46, 5  ;;  %v3950_v7 = vrot.slane %v3732_v52, 4 }
  0xe9   : > { %v5446_v8 = vsel %vm852_vm6, %v5445_v50, %v5444_v3  ;;  %v3741_v51 = vld [vmem:[%s14045_s30 + $0x16a] sm:$0x1]  ;;  %v3952_v9 = vrot.slane %v3733_v53, 3  ;;  %v3954_v10 = vrot.slane %v3734_v58, 2  ;;  %v3956_v11 = vrot.slane %v3735_v59, 1 }
  0xea   : > { %v5448_v12 = vsel %vm855_vm7, %v5447_v57, %v5446_v8  ;;  %v3742_v13 = vld [vmem:[%s14045_s30 + $0x172] sm:$0x1]  ;;  %v3947_v15 = vsel %vm840_vm2, %v3946_v5, %v3945_v2  ;;  %v3958_v16 = vrot.slane %v3737_v62, 7  ;;  %v3960_v17 = vrot.slane %v3738_v63, 6  ;;  %v5234_v18 = vld [vmem:[%s14045_s30 + $0x10b] sm:$0x1] }
  0xeb   : > { %v13397_v1 = vpack.c.bf16 %v5448_v12, %v5434_v60  ;;  %v3743_v19 = vld [vmem:[%s14045_s30 + $0x17a] sm:$0x1]  ;;  %v3949_v21 = vsel %vm843_vm3, %v3948_v6, %v3947_v15  ;;  %v3962_v22 = vrot.slane %v3739_v0, 5  ;;  %v3964_v23 = vrot.slane %v3740_v4, 4  ;;  %v5233_v24 = vld [vmem:[%s14045_s30 + $0x103] sm:$0x1] }
  0xec   : > { %v3951_v25 = vsel %vm846_vm4, %v3950_v7, %v3949_v21  ;;  %v3959_v26 = vsel %vm837_vm1, %v3958_v16, %v3736_v61  ;;  %v3966_v27 = vrot.slane %v3741_v51, 3  ;;  %v5235_v28 = vld [vmem:[%s14045_s30 + $0x113] sm:$0x1]  ;;  %v5236_v29 = vld [vmem:[%s14045_s30 + $0x11b] sm:$0x1]  ;;  %v3968_v32 = vrot.slane %v3742_v13, 2 }
  0xed   : > { %13398 = vmatprep.subr.bf16.mxu1 %v13397_v1  ;;  %v3953_v30 = vsel %vm849_vm5, %v3952_v9, %v3951_v25  ;;  %v3961_v31 = vsel %vm840_vm2, %v3960_v17, %v3959_v26  ;;  %v5237_v33 = vld [vmem:[%s14045_s30 + $0x123] sm:$0x1]  ;;  %v5238_v34 = vld [vmem:[%s14045_s30 + $0x12b] sm:$0x1]  ;;  %v5449_v14 = vrot.slane %v5234_v18, 7  ;;  %v3970_v37 = vrot.slane %v3743_v19, 1 }
  0xee   : > { %13400 = vmatpush3.bf16.msra.mxu1 %v13397_v1  ;;  %v3955_v35 = vsel %vm852_vm6, %v3954_v10, %v3953_v30  ;;  %v3963_v36 = vsel %vm843_vm3, %v3962_v22, %v3961_v31  ;;  %v5239_v38 = vld [vmem:[%s14045_s30 + $0x133] sm:$0x1]  ;;  %v5240_v39 = vld [vmem:[%s14045_s30 + $0x13b] sm:$0x1]  ;;  %v5241_v42 = vld [vmem:[%s14045_s30 + $0x143] sm:$0x1] }
  0xef   : > { %v3957_v40 = vsel %vm855_vm7, %v3956_v11, %v3955_v35  ;;  %v3965_v41 = vsel %vm846_vm4, %v3964_v23, %v3963_v36  ;;  %v5242_v43 = vld [vmem:[%s14045_s30 + $0x14b] sm:$0x1]  ;;  %v5243_v44 = vld [vmem:[%s14045_s30 + $0x153] sm:$0x1]  ;;  %v5244_v20 = vld [vmem:[%s14045_s30 + $0x15b] sm:$0x1]  ;;  %v5450_v45 = vsel %vm837_vm1, %v5449_v14, %v5233_v24 }
  0xf0   : > { %v3967_v46 = vsel %vm849_vm5, %v3966_v27, %v3965_v41  ;;  %v5245_v47 = vld [vmem:[%s14045_s30 + $0x163] sm:$0x1]  ;;  %v5451_v48 = vrot.slane %v5235_v28, 6  ;;  %v5453_v50 = vrot.slane %v5236_v29, 5  ;;  %v5455_v52 = vrot.slane %v5237_v33, 4 }
  0xf1   : > { %v3969_v53 = vsel %vm852_vm6, %v3968_v32, %v3967_v46  ;;  %v5246_v54 = vld [vmem:[%s14045_s30 + $0x16b] sm:$0x1]  ;;  %v5457_v55 = vrot.slane %v5238_v34, 3  ;;  %v5459_v56 = vrot.slane %v5239_v38, 2  ;;  %v5461_v57 = vrot.slane %v5240_v39, 1 }
  0xf2   : > { %v3971_v58 = vsel %vm855_vm7, %v3970_v37, %v3969_v53  ;;  %v5247_v59 = vld [vmem:[%s14045_s30 + $0x173] sm:$0x1]  ;;  %v5452_v60 = vsel %vm840_vm2, %v5451_v48, %v5450_v45  ;;  %v5463_v49 = vrot.slane %v5242_v43, 7  ;;  %v5465_v61 = vrot.slane %v5243_v44, 6  ;;  %v3745_v62 = vld [vmem:[%s14045_s30 + $0x18a] sm:$0x1] }
  0xf3   : > { %v13377_v63 = vpack.c.bf16 %v3971_v58, %v3957_v40  ;;  %v5248_v0 = vld [vmem:[%s14045_s30 + $0x17b] sm:$0x1]  ;;  %v5454_v2 = vsel %vm843_vm3, %v5453_v50, %v5452_v60  ;;  %v5467_v3 = vrot.slane %v5244_v20, 5  ;;  %v5469_v4 = vrot.slane %v5245_v47, 4  ;;  %v3744_v5 = vld [vmem:[%s14045_s30 + $0x182] sm:$0x1] }
  0xf4   : > { %v5456_v6 = vsel %vm846_vm4, %v5455_v52, %v5454_v2  ;;  %v5464_v7 = vsel %vm837_vm1, %v5463_v49, %v5241_v42  ;;  %v5471_v8 = vrot.slane %v5246_v54, 3  ;;  %v3746_v51 = vld [vmem:[%s14045_s30 + $0x192] sm:$0x1]  ;;  %v3747_v9 = vld [vmem:[%s14045_s30 + $0x19a] sm:$0x1]  ;;  %v5473_v12 = vrot.slane %v5247_v59, 2 }
  0xf5   : > { %13378 = vmatprep.subr.bf16.mxu0 %v13377_v63  ;;  %v5458_v10 = vsel %vm849_vm5, %v5457_v55, %v5456_v6  ;;  %v5466_v11 = vsel %vm840_vm2, %v5465_v61, %v5464_v7  ;;  %v3748_v13 = vld [vmem:[%s14045_s30 + $0x1a2] sm:$0x1]  ;;  %v3749_v15 = vld [vmem:[%s14045_s30 + $0x1aa] sm:$0x1]  ;;  %v3972_v16 = vrot.slane %v3745_v62, 7  ;;  %v5475_v1 = vrot.slane %v5248_v0, 1 }
  0xf6   : > { %v5460_v17 = vsel %vm852_vm6, %v5459_v56, %v5458_v10  ;;  %v5468_v18 = vsel %vm843_vm3, %v5467_v3, %v5466_v11  ;;  %13380 = vmatpush3.bf16.msra.mxu0 %v13377_v63  ;;  %v3750_v19 = vld [vmem:[%s14045_s30 + $0x1b2] sm:$0x1]  ;;  %v3751_v21 = vld [vmem:[%s14045_s30 + $0x1ba] sm:$0x1]  ;;  %v3752_v24 = vld [vmem:[%s14045_s30 + $0x1c2] sm:$0x1] }
  0xf7   : > { %v5462_v22 = vsel %vm855_vm7, %v5461_v57, %v5460_v17  ;;  %v5470_v23 = vsel %vm846_vm4, %v5469_v4, %v5468_v18  ;;  %v3753_v25 = vld [vmem:[%s14045_s30 + $0x1ca] sm:$0x1]  ;;  %v3754_v26 = vld [vmem:[%s14045_s30 + $0x1d2] sm:$0x1]  ;;  %v3755_v27 = vld [vmem:[%s14045_s30 + $0x1da] sm:$0x1]  ;;  %v3973_v28 = vsel %vm837_vm1, %v3972_v16, %v3744_v5 }
  0xf8   : > { %v5472_v29 = vsel %vm849_vm5, %v5471_v8, %v5470_v23  ;;  %v3756_v30 = vld [vmem:[%s14045_s30 + $0x1e2] sm:$0x1]  ;;  %v3974_v31 = vrot.slane %v3746_v51, 6  ;;  %v3976_v32 = vrot.slane %v3747_v9, 5  ;;  %v3978_v33 = vrot.slane %v3748_v13, 4 }
  0xf9   : > { %v5474_v34 = vsel %vm852_vm6, %v5473_v12, %v5472_v29  ;;  %v3757_v14 = vld [vmem:[%s14045_s30 + $0x1ea] sm:$0x1]  ;;  %v3980_v35 = vrot.slane %v3749_v15, 3  ;;  %v3982_v36 = vrot.slane %v3750_v19, 2  ;;  %v3984_v37 = vrot.slane %v3751_v21, 1 }
  0xfa   : > { %v5476_v38 = vsel %vm855_vm7, %v5475_v1, %v5474_v34  ;;  %v3758_v39 = vld [vmem:[%s14045_s30 + $0x1f2] sm:$0x1]  ;;  %v3975_v40 = vsel %vm840_vm2, %v3974_v31, %v3973_v28  ;;  %v3986_v41 = vrot.slane %v3753_v25, 7  ;;  %v3988_v42 = vrot.slane %v3754_v26, 6  ;;  %v5250_v43 = vld [vmem:[%s14045_s30 + $0x18b] sm:$0x1] }
  0xfb   : > { %v13401_v44 = vpack.c.bf16 %v5476_v38, %v5462_v22  ;;  %v3759_v20 = vld [vmem:[%s14045_s30 + $0x1fa] sm:$0x1]  ;;  %v3977_v45 = vsel %vm843_vm3, %v3976_v32, %v3975_v40  ;;  %v3990_v46 = vrot.slane %v3755_v27, 5  ;;  %v3992_v47 = vrot.slane %v3756_v30, 4  ;;  %v5249_v48 = vld [vmem:[%s14045_s30 + $0x183] sm:$0x1] }
  0xfc   : > { %v3979_v50 = vsel %vm846_vm4, %v3978_v33, %v3977_v45  ;;  %v3987_v52 = vsel %vm837_vm1, %v3986_v41, %v3752_v24  ;;  %v3994_v53 = vrot.slane %v3757_v14, 3  ;;  %v5251_v54 = vld [vmem:[%s14045_s30 + $0x193] sm:$0x1]  ;;  %v5252_v55 = vld [vmem:[%s14045_s30 + $0x19b] sm:$0x1]  ;;  %v3996_v58 = vrot.slane %v3758_v39, 2 }
  0xfd   : > { %13402 = vmatprep.subr.bf16.mxu1 %v13401_v44  ;;  %v3981_v56 = vsel %vm849_vm5, %v3980_v35, %v3979_v50  ;;  %v3989_v57 = vsel %vm840_vm2, %v3988_v42, %v3987_v52  ;;  %v5253_v59 = vld [vmem:[%s14045_s30 + $0x1a3] sm:$0x1]  ;;  %v5254_v60 = vld [vmem:[%s14045_s30 + $0x1ab] sm:$0x1]  ;;  %v5477_v49 = vrot.slane %v5250_v43, 7  ;;  %v3998_v63 = vrot.slane %v3759_v20, 1 }
  0xfe   : > { %13404 = vmatpush3.bf16.msra.mxu1 %v13401_v44  ;;  %v3983_v61 = vsel %vm852_vm6, %v3982_v36, %v3981_v56  ;;  %v3991_v62 = vsel %vm843_vm3, %v3990_v46, %v3989_v57  ;;  %v5255_v0 = vld [vmem:[%s14045_s30 + $0x1b3] sm:$0x1]  ;;  %v5256_v2 = vld [vmem:[%s14045_s30 + $0x1bb] sm:$0x1]  ;;  %v5257_v5 = vld [vmem:[%s14045_s30 + $0x1c3] sm:$0x1] }
  0xff   : > { %v3985_v3 = vsel %vm855_vm7, %v3984_v37, %v3983_v61  ;;  %v3993_v4 = vsel %vm846_vm4, %v3992_v47, %v3991_v62  ;;  %v5258_v6 = vld [vmem:[%s14045_s30 + $0x1cb] sm:$0x1]  ;;  %v5259_v7 = vld [vmem:[%s14045_s30 + $0x1d3] sm:$0x1]  ;;  %v5260_v8 = vld [vmem:[%s14045_s30 + $0x1db] sm:$0x1]  ;;  %v5478_v51 = vsel %vm837_vm1, %v5477_v49, %v5249_v48 }
 0x100   : > { %v3995_v9 = vsel %vm849_vm5, %v3994_v53, %v3993_v4  ;;  %v5261_v10 = vld [vmem:[%s14045_s30 + $0x1e3] sm:$0x1]  ;;  %v5479_v11 = vrot.slane %v5251_v54, 6  ;;  %v5481_v12 = vrot.slane %v5252_v55, 5  ;;  %v5483_v13 = vrot.slane %v5253_v59, 4 }
 0x101   : > { %v3997_v15 = vsel %vm852_vm6, %v3996_v58, %v3995_v9  ;;  %v5262_v16 = vld [vmem:[%s14045_s30 + $0x1eb] sm:$0x1]  ;;  %v5485_v17 = vrot.slane %v5254_v60, 3  ;;  %v5487_v18 = vrot.slane %v5255_v0, 2  ;;  %v5489_v1 = vrot.slane %v5256_v2, 1 }
 0x102   : > { %v3999_v19 = vsel %vm855_vm7, %v3998_v63, %v3997_v15  ;;  %v5263_v21 = vld [vmem:[%s14045_s30 + $0x1f3] sm:$0x1]  ;;  %v5480_v22 = vsel %vm840_vm2, %v5479_v11, %v5478_v51  ;;  %v5491_v23 = vrot.slane %v5258_v6, 7  ;;  %v5493_v24 = vrot.slane %v5259_v7, 6  ;;  %v3761_v25 = vld [vmem:[%s14045_s30 + $0x20a] sm:$0x1] }
 0x103   : > { %v13381_v26 = vpack.c.bf16 %v3999_v19, %v3985_v3  ;;  %v5264_v27 = vld [vmem:[%s14045_s30 + $0x1fb] sm:$0x1]  ;;  %v5482_v28 = vsel %vm843_vm3, %v5481_v12, %v5480_v22  ;;  %v5495_v29 = vrot.slane %v5260_v8, 5  ;;  %v5497_v30 = vrot.slane %v5261_v10, 4  ;;  %v3760_v31 = vld [vmem:[%s14045_s30 + $0x202] sm:$0x1] }
 0x104   : > { %v5484_v32 = vsel %vm846_vm4, %v5483_v13, %v5482_v28  ;;  %v5492_v33 = vsel %vm837_vm1, %v5491_v23, %v5257_v5  ;;  %v5499_v34 = vrot.slane %v5262_v16, 3  ;;  %v3762_v14 = vld [vmem:[%s14045_s30 + $0x212] sm:$0x1]  ;;  %v3763_v35 = vld [vmem:[%s14045_s30 + $0x21a] sm:$0x1]  ;;  %v5501_v38 = vrot.slane %v5263_v21, 2 }
 0x105   : > { %13382 = vmatprep.subr.bf16.mxu0 %v13381_v26  ;;  %v5486_v36 = vsel %vm849_vm5, %v5485_v17, %v5484_v32  ;;  %v5494_v37 = vsel %vm840_vm2, %v5493_v24, %v5492_v33  ;;  %v3764_v39 = vld [vmem:[%s14045_s30 + $0x222] sm:$0x1]  ;;  %v3765_v40 = vld [vmem:[%s14045_s30 + $0x22a] sm:$0x1]  ;;  %v4000_v41 = vrot.slane %v3761_v25, 7  ;;  %v5503_v44 = vrot.slane %v5264_v27, 1 }
 0x106   : > { %v5488_v42 = vsel %vm852_vm6, %v5487_v18, %v5486_v36  ;;  %v5496_v43 = vsel %vm843_vm3, %v5495_v29, %v5494_v37  ;;  %13384 = vmatpush3.bf16.msra.mxu0 %v13381_v26  ;;  %v3766_v20 = vld [vmem:[%s14045_s30 + $0x232] sm:$0x1]  ;;  %v3767_v45 = vld [vmem:[%s14045_s30 + $0x23a] sm:$0x1]  ;;  %v3768_v48 = vld [vmem:[%s14045_s30 + $0x242] sm:$0x1] }
 0x107   : > { %v5490_v46 = vsel %vm855_vm7, %v5489_v1, %v5488_v42  ;;  %v5498_v47 = vsel %vm846_vm4, %v5497_v30, %v5496_v43  ;;  %v3769_v50 = vld [vmem:[%s14045_s30 + $0x24a] sm:$0x1]  ;;  %v3770_v52 = vld [vmem:[%s14045_s30 + $0x252] sm:$0x1]  ;;  %v3771_v53 = vld [vmem:[%s14045_s30 + $0x25a] sm:$0x1]  ;;  %v4001_v54 = vsel %vm837_vm1, %v4000_v41, %v3760_v31 }
 0x108   : > { %v5500_v55 = vsel %vm849_vm5, %v5499_v34, %v5498_v47  ;;  %v3772_v56 = vld [vmem:[%s14045_s30 + $0x262] sm:$0x1]  ;;  %v4002_v57 = vrot.slane %v3762_v14, 6  ;;  %v4004_v58 = vrot.slane %v3763_v35, 5  ;;  %v4006_v59 = vrot.slane %v3764_v39, 4 }
 0x109   : > { %v5502_v60 = vsel %vm852_vm6, %v5501_v38, %v5500_v55  ;;  %v3773_v49 = vld [vmem:[%s14045_s30 + $0x26a] sm:$0x1]  ;;  %v4008_v61 = vrot.slane %v3765_v40, 3  ;;  %v4010_v62 = vrot.slane %v3766_v20, 2  ;;  %v4012_v63 = vrot.slane %v3767_v45, 1 }
 0x10a   : > { %v5504_v0 = vsel %vm855_vm7, %v5503_v44, %v5502_v60  ;;  %v3774_v2 = vld [vmem:[%s14045_s30 + $0x272] sm:$0x1]  ;;  %v4003_v3 = vsel %vm840_vm2, %v4002_v57, %v4001_v54  ;;  %v4014_v4 = vrot.slane %v3769_v50, 7  ;;  %v4016_v5 = vrot.slane %v3770_v52, 6  ;;  %v5266_v6 = vld [vmem:[%s14045_s30 + $0x20b] sm:$0x1] }
 0x10b   : > { %v13405_v7 = vpack.c.bf16 %v5504_v0, %v5490_v46  ;;  %v3775_v8 = vld [vmem:[%s14045_s30 + $0x27a] sm:$0x1]  ;;  %v4005_v51 = vsel %vm843_vm3, %v4004_v58, %v4003_v3  ;;  %v4018_v9 = vrot.slane %v3771_v53, 5  ;;  %v4020_v10 = vrot.slane %v3772_v56, 4  ;;  %v5265_v11 = vld [vmem:[%s14045_s30 + $0x203] sm:$0x1] }
 0x10c   : > { %v4007_v12 = vsel %vm846_vm4, %v4006_v59, %v4005_v51  ;;  %v4015_v13 = vsel %vm837_vm1, %v4014_v4, %v3768_v48  ;;  %v4022_v15 = vrot.slane %v3773_v49, 3  ;;  %v5267_v16 = vld [vmem:[%s14045_s30 + $0x213] sm:$0x1]  ;;  %v5268_v17 = vld [vmem:[%s14045_s30 + $0x21b] sm:$0x1]  ;;  %v4024_v19 = vrot.slane %v3774_v2, 2 }
 0x10d   : > { %13406 = vmatprep.subr.bf16.mxu1 %v13405_v7  ;;  %v4009_v18 = vsel %vm849_vm5, %v4008_v61, %v4007_v12  ;;  %v4017_v1 = vsel %vm840_vm2, %v4016_v5, %v4015_v13  ;;  %v5269_v21 = vld [vmem:[%s14045_s30 + $0x223] sm:$0x1]  ;;  %v5270_v22 = vld [vmem:[%s14045_s30 + $0x22b] sm:$0x1]  ;;  %v5505_v23 = vrot.slane %v5266_v6, 7  ;;  %v4026_v26 = vrot.slane %v3775_v8, 1 }
 0x10e   : > { %13408 = vmatpush3.bf16.msra.mxu1 %v13405_v7  ;;  %v4011_v24 = vsel %vm852_vm6, %v4010_v62, %v4009_v18  ;;  %v4019_v25 = vsel %vm843_vm3, %v4018_v9, %v4017_v1  ;;  %v5271_v27 = vld [vmem:[%s14045_s30 + $0x233] sm:$0x1]  ;;  %v5272_v28 = vld [vmem:[%s14045_s30 + $0x23b] sm:$0x1]  ;;  %v5273_v31 = vld [vmem:[%s14045_s30 + $0x243] sm:$0x1] }
 0x10f   : > { %v4013_v29 = vsel %vm855_vm7, %v4012_v63, %v4011_v24  ;;  %v4021_v30 = vsel %vm846_vm4, %v4020_v10, %v4019_v25  ;;  %v5274_v32 = vld [vmem:[%s14045_s30 + $0x24b] sm:$0x1]  ;;  %v5275_v33 = vld [vmem:[%s14045_s30 + $0x253] sm:$0x1]  ;;  %v5276_v34 = vld [vmem:[%s14045_s30 + $0x25b] sm:$0x1]  ;;  %v5506_v14 = vsel %vm837_vm1, %v5505_v23, %v5265_v11 }
 0x110   : > { %v4023_v35 = vsel %vm849_vm5, %v4022_v15, %v4021_v30  ;;  %v5277_v36 = vld [vmem:[%s14045_s30 + $0x263] sm:$0x1]  ;;  %v5507_v37 = vrot.slane %v5267_v16, 6  ;;  %v5509_v38 = vrot.slane %v5268_v17, 5  ;;  %v5511_v39 = vrot.slane %v5269_v21, 4 }
 0x111   : > { %v4025_v40 = vsel %vm852_vm6, %v4024_v19, %v4023_v35  ;;  %v5278_v41 = vld [vmem:[%s14045_s30 + $0x26b] sm:$0x1]  ;;  %v5513_v42 = vrot.slane %v5270_v22, 3  ;;  %v5515_v43 = vrot.slane %v5271_v27, 2  ;;  %v5517_v44 = vrot.slane %v5272_v28, 1 }
 0x112   : > { %v4027_v20 = vsel %vm855_vm7, %v4026_v26, %v4025_v40  ;;  %v5279_v45 = vld [vmem:[%s14045_s30 + $0x273] sm:$0x1]  ;;  %v5508_v46 = vsel %vm840_vm2, %v5507_v37, %v5506_v14  ;;  %v5519_v47 = vrot.slane %v5274_v32, 7  ;;  %v5521_v48 = vrot.slane %v5275_v33, 6  ;;  %v3777_v50 = vld [vmem:[%s14045_s30 + $0x28a] sm:$0x1] }
 0x113   : > { %v13385_v52 = vpack.c.bf16 %v4027_v20, %v4013_v29  ;;  %v5280_v53 = vld [vmem:[%s14045_s30 + $0x27b] sm:$0x1]  ;;  %v5510_v54 = vsel %vm843_vm3, %v5509_v38, %v5508_v46  ;;  %v5523_v55 = vrot.slane %v5276_v34, 5  ;;  %v5525_v56 = vrot.slane %v5277_v36, 4  ;;  %v3776_v57 = vld [vmem:[%s14045_s30 + $0x282] sm:$0x1] }
 0x114   : > { %v5512_v58 = vsel %vm846_vm4, %v5511_v39, %v5510_v54  ;;  %v5520_v59 = vsel %vm837_vm1, %v5519_v47, %v5273_v31  ;;  %v5527_v60 = vrot.slane %v5278_v41, 3  ;;  %v3778_v49 = vld [vmem:[%s14045_s30 + $0x292] sm:$0x1]  ;;  %v3779_v61 = vld [vmem:[%s14045_s30 + $0x29a] sm:$0x1]  ;;  %v5529_v0 = vrot.slane %v5279_v45, 2 }
 0x115   : > { %13386 = vmatprep.subr.bf16.mxu0 %v13385_v52  ;;  %v5514_v62 = vsel %vm849_vm5, %v5513_v42, %v5512_v58  ;;  %v5522_v63 = vsel %vm840_vm2, %v5521_v48, %v5520_v59  ;;  %v3780_v2 = vld [vmem:[%s14045_s30 + $0x2a2] sm:$0x1]  ;;  %v3781_v3 = vld [vmem:[%s14045_s30 + $0x2aa] sm:$0x1]  ;;  %v4028_v4 = vrot.slane %v3777_v50, 7  ;;  %v5531_v7 = vrot.slane %v5280_v53, 1 }
 0x116   : > { %v5516_v5 = vsel %vm852_vm6, %v5515_v43, %v5514_v62  ;;  %v5524_v6 = vsel %vm843_vm3, %v5523_v55, %v5522_v63  ;;  %13388 = vmatpush3.bf16.msra.mxu0 %v13385_v52  ;;  %v3782_v8 = vld [vmem:[%s14045_s30 + $0x2b2] sm:$0x1]  ;;  %v3783_v51 = vld [vmem:[%s14045_s30 + $0x2ba] sm:$0x1]  ;;  %v3784_v11 = vld [vmem:[%s14045_s30 + $0x2c2] sm:$0x1] }
 0x117   : > { %v5518_v9 = vsel %vm855_vm7, %v5517_v44, %v5516_v5  ;;  %v5526_v10 = vsel %vm846_vm4, %v5525_v56, %v5524_v6  ;;  %v3785_v12 = vld [vmem:[%s14045_s30 + $0x2ca] sm:$0x1]  ;;  %v3786_v13 = vld [vmem:[%s14045_s30 + $0x2d2] sm:$0x1]  ;;  %v3787_v15 = vld [vmem:[%s14045_s30 + $0x2da] sm:$0x1]  ;;  %v4029_v16 = vsel %vm837_vm1, %v4028_v4, %v3776_v57 }
 0x118   : > { %v5528_v17 = vsel %vm849_vm5, %v5527_v60, %v5526_v10  ;;  %v3788_v18 = vld [vmem:[%s14045_s30 + $0x2e2] sm:$0x1]  ;;  %v4030_v1 = vrot.slane %v3778_v49, 6  ;;  %v4032_v19 = vrot.slane %v3779_v61, 5  ;;  %v4034_v21 = vrot.slane %v3780_v2, 4 }
 0x119   : > { %v5530_v22 = vsel %vm852_vm6, %v5529_v0, %v5528_v17  ;;  %v3789_v23 = vld [vmem:[%s14045_s30 + $0x2ea] sm:$0x1]  ;;  %v4036_v24 = vrot.slane %v3781_v3, 3  ;;  %v4038_v25 = vrot.slane %v3782_v8, 2  ;;  %v4040_v26 = vrot.slane %v3783_v51, 1 }
 0x11a   : > { %v5532_v27 = vsel %vm855_vm7, %v5531_v7, %v5530_v22  ;;  %v3790_v28 = vld [vmem:[%s14045_s30 + $0x2f2] sm:$0x1]  ;;  %v4031_v29 = vsel %vm840_vm2, %v4030_v1, %v4029_v16  ;;  %v4042_v30 = vrot.slane %v3785_v12, 7  ;;  %v4044_v31 = vrot.slane %v3786_v13, 6  ;;  %v5282_v32 = vld [vmem:[%s14045_s30 + $0x28b] sm:$0x1] }
 0x11b   : > { %v13409_v33 = vpack.c.bf16 %v5532_v27, %v5518_v9  ;;  %v3791_v34 = vld [vmem:[%s14045_s30 + $0x2fa] sm:$0x1]  ;;  %v4033_v14 = vsel %vm843_vm3, %v4032_v19, %v4031_v29  ;;  %v4046_v35 = vrot.slane %v3787_v15, 5  ;;  %v4048_v36 = vrot.slane %v3788_v18, 4  ;;  %v5281_v37 = vld [vmem:[%s14045_s30 + $0x283] sm:$0x1] }
 0x11c   : > { %v4035_v38 = vsel %vm846_vm4, %v4034_v21, %v4033_v14  ;;  %v4043_v39 = vsel %vm837_vm1, %v4042_v30, %v3784_v11  ;;  %v4050_v40 = vrot.slane %v3789_v23, 3  ;;  %v5283_v41 = vld [vmem:[%s14045_s30 + $0x293] sm:$0x1]  ;;  %v5284_v42 = vld [vmem:[%s14045_s30 + $0x29b] sm:$0x1]  ;;  %v4052_v20 = vrot.slane %v3790_v28, 2 }
 0x11d   : > { %13410 = vmatprep.subr.bf16.mxu1 %v13409_v33  ;;  %v4037_v43 = vsel %vm849_vm5, %v4036_v24, %v4035_v38  ;;  %v4045_v44 = vsel %vm840_vm2, %v4044_v31, %v4043_v39  ;;  %v5285_v45 = vld [vmem:[%s14045_s30 + $0x2a3] sm:$0x1]  ;;  %v5286_v46 = vld [vmem:[%s14045_s30 + $0x2ab] sm:$0x1]  ;;  %v5533_v47 = vrot.slane %v5282_v32, 7  ;;  %v4054_v52 = vrot.slane %v3791_v34, 1 }
 0x11e   : > { %13412 = vmatpush3.bf16.msra.mxu1 %v13409_v33  ;;  %v4039_v48 = vsel %vm852_vm6, %v4038_v25, %v4037_v43  ;;  %v4047_v50 = vsel %vm843_vm3, %v4046_v35, %v4045_v44  ;;  %v5287_v53 = vld [vmem:[%s14045_s30 + $0x2b3] sm:$0x1]  ;;  %v5288_v54 = vld [vmem:[%s14045_s30 + $0x2bb] sm:$0x1]  ;;  %v5289_v57 = vld [vmem:[%s14045_s30 + $0x2c3] sm:$0x1] }
 0x11f   : > { %v4041_v55 = vsel %vm855_vm7, %v4040_v26, %v4039_v48  ;;  %v4049_v56 = vsel %vm846_vm4, %v4048_v36, %v4047_v50  ;;  %v5290_v58 = vld [vmem:[%s14045_s30 + $0x2cb] sm:$0x1]  ;;  %v5291_v59 = vld [vmem:[%s14045_s30 + $0x2d3] sm:$0x1]  ;;  %v5292_v60 = vld [vmem:[%s14045_s30 + $0x2db] sm:$0x1]  ;;  %v5534_v49 = vsel %vm837_vm1, %v5533_v47, %v5281_v37 }
 0x120   : > { %v4051_v61 = vsel %vm849_vm5, %v4050_v40, %v4049_v56  ;;  %v5293_v62 = vld [vmem:[%s14045_s30 + $0x2e3] sm:$0x1]  ;;  %v5535_v63 = vrot.slane %v5283_v41, 6  ;;  %v5537_v0 = vrot.slane %v5284_v42, 5  ;;  %v5539_v2 = vrot.slane %v5285_v45, 4  ;;  %v13624_v47 = vld [vmem:[%s21053_s1 + $0x8] sm:$0xff] }
 0x121   : > { %v4053_v3 = vsel %vm852_vm6, %v4052_v20, %v4051_v61  ;;  %v5294_v4 = vld [vmem:[%s14045_s30 + $0x2eb] sm:$0x1]  ;;  %v5541_v5 = vrot.slane %v5286_v46, 3  ;;  %v5543_v6 = vrot.slane %v5287_v53, 2  ;;  %v5545_v7 = vrot.slane %v5288_v54, 1 }
 0x122   : > { %v4055_v8 = vsel %vm855_vm7, %v4054_v52, %v4053_v3  ;;  %v5295_v51 = vld [vmem:[%s14045_s30 + $0x2f3] sm:$0x1]  ;;  %v5536_v9 = vsel %vm840_vm2, %v5535_v63, %v5534_v49  ;;  %v5547_v10 = vrot.slane %v5290_v58, 7  ;;  %v5549_v11 = vrot.slane %v5291_v59, 6  ;;  %v6707_v12 = vld [vmem:[%s14045_s30 + $0xc] sm:$0x1] }
 0x123   : > { %v13389_v13 = vpack.c.bf16 %v4055_v8, %v4041_v55  ;;  %v5296_v15 = vld [vmem:[%s14045_s30 + $0x2fb] sm:$0x1]  ;;  %v5538_v16 = vsel %vm843_vm3, %v5537_v0, %v5536_v9  ;;  %v5551_v17 = vrot.slane %v5292_v60, 5  ;;  %v5553_v18 = vrot.slane %v5293_v62, 4  ;;  %v6706_v1 = vld [vmem:[%s14045_s30 + $0x4] sm:$0x1] }
 0x124   : > { %v5540_v19 = vsel %vm846_vm4, %v5539_v2, %v5538_v16  ;;  %v5548_v21 = vsel %vm837_vm1, %v5547_v10, %v5289_v57  ;;  %v5555_v22 = vrot.slane %v5294_v4, 3  ;;  %v6708_v23 = vld [vmem:[%s14045_s30 + $0x14] sm:$0x1]  ;;  %v6709_v24 = vld [vmem:[%s14045_s30 + $0x1c] sm:$0x1]  ;;  %v5557_v27 = vrot.slane %v5295_v51, 2 }
 0x125   : > { %13390 = vmatprep.subr.bf16.mxu0 %v13389_v13  ;;  %v5542_v25 = vsel %vm849_vm5, %v5541_v5, %v5540_v19  ;;  %v5550_v26 = vsel %vm840_vm2, %v5549_v11, %v5548_v21  ;;  %v6710_v28 = vld [vmem:[%s14045_s30 + $0x24] sm:$0x1]  ;;  %v6711_v29 = vld [vmem:[%s14045_s30 + $0x2c] sm:$0x1]  ;;  %v6898_v30 = vrot.slane %v6707_v12, 7  ;;  %v5559_v33 = vrot.slane %v5296_v15, 1 }
 0x126   : > { %v5544_v31 = vsel %vm852_vm6, %v5543_v6, %v5542_v25  ;;  %v5552_v32 = vsel %vm843_vm3, %v5551_v17, %v5550_v26  ;;  %13392 = vmatpush3.bf16.msra.mxu0 %v13389_v13  ;;  %v6712_v34 = vld [vmem:[%s14045_s30 + $0x34] sm:$0x1]  ;;  %v6713_v14 = vld [vmem:[%s14045_s30 + $0x3c] sm:$0x1]  ;;  %v6714_v37 = vld [vmem:[%s14045_s30 + $0x44] sm:$0x1] }
 0x127   : > { %v5546_v35 = vsel %vm855_vm7, %v5545_v7, %v5544_v31  ;;  %v5554_v36 = vsel %vm846_vm4, %v5553_v18, %v5552_v32  ;;  %v6715_v38 = vld [vmem:[%s14045_s30 + $0x4c] sm:$0x1]  ;;  %v6716_v39 = vld [vmem:[%s14045_s30 + $0x54] sm:$0x1]  ;;  %v6717_v40 = vld [vmem:[%s14045_s30 + $0x5c] sm:$0x1]  ;;  %v6899_v41 = vsel %vm837_vm1, %v6898_v30, %v6706_v1 }
 0x128   : > { %v5556_v42 = vsel %vm849_vm5, %v5555_v22, %v5554_v36  ;;  %v6718_v43 = vld [vmem:[%s14045_s30 + $0x64] sm:$0x1]  ;;  %v6900_v44 = vrot.slane %v6708_v23, 6  ;;  %v6902_v20 = vrot.slane %v6709_v24, 5  ;;  %v6904_v45 = vrot.slane %v6710_v28, 4  ;;  %v13625_v60 = vld [vmem:[%s21053_s1 + $0x10] sm:$0xff] }
 0x129   : > { %v5558_v46 = vsel %vm852_vm6, %v5557_v27, %v5556_v42  ;;  %13148 = vmatmul.mubr.msk.f32.vlgmr.msra.gmra.mrb[6].mxu0 %vm1023_vm0, %v13624_v47  ;;  %v6719_v48 = vld [vmem:[%s14045_s30 + $0x6c] sm:$0x1]  ;;  %v6906_v50 = vrot.slane %v6711_v29, 3  ;;  %v6908_v52 = vrot.slane %v6712_v34, 2  ;;  %v6910_v53 = vrot.slane %v6713_v14, 1  ;;  %v13626_v13 = vld [vmem:[%s21053_s1 + $0x18] sm:$0xff] }
 0x12a   : > { %v5560_v54 = vsel %vm855_vm7, %v5559_v33, %v5558_v46  ;;  %v6720_v55 = vld [vmem:[%s14045_s30 + $0x74] sm:$0x1]  ;;  %v6901_v56 = vsel %vm840_vm2, %v6900_v44, %v6899_v41  ;;  %v6912_v57 = vrot.slane %v6715_v38, 7  ;;  %v6914_v58 = vrot.slane %v6716_v39, 6  ;;  %v8212_v59 = vld [vmem:[%s14045_s30 + $0xd] sm:$0x1]  ;;  %13150 = vmatprep.mubr.msk.f32.mxu0 %vm1023_vm0, %v13625_v60 }
 0x12b   : > { %v13413_v49 = vpack.c.bf16 %v5560_v54, %v5546_v35  ;;  %v6721_v61 = vld [vmem:[%s14045_s30 + $0x7c] sm:$0x1]  ;;  %v6903_v62 = vsel %vm843_vm3, %v6902_v20, %v6901_v56  ;;  %v6916_v63 = vrot.slane %v6717_v40, 5  ;;  %v6918_v0 = vrot.slane %v6718_v43, 4  ;;  %v8211_v2 = vld [vmem:[%s14045_s30 + $0x5] sm:$0x1] }
 0x12c   : > { %v6905_v3 = vsel %vm846_vm4, %v6904_v45, %v6903_v62  ;;  %v6913_v4 = vsel %vm837_vm1, %v6912_v57, %v6714_v37  ;;  %v6920_v5 = vrot.slane %v6719_v48, 3  ;;  %v8213_v6 = vld [vmem:[%s14045_s30 + $0x15] sm:$0x1]  ;;  %v8214_v7 = vld [vmem:[%s14045_s30 + $0x1d] sm:$0x1]  ;;  %v6922_v9 = vrot.slane %v6720_v55, 2 }
 0x12d   : > { %13414 = vmatprep.subr.bf16.mxu1 %v13413_v49  ;;  %v6907_v8 = vsel %vm849_vm5, %v6906_v50, %v6905_v3  ;;  %v6915_v51 = vsel %vm840_vm2, %v6914_v58, %v6913_v4  ;;  %v8215_v10 = vld [vmem:[%s14045_s30 + $0x25] sm:$0x1]  ;;  %v8216_v11 = vld [vmem:[%s14045_s30 + $0x2d] sm:$0x1]  ;;  %v8403_v12 = vrot.slane %v8212_v59, 7  ;;  %13151 = vmatmul.mubr.msk.f32.gmra.mrb[8].mxu0 %vm1023_vm0, %v13626_v13  ;;  %v6924_v17 = vrot.slane %v6721_v61, 1 }
 0x12e   : > { %13416 = vmatpush3.bf16.msra.mxu1 %v13413_v49  ;;  %v6909_v15 = vsel %vm852_vm6, %v6908_v52, %v6907_v8  ;;  %v6917_v16 = vsel %vm843_vm3, %v6916_v63, %v6915_v51  ;;  %v8217_v18 = vld [vmem:[%s14045_s30 + $0x35] sm:$0x1]  ;;  %v8218_v1 = vld [vmem:[%s14045_s30 + $0x3d] sm:$0x1]  ;;  %v13627_v19 = vld [vmem:[%s21053_s1 + $0x20] sm:$0xff]  ;;  %v8405_v30 = vrot.slane %v8213_v6, 6 }
 0x12f   : > { %13153 = vmatprep.mubr.msk.f32.mxu0 %vm1023_vm0, %v13627_v19  ;;  %v6911_v21 = vsel %vm855_vm7, %v6910_v53, %v6909_v15  ;;  %v6919_v22 = vsel %vm846_vm4, %v6918_v0, %v6917_v16  ;;  %v8219_v23 = vld [vmem:[%s14045_s30 + $0x45] sm:$0x1]  ;;  %v8220_v24 = vld [vmem:[%s14045_s30 + $0x4d] sm:$0x1]  ;;  %v8221_v25 = vld [vmem:[%s14045_s30 + $0x55] sm:$0x1]  ;;  %v8404_v27 = vsel %vm837_vm1, %v8403_v12, %v8211_v2 }
 0x130   : > { %v8222_v26 = vld [vmem:[%s14045_s30 + $0x5d] sm:$0x1]  ;;  %v6921_v28 = vsel %vm849_vm5, %v6920_v5, %v6919_v22  ;;  %v8223_v29 = vld [vmem:[%s14045_s30 + $0x65] sm:$0x1]  ;;  %v8407_v31 = vrot.slane %v8214_v7, 5  ;;  %v8409_v32 = vrot.slane %v8215_v10, 4  ;;  %v8406_v40 = vsel %vm840_vm2, %v8405_v30, %v8404_v27 }
 0x131   : > { %13181 = vmatmul.mubr.msk.f32.vlgmr.msra.gmra.mrb[6].mxu1 %vm1023_vm0, %v13624_v47  ;;  %v6923_v33 = vsel %vm852_vm6, %v6922_v9, %v6921_v28  ;;  %v8224_v34 = vld [vmem:[%s14045_s30 + $0x6d] sm:$0x1]  ;;  %v8411_v14 = vrot.slane %v8216_v11, 3  ;;  %v8413_v35 = vrot.slane %v8217_v18, 2  ;;  %v8415_v36 = vrot.slane %v8218_v1, 1  ;;  %v13629_v44 = vld [vmem:[%s21053_s1] sm:$0xff] }
 0x132   : > { %v13628_v37 = vld [vmem:[%s21053_s1 + $0x28] sm:$0xff]  ;;  %v6925_v38 = vsel %vm855_vm7, %v6924_v17, %v6923_v33  ;;  %v8225_v39 = vld [vmem:[%s14045_s30 + $0x75] sm:$0x1]  ;;  %v8417_v41 = vrot.slane %v8220_v24, 7  ;;  %v8419_v42 = vrot.slane %v8221_v25, 6  ;;  %13183 = vmatprep.mubr.msk.f32.mxu1 %vm1023_vm0, %v13625_v60  ;;  %v8408_v46 = vsel %vm843_vm3, %v8407_v31, %v8406_v40 }
 0x133   : > { %13154 = vmatmul.mubr.msk.f32.gmra.mrb[10].mxu0 %vm1023_vm0, %v13628_v37  ;;  %v6723_v43 = vld [vmem:[%s14045_s30 + $0x8c] sm:$0x1]  ;;  %v13417_v20 = vpack.c.bf16 %v6925_v38, %v6911_v21  ;;  %v8226_v45 = vld [vmem:[%s14045_s30 + $0x7d] sm:$0x1]  ;;  %v8421_v47 = vrot.slane %v8222_v26, 5  ;;  %v8423_v48 = vrot.slane %v8223_v29, 4  ;;  %v8410_v52 = vsel %vm846_vm4, %v8409_v32, %v8408_v46 }
 0x134   : > { %13213 = vmatprep.mubr.msk.f32.mxu0 %vm1023_vm0, %v13629_v44  ;;  %v6722_v50 = vld [vmem:[%s14045_s30 + $0x84] sm:$0x1]  ;;  %v8418_v53 = vsel %vm837_vm1, %v8417_v41, %v8219_v23  ;;  %v8425_v54 = vrot.slane %v8224_v34, 3  ;;  %v6724_v55 = vld [vmem:[%s14045_s30 + $0x94] sm:$0x1]  ;;  %v8412_v57 = vsel %vm849_vm5, %v8411_v14, %v8410_v52  ;;  %v8427_v59 = vrot.slane %v8225_v39, 2 }
 0x135   : > { %v6725_v56 = vld [vmem:[%s14045_s30 + $0x9c] sm:$0x1]  ;;  %13418 = vmatprep.subr.bf16.mxu0 %v13417_v20  ;;  %v8420_v58 = vsel %vm840_vm2, %v8419_v42, %v8418_v53  ;;  %13184 = vmatmul.mubr.msk.f32.gmra.mrb[8].mxu1 %vm1023_vm0, %v13626_v13  ;;  %v6726_v60 = vld [vmem:[%s14045_s30 + $0xa4] sm:$0x1]  ;;  %v6727_v49 = vld [vmem:[%s14045_s30 + $0xac] sm:$0x1]  ;;  %v8414_v62 = vsel %vm852_vm6, %v8413_v35, %v8412_v57 }
 0x136   : > { %v6926_v61 = vrot.slane %v6723_v43, 7  ;;  %v8422_v63 = vsel %vm843_vm3, %v8421_v47, %v8420_v58  ;;  %v8429_v0 = vrot.slane %v8226_v45, 1  ;;  %13420 = vmatpush3.bf16.msra.mxu0 %v13417_v20  ;;  %v6728_v2 = vld [vmem:[%s14045_s30 + $0xb4] sm:$0x1]  ;;  %v6729_v3 = vld [vmem:[%s14045_s30 + $0xbc] sm:$0x1]  ;;  %13186 = vmatprep.mubr.msk.f32.mxu1 %vm1023_vm0, %v13627_v19  ;;  %v8416_v4 = vsel %vm855_vm7, %v8415_v36, %v8414_v62 }
 0x137   : > { %v8424_v5 = vsel %vm846_vm4, %v8423_v48, %v8422_v63  ;;  %v6730_v6 = vld [vmem:[%s14045_s30 + $0xc4] sm:$0x1]  ;;  %v6731_v7 = vld [vmem:[%s14045_s30 + $0xcc] sm:$0x1]  ;;  %v6732_v8 = vld [vmem:[%s14045_s30 + $0xd4] sm:$0x1] }
 0x138   : > { %v6733_v51 = vld [vmem:[%s14045_s30 + $0xdc] sm:$0x1]  ;;  %v6927_v9 = vsel %vm837_vm1, %v6926_v61, %v6722_v50  ;;  %v8426_v10 = vsel %vm849_vm5, %v8425_v54, %v8424_v5  ;;  %v6734_v11 = vld [vmem:[%s14045_s30 + $0xe4] sm:$0x1]  ;;  %v6928_v12 = vrot.slane %v6724_v55, 6  ;;  %v6930_v13 = vrot.slane %v6725_v56, 5 }
 0x139   : > { %v6932_v15 = vrot.slane %v6726_v60, 4  ;;  %v8428_v16 = vsel %vm852_vm6, %v8427_v59, %v8426_v10  ;;  %v6735_v17 = vld [vmem:[%s14045_s30 + $0xec] sm:$0x1]  ;;  %v6934_v18 = vrot.slane %v6727_v49, 3  ;;  %v6936_v1 = vrot.slane %v6728_v2, 2  ;;  %13187 = vmatmul.mubr.msk.f32.gmra.mrb[10].mxu1 %vm1023_vm0, %v13628_v37 }
 0x13a   : > { %v6938_v19 = vrot.slane %v6729_v3, 1  ;;  %v8430_v21 = vsel %vm855_vm7, %v8429_v0, %v8428_v16  ;;  %v6736_v22 = vld [vmem:[%s14045_s30 + $0xf4] sm:$0x1]  ;;  %v6929_v23 = vsel %vm840_vm2, %v6928_v12, %v6927_v9  ;;  %v6940_v24 = vrot.slane %v6731_v7, 7  ;;  %v8228_v26 = vld [vmem:[%s14045_s30 + $0x8d] sm:$0x1]  ;;  %13246 = vmatprep.mubr.msk.f32.mxu1 %vm1023_vm0, %v13629_v44 }
 0x13b   : > { %v6942_v25 = vrot.slane %v6732_v8, 6  ;;  %v13441_v27 = vpack.c.bf16 %v8430_v21, %v8416_v4  ;;  %v6737_v28 = vld [vmem:[%s14045_s30 + $0xfc] sm:$0x1]  ;;  %v6931_v29 = vsel %vm843_vm3, %v6930_v13, %v6929_v23  ;;  %v6944_v30 = vrot.slane %v6733_v51, 5  ;;  %v8227_v32 = vld [vmem:[%s14045_s30 + $0x85] sm:$0x1] }
 0x13c   : > { %v6946_v31 = vrot.slane %v6734_v11, 4  ;;  %v6933_v33 = vsel %vm846_vm4, %v6932_v15, %v6931_v29  ;;  %v6941_v34 = vsel %vm837_vm1, %v6940_v24, %v6730_v6  ;;  %v6948_v14 = vrot.slane %v6735_v17, 3  ;;  %v8229_v35 = vld [vmem:[%s14045_s30 + $0x95] sm:$0x1]  ;;  %v8230_v36 = vld [vmem:[%s14045_s30 + $0x9d] sm:$0x1] }
 0x13d   : > { %13442 = vmatprep.subr.bf16.mxu1 %v13441_v27  ;;  %v6935_v37 = vsel %vm849_vm5, %v6934_v18, %v6933_v33  ;;  %v6943_v38 = vsel %vm840_vm2, %v6942_v25, %v6941_v34  ;;  %v6950_v39 = vrot.slane %v6736_v22, 2  ;;  %v8231_v40 = vld [vmem:[%s14045_s30 + $0xa5] sm:$0x1]  ;;  %v8232_v41 = vld [vmem:[%s14045_s30 + $0xad] sm:$0x1]  ;;  %v8431_v42 = vrot.slane %v8228_v26, 7 }
 0x13e   : > { %13444 = vmatpush3.bf16.msra.mxu1 %v13441_v27  ;;  %v6937_v43 = vsel %vm852_vm6, %v6936_v1, %v6935_v37  ;;  %v6945_v44 = vsel %vm843_vm3, %v6944_v30, %v6943_v38  ;;  %v6952_v20 = vrot.slane %v6737_v28, 1  ;;  %v8233_v45 = vld [vmem:[%s14045_s30 + $0xb5] sm:$0x1]  ;;  %v8234_v46 = vld [vmem:[%s14045_s30 + $0xbd] sm:$0x1]  ;;  %v8433_v58 = vrot.slane %v8229_v35, 6 }
 0x13f   : > { %v6939_v47 = vsel %vm855_vm7, %v6938_v19, %v6937_v43  ;;  %v6947_v48 = vsel %vm846_vm4, %v6946_v31, %v6945_v44  ;;  %v8235_v50 = vld [vmem:[%s14045_s30 + $0xc5] sm:$0x1]  ;;  %v8236_v52 = vld [vmem:[%s14045_s30 + $0xcd] sm:$0x1]  ;;  %v8237_v53 = vld [vmem:[%s14045_s30 + $0xd5] sm:$0x1]  ;;  %v8432_v55 = vsel %vm837_vm1, %v8431_v42, %v8227_v32 }
 0x140   : > { %v8238_v54 = vld [vmem:[%s14045_s30 + $0xdd] sm:$0x1]  ;;  %v6949_v56 = vsel %vm849_vm5, %v6948_v14, %v6947_v48  ;;  %v8239_v57 = vld [vmem:[%s14045_s30 + $0xe5] sm:$0x1]  ;;  %v8435_v59 = vrot.slane %v8230_v36, 5  ;;  %v8437_v60 = vrot.slane %v8231_v40, 4  ;;  %v8434_v4 = vsel %vm840_vm2, %v8433_v58, %v8432_v55 }
 0x141   : > { %v6951_v49 = vsel %vm852_vm6, %v6950_v39, %v6949_v56  ;;  %v8240_v61 = vld [vmem:[%s14045_s30 + $0xed] sm:$0x1]  ;;  %v8439_v62 = vrot.slane %v8232_v41, 3  ;;  %v8441_v63 = vrot.slane %v8233_v45, 2  ;;  %v8443_v0 = vrot.slane %v8234_v46, 1 }
 0x142   : > { %v6953_v2 = vsel %vm855_vm7, %v6952_v20, %v6951_v49  ;;  %v8241_v3 = vld [vmem:[%s14045_s30 + $0xf5] sm:$0x1]  ;;  %v8445_v5 = vrot.slane %v8236_v52, 7  ;;  %v8447_v6 = vrot.slane %v8237_v53, 6  ;;  %v6739_v7 = vld [vmem:[%s14045_s30 + $0x10c] sm:$0x1]  ;;  %v8436_v9 = vsel %vm843_vm3, %v8435_v59, %v8434_v4 }
 0x143   : > { %v13421_v8 = vpack.c.bf16 %v6953_v2, %v6939_v47  ;;  %v8242_v51 = vld [vmem:[%s14045_s30 + $0xfd] sm:$0x1]  ;;  %v8449_v10 = vrot.slane %v8238_v54, 5  ;;  %v8451_v11 = vrot.slane %v8239_v57, 4  ;;  %v6738_v12 = vld [vmem:[%s14045_s30 + $0x104] sm:$0x1]  ;;  %v8438_v13 = vsel %vm846_vm4, %v8437_v60, %v8436_v9 }
 0x144   : > { %v8446_v15 = vsel %vm837_vm1, %v8445_v5, %v8235_v50  ;;  %v8453_v16 = vrot.slane %v8240_v61, 3  ;;  %v6740_v17 = vld [vmem:[%s14045_s30 + $0x114] sm:$0x1]  ;;  %v6741_v18 = vld [vmem:[%s14045_s30 + $0x11c] sm:$0x1]  ;;  %v8440_v1 = vsel %vm849_vm5, %v8439_v62, %v8438_v13  ;;  %v8455_v21 = vrot.slane %v8241_v3, 2 }
 0x145   : > { %13422 = vmatprep.subr.bf16.mxu0 %v13421_v8  ;;  %v8448_v19 = vsel %vm840_vm2, %v8447_v6, %v8446_v15  ;;  %v6742_v22 = vld [vmem:[%s14045_s30 + $0x124] sm:$0x1]  ;;  %v6743_v23 = vld [vmem:[%s14045_s30 + $0x12c] sm:$0x1]  ;;  %v6954_v24 = vrot.slane %v6739_v7, 7  ;;  %v8442_v25 = vsel %vm852_vm6, %v8441_v63, %v8440_v1  ;;  %v8457_v27 = vrot.slane %v8242_v51, 1 }
 0x146   : > { %v8450_v26 = vsel %vm843_vm3, %v8449_v10, %v8448_v19  ;;  %13424 = vmatpush3.bf16.msra.mxu0 %v13421_v8  ;;  %v6744_v28 = vld [vmem:[%s14045_s30 + $0x134] sm:$0x1]  ;;  %v6745_v29 = vld [vmem:[%s14045_s30 + $0x13c] sm:$0x1]  ;;  %v8444_v30 = vsel %vm855_vm7, %v8443_v0, %v8442_v25  ;;  %v6746_v32 = vld [vmem:[%s14045_s30 + $0x144] sm:$0x1] }
 0x147   : > { %v8452_v31 = vsel %vm846_vm4, %v8451_v11, %v8450_v26  ;;  %v6747_v33 = vld [vmem:[%s14045_s30 + $0x14c] sm:$0x1]  ;;  %v6748_v34 = vld [vmem:[%s14045_s30 + $0x154] sm:$0x1]  ;;  %v6749_v14 = vld [vmem:[%s14045_s30 + $0x15c] sm:$0x1]  ;;  %v6955_v35 = vsel %vm837_vm1, %v6954_v24, %v6738_v12 }
 0x148   : > { %v8454_v36 = vsel %vm849_vm5, %v8453_v16, %v8452_v31  ;;  %v6750_v37 = vld [vmem:[%s14045_s30 + $0x164] sm:$0x1]  ;;  %v6956_v38 = vrot.slane %v6740_v17, 6  ;;  %v6958_v39 = vrot.slane %v6741_v18, 5  ;;  %v6960_v40 = vrot.slane %v6742_v22, 4 }
 0x149   : > { %v8456_v41 = vsel %vm852_vm6, %v8455_v21, %v8454_v36  ;;  %v6751_v42 = vld [vmem:[%s14045_s30 + $0x16c] sm:$0x1]  ;;  %v6962_v43 = vrot.slane %v6743_v23, 3  ;;  %v6964_v44 = vrot.slane %v6744_v28, 2  ;;  %v6966_v20 = vrot.slane %v6745_v29, 1 }
 0x14a   : > { %v8458_v45 = vsel %vm855_vm7, %v8457_v27, %v8456_v41  ;;  %v6752_v46 = vld [vmem:[%s14045_s30 + $0x174] sm:$0x1]  ;;  %v6957_v47 = vsel %vm840_vm2, %v6956_v38, %v6955_v35  ;;  %v6968_v48 = vrot.slane %v6747_v33, 7  ;;  %v6970_v50 = vrot.slane %v6748_v34, 6  ;;  %v8244_v52 = vld [vmem:[%s14045_s30 + $0x10d] sm:$0x1] }
 0x14b   : > { %v13445_v53 = vpack.c.bf16 %v8458_v45, %v8444_v30  ;;  %v6753_v54 = vld [vmem:[%s14045_s30 + $0x17c] sm:$0x1]  ;;  %v6959_v55 = vsel %vm843_vm3, %v6958_v39, %v6957_v47  ;;  %v6972_v56 = vrot.slane %v6749_v14, 5  ;;  %v6974_v57 = vrot.slane %v6750_v37, 4  ;;  %v8243_v58 = vld [vmem:[%s14045_s30 + $0x105] sm:$0x1] }
 0x14c   : > { %v6961_v59 = vsel %vm846_vm4, %v6960_v40, %v6959_v55  ;;  %v6969_v60 = vsel %vm837_vm1, %v6968_v48, %v6746_v32  ;;  %v6976_v49 = vrot.slane %v6751_v42, 3  ;;  %v8245_v61 = vld [vmem:[%s14045_s30 + $0x115] sm:$0x1]  ;;  %v8246_v62 = vld [vmem:[%s14045_s30 + $0x11d] sm:$0x1]  ;;  %v6978_v2 = vrot.slane %v6752_v46, 2 }
 0x14d   : > { %13446 = vmatprep.subr.bf16.mxu1 %v13445_v53  ;;  %v6963_v63 = vsel %vm849_vm5, %v6962_v43, %v6961_v59  ;;  %v6971_v0 = vsel %vm840_vm2, %v6970_v50, %v6969_v60  ;;  %v8247_v3 = vld [vmem:[%s14045_s30 + $0x125] sm:$0x1]  ;;  %v8248_v4 = vld [vmem:[%s14045_s30 + $0x12d] sm:$0x1]  ;;  %v8459_v5 = vrot.slane %v8244_v52, 7  ;;  %v6980_v8 = vrot.slane %v6753_v54, 1 }
 0x14e   : > { %13448 = vmatpush3.bf16.msra.mxu1 %v13445_v53  ;;  %v6965_v6 = vsel %vm852_vm6, %v6964_v44, %v6963_v63  ;;  %v6973_v7 = vsel %vm843_vm3, %v6972_v56, %v6971_v0  ;;  %v8249_v51 = vld [vmem:[%s14045_s30 + $0x135] sm:$0x1]  ;;  %v8250_v9 = vld [vmem:[%s14045_s30 + $0x13d] sm:$0x1]  ;;  %v8251_v12 = vld [vmem:[%s14045_s30 + $0x145] sm:$0x1] }
 0x14f   : > { %v6967_v10 = vsel %vm855_vm7, %v6966_v20, %v6965_v6  ;;  %v6975_v11 = vsel %vm846_vm4, %v6974_v57, %v6973_v7  ;;  %v8252_v13 = vld [vmem:[%s14045_s30 + $0x14d] sm:$0x1]  ;;  %v8253_v15 = vld [vmem:[%s14045_s30 + $0x155] sm:$0x1]  ;;  %v8254_v16 = vld [vmem:[%s14045_s30 + $0x15d] sm:$0x1]  ;;  %v8460_v17 = vsel %vm837_vm1, %v8459_v5, %v8243_v58 }
 0x150   : > { %v6977_v18 = vsel %vm849_vm5, %v6976_v49, %v6975_v11  ;;  %v8255_v1 = vld [vmem:[%s14045_s30 + $0x165] sm:$0x1]  ;;  %v8461_v19 = vrot.slane %v8245_v61, 6  ;;  %v8463_v21 = vrot.slane %v8246_v62, 5  ;;  %v8465_v22 = vrot.slane %v8247_v3, 4 }
 0x151   : > { %v6979_v23 = vsel %vm852_vm6, %v6978_v2, %v6977_v18  ;;  %v8256_v24 = vld [vmem:[%s14045_s30 + $0x16d] sm:$0x1]  ;;  %v8467_v25 = vrot.slane %v8248_v4, 3  ;;  %v8469_v26 = vrot.slane %v8249_v51, 2  ;;  %v8471_v27 = vrot.slane %v8250_v9, 1 }
 0x152   : > { %v6981_v28 = vsel %vm855_vm7, %v6980_v8, %v6979_v23  ;;  %v8257_v29 = vld [vmem:[%s14045_s30 + $0x175] sm:$0x1]  ;;  %v8462_v30 = vsel %vm840_vm2, %v8461_v19, %v8460_v17  ;;  %v8473_v31 = vrot.slane %v8252_v13, 7  ;;  %v8475_v32 = vrot.slane %v8253_v15, 6  ;;  %v6755_v33 = vld [vmem:[%s14045_s30 + $0x18c] sm:$0x1] }
 0x153   : > { %v13425_v34 = vpack.c.bf16 %v6981_v28, %v6967_v10  ;;  %v8258_v14 = vld [vmem:[%s14045_s30 + $0x17d] sm:$0x1]  ;;  %v8464_v35 = vsel %vm843_vm3, %v8463_v21, %v8462_v30  ;;  %v8477_v36 = vrot.slane %v8254_v16, 5  ;;  %v8479_v37 = vrot.slane %v8255_v1, 4  ;;  %v6754_v38 = vld [vmem:[%s14045_s30 + $0x184] sm:$0x1] }
 0x154   : > { %v8466_v39 = vsel %vm846_vm4, %v8465_v22, %v8464_v35  ;;  %v8474_v40 = vsel %vm837_vm1, %v8473_v31, %v8251_v12  ;;  %v8481_v41 = vrot.slane %v8256_v24, 3  ;;  %v6756_v42 = vld [vmem:[%s14045_s30 + $0x194] sm:$0x1]  ;;  %v6757_v43 = vld [vmem:[%s14045_s30 + $0x19c] sm:$0x1]  ;;  %v8483_v45 = vrot.slane %v8257_v29, 2 }
 0x155   : > { %13426 = vmatprep.subr.bf16.mxu0 %v13425_v34  ;;  %v8468_v44 = vsel %vm849_vm5, %v8467_v25, %v8466_v39  ;;  %v8476_v20 = vsel %vm840_vm2, %v8475_v32, %v8474_v40  ;;  %v6758_v46 = vld [vmem:[%s14045_s30 + $0x1a4] sm:$0x1]  ;;  %v6759_v47 = vld [vmem:[%s14045_s30 + $0x1ac] sm:$0x1]  ;;  %v6982_v48 = vrot.slane %v6755_v33, 7  ;;  %v8485_v53 = vrot.slane %v8258_v14, 1 }
 0x156   : > { %v8470_v50 = vsel %vm852_vm6, %v8469_v26, %v8468_v44  ;;  %v8478_v52 = vsel %vm843_vm3, %v8477_v36, %v8476_v20  ;;  %13428 = vmatpush3.bf16.msra.mxu0 %v13425_v34  ;;  %v6760_v54 = vld [vmem:[%s14045_s30 + $0x1b4] sm:$0x1]  ;;  %v6761_v55 = vld [vmem:[%s14045_s30 + $0x1bc] sm:$0x1]  ;;  %v6762_v58 = vld [vmem:[%s14045_s30 + $0x1c4] sm:$0x1] }
 0x157   : > { %v8472_v56 = vsel %vm855_vm7, %v8471_v27, %v8470_v50  ;;  %v8480_v57 = vsel %vm846_vm4, %v8479_v37, %v8478_v52  ;;  %v6763_v59 = vld [vmem:[%s14045_s30 + $0x1cc] sm:$0x1]  ;;  %v6764_v60 = vld [vmem:[%s14045_s30 + $0x1d4] sm:$0x1]  ;;  %v6765_v49 = vld [vmem:[%s14045_s30 + $0x1dc] sm:$0x1]  ;;  %v6983_v61 = vsel %vm837_vm1, %v6982_v48, %v6754_v38 }
 0x158   : > { %v8482_v62 = vsel %vm849_vm5, %v8481_v41, %v8480_v57  ;;  %v6766_v63 = vld [vmem:[%s14045_s30 + $0x1e4] sm:$0x1]  ;;  %v6984_v0 = vrot.slane %v6756_v42, 6  ;;  %v6986_v2 = vrot.slane %v6757_v43, 5  ;;  %v6988_v3 = vrot.slane %v6758_v46, 4 }
 0x159   : > { %v8484_v4 = vsel %vm852_vm6, %v8483_v45, %v8482_v62  ;;  %v6767_v5 = vld [vmem:[%s14045_s30 + $0x1ec] sm:$0x1]  ;;  %v6990_v6 = vrot.slane %v6759_v47, 3  ;;  %v6992_v7 = vrot.slane %v6760_v54, 2  ;;  %v6994_v8 = vrot.slane %v6761_v55, 1 }
 0x15a   : > { %v8486_v51 = vsel %vm855_vm7, %v8485_v53, %v8484_v4  ;;  %v6768_v9 = vld [vmem:[%s14045_s30 + $0x1f4] sm:$0x1]  ;;  %v6985_v10 = vsel %vm840_vm2, %v6984_v0, %v6983_v61  ;;  %v6996_v11 = vrot.slane %v6763_v59, 7  ;;  %v6998_v12 = vrot.slane %v6764_v60, 6  ;;  %v8260_v13 = vld [vmem:[%s14045_s30 + $0x18d] sm:$0x1] }
 0x15b   : > { %v13449_v15 = vpack.c.bf16 %v8486_v51, %v8472_v56  ;;  %v6769_v16 = vld [vmem:[%s14045_s30 + $0x1fc] sm:$0x1]  ;;  %v6987_v17 = vsel %vm843_vm3, %v6986_v2, %v6985_v10  ;;  %v7000_v18 = vrot.slane %v6765_v49, 5  ;;  %v7002_v1 = vrot.slane %v6766_v63, 4  ;;  %v8259_v19 = vld [vmem:[%s14045_s30 + $0x185] sm:$0x1] }
 0x15c   : > { %v6989_v21 = vsel %vm846_vm4, %v6988_v3, %v6987_v17  ;;  %v6997_v22 = vsel %vm837_vm1, %v6996_v11, %v6762_v58  ;;  %v7004_v23 = vrot.slane %v6767_v5, 3  ;;  %v8261_v24 = vld [vmem:[%s14045_s30 + $0x195] sm:$0x1]  ;;  %v8262_v25 = vld [vmem:[%s14045_s30 + $0x19d] sm:$0x1]  ;;  %v7006_v28 = vrot.slane %v6768_v9, 2 }
 0x15d   : > { %13450 = vmatprep.subr.bf16.mxu1 %v13449_v15  ;;  %v6991_v26 = vsel %vm849_vm5, %v6990_v6, %v6989_v21  ;;  %v6999_v27 = vsel %vm840_vm2, %v6998_v12, %v6997_v22  ;;  %v8263_v29 = vld [vmem:[%s14045_s30 + $0x1a5] sm:$0x1]  ;;  %v8264_v30 = vld [vmem:[%s14045_s30 + $0x1ad] sm:$0x1]  ;;  %v8487_v31 = vrot.slane %v8260_v13, 7  ;;  %v7008_v34 = vrot.slane %v6769_v16, 1 }
 0x15e   : > { %13452 = vmatpush3.bf16.msra.mxu1 %v13449_v15  ;;  %v6993_v32 = vsel %vm852_vm6, %v6992_v7, %v6991_v26  ;;  %v7001_v33 = vsel %vm843_vm3, %v7000_v18, %v6999_v27  ;;  %v8265_v14 = vld [vmem:[%s14045_s30 + $0x1b5] sm:$0x1]  ;;  %v8266_v35 = vld [vmem:[%s14045_s30 + $0x1bd] sm:$0x1]  ;;  %v8267_v38 = vld [vmem:[%s14045_s30 + $0x1c5] sm:$0x1] }
 0x15f   : > { %v6995_v36 = vsel %vm855_vm7, %v6994_v8, %v6993_v32  ;;  %v7003_v37 = vsel %vm846_vm4, %v7002_v1, %v7001_v33  ;;  %v8268_v39 = vld [vmem:[%s14045_s30 + $0x1cd] sm:$0x1]  ;;  %v8269_v40 = vld [vmem:[%s14045_s30 + $0x1d5] sm:$0x1]  ;;  %v8270_v41 = vld [vmem:[%s14045_s30 + $0x1dd] sm:$0x1]  ;;  %v8488_v42 = vsel %vm837_vm1, %v8487_v31, %v8259_v19 }
 0x160   : > { %v7005_v43 = vsel %vm849_vm5, %v7004_v23, %v7003_v37  ;;  %v8271_v44 = vld [vmem:[%s14045_s30 + $0x1e5] sm:$0x1]  ;;  %v8489_v20 = vrot.slane %v8261_v24, 6  ;;  %v8491_v45 = vrot.slane %v8262_v25, 5  ;;  %v8493_v46 = vrot.slane %v8263_v29, 4 }
 0x161   : > { %v7007_v47 = vsel %vm852_vm6, %v7006_v28, %v7005_v43  ;;  %v8272_v48 = vld [vmem:[%s14045_s30 + $0x1ed] sm:$0x1]  ;;  %v8495_v50 = vrot.slane %v8264_v30, 3  ;;  %v8497_v52 = vrot.slane %v8265_v14, 2  ;;  %v8499_v53 = vrot.slane %v8266_v35, 1 }
 0x162   : > { %v7009_v54 = vsel %vm855_vm7, %v7008_v34, %v7007_v47  ;;  %v8273_v55 = vld [vmem:[%s14045_s30 + $0x1f5] sm:$0x1]  ;;  %v8490_v56 = vsel %vm840_vm2, %v8489_v20, %v8488_v42  ;;  %v8501_v57 = vrot.slane %v8268_v39, 7  ;;  %v8503_v58 = vrot.slane %v8269_v40, 6  ;;  %v6771_v59 = vld [vmem:[%s14045_s30 + $0x20c] sm:$0x1] }
 0x163   : > { %v13429_v60 = vpack.c.bf16 %v7009_v54, %v6995_v36  ;;  %v8274_v49 = vld [vmem:[%s14045_s30 + $0x1fd] sm:$0x1]  ;;  %v8492_v61 = vsel %vm843_vm3, %v8491_v45, %v8490_v56  ;;  %v8505_v62 = vrot.slane %v8270_v41, 5  ;;  %v8507_v63 = vrot.slane %v8271_v44, 4  ;;  %v6770_v0 = vld [vmem:[%s14045_s30 + $0x204] sm:$0x1] }
 0x164   : > { %v8494_v2 = vsel %vm846_vm4, %v8493_v46, %v8492_v61  ;;  %v8502_v3 = vsel %vm837_vm1, %v8501_v57, %v8267_v38  ;;  %v8509_v4 = vrot.slane %v8272_v48, 3  ;;  %v6772_v5 = vld [vmem:[%s14045_s30 + $0x214] sm:$0x1]  ;;  %v6773_v6 = vld [vmem:[%s14045_s30 + $0x21c] sm:$0x1]  ;;  %v8511_v51 = vrot.slane %v8273_v55, 2 }
 0x165   : > { %13430 = vmatprep.subr.bf16.mxu0 %v13429_v60  ;;  %v8496_v7 = vsel %vm849_vm5, %v8495_v50, %v8494_v2  ;;  %v8504_v8 = vsel %vm840_vm2, %v8503_v58, %v8502_v3  ;;  %v6774_v9 = vld [vmem:[%s14045_s30 + $0x224] sm:$0x1]  ;;  %v6775_v10 = vld [vmem:[%s14045_s30 + $0x22c] sm:$0x1]  ;;  %v7010_v11 = vrot.slane %v6771_v59, 7  ;;  %v8513_v15 = vrot.slane %v8274_v49, 1 }
 0x166   : > { %v8498_v12 = vsel %vm852_vm6, %v8497_v52, %v8496_v7  ;;  %v8506_v13 = vsel %vm843_vm3, %v8505_v62, %v8504_v8  ;;  %13432 = vmatpush3.bf16.msra.mxu0 %v13429_v60  ;;  %v6776_v16 = vld [vmem:[%s14045_s30 + $0x234] sm:$0x1]  ;;  %v6777_v17 = vld [vmem:[%s14045_s30 + $0x23c] sm:$0x1]  ;;  %v6778_v19 = vld [vmem:[%s14045_s30 + $0x244] sm:$0x1] }
 0x167   : > { %v8500_v18 = vsel %vm855_vm7, %v8499_v53, %v8498_v12  ;;  %v8508_v1 = vsel %vm846_vm4, %v8507_v63, %v8506_v13  ;;  %v6779_v21 = vld [vmem:[%s14045_s30 + $0x24c] sm:$0x1]  ;;  %v6780_v22 = vld [vmem:[%s14045_s30 + $0x254] sm:$0x1]  ;;  %v6781_v23 = vld [vmem:[%s14045_s30 + $0x25c] sm:$0x1]  ;;  %v7011_v24 = vsel %vm837_vm1, %v7010_v11, %v6770_v0 }
 0x168   : > { %v8510_v25 = vsel %vm849_vm5, %v8509_v4, %v8508_v1  ;;  %v6782_v26 = vld [vmem:[%s14045_s30 + $0x264] sm:$0x1]  ;;  %v7012_v27 = vrot.slane %v6772_v5, 6  ;;  %v7014_v28 = vrot.slane %v6773_v6, 5  ;;  %v7016_v29 = vrot.slane %v6774_v9, 4 }
 0x169   : > { %v8512_v30 = vsel %vm852_vm6, %v8511_v51, %v8510_v25  ;;  %v6783_v31 = vld [vmem:[%s14045_s30 + $0x26c] sm:$0x1]  ;;  %v7018_v32 = vrot.slane %v6775_v10, 3  ;;  %v7020_v33 = vrot.slane %v6776_v16, 2  ;;  %v7022_v34 = vrot.slane %v6777_v17, 1 }
 0x16a   : > { %v8514_v14 = vsel %vm855_vm7, %v8513_v15, %v8512_v30  ;;  %v6784_v35 = vld [vmem:[%s14045_s30 + $0x274] sm:$0x1]  ;;  %v7013_v36 = vsel %vm840_vm2, %v7012_v27, %v7011_v24  ;;  %v7024_v37 = vrot.slane %v6779_v21, 7  ;;  %v7026_v38 = vrot.slane %v6780_v22, 6  ;;  %v8276_v39 = vld [vmem:[%s14045_s30 + $0x20d] sm:$0x1] }
 0x16b   : > { %v13453_v40 = vpack.c.bf16 %v8514_v14, %v8500_v18  ;;  %v6785_v41 = vld [vmem:[%s14045_s30 + $0x27c] sm:$0x1]  ;;  %v7015_v42 = vsel %vm843_vm3, %v7014_v28, %v7013_v36  ;;  %v7028_v43 = vrot.slane %v6781_v23, 5  ;;  %v7030_v44 = vrot.slane %v6782_v26, 4  ;;  %v8275_v20 = vld [vmem:[%s14045_s30 + $0x205] sm:$0x1] }
 0x16c   : > { %v7017_v45 = vsel %vm846_vm4, %v7016_v29, %v7015_v42  ;;  %v7025_v46 = vsel %vm837_vm1, %v7024_v37, %v6778_v19  ;;  %v7032_v47 = vrot.slane %v6783_v31, 3  ;;  %v8277_v48 = vld [vmem:[%s14045_s30 + $0x215] sm:$0x1]  ;;  %v8278_v50 = vld [vmem:[%s14045_s30 + $0x21d] sm:$0x1]  ;;  %v7034_v54 = vrot.slane %v6784_v35, 2 }
 0x16d   : > { %13454 = vmatprep.subr.bf16.mxu1 %v13453_v40  ;;  %v7019_v52 = vsel %vm849_vm5, %v7018_v32, %v7017_v45  ;;  %v7027_v53 = vsel %vm840_vm2, %v7026_v38, %v7025_v46  ;;  %v8279_v55 = vld [vmem:[%s14045_s30 + $0x225] sm:$0x1]  ;;  %v8280_v56 = vld [vmem:[%s14045_s30 + $0x22d] sm:$0x1]  ;;  %v8515_v57 = vrot.slane %v8276_v39, 7  ;;  %v7036_v60 = vrot.slane %v6785_v41, 1 }
 0x16e   : > { %13456 = vmatpush3.bf16.msra.mxu1 %v13453_v40  ;;  %v7021_v58 = vsel %vm852_vm6, %v7020_v33, %v7019_v52  ;;  %v7029_v59 = vsel %vm843_vm3, %v7028_v43, %v7027_v53  ;;  %v8281_v49 = vld [vmem:[%s14045_s30 + $0x235] sm:$0x1]  ;;  %v8282_v61 = vld [vmem:[%s14045_s30 + $0x23d] sm:$0x1]  ;;  %v8283_v0 = vld [vmem:[%s14045_s30 + $0x245] sm:$0x1] }
 0x16f   : > { %v7023_v62 = vsel %vm855_vm7, %v7022_v34, %v7021_v58  ;;  %v7031_v63 = vsel %vm846_vm4, %v7030_v44, %v7029_v59  ;;  %v8284_v2 = vld [vmem:[%s14045_s30 + $0x24d] sm:$0x1]  ;;  %v8285_v3 = vld [vmem:[%s14045_s30 + $0x255] sm:$0x1]  ;;  %v8286_v4 = vld [vmem:[%s14045_s30 + $0x25d] sm:$0x1]  ;;  %v8516_v5 = vsel %vm837_vm1, %v8515_v57, %v8275_v20 }
 0x170   : > { %v7033_v6 = vsel %vm849_vm5, %v7032_v47, %v7031_v63  ;;  %v8287_v7 = vld [vmem:[%s14045_s30 + $0x265] sm:$0x1]  ;;  %v8517_v8 = vrot.slane %v8277_v48, 6  ;;  %v8519_v51 = vrot.slane %v8278_v50, 5  ;;  %v8521_v9 = vrot.slane %v8279_v55, 4 }
 0x171   : > { %v7035_v10 = vsel %vm852_vm6, %v7034_v54, %v7033_v6  ;;  %v8288_v11 = vld [vmem:[%s14045_s30 + $0x26d] sm:$0x1]  ;;  %v8523_v12 = vrot.slane %v8280_v56, 3  ;;  %v8525_v13 = vrot.slane %v8281_v49, 2  ;;  %v8527_v15 = vrot.slane %v8282_v61, 1 }
 0x172   : > { %v7037_v16 = vsel %vm855_vm7, %v7036_v60, %v7035_v10  ;;  %v8289_v17 = vld [vmem:[%s14045_s30 + $0x275] sm:$0x1]  ;;  %v8518_v18 = vsel %vm840_vm2, %v8517_v8, %v8516_v5  ;;  %v8529_v1 = vrot.slane %v8284_v2, 7  ;;  %v8531_v19 = vrot.slane %v8285_v3, 6  ;;  %v6787_v21 = vld [vmem:[%s14045_s30 + $0x28c] sm:$0x1] }
 0x173   : > { %v13433_v22 = vpack.c.bf16 %v7037_v16, %v7023_v62  ;;  %v8290_v23 = vld [vmem:[%s14045_s30 + $0x27d] sm:$0x1]  ;;  %v8520_v24 = vsel %vm843_vm3, %v8519_v51, %v8518_v18  ;;  %v8533_v25 = vrot.slane %v8286_v4, 5  ;;  %v8535_v26 = vrot.slane %v8287_v7, 4  ;;  %v6786_v27 = vld [vmem:[%s14045_s30 + $0x284] sm:$0x1] }
 0x174   : > { %v8522_v28 = vsel %vm846_vm4, %v8521_v9, %v8520_v24  ;;  %v8530_v29 = vsel %vm837_vm1, %v8529_v1, %v8283_v0  ;;  %v8537_v30 = vrot.slane %v8288_v11, 3  ;;  %v6788_v31 = vld [vmem:[%s14045_s30 + $0x294] sm:$0x1]  ;;  %v6789_v32 = vld [vmem:[%s14045_s30 + $0x29c] sm:$0x1]  ;;  %v8539_v14 = vrot.slane %v8289_v17, 2 }
 0x175   : > { %13434 = vmatprep.subr.bf16.mxu0 %v13433_v22  ;;  %v8524_v33 = vsel %vm849_vm5, %v8523_v12, %v8522_v28  ;;  %v8532_v34 = vsel %vm840_vm2, %v8531_v19, %v8530_v29  ;;  %v6790_v35 = vld [vmem:[%s14045_s30 + $0x2a4] sm:$0x1]  ;;  %v6791_v36 = vld [vmem:[%s14045_s30 + $0x2ac] sm:$0x1]  ;;  %v7038_v37 = vrot.slane %v6787_v21, 7  ;;  %v8541_v40 = vrot.slane %v8290_v23, 1 }
 0x176   : > { %v8526_v38 = vsel %vm852_vm6, %v8525_v13, %v8524_v33  ;;  %v8534_v39 = vsel %vm843_vm3, %v8533_v25, %v8532_v34  ;;  %13436 = vmatpush3.bf16.msra.mxu0 %v13433_v22  ;;  %v6792_v41 = vld [vmem:[%s14045_s30 + $0x2b4] sm:$0x1]  ;;  %v6793_v42 = vld [vmem:[%s14045_s30 + $0x2bc] sm:$0x1]  ;;  %v6794_v20 = vld [vmem:[%s14045_s30 + $0x2c4] sm:$0x1] }
 0x177   : > { %v8528_v43 = vsel %vm855_vm7, %v8527_v15, %v8526_v38  ;;  %v8536_v44 = vsel %vm846_vm4, %v8535_v26, %v8534_v39  ;;  %v6795_v45 = vld [vmem:[%s14045_s30 + $0x2cc] sm:$0x1]  ;;  %v6796_v46 = vld [vmem:[%s14045_s30 + $0x2d4] sm:$0x1]  ;;  %v6797_v47 = vld [vmem:[%s14045_s30 + $0x2dc] sm:$0x1]  ;;  %v7039_v48 = vsel %vm837_vm1, %v7038_v37, %v6786_v27 }
 0x178   : > { %v8538_v50 = vsel %vm849_vm5, %v8537_v30, %v8536_v44  ;;  %v6798_v52 = vld [vmem:[%s14045_s30 + $0x2e4] sm:$0x1]  ;;  %v7040_v53 = vrot.slane %v6788_v31, 6  ;;  %v7042_v54 = vrot.slane %v6789_v32, 5  ;;  %v7044_v55 = vrot.slane %v6790_v35, 4 }
 0x179   : > { %v8540_v56 = vsel %vm852_vm6, %v8539_v14, %v8538_v50  ;;  %v6799_v57 = vld [vmem:[%s14045_s30 + $0x2ec] sm:$0x1]  ;;  %v7046_v58 = vrot.slane %v6791_v36, 3  ;;  %v7048_v59 = vrot.slane %v6792_v41, 2  ;;  %v7050_v60 = vrot.slane %v6793_v42, 1 }
 0x17a   : > { %v8542_v49 = vsel %vm855_vm7, %v8541_v40, %v8540_v56  ;;  %v6800_v61 = vld [vmem:[%s14045_s30 + $0x2f4] sm:$0x1]  ;;  %v7041_v62 = vsel %vm840_vm2, %v7040_v53, %v7039_v48  ;;  %v7052_v63 = vrot.slane %v6795_v45, 7  ;;  %v7054_v0 = vrot.slane %v6796_v46, 6  ;;  %v8292_v2 = vld [vmem:[%s14045_s30 + $0x28d] sm:$0x1] }
 0x17b   : > { %v13457_v3 = vpack.c.bf16 %v8542_v49, %v8528_v43  ;;  %v6801_v4 = vld [vmem:[%s14045_s30 + $0x2fc] sm:$0x1]  ;;  %v7043_v5 = vsel %vm843_vm3, %v7042_v54, %v7041_v62  ;;  %v7056_v6 = vrot.slane %v6797_v47, 5  ;;  %v7058_v7 = vrot.slane %v6798_v52, 4  ;;  %v8291_v8 = vld [vmem:[%s14045_s30 + $0x285] sm:$0x1] }
 0x17c   : > { %v7045_v51 = vsel %vm846_vm4, %v7044_v55, %v7043_v5  ;;  %v7053_v9 = vsel %vm837_vm1, %v7052_v63, %v6794_v20  ;;  %v7060_v10 = vrot.slane %v6799_v57, 3  ;;  %v8293_v11 = vld [vmem:[%s14045_s30 + $0x295] sm:$0x1]  ;;  %v8294_v12 = vld [vmem:[%s14045_s30 + $0x29d] sm:$0x1]  ;;  %v7062_v16 = vrot.slane %v6800_v61, 2 }
 0x17d   : > { %13458 = vmatprep.subr.bf16.mxu1 %v13457_v3  ;;  %v7047_v13 = vsel %vm849_vm5, %v7046_v58, %v7045_v51  ;;  %v7055_v15 = vsel %vm840_vm2, %v7054_v0, %v7053_v9  ;;  %v8295_v17 = vld [vmem:[%s14045_s30 + $0x2a5] sm:$0x1]  ;;  %v8296_v18 = vld [vmem:[%s14045_s30 + $0x2ad] sm:$0x1]  ;;  %v8543_v1 = vrot.slane %v8292_v2, 7  ;;  %v7064_v22 = vrot.slane %v6801_v4, 1 }
 0x17e   : > { %13460 = vmatpush3.bf16.msra.mxu1 %v13457_v3  ;;  %v7049_v19 = vsel %vm852_vm6, %v7048_v59, %v7047_v13  ;;  %v7057_v21 = vsel %vm843_vm3, %v7056_v6, %v7055_v15  ;;  %v8297_v23 = vld [vmem:[%s14045_s30 + $0x2b5] sm:$0x1]  ;;  %v8298_v24 = vld [vmem:[%s14045_s30 + $0x2bd] sm:$0x1]  ;;  %v8299_v27 = vld [vmem:[%s14045_s30 + $0x2c5] sm:$0x1] }
 0x17f   : > { %v7051_v25 = vsel %vm855_vm7, %v7050_v60, %v7049_v19  ;;  %v7059_v26 = vsel %vm846_vm4, %v7058_v7, %v7057_v21  ;;  %v8300_v28 = vld [vmem:[%s14045_s30 + $0x2cd] sm:$0x1]  ;;  %v8301_v29 = vld [vmem:[%s14045_s30 + $0x2d5] sm:$0x1]  ;;  %v8302_v30 = vld [vmem:[%s14045_s30 + $0x2dd] sm:$0x1]  ;;  %v8544_v31 = vsel %vm837_vm1, %v8543_v1, %v8291_v8 }
 0x180   : > { %v7061_v32 = vsel %vm849_vm5, %v7060_v10, %v7059_v26  ;;  %v8303_v33 = vld [vmem:[%s14045_s30 + $0x2e5] sm:$0x1]  ;;  %v8545_v34 = vrot.slane %v8293_v11, 6  ;;  %v8547_v14 = vrot.slane %v8294_v12, 5  ;;  %v8549_v35 = vrot.slane %v8295_v17, 4  ;;  %v13630_v1 = vld [vmem:[%s21053_s1 + $0x8] sm:$0xff] }
 0x181   : > { %v7063_v36 = vsel %vm852_vm6, %v7062_v16, %v7061_v32  ;;  %v8304_v37 = vld [vmem:[%s14045_s30 + $0x2ed] sm:$0x1]  ;;  %v8551_v38 = vrot.slane %v8296_v18, 3  ;;  %v8553_v39 = vrot.slane %v8297_v23, 2  ;;  %v8555_v40 = vrot.slane %v8298_v24, 1 }
 0x182   : > { %v7065_v41 = vsel %vm855_vm7, %v7064_v22, %v7063_v36  ;;  %v8305_v42 = vld [vmem:[%s14045_s30 + $0x2f5] sm:$0x1]  ;;  %v8546_v43 = vsel %vm840_vm2, %v8545_v34, %v8544_v31  ;;  %v8557_v44 = vrot.slane %v8300_v28, 7  ;;  %v8559_v20 = vrot.slane %v8301_v29, 6  ;;  %v9717_v45 = vld [vmem:[%s14045_s30 + $0xe] sm:$0x1] }
 0x183   : > { %v13437_v46 = vpack.c.bf16 %v7065_v41, %v7051_v25  ;;  %v8306_v47 = vld [vmem:[%s14045_s30 + $0x2fd] sm:$0x1]  ;;  %v8548_v48 = vsel %vm843_vm3, %v8547_v14, %v8546_v43  ;;  %v8561_v50 = vrot.slane %v8302_v30, 5  ;;  %v8563_v52 = vrot.slane %v8303_v33, 4  ;;  %v9716_v53 = vld [vmem:[%s14045_s30 + $0x6] sm:$0x1] }
 0x184   : > { %v8550_v54 = vsel %vm846_vm4, %v8549_v35, %v8548_v48  ;;  %v8558_v55 = vsel %vm837_vm1, %v8557_v44, %v8299_v27  ;;  %v8565_v56 = vrot.slane %v8304_v37, 3  ;;  %v9718_v57 = vld [vmem:[%s14045_s30 + $0x16] sm:$0x1]  ;;  %v9719_v58 = vld [vmem:[%s14045_s30 + $0x1e] sm:$0x1]  ;;  %v8567_v49 = vrot.slane %v8305_v42, 2 }
 0x185   : > { %13438 = vmatprep.subr.bf16.mxu0 %v13437_v46  ;;  %v8552_v59 = vsel %vm849_vm5, %v8551_v38, %v8550_v54  ;;  %v8560_v60 = vsel %vm840_vm2, %v8559_v20, %v8558_v55  ;;  %v9720_v61 = vld [vmem:[%s14045_s30 + $0x26] sm:$0x1]  ;;  %v9721_v62 = vld [vmem:[%s14045_s30 + $0x2e] sm:$0x1]  ;;  %v9908_v63 = vrot.slane %v9717_v45, 7  ;;  %v8569_v3 = vrot.slane %v8306_v47, 1 }
 0x186   : > { %v8554_v0 = vsel %vm852_vm6, %v8553_v39, %v8552_v59  ;;  %v8562_v2 = vsel %vm843_vm3, %v8561_v50, %v8560_v60  ;;  %13440 = vmatpush3.bf16.msra.mxu0 %v13437_v46  ;;  %v9722_v4 = vld [vmem:[%s14045_s30 + $0x36] sm:$0x1]  ;;  %v9723_v5 = vld [vmem:[%s14045_s30 + $0x3e] sm:$0x1]  ;;  %v9724_v8 = vld [vmem:[%s14045_s30 + $0x46] sm:$0x1] }
 0x187   : > { %v8556_v6 = vsel %vm855_vm7, %v8555_v40, %v8554_v0  ;;  %v8564_v7 = vsel %vm846_vm4, %v8563_v52, %v8562_v2  ;;  %v9725_v51 = vld [vmem:[%s14045_s30 + $0x4e] sm:$0x1]  ;;  %v9726_v9 = vld [vmem:[%s14045_s30 + $0x56] sm:$0x1]  ;;  %v9727_v10 = vld [vmem:[%s14045_s30 + $0x5e] sm:$0x1]  ;;  %v9909_v11 = vsel %vm837_vm1, %v9908_v63, %v9716_v53 }
 0x188   : > { %v8566_v12 = vsel %vm849_vm5, %v8565_v56, %v8564_v7  ;;  %v9728_v13 = vld [vmem:[%s14045_s30 + $0x66] sm:$0x1]  ;;  %v9910_v15 = vrot.slane %v9718_v57, 6  ;;  %v9912_v16 = vrot.slane %v9719_v58, 5  ;;  %v9914_v17 = vrot.slane %v9720_v61, 4  ;;  %v13631_v30 = vld [vmem:[%s21053_s1 + $0x10] sm:$0xff] }
 0x189   : > { %v8568_v18 = vsel %vm852_vm6, %v8567_v49, %v8566_v12  ;;  %13214 = vmatmul.mubr.msk.f32.vlgmr.msra.gmra.mrb[12].mxu0 %vm1023_vm0, %v13630_v1  ;;  %v9729_v19 = vld [vmem:[%s14045_s30 + $0x6e] sm:$0x1]  ;;  %v9916_v21 = vrot.slane %v9721_v62, 3  ;;  %v9918_v22 = vrot.slane %v9722_v4, 2  ;;  %v9920_v23 = vrot.slane %v9723_v5, 1  ;;  %v13632_v46 = vld [vmem:[%s21053_s1 + $0x18] sm:$0xff] }
 0x18a   : > { %v8570_v24 = vsel %vm855_vm7, %v8569_v3, %v8568_v18  ;;  %v9730_v25 = vld [vmem:[%s14045_s30 + $0x76] sm:$0x1]  ;;  %v9911_v26 = vsel %vm840_vm2, %v9910_v15, %v9909_v11  ;;  %v9922_v27 = vrot.slane %v9725_v51, 7  ;;  %v9924_v28 = vrot.slane %v9726_v9, 6  ;;  %v11222_v29 = vld [vmem:[%s14045_s30 + $0xf] sm:$0x1]  ;;  %13216 = vmatprep.mubr.msk.f32.mxu0 %vm1023_vm0, %v13631_v30 }
 0x18b   : > { %v13461_v31 = vpack.c.bf16 %v8570_v24, %v8556_v6  ;;  %v9731_v32 = vld [vmem:[%s14045_s30 + $0x7e] sm:$0x1]  ;;  %v9913_v33 = vsel %vm843_vm3, %v9912_v16, %v9911_v26  ;;  %v9926_v34 = vrot.slane %v9727_v10, 5  ;;  %v9928_v14 = vrot.slane %v9728_v13, 4  ;;  %v11221_v35 = vld [vmem:[%s14045_s30 + $0x7] sm:$0x1] }
 0x18c   : > { %v9915_v36 = vsel %vm846_vm4, %v9914_v17, %v9913_v33  ;;  %v9923_v37 = vsel %vm837_vm1, %v9922_v27, %v9724_v8  ;;  %v9930_v38 = vrot.slane %v9729_v19, 3  ;;  %v11223_v39 = vld [vmem:[%s14045_s30 + $0x17] sm:$0x1]  ;;  %v11224_v40 = vld [vmem:[%s14045_s30 + $0x1f] sm:$0x1]  ;;  %v9932_v43 = vrot.slane %v9730_v25, 2 }
 0x18d   : > { %13462 = vmatprep.subr.bf16.mxu1 %v13461_v31  ;;  %v9917_v41 = vsel %vm849_vm5, %v9916_v21, %v9915_v36  ;;  %v9925_v42 = vsel %vm840_vm2, %v9924_v28, %v9923_v37  ;;  %v11225_v44 = vld [vmem:[%s14045_s30 + $0x27] sm:$0x1]  ;;  %v11226_v20 = vld [vmem:[%s14045_s30 + $0x2f] sm:$0x1]  ;;  %v11413_v45 = vrot.slane %v11222_v29, 7  ;;  %13217 = vmatmul.mubr.msk.f32.gmra.mrb[14].mxu0 %vm1023_vm0, %v13632_v46  ;;  %v9934_v50 = vrot.slane %v9731_v32, 1 }
 0x18e   : > { %13464 = vmatpush3.bf16.msra.mxu1 %v13461_v31  ;;  %v9919_v47 = vsel %vm852_vm6, %v9918_v22, %v9917_v41  ;;  %v9927_v48 = vsel %vm843_vm3, %v9926_v34, %v9925_v42  ;;  %v11227_v52 = vld [vmem:[%s14045_s30 + $0x37] sm:$0x1]  ;;  %v11228_v53 = vld [vmem:[%s14045_s30 + $0x3f] sm:$0x1]  ;;  %v13633_v54 = vld [vmem:[%s21053_s1 + $0x20] sm:$0xff]  ;;  %v11415_v63 = vrot.slane %v11223_v39, 6 }
 0x18f   : > { %13219 = vmatprep.mubr.msk.f32.mxu0 %vm1023_vm0, %v13633_v54  ;;  %v9921_v55 = vsel %vm855_vm7, %v9920_v23, %v9919_v47  ;;  %v9929_v56 = vsel %vm846_vm4, %v9928_v14, %v9927_v48  ;;  %v11229_v57 = vld [vmem:[%s14045_s30 + $0x47] sm:$0x1]  ;;  %v11230_v58 = vld [vmem:[%s14045_s30 + $0x4f] sm:$0x1]  ;;  %v11231_v59 = vld [vmem:[%s14045_s30 + $0x57] sm:$0x1]  ;;  %v11414_v49 = vsel %vm837_vm1, %v11413_v45, %v11221_v35 }
 0x190   : > { %v11232_v60 = vld [vmem:[%s14045_s30 + $0x5f] sm:$0x1]  ;;  %v9931_v61 = vsel %vm849_vm5, %v9930_v38, %v9929_v56  ;;  %v11233_v62 = vld [vmem:[%s14045_s30 + $0x67] sm:$0x1]  ;;  %v11417_v0 = vrot.slane %v11224_v40, 5  ;;  %v11419_v2 = vrot.slane %v11225_v44, 4  ;;  %v11416_v10 = vsel %vm840_vm2, %v11415_v63, %v11414_v49 }
 0x191   : > { %13247 = vmatmul.mubr.msk.f32.vlgmr.msra.gmra.mrb[12].mxu1 %vm1023_vm0, %v13630_v1  ;;  %v9933_v3 = vsel %vm852_vm6, %v9932_v43, %v9931_v61  ;;  %v11234_v4 = vld [vmem:[%s14045_s30 + $0x6f] sm:$0x1]  ;;  %v11421_v5 = vrot.slane %v11226_v20, 3  ;;  %v11423_v6 = vrot.slane %v11227_v52, 2  ;;  %v11425_v7 = vrot.slane %v11228_v53, 1  ;;  %v13635_v15 = vld [vmem:[%s21053_s1] sm:$0xff] }
 0x192   : > { %v13634_v8 = vld [vmem:[%s21053_s1 + $0x28] sm:$0xff]  ;;  %v9935_v51 = vsel %vm855_vm7, %v9934_v50, %v9933_v3  ;;  %v11235_v9 = vld [vmem:[%s14045_s30 + $0x77] sm:$0x1]  ;;  %v11427_v11 = vrot.slane %v11230_v58, 7  ;;  %v11429_v12 = vrot.slane %v11231_v59, 6  ;;  %13249 = vmatprep.mubr.msk.f32.mxu1 %vm1023_vm0, %v13631_v30  ;;  %v11418_v18 = vsel %vm843_vm3, %v11417_v0, %v11416_v10 }
 0x193   : > { %13220 = vmatmul.mubr.msk.f32.gmra.mrb[16].mxu0 %vm1023_vm0, %v13634_v8  ;;  %v9733_v13 = vld [vmem:[%s14045_s30 + $0x8e] sm:$0x1]  ;;  %v13465_v16 = vpack.c.bf16 %v9935_v51, %v9921_v55  ;;  %v11236_v17 = vld [vmem:[%s14045_s30 + $0x7f] sm:$0x1]  ;;  %v11431_v1 = vrot.slane %v11232_v60, 5  ;;  %v11433_v19 = vrot.slane %v11233_v62, 4  ;;  %v11420_v22 = vsel %vm846_vm4, %v11419_v2, %v11418_v18 }
 0x194   : > { %13279 = vmatprep.mubr.msk.f32.mxu0 %vm1023_vm0, %v13635_v15  ;;  %v9732_v21 = vld [vmem:[%s14045_s30 + $0x86] sm:$0x1]  ;;  %v11428_v23 = vsel %vm837_vm1, %v11427_v11, %v11229_v57  ;;  %v11435_v24 = vrot.slane %v11234_v4, 3  ;;  %v9734_v25 = vld [vmem:[%s14045_s30 + $0x96] sm:$0x1]  ;;  %v11422_v27 = vsel %vm849_vm5, %v11421_v5, %v11420_v22  ;;  %v11437_v29 = vrot.slane %v11235_v9, 2 }
 0x195   : > { %v9735_v26 = vld [vmem:[%s14045_s30 + $0x9e] sm:$0x1]  ;;  %13466 = vmatprep.subr.bf16.mxu0 %v13465_v16  ;;  %v11430_v28 = vsel %vm840_vm2, %v11429_v12, %v11428_v23  ;;  %13250 = vmatmul.mubr.msk.f32.gmra.mrb[14].mxu1 %vm1023_vm0, %v13632_v46  ;;  %v9736_v30 = vld [vmem:[%s14045_s30 + $0xa6] sm:$0x1]  ;;  %v9737_v31 = vld [vmem:[%s14045_s30 + $0xae] sm:$0x1]  ;;  %v11424_v33 = vsel %vm852_vm6, %v11423_v6, %v11422_v27 }
 0x196   : > { %v9936_v32 = vrot.slane %v9733_v13, 7  ;;  %v11432_v34 = vsel %vm843_vm3, %v11431_v1, %v11430_v28  ;;  %v11439_v14 = vrot.slane %v11236_v17, 1  ;;  %13468 = vmatpush3.bf16.msra.mxu0 %v13465_v16  ;;  %v9738_v35 = vld [vmem:[%s14045_s30 + $0xb6] sm:$0x1]  ;;  %v9739_v36 = vld [vmem:[%s14045_s30 + $0xbe] sm:$0x1]  ;;  %13252 = vmatprep.mubr.msk.f32.mxu1 %vm1023_vm0, %v13633_v54  ;;  %v11426_v37 = vsel %vm855_vm7, %v11425_v7, %v11424_v33 }
 0x197   : > { %v11434_v38 = vsel %vm846_vm4, %v11433_v19, %v11432_v34  ;;  %v9740_v39 = vld [vmem:[%s14045_s30 + $0xc6] sm:$0x1]  ;;  %v9741_v40 = vld [vmem:[%s14045_s30 + $0xce] sm:$0x1]  ;;  %v9742_v41 = vld [vmem:[%s14045_s30 + $0xd6] sm:$0x1] }
 0x198   : > { %v9743_v42 = vld [vmem:[%s14045_s30 + $0xde] sm:$0x1]  ;;  %v9937_v43 = vsel %vm837_vm1, %v9936_v32, %v9732_v21  ;;  %v11436_v44 = vsel %vm849_vm5, %v11435_v24, %v11434_v38  ;;  %v9744_v20 = vld [vmem:[%s14045_s30 + $0xe6] sm:$0x1]  ;;  %v9938_v45 = vrot.slane %v9734_v25, 6  ;;  %v9940_v46 = vrot.slane %v9735_v26, 5 }
 0x199   : > { %v9942_v47 = vrot.slane %v9736_v30, 4  ;;  %v11438_v48 = vsel %vm852_vm6, %v11437_v29, %v11436_v44  ;;  %v9745_v50 = vld [vmem:[%s14045_s30 + $0xee] sm:$0x1]  ;;  %v9944_v52 = vrot.slane %v9737_v31, 3  ;;  %v9946_v53 = vrot.slane %v9738_v35, 2  ;;  %13253 = vmatmul.mubr.msk.f32.gmra.mrb[16].mxu1 %vm1023_vm0, %v13634_v8 }
 0x19a   : > { %v9948_v54 = vrot.slane %v9739_v36, 1  ;;  %v11440_v55 = vsel %vm855_vm7, %v11439_v14, %v11438_v48  ;;  %v9746_v56 = vld [vmem:[%s14045_s30 + $0xf6] sm:$0x1]  ;;  %v9939_v57 = vsel %vm840_vm2, %v9938_v45, %v9937_v43  ;;  %v9950_v58 = vrot.slane %v9741_v40, 7  ;;  %v11238_v60 = vld [vmem:[%s14045_s30 + $0x8f] sm:$0x1]  ;;  %13312 = vmatprep.mubr.msk.f32.mxu1 %vm1023_vm0, %v13635_v15 }
 0x19b   : > { %v9952_v59 = vrot.slane %v9742_v41, 6  ;;  %v13489_v49 = vpack.c.bf16 %v11440_v55, %v11426_v37  ;;  %v9747_v61 = vld [vmem:[%s14045_s30 + $0xfe] sm:$0x1]  ;;  %v9941_v62 = vsel %vm843_vm3, %v9940_v46, %v9939_v57  ;;  %v9954_v63 = vrot.slane %v9743_v42, 5  ;;  %v11237_v2 = vld [vmem:[%s14045_s30 + $0x87] sm:$0x1] }
 0x19c   : > { %v9956_v0 = vrot.slane %v9744_v20, 4  ;;  %v9943_v3 = vsel %vm846_vm4, %v9942_v47, %v9941_v62  ;;  %v9951_v4 = vsel %vm837_vm1, %v9950_v58, %v9740_v39  ;;  %v9958_v5 = vrot.slane %v9745_v50, 3  ;;  %v11239_v6 = vld [vmem:[%s14045_s30 + $0x97] sm:$0x1]  ;;  %v11240_v7 = vld [vmem:[%s14045_s30 + $0x9f] sm:$0x1] }
 0x19d   : > { %13490 = vmatprep.subr.bf16.mxu1 %v13489_v49  ;;  %v9945_v8 = vsel %vm849_vm5, %v9944_v52, %v9943_v3  ;;  %v9953_v51 = vsel %vm840_vm2, %v9952_v59, %v9951_v4  ;;  %v9960_v9 = vrot.slane %v9746_v56, 2  ;;  %v11241_v10 = vld [vmem:[%s14045_s30 + $0xa7] sm:$0x1]  ;;  %v11242_v11 = vld [vmem:[%s14045_s30 + $0xaf] sm:$0x1]  ;;  %v11441_v12 = vrot.slane %v11238_v60, 7 }
 0x19e   : > { %13492 = vmatpush3.bf16.msra.mxu1 %v13489_v49  ;;  %v9947_v13 = vsel %vm852_vm6, %v9946_v53, %v9945_v8  ;;  %v9955_v15 = vsel %vm843_vm3, %v9954_v63, %v9953_v51  ;;  %v9962_v16 = vrot.slane %v9747_v61, 1  ;;  %v11243_v17 = vld [vmem:[%s14045_s30 + $0xb7] sm:$0x1]  ;;  %v11244_v18 = vld [vmem:[%s14045_s30 + $0xbf] sm:$0x1]  ;;  %v11443_v28 = vrot.slane %v11239_v6, 6 }
 0x19f   : > { %v9949_v1 = vsel %vm855_vm7, %v9948_v54, %v9947_v13  ;;  %v9957_v19 = vsel %vm846_vm4, %v9956_v0, %v9955_v15  ;;  %v11245_v21 = vld [vmem:[%s14045_s30 + $0xc7] sm:$0x1]  ;;  %v11246_v22 = vld [vmem:[%s14045_s30 + $0xcf] sm:$0x1]  ;;  %v11247_v23 = vld [vmem:[%s14045_s30 + $0xd7] sm:$0x1]  ;;  %v11442_v25 = vsel %vm837_vm1, %v11441_v12, %v11237_v2 }
 0x1a0   : > { %v11248_v24 = vld [vmem:[%s14045_s30 + $0xdf] sm:$0x1]  ;;  %v9959_v26 = vsel %vm849_vm5, %v9958_v5, %v9957_v19  ;;  %v11249_v27 = vld [vmem:[%s14045_s30 + $0xe7] sm:$0x1]  ;;  %v11445_v29 = vrot.slane %v11240_v7, 5  ;;  %v11447_v30 = vrot.slane %v11241_v10, 4  ;;  %v11444_v37 = vsel %vm840_vm2, %v11443_v28, %v11442_v25 }
 0x1a1   : > { %v9961_v31 = vsel %vm852_vm6, %v9960_v9, %v9959_v26  ;;  %v11250_v32 = vld [vmem:[%s14045_s30 + $0xef] sm:$0x1]  ;;  %v11449_v33 = vrot.slane %v11242_v11, 3  ;;  %v11451_v34 = vrot.slane %v11243_v17, 2  ;;  %v11453_v14 = vrot.slane %v11244_v18, 1 }
 0x1a2   : > { %v9963_v35 = vsel %vm855_vm7, %v9962_v16, %v9961_v31  ;;  %v11251_v36 = vld [vmem:[%s14045_s30 + $0xf7] sm:$0x1]  ;;  %v11455_v38 = vrot.slane %v11246_v22, 7  ;;  %v11457_v39 = vrot.slane %v11247_v23, 6  ;;  %v9749_v40 = vld [vmem:[%s14045_s30 + $0x10e] sm:$0x1]  ;;  %v11446_v43 = vsel %vm843_vm3, %v11445_v29, %v11444_v37 }
 0x1a3   : > { %v13469_v41 = vpack.c.bf16 %v9963_v35, %v9949_v1  ;;  %v11252_v42 = vld [vmem:[%s14045_s30 + $0xff] sm:$0x1]  ;;  %v11459_v44 = vrot.slane %v11248_v24, 5  ;;  %v11461_v20 = vrot.slane %v11249_v27, 4  ;;  %v9748_v45 = vld [vmem:[%s14045_s30 + $0x106] sm:$0x1]  ;;  %v11448_v46 = vsel %vm846_vm4, %v11447_v30, %v11446_v43 }
 0x1a4   : > { %v11456_v47 = vsel %vm837_vm1, %v11455_v38, %v11245_v21  ;;  %v11463_v48 = vrot.slane %v11250_v32, 3  ;;  %v9750_v50 = vld [vmem:[%s14045_s30 + $0x116] sm:$0x1]  ;;  %v9751_v52 = vld [vmem:[%s14045_s30 + $0x11e] sm:$0x1]  ;;  %v11450_v53 = vsel %vm849_vm5, %v11449_v33, %v11448_v46  ;;  %v11465_v55 = vrot.slane %v11251_v36, 2 }
 0x1a5   : > { %13470 = vmatprep.subr.bf16.mxu0 %v13469_v41  ;;  %v11458_v54 = vsel %vm840_vm2, %v11457_v39, %v11456_v47  ;;  %v9752_v56 = vld [vmem:[%s14045_s30 + $0x126] sm:$0x1]  ;;  %v9753_v57 = vld [vmem:[%s14045_s30 + $0x12e] sm:$0x1]  ;;  %v9964_v58 = vrot.slane %v9749_v40, 7  ;;  %v11452_v59 = vsel %vm852_vm6, %v11451_v34, %v11450_v53  ;;  %v11467_v49 = vrot.slane %v11252_v42, 1 }
 0x1a6   : > { %v11460_v60 = vsel %vm843_vm3, %v11459_v44, %v11458_v54  ;;  %13472 = vmatpush3.bf16.msra.mxu0 %v13469_v41  ;;  %v9754_v61 = vld [vmem:[%s14045_s30 + $0x136] sm:$0x1]  ;;  %v9755_v62 = vld [vmem:[%s14045_s30 + $0x13e] sm:$0x1]  ;;  %v11454_v63 = vsel %vm855_vm7, %v11453_v14, %v11452_v59  ;;  %v9756_v2 = vld [vmem:[%s14045_s30 + $0x146] sm:$0x1] }
 0x1a7   : > { %v11462_v0 = vsel %vm846_vm4, %v11461_v20, %v11460_v60  ;;  %v9757_v3 = vld [vmem:[%s14045_s30 + $0x14e] sm:$0x1]  ;;  %v9758_v4 = vld [vmem:[%s14045_s30 + $0x156] sm:$0x1]  ;;  %v9759_v5 = vld [vmem:[%s14045_s30 + $0x15e] sm:$0x1]  ;;  %v9965_v6 = vsel %vm837_vm1, %v9964_v58, %v9748_v45 }
 0x1a8   : > { %v11464_v7 = vsel %vm849_vm5, %v11463_v48, %v11462_v0  ;;  %v9760_v8 = vld [vmem:[%s14045_s30 + $0x166] sm:$0x1]  ;;  %v9966_v51 = vrot.slane %v9750_v50, 6  ;;  %v9968_v9 = vrot.slane %v9751_v52, 5  ;;  %v9970_v10 = vrot.slane %v9752_v56, 4 }
 0x1a9   : > { %v11466_v11 = vsel %vm852_vm6, %v11465_v55, %v11464_v7  ;;  %v9761_v12 = vld [vmem:[%s14045_s30 + $0x16e] sm:$0x1]  ;;  %v9972_v13 = vrot.slane %v9753_v57, 3  ;;  %v9974_v15 = vrot.slane %v9754_v61, 2  ;;  %v9976_v16 = vrot.slane %v9755_v62, 1 }
 0x1aa   : > { %v11468_v17 = vsel %vm855_vm7, %v11467_v49, %v11466_v11  ;;  %v9762_v18 = vld [vmem:[%s14045_s30 + $0x176] sm:$0x1]  ;;  %v9967_v1 = vsel %vm840_vm2, %v9966_v51, %v9965_v6  ;;  %v9978_v19 = vrot.slane %v9757_v3, 7  ;;  %v9980_v21 = vrot.slane %v9758_v4, 6  ;;  %v11254_v22 = vld [vmem:[%s14045_s30 + $0x10f] sm:$0x1] }
 0x1ab   : > { %v13493_v23 = vpack.c.bf16 %v11468_v17, %v11454_v63  ;;  %v9763_v24 = vld [vmem:[%s14045_s30 + $0x17e] sm:$0x1]  ;;  %v9969_v25 = vsel %vm843_vm3, %v9968_v9, %v9967_v1  ;;  %v9982_v26 = vrot.slane %v9759_v5, 5  ;;  %v9984_v27 = vrot.slane %v9760_v8, 4  ;;  %v11253_v28 = vld [vmem:[%s14045_s30 + $0x107] sm:$0x1] }
 0x1ac   : > { %v9971_v29 = vsel %vm846_vm4, %v9970_v10, %v9969_v25  ;;  %v9979_v30 = vsel %vm837_vm1, %v9978_v19, %v9756_v2  ;;  %v9986_v31 = vrot.slane %v9761_v12, 3  ;;  %v11255_v32 = vld [vmem:[%s14045_s30 + $0x117] sm:$0x1]  ;;  %v11256_v33 = vld [vmem:[%s14045_s30 + $0x11f] sm:$0x1]  ;;  %v9988_v35 = vrot.slane %v9762_v18, 2 }
 0x1ad   : > { %13494 = vmatprep.subr.bf16.mxu1 %v13493_v23  ;;  %v9973_v34 = vsel %vm849_vm5, %v9972_v13, %v9971_v29  ;;  %v9981_v14 = vsel %vm840_vm2, %v9980_v21, %v9979_v30  ;;  %v11257_v36 = vld [vmem:[%s14045_s30 + $0x127] sm:$0x1]  ;;  %v11258_v37 = vld [vmem:[%s14045_s30 + $0x12f] sm:$0x1]  ;;  %v11469_v38 = vrot.slane %v11254_v22, 7  ;;  %v9990_v41 = vrot.slane %v9763_v24, 1 }
 0x1ae   : > { %13496 = vmatpush3.bf16.msra.mxu1 %v13493_v23  ;;  %v9975_v39 = vsel %vm852_vm6, %v9974_v15, %v9973_v34  ;;  %v9983_v40 = vsel %vm843_vm3, %v9982_v26, %v9981_v14  ;;  %v11259_v42 = vld [vmem:[%s14045_s30 + $0x137] sm:$0x1]  ;;  %v11260_v43 = vld [vmem:[%s14045_s30 + $0x13f] sm:$0x1]  ;;  %v11261_v45 = vld [vmem:[%s14045_s30 + $0x147] sm:$0x1] }
 0x1af   : > { %v9977_v44 = vsel %vm855_vm7, %v9976_v16, %v9975_v39  ;;  %v9985_v20 = vsel %vm846_vm4, %v9984_v27, %v9983_v40  ;;  %v11262_v46 = vld [vmem:[%s14045_s30 + $0x14f] sm:$0x1]  ;;  %v11263_v47 = vld [vmem:[%s14045_s30 + $0x157] sm:$0x1]  ;;  %v11264_v48 = vld [vmem:[%s14045_s30 + $0x15f] sm:$0x1]  ;;  %v11470_v50 = vsel %vm837_vm1, %v11469_v38, %v11253_v28 }
 0x1b0   : > { %v9987_v52 = vsel %vm849_vm5, %v9986_v31, %v9985_v20  ;;  %v11265_v53 = vld [vmem:[%s14045_s30 + $0x167] sm:$0x1]  ;;  %v11471_v54 = vrot.slane %v11255_v32, 6  ;;  %v11473_v55 = vrot.slane %v11256_v33, 5  ;;  %v11475_v56 = vrot.slane %v11257_v36, 4 }
 0x1b1   : > { %v9989_v57 = vsel %vm852_vm6, %v9988_v35, %v9987_v52  ;;  %v11266_v58 = vld [vmem:[%s14045_s30 + $0x16f] sm:$0x1]  ;;  %v11477_v59 = vrot.slane %v11258_v37, 3  ;;  %v11479_v60 = vrot.slane %v11259_v42, 2  ;;  %v11481_v49 = vrot.slane %v11260_v43, 1 }
 0x1b2   : > { %v9991_v61 = vsel %vm855_vm7, %v9990_v41, %v9989_v57  ;;  %v11267_v62 = vld [vmem:[%s14045_s30 + $0x177] sm:$0x1]  ;;  %v11472_v63 = vsel %vm840_vm2, %v11471_v54, %v11470_v50  ;;  %v11483_v0 = vrot.slane %v11262_v46, 7  ;;  %v11485_v2 = vrot.slane %v11263_v47, 6  ;;  %v9765_v3 = vld [vmem:[%s14045_s30 + $0x18e] sm:$0x1] }
 0x1b3   : > { %v13473_v4 = vpack.c.bf16 %v9991_v61, %v9977_v44  ;;  %v11268_v5 = vld [vmem:[%s14045_s30 + $0x17f] sm:$0x1]  ;;  %v11474_v6 = vsel %vm843_vm3, %v11473_v55, %v11472_v63  ;;  %v11487_v7 = vrot.slane %v11264_v48, 5  ;;  %v11489_v8 = vrot.slane %v11265_v53, 4  ;;  %v9764_v51 = vld [vmem:[%s14045_s30 + $0x186] sm:$0x1] }
 0x1b4   : > { %v11476_v9 = vsel %vm846_vm4, %v11475_v56, %v11474_v6  ;;  %v11484_v10 = vsel %vm837_vm1, %v11483_v0, %v11261_v45  ;;  %v11491_v11 = vrot.slane %v11266_v58, 3  ;;  %v9766_v12 = vld [vmem:[%s14045_s30 + $0x196] sm:$0x1]  ;;  %v9767_v13 = vld [vmem:[%s14045_s30 + $0x19e] sm:$0x1]  ;;  %v11493_v17 = vrot.slane %v11267_v62, 2 }
 0x1b5   : > { %13474 = vmatprep.subr.bf16.mxu0 %v13473_v4  ;;  %v11478_v15 = vsel %vm849_vm5, %v11477_v59, %v11476_v9  ;;  %v11486_v16 = vsel %vm840_vm2, %v11485_v2, %v11484_v10  ;;  %v9768_v18 = vld [vmem:[%s14045_s30 + $0x1a6] sm:$0x1]  ;;  %v9769_v1 = vld [vmem:[%s14045_s30 + $0x1ae] sm:$0x1]  ;;  %v9992_v19 = vrot.slane %v9765_v3, 7  ;;  %v11495_v23 = vrot.slane %v11268_v5, 1 }
 0x1b6   : > { %v11480_v21 = vsel %vm852_vm6, %v11479_v60, %v11478_v15  ;;  %v11488_v22 = vsel %vm843_vm3, %v11487_v7, %v11486_v16  ;;  %13476 = vmatpush3.bf16.msra.mxu0 %v13473_v4  ;;  %v9770_v24 = vld [vmem:[%s14045_s30 + $0x1b6] sm:$0x1]  ;;  %v9771_v25 = vld [vmem:[%s14045_s30 + $0x1be] sm:$0x1]  ;;  %v9772_v28 = vld [vmem:[%s14045_s30 + $0x1c6] sm:$0x1] }
 0x1b7   : > { %v11482_v26 = vsel %vm855_vm7, %v11481_v49, %v11480_v21  ;;  %v11490_v27 = vsel %vm846_vm4, %v11489_v8, %v11488_v22  ;;  %v9773_v29 = vld [vmem:[%s14045_s30 + $0x1ce] sm:$0x1]  ;;  %v9774_v30 = vld [vmem:[%s14045_s30 + $0x1d6] sm:$0x1]  ;;  %v9775_v31 = vld [vmem:[%s14045_s30 + $0x1de] sm:$0x1]  ;;  %v9993_v32 = vsel %vm837_vm1, %v9992_v19, %v9764_v51 }
 0x1b8   : > { %v11492_v33 = vsel %vm849_vm5, %v11491_v11, %v11490_v27  ;;  %v9776_v34 = vld [vmem:[%s14045_s30 + $0x1e6] sm:$0x1]  ;;  %v9994_v14 = vrot.slane %v9766_v12, 6  ;;  %v9996_v35 = vrot.slane %v9767_v13, 5  ;;  %v9998_v36 = vrot.slane %v9768_v18, 4 }
 0x1b9   : > { %v11494_v37 = vsel %vm852_vm6, %v11493_v17, %v11492_v33  ;;  %v9777_v38 = vld [vmem:[%s14045_s30 + $0x1ee] sm:$0x1]  ;;  %v10000_v39 = vrot.slane %v9769_v1, 3  ;;  %v10002_v40 = vrot.slane %v9770_v24, 2  ;;  %v10004_v41 = vrot.slane %v9771_v25, 1 }
 0x1ba   : > { %v11496_v42 = vsel %vm855_vm7, %v11495_v23, %v11494_v37  ;;  %v9778_v43 = vld [vmem:[%s14045_s30 + $0x1f6] sm:$0x1]  ;;  %v9995_v44 = vsel %vm840_vm2, %v9994_v14, %v9993_v32  ;;  %v10006_v20 = vrot.slane %v9773_v29, 7  ;;  %v10008_v45 = vrot.slane %v9774_v30, 6  ;;  %v11270_v46 = vld [vmem:[%s14045_s30 + $0x18f] sm:$0x1] }
 0x1bb   : > { %v13497_v47 = vpack.c.bf16 %v11496_v42, %v11482_v26  ;;  %v9779_v48 = vld [vmem:[%s14045_s30 + $0x1fe] sm:$0x1]  ;;  %v9997_v50 = vsel %vm843_vm3, %v9996_v35, %v9995_v44  ;;  %v10010_v52 = vrot.slane %v9775_v31, 5  ;;  %v10012_v53 = vrot.slane %v9776_v34, 4  ;;  %v11269_v54 = vld [vmem:[%s14045_s30 + $0x187] sm:$0x1] }
 0x1bc   : > { %v9999_v55 = vsel %vm846_vm4, %v9998_v36, %v9997_v50  ;;  %v10007_v56 = vsel %vm837_vm1, %v10006_v20, %v9772_v28  ;;  %v10014_v57 = vrot.slane %v9777_v38, 3  ;;  %v11271_v58 = vld [vmem:[%s14045_s30 + $0x197] sm:$0x1]  ;;  %v11272_v59 = vld [vmem:[%s14045_s30 + $0x19f] sm:$0x1]  ;;  %v10016_v61 = vrot.slane %v9778_v43, 2 }
 0x1bd   : > { %13498 = vmatprep.subr.bf16.mxu1 %v13497_v47  ;;  %v10001_v60 = vsel %vm849_vm5, %v10000_v39, %v9999_v55  ;;  %v10009_v49 = vsel %vm840_vm2, %v10008_v45, %v10007_v56  ;;  %v11273_v62 = vld [vmem:[%s14045_s30 + $0x1a7] sm:$0x1]  ;;  %v11274_v63 = vld [vmem:[%s14045_s30 + $0x1af] sm:$0x1]  ;;  %v11497_v0 = vrot.slane %v11270_v46, 7  ;;  %v10018_v4 = vrot.slane %v9779_v48, 1 }
 0x1be   : > { %13500 = vmatpush3.bf16.msra.mxu1 %v13497_v47  ;;  %v10003_v2 = vsel %vm852_vm6, %v10002_v40, %v10001_v60  ;;  %v10011_v3 = vsel %vm843_vm3, %v10010_v52, %v10009_v49  ;;  %v11275_v5 = vld [vmem:[%s14045_s30 + $0x1b7] sm:$0x1]  ;;  %v11276_v6 = vld [vmem:[%s14045_s30 + $0x1bf] sm:$0x1]  ;;  %v11277_v51 = vld [vmem:[%s14045_s30 + $0x1c7] sm:$0x1] }
 0x1bf   : > { %v10005_v7 = vsel %vm855_vm7, %v10004_v41, %v10003_v2  ;;  %v10013_v8 = vsel %vm846_vm4, %v10012_v53, %v10011_v3  ;;  %v11278_v9 = vld [vmem:[%s14045_s30 + $0x1cf] sm:$0x1]  ;;  %v11279_v10 = vld [vmem:[%s14045_s30 + $0x1d7] sm:$0x1]  ;;  %v11280_v11 = vld [vmem:[%s14045_s30 + $0x1df] sm:$0x1]  ;;  %v11498_v12 = vsel %vm837_vm1, %v11497_v0, %v11269_v54 }
 0x1c0   : > { %v10015_v13 = vsel %vm849_vm5, %v10014_v57, %v10013_v8  ;;  %v11281_v15 = vld [vmem:[%s14045_s30 + $0x1e7] sm:$0x1]  ;;  %v11499_v16 = vrot.slane %v11271_v58, 6  ;;  %v11501_v17 = vrot.slane %v11272_v59, 5  ;;  %v11503_v18 = vrot.slane %v11273_v62, 4 }
 0x1c1   : > { %v10017_v1 = vsel %vm852_vm6, %v10016_v61, %v10015_v13  ;;  %v11282_v19 = vld [vmem:[%s14045_s30 + $0x1ef] sm:$0x1]  ;;  %v11505_v21 = vrot.slane %v11274_v63, 3  ;;  %v11507_v22 = vrot.slane %v11275_v5, 2  ;;  %v11509_v23 = vrot.slane %v11276_v6, 1 }
 0x1c2   : > { %v10019_v24 = vsel %vm855_vm7, %v10018_v4, %v10017_v1  ;;  %v11283_v25 = vld [vmem:[%s14045_s30 + $0x1f7] sm:$0x1]  ;;  %v11500_v26 = vsel %vm840_vm2, %v11499_v16, %v11498_v12  ;;  %v11511_v27 = vrot.slane %v11278_v9, 7  ;;  %v11513_v28 = vrot.slane %v11279_v10, 6  ;;  %v9781_v29 = vld [vmem:[%s14045_s30 + $0x20e] sm:$0x1] }
 0x1c3   : > { %v13477_v30 = vpack.c.bf16 %v10019_v24, %v10005_v7  ;;  %v11284_v31 = vld [vmem:[%s14045_s30 + $0x1ff] sm:$0x1]  ;;  %v11502_v32 = vsel %vm843_vm3, %v11501_v17, %v11500_v26  ;;  %v11515_v33 = vrot.slane %v11280_v11, 5  ;;  %v11517_v34 = vrot.slane %v11281_v15, 4  ;;  %v9780_v14 = vld [vmem:[%s14045_s30 + $0x206] sm:$0x1] }
 0x1c4   : > { %v11504_v35 = vsel %vm846_vm4, %v11503_v18, %v11502_v32  ;;  %v11512_v36 = vsel %vm837_vm1, %v11511_v27, %v11277_v51  ;;  %v11519_v37 = vrot.slane %v11282_v19, 3  ;;  %v9782_v38 = vld [vmem:[%s14045_s30 + $0x216] sm:$0x1]  ;;  %v9783_v39 = vld [vmem:[%s14045_s30 + $0x21e] sm:$0x1]  ;;  %v11521_v42 = vrot.slane %v11283_v25, 2 }
 0x1c5   : > { %13478 = vmatprep.subr.bf16.mxu0 %v13477_v30  ;;  %v11506_v40 = vsel %vm849_vm5, %v11505_v21, %v11504_v35  ;;  %v11514_v41 = vsel %vm840_vm2, %v11513_v28, %v11512_v36  ;;  %v9784_v43 = vld [vmem:[%s14045_s30 + $0x226] sm:$0x1]  ;;  %v9785_v44 = vld [vmem:[%s14045_s30 + $0x22e] sm:$0x1]  ;;  %v10020_v20 = vrot.slane %v9781_v29, 7  ;;  %v11523_v47 = vrot.slane %v11284_v31, 1 }
 0x1c6   : > { %v11508_v45 = vsel %vm852_vm6, %v11507_v22, %v11506_v40  ;;  %v11516_v46 = vsel %vm843_vm3, %v11515_v33, %v11514_v41  ;;  %13480 = vmatpush3.bf16.msra.mxu0 %v13477_v30  ;;  %v9786_v48 = vld [vmem:[%s14045_s30 + $0x236] sm:$0x1]  ;;  %v9787_v50 = vld [vmem:[%s14045_s30 + $0x23e] sm:$0x1]  ;;  %v9788_v54 = vld [vmem:[%s14045_s30 + $0x246] sm:$0x1] }
 0x1c7   : > { %v11510_v52 = vsel %vm855_vm7, %v11509_v23, %v11508_v45  ;;  %v11518_v53 = vsel %vm846_vm4, %v11517_v34, %v11516_v46  ;;  %v9789_v55 = vld [vmem:[%s14045_s30 + $0x24e] sm:$0x1]  ;;  %v9790_v56 = vld [vmem:[%s14045_s30 + $0x256] sm:$0x1]  ;;  %v9791_v57 = vld [vmem:[%s14045_s30 + $0x25e] sm:$0x1]  ;;  %v10021_v58 = vsel %vm837_vm1, %v10020_v20, %v9780_v14 }
 0x1c8   : > { %v11520_v59 = vsel %vm849_vm5, %v11519_v37, %v11518_v53  ;;  %v9792_v60 = vld [vmem:[%s14045_s30 + $0x266] sm:$0x1]  ;;  %v10022_v49 = vrot.slane %v9782_v38, 6  ;;  %v10024_v61 = vrot.slane %v9783_v39, 5  ;;  %v10026_v62 = vrot.slane %v9784_v43, 4 }
 0x1c9   : > { %v11522_v63 = vsel %vm852_vm6, %v11521_v42, %v11520_v59  ;;  %v9793_v0 = vld [vmem:[%s14045_s30 + $0x26e] sm:$0x1]  ;;  %v10028_v2 = vrot.slane %v9785_v44, 3  ;;  %v10030_v3 = vrot.slane %v9786_v48, 2  ;;  %v10032_v4 = vrot.slane %v9787_v50, 1 }
 0x1ca   : > { %v11524_v5 = vsel %vm855_vm7, %v11523_v47, %v11522_v63  ;;  %v9794_v6 = vld [vmem:[%s14045_s30 + $0x276] sm:$0x1]  ;;  %v10023_v7 = vsel %vm840_vm2, %v10022_v49, %v10021_v58  ;;  %v10034_v8 = vrot.slane %v9789_v55, 7  ;;  %v10036_v51 = vrot.slane %v9790_v56, 6  ;;  %v11286_v9 = vld [vmem:[%s14045_s30 + $0x20f] sm:$0x1] }
 0x1cb   : > { %v13501_v10 = vpack.c.bf16 %v11524_v5, %v11510_v52  ;;  %v9795_v11 = vld [vmem:[%s14045_s30 + $0x27e] sm:$0x1]  ;;  %v10025_v12 = vsel %vm843_vm3, %v10024_v61, %v10023_v7  ;;  %v10038_v13 = vrot.slane %v9791_v57, 5  ;;  %v10040_v15 = vrot.slane %v9792_v60, 4  ;;  %v11285_v16 = vld [vmem:[%s14045_s30 + $0x207] sm:$0x1] }
 0x1cc   : > { %v10027_v17 = vsel %vm846_vm4, %v10026_v62, %v10025_v12  ;;  %v10035_v18 = vsel %vm837_vm1, %v10034_v8, %v9788_v54  ;;  %v10042_v1 = vrot.slane %v9793_v0, 3  ;;  %v11287_v19 = vld [vmem:[%s14045_s30 + $0x217] sm:$0x1]  ;;  %v11288_v21 = vld [vmem:[%s14045_s30 + $0x21f] sm:$0x1]  ;;  %v10044_v24 = vrot.slane %v9794_v6, 2 }
 0x1cd   : > { %13502 = vmatprep.subr.bf16.mxu1 %v13501_v10  ;;  %v10029_v22 = vsel %vm849_vm5, %v10028_v2, %v10027_v17  ;;  %v10037_v23 = vsel %vm840_vm2, %v10036_v51, %v10035_v18  ;;  %v11289_v25 = vld [vmem:[%s14045_s30 + $0x227] sm:$0x1]  ;;  %v11290_v26 = vld [vmem:[%s14045_s30 + $0x22f] sm:$0x1]  ;;  %v11525_v27 = vrot.slane %v11286_v9, 7  ;;  %v10046_v30 = vrot.slane %v9795_v11, 1 }
 0x1ce   : > { %13504 = vmatpush3.bf16.msra.mxu1 %v13501_v10  ;;  %v10031_v28 = vsel %vm852_vm6, %v10030_v3, %v10029_v22  ;;  %v10039_v29 = vsel %vm843_vm3, %v10038_v13, %v10037_v23  ;;  %v11291_v31 = vld [vmem:[%s14045_s30 + $0x237] sm:$0x1]  ;;  %v11292_v32 = vld [vmem:[%s14045_s30 + $0x23f] sm:$0x1]  ;;  %v11293_v14 = vld [vmem:[%s14045_s30 + $0x247] sm:$0x1] }
 0x1cf   : > { %v10033_v33 = vsel %vm855_vm7, %v10032_v4, %v10031_v28  ;;  %v10041_v34 = vsel %vm846_vm4, %v10040_v15, %v10039_v29  ;;  %v11294_v35 = vld [vmem:[%s14045_s30 + $0x24f] sm:$0x1]  ;;  %v11295_v36 = vld [vmem:[%s14045_s30 + $0x257] sm:$0x1]  ;;  %v11296_v37 = vld [vmem:[%s14045_s30 + $0x25f] sm:$0x1]  ;;  %v11526_v38 = vsel %vm837_vm1, %v11525_v27, %v11285_v16 }
 0x1d0   : > { %v10043_v39 = vsel %vm849_vm5, %v10042_v1, %v10041_v34  ;;  %v11297_v40 = vld [vmem:[%s14045_s30 + $0x267] sm:$0x1]  ;;  %v11527_v41 = vrot.slane %v11287_v19, 6  ;;  %v11529_v42 = vrot.slane %v11288_v21, 5  ;;  %v11531_v43 = vrot.slane %v11289_v25, 4 }
 0x1d1   : > { %v10045_v44 = vsel %vm852_vm6, %v10044_v24, %v10043_v39  ;;  %v11298_v20 = vld [vmem:[%s14045_s30 + $0x26f] sm:$0x1]  ;;  %v11533_v45 = vrot.slane %v11290_v26, 3  ;;  %v11535_v46 = vrot.slane %v11291_v31, 2  ;;  %v11537_v47 = vrot.slane %v11292_v32, 1 }
 0x1d2   : > { %v10047_v48 = vsel %vm855_vm7, %v10046_v30, %v10045_v44  ;;  %v11299_v50 = vld [vmem:[%s14045_s30 + $0x277] sm:$0x1]  ;;  %v11528_v52 = vsel %vm840_vm2, %v11527_v41, %v11526_v38  ;;  %v11539_v53 = vrot.slane %v11294_v35, 7  ;;  %v11541_v54 = vrot.slane %v11295_v36, 6  ;;  %v9797_v55 = vld [vmem:[%s14045_s30 + $0x28e] sm:$0x1] }
 0x1d3   : > { %v13481_v56 = vpack.c.bf16 %v10047_v48, %v10033_v33  ;;  %v11300_v57 = vld [vmem:[%s14045_s30 + $0x27f] sm:$0x1]  ;;  %v11530_v58 = vsel %vm843_vm3, %v11529_v42, %v11528_v52  ;;  %v11543_v59 = vrot.slane %v11296_v37, 5  ;;  %v11545_v60 = vrot.slane %v11297_v40, 4  ;;  %v9796_v49 = vld [vmem:[%s14045_s30 + $0x286] sm:$0x1] }
 0x1d4   : > { %v11532_v61 = vsel %vm846_vm4, %v11531_v43, %v11530_v58  ;;  %v11540_v62 = vsel %vm837_vm1, %v11539_v53, %v11293_v14  ;;  %v11547_v63 = vrot.slane %v11298_v20, 3  ;;  %v9798_v0 = vld [vmem:[%s14045_s30 + $0x296] sm:$0x1]  ;;  %v9799_v2 = vld [vmem:[%s14045_s30 + $0x29e] sm:$0x1]  ;;  %v11549_v5 = vrot.slane %v11299_v50, 2 }
 0x1d5   : > { %13482 = vmatprep.subr.bf16.mxu0 %v13481_v56  ;;  %v11534_v3 = vsel %vm849_vm5, %v11533_v45, %v11532_v61  ;;  %v11542_v4 = vsel %vm840_vm2, %v11541_v54, %v11540_v62  ;;  %v9800_v6 = vld [vmem:[%s14045_s30 + $0x2a6] sm:$0x1]  ;;  %v9801_v7 = vld [vmem:[%s14045_s30 + $0x2ae] sm:$0x1]  ;;  %v10048_v8 = vrot.slane %v9797_v55, 7  ;;  %v11551_v10 = vrot.slane %v11300_v57, 1 }
 0x1d6   : > { %v11536_v51 = vsel %vm852_vm6, %v11535_v46, %v11534_v3  ;;  %v11544_v9 = vsel %vm843_vm3, %v11543_v59, %v11542_v4  ;;  %13484 = vmatpush3.bf16.msra.mxu0 %v13481_v56  ;;  %v9802_v11 = vld [vmem:[%s14045_s30 + $0x2b6] sm:$0x1]  ;;  %v9803_v12 = vld [vmem:[%s14045_s30 + $0x2be] sm:$0x1]  ;;  %v9804_v16 = vld [vmem:[%s14045_s30 + $0x2c6] sm:$0x1] }
 0x1d7   : > { %v11538_v13 = vsel %vm855_vm7, %v11537_v47, %v11536_v51  ;;  %v11546_v15 = vsel %vm846_vm4, %v11545_v60, %v11544_v9  ;;  %v9805_v17 = vld [vmem:[%s14045_s30 + $0x2ce] sm:$0x1]  ;;  %v9806_v18 = vld [vmem:[%s14045_s30 + $0x2d6] sm:$0x1]  ;;  %v9807_v1 = vld [vmem:[%s14045_s30 + $0x2de] sm:$0x1]  ;;  %v10049_v19 = vsel %vm837_vm1, %v10048_v8, %v9796_v49 }
 0x1d8   : > { %v11548_v21 = vsel %vm849_vm5, %v11547_v63, %v11546_v15  ;;  %v9808_v22 = vld [vmem:[%s14045_s30 + $0x2e6] sm:$0x1]  ;;  %v10050_v23 = vrot.slane %v9798_v0, 6  ;;  %v10052_v24 = vrot.slane %v9799_v2, 5  ;;  %v10054_v25 = vrot.slane %v9800_v6, 4 }
 0x1d9   : > { %v11550_v26 = vsel %vm852_vm6, %v11549_v5, %v11548_v21  ;;  %v9809_v27 = vld [vmem:[%s14045_s30 + $0x2ee] sm:$0x1]  ;;  %v10056_v28 = vrot.slane %v9801_v7, 3  ;;  %v10058_v29 = vrot.slane %v9802_v11, 2  ;;  %v10060_v30 = vrot.slane %v9803_v12, 1 }
 0x1da   : > { %v11552_v31 = vsel %vm855_vm7, %v11551_v10, %v11550_v26  ;;  %v9810_v32 = vld [vmem:[%s14045_s30 + $0x2f6] sm:$0x1]  ;;  %v10051_v33 = vsel %vm840_vm2, %v10050_v23, %v10049_v19  ;;  %v10062_v34 = vrot.slane %v9805_v17, 7  ;;  %v10064_v14 = vrot.slane %v9806_v18, 6  ;;  %v11302_v35 = vld [vmem:[%s14045_s30 + $0x28f] sm:$0x1] }
 0x1db   : > { %v13505_v36 = vpack.c.bf16 %v11552_v31, %v11538_v13  ;;  %v9811_v37 = vld [vmem:[%s14045_s30 + $0x2fe] sm:$0x1]  ;;  %v10053_v38 = vsel %vm843_vm3, %v10052_v24, %v10051_v33  ;;  %v10066_v39 = vrot.slane %v9807_v1, 5  ;;  %v10068_v40 = vrot.slane %v9808_v22, 4  ;;  %v11301_v44 = vld [vmem:[%s14045_s30 + $0x287] sm:$0x1] }
 0x1dc   : > { %v10055_v41 = vsel %vm846_vm4, %v10054_v25, %v10053_v38  ;;  %v10063_v42 = vsel %vm837_vm1, %v10062_v34, %v9804_v16  ;;  %v10070_v43 = vrot.slane %v9809_v27, 3  ;;  %v11303_v20 = vld [vmem:[%s14045_s30 + $0x297] sm:$0x1]  ;;  %v10072_v47 = vrot.slane %v9810_v32, 2  ;;  %v11304_v48 = vld [vmem:[%s14045_s30 + $0x29f] sm:$0x1] }
 0x1dd   : > { %13506 = vmatprep.subr.bf16.mxu1 %v13505_v36  ;;  %v10057_v45 = vsel %vm849_vm5, %v10056_v28, %v10055_v41  ;;  %v10065_v46 = vsel %vm840_vm2, %v10064_v14, %v10063_v42  ;;  %v11305_v50 = vld [vmem:[%s14045_s30 + $0x2a7] sm:$0x1]  ;;  %v11553_v52 = vrot.slane %v11302_v35, 7  ;;  %v10074_v55 = vrot.slane %v9811_v37, 1  ;;  %v11306_v56 = vld [vmem:[%s14045_s30 + $0x2af] sm:$0x1] }
 0x1de   : > { %13508 = vmatpush3.bf16.msra.mxu1 %v13505_v36  ;;  %v10059_v53 = vsel %vm852_vm6, %v10058_v29, %v10057_v45  ;;  %v10067_v54 = vsel %vm843_vm3, %v10066_v39, %v10065_v46  ;;  %v11307_v57 = vld [vmem:[%s14045_s30 + $0x2b7] sm:$0x1]  ;;  %v11308_v60 = vld [vmem:[%s14045_s30 + $0x2bf] sm:$0x1]  ;;  %v11310_v49 = vld [vmem:[%s14045_s30 + $0x2cf] sm:$0x1] }
 0x1df   : > { %v10061_v58 = vsel %vm855_vm7, %v10060_v30, %v10059_v53  ;;  %v10069_v59 = vsel %vm846_vm4, %v10068_v40, %v10067_v54  ;;  %v11311_v61 = vld [vmem:[%s14045_s30 + $0x2d7] sm:$0x1]  ;;  %v11312_v62 = vld [vmem:[%s14045_s30 + $0x2df] sm:$0x1]  ;;  %v11554_v63 = vsel %vm837_vm1, %v11553_v52, %v11301_v44  ;;  %v11313_v2 = vld [vmem:[%s14045_s30 + $0x2e7] sm:$0x1] }
 0x1e0   : > { %v10071_v0 = vsel %vm849_vm5, %v10070_v43, %v10069_v59  ;;  %v11555_v3 = vrot.slane %v11303_v20, 6  ;;  %v11557_v4 = vrot.slane %v11304_v48, 5  ;;  %v11559_v5 = vrot.slane %v11305_v50, 4  ;;  %v11309_v7 = vld [vmem:[%s14045_s30 + $0x2c7] sm:$0x1]  ;;  %v610_v29 = vld [vmem:[%s21054_s2 + $0x10] sm:$0xff] }
 0x1e1   : > { %v10073_v6 = vsel %vm852_vm6, %v10072_v47, %v10071_v0  ;;  %v11314_v8 = vld [vmem:[%s14045_s30 + $0x2ef] sm:$0x1]  ;;  %v11561_v51 = vrot.slane %v11306_v56, 3  ;;  %v11563_v9 = vrot.slane %v11307_v57, 2  ;;  %v11315_v11 = vld [vmem:[%s14045_s30 + $0x2f7] sm:$0x1] }
 0x1e2   : > { %v10075_v10 = vsel %vm855_vm7, %v10074_v55, %v10073_v6  ;;  %v11556_v12 = vsel %vm840_vm2, %v11555_v3, %v11554_v63  ;;  %v11567_v13 = vrot.slane %v11310_v49, 7  ;;  %v11569_v15 = vrot.slane %v11311_v61, 6  ;;  %v11316_v17 = vld [vmem:[%s14045_s30 + $0x2ff] sm:$0x1]  ;;  %v608_v25 = vld [vmem:[%s21054_s2] sm:$0xff]  ;;  %v609_v36 = vld [vmem:[%s21054_s2 + $0x8] sm:$0xff] }
 0x1e3   : > { %v13485_v16 = vpack.c.bf16 %v10075_v10, %v10061_v58  ;;  %v11558_v18 = vsel %vm843_vm3, %v11557_v4, %v11556_v12  ;;  %v11571_v1 = vrot.slane %v11312_v62, 5  ;;  %v11573_v19 = vrot.slane %v11313_v2, 4  ;;  %v13636_v38 = vld [vmem:[%s21053_s1 + $0x8] sm:$0xff]  ;;  %v611_v39 = vld [vmem:[%s21054_s2 + $0x18] sm:$0xff]  ;;  %v13637_v41 = vld [vmem:[%s21053_s1 + $0x10] sm:$0xff]  ;;  %v13083_v46 = vpop.f32.mrb[0].mxu0 }
 0x1e4   : > { %v11560_v21 = vsel %vm846_vm4, %v11559_v5, %v11558_v18  ;;  %v11565_v22 = vrot.slane %v11308_v60, 1  ;;  %v11568_v23 = vsel %vm837_vm1, %v11567_v13, %v11309_v7  ;;  %v11575_v24 = vrot.slane %v11314_v8, 3  ;;  %v612_v43 = vld [vmem:[%s21054_s2 + $0x20] sm:$0xff]  ;;  %v13638_v44 = vld [vmem:[%s21053_s1 + $0x18] sm:$0xff]  ;;  %v613_v20 = vld [vmem:[%s21054_s2 + $0x28] sm:$0xff]  ;;  %v13116_v47 = vpop.f32.mrb[0].mxu1 }
 0x1e5   : > { %13486 = vmatprep.subr.bf16.mxu0 %v13485_v16  ;;  %v11562_v26 = vsel %vm849_vm5, %v11561_v51, %v11560_v21  ;;  %v11570_v27 = vsel %vm840_vm2, %v11569_v15, %v11568_v23  ;;  %v11577_v28 = vrot.slane %v11315_v11, 2  ;;  %v11579_v32 = vrot.slane %v11316_v17, 1  ;;  %v13639_v45 = vld [vmem:[%s21053_s1 + $0x20] sm:$0xff]  ;;  %v1108_v48 = vpop.f32.mrb[1].mxu0  ;;  %v2629_v50 = vpop.f32.mrb[1].mxu1  ;;  %v13640_v54 = vld [vmem:[%s21053_s1 + $0x28] sm:$0xff] }
 0x1e6   : > { %v11564_v30 = vsel %vm852_vm6, %v11563_v9, %v11562_v26  ;;  %v11572_v31 = vsel %vm843_vm3, %v11571_v1, %v11570_v27  ;;  %13488 = vmatpush3.bf16.msra.mxu0 %v13485_v16  ;;  %v13709_v33 = vmov 0   ;;  %v13086_v52 = vpop.f32.mrb[2].mxu0  ;;  %v13119_v53 = vpop.f32.mrb[2].mxu1  ;;  %s21022_s30 = smov 28   ;;  %vm2163_vm1 = vcmask 326656   ;;  %s21700_s1 = smov 4  }
 0x1e7   : > { %13621 = vset.pattern.permute.xlu0 %v13709_v33  ;;  %v11574_v34 = vsel %vm846_vm4, %v11573_v19, %v11572_v31  ;;  %13622 = vset.pattern.permute.xlu1 %v13709_v33  ;;  %v11566_v14 = vsel %vm855_vm7, %v11565_v22, %v11564_v30  ;;  %v1118_v55 = vpop.f32.mrb[3].mxu0  ;;  %v2639_v56 = vpop.f32.mrb[3].mxu1  ;;  %vm2167_vm2 = vcmask 359424   ;;  %vm2171_vm3 = vcmask 392192   ;;  %s21706_s2 = smov 8  }
 0x1e8   : > { %712 = vperm.xlu0 %13621, %v608_v25   ;;  %v11576_v35 = vsel %vm849_vm5, %v11575_v24, %v11574_v34  ;;  %722 = vperm.xlu1 %13622, %v610_v29   ;;  %v15637_v57 = vpop.f32.mrb[4].mxu1  ;;  %v13089_v58 = vpop.f32.mrb[4].mxu0  ;;  %vm2175_vm4 = vcmask 424960   ;;  %vm2179_vm5 = vcmask 457728  }
 0x1e9   : > { %v11578_v37 = vsel %vm852_vm6, %v11577_v28, %v11576_v35  ;;  %13280 = vmatmul.mubr.msk.f32.vlgmr.msra.gmra.mrb[18].mxu0 %vm1023_vm0, %v13636_v38  ;;  %v15639_v59 = vpop.f32.mrb[5].mxu0  ;;  %v15641_v60 = vpop.f32.mrb[5].mxu1  ;;  %vm2183_vm6 = vcmask 490496  }
 0x1ea   : > { %v11580_v40 = vsel %vm855_vm7, %v11579_v32, %v11578_v37  ;;  %13282 = vmatprep.mubr.msk.f32.mxu0 %vm1023_vm0, %v13637_v41  ;;  %vm2187_vm7 = vcmask 519168  }
 0x1eb   : > { %v13509_v42 = vpack.c.bf16 %v11580_v40, %v11566_v14 }
 0x1ec   : > { %717 = vperm.xlu0 %13621, %v609_v36   ;;  %727 = vperm.xlu1 %13622, %v611_v39  }
 0x1ed   : > { %13510 = vmatprep.subr.bf16.mxu1 %v13509_v42  ;;  %13283 = vmatmul.mubr.msk.f32.gmra.mrb[20].mxu0 %vm1023_vm0, %v13638_v44 }
 0x1ee   : > { %13512 = vmatpush3.bf16.msra.mxu1 %v13509_v42  ;;  %13285 = vmatprep.mubr.msk.f32.mxu0 %vm1023_vm0, %v13639_v45 }
 0x1f0   : > { %732 = vperm.xlu0 %13621, %v612_v43   ;;  %737 = vperm.xlu1 %13622, %v613_v20  }
 0x1f1   : > { %13313 = vmatmul.mubr.msk.f32.vlgmr.msra.gmra.mrb[18].mxu1 %vm1023_vm0, %v13636_v38  ;;  %13286 = vmatmul.mubr.msk.f32.gmra.mrb[22].mxu0 %vm1023_vm0, %v13640_v54 }
 0x1f2   : > { %13315 = vmatprep.mubr.msk.f32.mxu1 %vm1023_vm0, %v13637_v41 }
 0x1f5   : > { %13316 = vmatmul.mubr.msk.f32.gmra.mrb[20].mxu1 %vm1023_vm0, %v13638_v44 }
 0x1f6   : > { %13318 = vmatprep.mubr.msk.f32.mxu1 %vm1023_vm0, %v13639_v45 }
 0x1f9   : > { %13319 = vmatmul.mubr.msk.f32.gmra.mrb[22].mxu1 %vm1023_vm0, %v13640_v54  ;;  %vm2159_vm0 = vcmask 293888  }
 0x1fc   : > { %v15646_v49 = vpop.f32.mrb[6].mxu0 }
 0x1fd   : > { %v15648_v61 = vpop.f32.mrb[7].mxu0 }
 0x200   : > { %v15654_v0 = vpop.f32.mrb[8].mxu0 }
 0x201   : > { %v15656_v2 = vpop.f32.mrb[9].mxu0 }
 0x204   : > { %v15650_v62 = vpop.f32.mrb[6].mxu1 }
 0x205   : > { %v15652_v63 = vpop.f32.mrb[7].mxu1 }
 0x206   : > { %v15660_v4 = vpop.f32.mrb[10].mxu0 }
 0x207   : > { %v15664_v6 = vpop.f32.mrb[11].mxu0 }
 0x208   : > { %v15658_v3 = vpop.f32.mrb[8].mxu1 }
 0x209   : > { %v15662_v5 = vpop.f32.mrb[9].mxu1 }
 0x20c   : > { %v15666_v7 = vpop.f32.mrb[10].mxu1 }
 0x20d   : > { %v15668_v8 = vpop.f32.mrb[11].mxu1 }
 0x25c   : > { %v15670_v51 = vpop.f32.mrb[12].mxu0 }
 0x25d   : > { %v15672_v9 = vpop.f32.mrb[13].mxu0 }
 0x260   : > { %v15674_v10 = vpop.f32.mrb[14].mxu0 }
 0x261   : > { %v15676_v11 = vpop.f32.mrb[15].mxu0 }
 0x264   : > { %v15678_v12 = vpop.f32.mrb[12].mxu1 }
 0x265   : > { %v15682_v15 = vpop.f32.mrb[13].mxu1 }
 0x266   : > { %v15680_v13 = vpop.f32.mrb[16].mxu0 }
 0x267   : > { %v15684_v16 = vpop.f32.mrb[17].mxu0  ;;  %v15686_v17 = vpop.permute.xlu0 %712 }
 0x268   : > { %v1109_v18 = vadd.f32 %v1108_v48, %v15686_v17  ;;  %v15689_v1 = vpop.permute.xlu1 %722  ;;  %v15691_v19 = vpop.f32.mrb[14].mxu1  ;;  %v2630_v24 = vadd.f32 %v2629_v50, %v15686_v17  ;;  %v4135_v50 = vadd.f32 %v15648_v61, %v15686_v17 }
 0x269   : > { %v15693_v22 = vpop.f32.mrb[15].mxu1  ;;  %v1119_v14 = vadd.f32 %v1118_v55, %v15689_v1  ;;  %v2640_v36 = vadd.f32 %v2639_v56, %v15689_v1  ;;  %v4145_v55 = vadd.f32 %v15656_v2, %v15689_v1 }
 0x26a   : > { %v1143_v21 = vcombine.high %v1109_v18, %v1109_v18  ;;  %v2664_v30 = vcombine.high %v2630_v24, %v2630_v24 }
 0x26b   : > { %v15695_v23 = vpop.permute.xlu0 %717  ;;  %v1145_v35 = vcombine.high %v1119_v14, %v1119_v14  ;;  %v2666_v39 = vcombine.high %v2640_v36, %v2640_v36 }
 0x26c   : > { %v1114_v25 = vadd.f32 %v13083_v46, %v15695_v23  ;;  %1187 = vxpose.xlu1.b32.start.end [1/1] (short) (narrow) %v1143_v21, 16  ;;  %v15699_v26 = vpop.permute.xlu1 %727  ;;  %v15701_v27 = vpop.f32.mrb[16].mxu1  ;;  %v2635_v31 = vadd.f32 %v13116_v47, %v15695_v23  ;;  %v4140_v56 = vadd.f32 %v15646_v49, %v15695_v23 }
 0x26d   : > { %v1124_v28 = vadd.f32 %v13086_v52, %v15699_v26  ;;  %v15704_v29 = vpop.f32.mrb[17].mxu1  ;;  %v2645_v33 = vadd.f32 %v13119_v53, %v15699_v26  ;;  %v5640_v52 = vadd.f32 %v15652_v63, %v15686_v17  ;;  %v4150_v53 = vadd.f32 %v15654_v0, %v15699_v26 }
 0x26e   : > { %1219 = vxpose.xlu0.b32.start.end [1/1] (short) (narrow) %v1114_v25, 16  ;;  %v1144_v38 = vcombine.high %v1114_v25, %v1114_v25  ;;  %v2665_v41 = vcombine.high %v2635_v31, %v2635_v31  ;;  %v5655_v54 = vadd.f32 %v15658_v3, %v15699_v26 }
 0x26f   : > { %v1146_v32 = vcombine.high %v1124_v28, %v1124_v28  ;;  %v2667_v34 = vcombine.high %v2645_v33, %v2645_v33  ;;  %v15715_v20 = vpop.permute.xlu0 %732 }
 0x270   : > { %v15710_v37 = vpop.permute.xlu1 %737  ;;  %v1129_v45 = vadd.f32 %v15639_v59, %v15715_v20  ;;  %v2650_v47 = vadd.f32 %v15641_v60, %v15715_v20  ;;  %v4170_v60 = vcombine.high %v4140_v56, %v4140_v56  ;;  %v4155_v3 = vadd.f32 %v15664_v6, %v15715_v20 }
 0x271   : > { %2708 = vxpose.xlu1.b32.start.end [1/1] (short) (narrow) %v2664_v30, 16  ;;  %v1134_v40 = vadd.f32 %v13089_v58, %v15710_v37  ;;  %v2655_v43 = vadd.f32 %v15637_v57, %v15710_v37  ;;  %v5650_v57 = vadd.f32 %v15662_v5, %v15689_v1  ;;  %v5645_v58 = vadd.f32 %v15650_v62, %v15695_v23 }
 0x272   : > { %v1147_v46 = vcombine.high %v1129_v45, %v1129_v45  ;;  %v2668_v48 = vcombine.high %v2650_v47, %v2650_v47  ;;  %v4160_v59 = vadd.f32 %v15660_v4, %v15710_v37  ;;  %v5665_v49 = vadd.f32 %v15666_v7, %v15710_v37 }
 0x273   : > { %2740 = vxpose.xlu0.b32.start.end [1/1] (short) (narrow) %v2635_v31, 16  ;;  %v1148_v42 = vcombine.high %v1134_v40, %v1134_v40  ;;  %v2669_v44 = vcombine.high %v2655_v43, %v2655_v43  ;;  %v5675_v0 = vcombine.high %v5645_v58, %v5645_v58  ;;  %v15761_v7 = vadd.f32 %v15668_v8, %v15715_v20 }
 0x274   : > { %v15767_v6 = vadd.f32 %v15672_v9, %v15686_v17  ;;  %v5674_v30 = vcombine.high %v5640_v52, %v5640_v52  ;;  %v15780_v8 = vadd.f32 %v15674_v10, %v15699_v26  ;;  %v15792_v10 = vadd.f32 %v15680_v13, %v15710_v37 }
 0x275   : > { %v15806_v13 = vadd.f32 %v15682_v15, %v15686_v17 }
 0x276   : > { %1379 = vxpose.xlu1.b32.start.end [1/1] (short) (narrow) %v1146_v32, 16  ;;  %v7179_v32 = vcombine.high %v15767_v6, %v15767_v6  ;;  %v7182_v9 = vcombine.high %v15780_v8, %v15780_v8 }
 0x278   : > { %1155 = vxpose.xlu0.b32.start.end [1/1] (short) (narrow) %v1109_v18, 16  ;;  %v4169_v18 = vcombine.high %v4135_v50, %v4135_v50 }
 0x27b   : > { %2900 = vxpose.xlu1.b32.start.end [1/1] (short) (narrow) %v2667_v34, 16  ;;  %v4172_v34 = vcombine.high %v4150_v53, %v4150_v53 }
 0x27d   : > { %2676 = vxpose.xlu0.b32.start.end [1/1] (short) (narrow) %v2630_v24, 16 }
 0x280   : > { %1315 = vxpose.xlu1.b32.start.end [1/1] (short) (narrow) %v1145_v35, 16  ;;  %v5677_v35 = vcombine.high %v5655_v54, %v5655_v54 }
 0x282   : > { %1251 = vxpose.xlu0.b32.start.end [1/1] (short) (narrow) %v1144_v38, 16  ;;  %v4171_v38 = vcombine.high %v4145_v55, %v4145_v55 }
 0x285   : > { %2836 = vxpose.xlu1.b32.start.end [1/1] (short) (narrow) %v2666_v39, 16  ;;  %v7184_v39 = vcombine.high %v15792_v10, %v15792_v10 }
 0x287   : > { %2772 = vxpose.xlu0.b32.start.end [1/1] (short) (narrow) %v2665_v41, 16 }
 0x28a   : > { %1507 = vxpose.xlu1.b32.start.end [1/1] (short) (narrow) %v1148_v42, 16  ;;  %v4174_v42 = vcombine.high %v4160_v59, %v4160_v59 }
 0x28c   : > { %1347 = vxpose.xlu0.b32.start.end [1/1] (short) (narrow) %v1124_v28, 16 }
 0x28f   : > { %3028 = vxpose.xlu1.b32.start.end [1/1] (short) (narrow) %v2669_v44, 16 }
 0x291   : > { %2868 = vxpose.xlu0.b32.start.end [1/1] (short) (narrow) %v2645_v33, 16 }
 0x294   : > { %1443 = vxpose.xlu1.b32.start.end [1/1] (short) (narrow) %v1147_v46, 16  ;;  %v8684_v46 = vcombine.high %v15806_v13, %v15806_v13 }
 0x296   : > { %1283 = vxpose.xlu0.b32.start.end [1/1] (short) (narrow) %v1119_v14, 16  ;;  %v15786_v14 = vadd.f32 %v15676_v11, %v15689_v1  ;;  %v15798_v11 = vadd.f32 %v15684_v16, %v15715_v20 }
 0x298   : > { %v7183_v41 = vcombine.high %v15798_v11, %v15798_v11 }
 0x299   : > { %2964 = vxpose.xlu1.b32.start.end [1/1] (short) (narrow) %v2668_v48, 16 }
 0x29b   : > { %2804 = vxpose.xlu0.b32.start.end [1/1] (short) (narrow) %v2640_v36, 16  ;;  %v7181_v36 = vcombine.high %v15786_v14, %v15786_v14 }
 0x29e   : > { %4181 = vxpose.xlu1.b32.start.end [1/1] (short) (narrow) %v4135_v50, 16  ;;  %v15818_v50 = vadd.f32 %v15693_v22, %v15689_v1 }
 0x2a0   : > { %1475 = vxpose.xlu0.b32.start.end [1/1] (short) (narrow) %v1134_v40, 16  ;;  %v5676_v40 = vcombine.high %v5650_v57, %v5650_v57 }
 0x2a3   : > { %5686 = vxpose.xlu1.b32.start.end [1/1] (short) (narrow) %v5640_v52, 16 }
 0x2a5   : > { %2996 = vxpose.xlu0.b32.start.end [1/1] (short) (narrow) %v2655_v43, 16 }
 0x2a8   : > { %4373 = vxpose.xlu1.b32.start.end [1/1] (short) (narrow) %v4150_v53, 16  ;;  %v8686_v53 = vcombine.high %v15818_v50, %v15818_v50 }
 0x2aa   : > { %1411 = vxpose.xlu0.b32.start.end [1/1] (short) (narrow) %v1129_v45, 16 }
 0x2ad   : > { %5878 = vxpose.xlu1.b32.start.end [1/1] (short) (narrow) %v5655_v54, 16 }
 0x2af   : > { %2932 = vxpose.xlu0.b32.start.end [1/1] (short) (narrow) %v2650_v47, 16  ;;  %v5679_v47 = vcombine.high %v5665_v49, %v5665_v49 }
 0x2b2   : > { %4309 = vxpose.xlu1.b32.start.end [1/1] (short) (narrow) %v4145_v55, 16  ;;  %v4173_v55 = vcombine.high %v4155_v3, %v4155_v3 }
 0x2b4   : > { %4245 = vxpose.xlu0.b32.start.end [1/1] (short) (narrow) %v4140_v56, 16 }
 0x2b7   : > { %5814 = vxpose.xlu1.b32.start.end [1/1] (short) (narrow) %v5650_v57, 16  ;;  %v15832_v57 = vadd.f32 %v15691_v19, %v15699_v26 }
 0x2b9   : > { %5750 = vxpose.xlu0.b32.start.end [1/1] (short) (narrow) %v5645_v58, 16 }
 0x2bc   : > { %4501 = vxpose.xlu1.b32.start.end [1/1] (short) (narrow) %v4160_v59, 16  ;;  %v15739_v61 = vpop.f32.mrb[18].mxu0 }
 0x2bd   : > { %v15741_v63 = vpop.f32.mrb[19].mxu0 }
 0x2be   : > { %4277 = vxpose.xlu0.b32.start.end [1/1] (short) (narrow) %v4170_v60, 16 }
 0x2c0   : > { %v15745_v2 = vpop.f32.mrb[20].mxu0 }
 0x2c1   : > { %6006 = vxpose.xlu1.b32.start.end [1/1] (short) (narrow) %v5665_v49, 16  ;;  %v15747_v62 = vpop.f32.mrb[21].mxu0  ;;  %v8687_v49 = vcombine.high %v15832_v57, %v15832_v57 }
 0x2c3   : > { %5782 = vxpose.xlu0.b32.start.end [1/1] (short) (narrow) %v5675_v0, 16 }
 0x2c4   : > { %v15751_v4 = vpop.f32.mrb[18].mxu1  ;;  %v15753_v5 = vpop.f32.mrb[22].mxu0 }
 0x2c5   : > { %21055 = vst [vmem:[#allocation8_spill] sm:$0xff] %v15751_v4  ;;  %v15755_v21 = vpop.f32.mrb[19].mxu1  ;;  %v15757_v24 = vpop.f32.mrb[23].mxu0 }
 0x2c6   : > { %4437 = vxpose.xlu1.b32.start.end [1/1] (short) (narrow) %v4155_v3, 16 }
 0x2c8   : > { %4213 = vxpose.xlu0.b32.start.end [1/1] (short) (narrow) %v4169_v18, 16  ;;  %v15763_v25 = vpop.f32.mrb[20].mxu1 }
 0x2c9   : > { %v15769_v28 = vpop.f32.mrb[21].mxu1 }
 0x2cb   : > { %5942 = vxpose.xlu1.b32.start.end [1/1] (short) (narrow) %v15761_v7, 16 }
 0x2cc   : > { %v15772_v31 = vpop.f32.mrb[22].mxu1 }
 0x2cd   : > { %5718 = vxpose.xlu0.b32.start.end [1/1] (short) (narrow) %v5674_v30, 16  ;;  %v15776_v33 = vpop.f32.mrb[23].mxu1  ;;  %v5678_v30 = vcombine.high %v15761_v7, %v15761_v7 }
 0x2d0   : > { %7223 = vxpose.xlu1.b32.start.end [1/1] (short) (narrow) %v7179_v32, 16  ;;  %v13710_v32 = vmov 1983009808  }
 0x2d1   : > { %v1542_v19 = vunpack.c.l.s4 %v13710_v32 }
 0x2d2   : > { %4405 = vxpose.xlu0.b32.start.end [1/1] (short) (narrow) %v4172_v34, 16  ;;  %v1544_v34 = vlaneseq }
 0x2d5   : > { %7415 = vxpose.xlu1.b32.start.end [1/1] (short) (narrow) %v7182_v9, 16 }
 0x2d7   : > { %5910 = vxpose.xlu0.b32.start.end [1/1] (short) (narrow) %v5677_v35, 16  ;;  %v15846_v35 = vadd.f32 %v15704_v29, %v15715_v20 }
 0x2da   : > { %7351 = vxpose.xlu1.b32.start.end [1/1] (short) (narrow) %v7181_v36, 16 }
 0x2dc   : > { %4341 = vxpose.xlu0.b32.start.end [1/1] (short) (narrow) %v4171_v38, 16 }
 0x2df   : > { %7543 = vxpose.xlu1.b32.start.end [1/1] (short) (narrow) %v7184_v39, 16 }
 0x2e1   : > { %5846 = vxpose.xlu0.b32.start.end [1/1] (short) (narrow) %v5676_v40, 16  ;;  %v1543_v40 = vunpack.c.0.s8 %v1542_v19 }
 0x2ec   : > { %v15802_v43 = vpop.trf.xlu1  ;;  %7479 = vxpose.xlu1.b32.start.end [1/1] (short) (narrow) %v7183_v41, 16  ;;  %v15850_v41 = vshrl.u32 %v1544_v34, 7 }
 0x2ee   : > { %v1235_v44 = vpop.trf.xlu0  ;;  %4533 = vxpose.xlu0.b32.start.end [1/1] (short) (narrow) %v4174_v42, 16  ;;  %v8688_v42 = vcombine.high %v15846_v35, %v15846_v35 }
 0x2f0   : > { %v15808_v45 = vpop.trf.xlu1 }
 0x2f2   : > { %v15812_v16 = vpop.trf.xlu0 }
 0x2f4   : > { %v15814_v48 = vpop.trf.xlu1  ;;  %8728 = vxpose.xlu1.b32.start.end [1/1] (short) (narrow) %v8684_v46, 16 }
 0x2f6   : > { %v15820_v52 = vpop.trf.xlu0  ;;  %6038 = vxpose.xlu0.b32.start.end [1/1] (short) (narrow) %v5679_v47, 16  ;;  %v15867_v47 = vsub.s32 %v1543_v40, %v15850_v41 }
 0x2f8   : > { %v15822_v15 = vpop.trf.xlu1 }
 0x2fa   : > { %v15826_v54 = vpop.trf.xlu0 }
 0x2fc   : > { %v15828_v56 = vpop.trf.xlu1  ;;  %8856 = vxpose.xlu1.b32.start.end [1/1] (short) (narrow) %v8686_v53, 16 }
 0x2fe   : > { %v1171_v22 = vpop.trf.xlu0  ;;  %4469 = vxpose.xlu0.b32.start.end [1/1] (short) (narrow) %v4173_v55, 16 }
 0x2ff   : > { %v1539_v58 = vcombine.low %v1171_v22, %v1235_v44  ;;  %v1540_v59 = vcombine.high %v1171_v22, %v1235_v44  ;;  %v15877_v22 = vadd.f32 %v15701_v27, %v15710_v37 }
 0x300   : > { %v15834_v60 = vpop.trf.xlu1 }
 0x302   : > { %v1172_v0 = vpop.trf.xlu0 }
 0x303   : > { %v1607_v18 = vcombine.low %v1172_v0, %v15812_v16  ;;  %v1608_v3 = vcombine.high %v1172_v0, %v15812_v16  ;;  %v15864_v16 = vadd.f32 %v15670_v51, %v15695_v23  ;;  %v15883_v0 = vrot.slane %v1539_v58, %v15867_v47 }
 0x304   : > { %v15842_v9 = vpop.trf.xlu1  ;;  %8920 = vxpose.xlu1.b32.start.end [1/1] (short) (narrow) %v8687_v49, 16  ;;  %v8689_v58 = vcombine.high %v15877_v22, %v15877_v22 }
 0x305   : > { %v15919_v40 = vrot.slane %v1607_v18, %v15867_v47 }
 0x306   : > { %v2692_v36 = vpop.trf.xlu0  ;;  %5974 = vxpose.xlu0.b32.start.end [1/1] (short) (narrow) %v5678_v30, 16  ;;  %v15886_v30 = vrot.slane %v1540_v59, %v15867_v47 }
 0x307   : > { %v3060_v38 = vcombine.low %v2692_v36, %v15820_v52  ;;  %v3061_v39 = vcombine.high %v2692_v36, %v15820_v52 }
 0x308   : > { %v15852_v7 = vpop.trf.xlu1 }
 0x309   : > { %v15935_v59 = vrot.slane %v3061_v39, %v15867_v47 }
 0x30a   : > { %v15856_v44 = vpop.trf.xlu0 }
 0x30b   : > { %v3128_v29 = vcombine.low %v15856_v44, %v15826_v54  ;;  %v3129_v46 = vcombine.high %v15856_v44, %v15826_v54  ;;  %21059 = vst [vmem:[#allocation12_spill] sm:$0xff] %v15935_v59 }
 0x30c   : > { %v15869_v52 = vpop.trf.xlu1  ;;  %8984 = vxpose.xlu1.b32.start.end [1/1] (short) (narrow) %v8688_v42, 16  ;;  %v15922_v42 = vrot.slane %v1608_v3, %v15867_v47 }
 0x30e   : > { %v1267_v54 = vpop.trf.xlu0  ;;  %7255 = vxpose.xlu0.b32.start.end [1/1] (short) (narrow) %v15864_v16, 16  ;;  %21056 = vst [vmem:[#allocation9_spill] sm:$0xff] %v15922_v42 }
 0x30f   : > { %v1555_v51 = vcombine.low %v15802_v43, %v1267_v54  ;;  %v1556_v49 = vcombine.high %v15802_v43, %v1267_v54  ;;  %v15961_v43 = vadd.f32 %v15741_v63, %v15686_v17 }
 0x310   : > { %v15888_v32 = vpop.trf.xlu1 }
 0x311   : > { %v15891_v19 = vrot.slane %v1555_v51, %v15867_v47  ;;  %v15894_v27 = vrot.slane %v1556_v49, %v15867_v47 }
 0x312   : > { %v1268_v36 = vpop.trf.xlu0 }
 0x313   : > { %v1623_v54 = vcombine.low %v15808_v45, %v1268_v36  ;;  %v1624_v51 = vcombine.high %v15808_v45, %v1268_v36 }
 0x314   : > { %v15912_v49 = vpop.trf.xlu1  ;;  %9048 = vxpose.xlu1.b32.start.end [1/1] (short) (narrow) %v8689_v58, 16  ;;  %v15932_v58 = vrot.slane %v3060_v38, %v15867_v47 }
 0x315   : > { %v15925_v44 = vrot.slane %v1623_v54, %v15867_v47  ;;  %v15928_v45 = vrot.slane %v1624_v51, %v15867_v47 }
 0x316   : > { %v2788_v36 = vpop.trf.xlu0  ;;  %7191 = vxpose.xlu0.b32.start.end [1/1] (short) (narrow) %v15767_v6, 16  ;;  %21058 = vst [vmem:[#allocation11_spill] sm:$0xff] %v15932_v58  ;;  %v15979_v6 = vrot.slane %v3128_v29, %v15867_v47  ;;  %v16012_v29 = vadd.f32 %v15745_v2, %v15699_v26 }
 0x317   : > { %21057 = vst [vmem:[#allocation10_spill] sm:$0xff] %v15928_v45  ;;  %v3076_v18 = vcombine.low %v15814_v48, %v2788_v36  ;;  %v3077_v3 = vcombine.high %v15814_v48, %v2788_v36  ;;  %v7180_v36 = vcombine.high %v15864_v16, %v15864_v16 }
 0x318   : > { %v15947_v38 = vpop.trf.xlu1  ;;  %21062 = vst [vmem:[#allocation15_spill] sm:$0xff] %v15979_v6  ;;  %v21067_v6 = vcombine.high %v15869_v52, %v15828_v56 }
 0x319   : > { %v15950_v39 = vrot.slane %v3076_v18, %v15867_v47  ;;  %v15953_v34 = vrot.slane %v3077_v3, %v15867_v47  ;;  %v15982_v18 = vrot.slane %v3129_v46, %v15867_v47 }
 0x31a   : > { %v2789_v51 = vpop.trf.xlu0 }
 0x31b   : > { %21060 = vst [vmem:[#allocation13_spill] sm:$0xff] %v15950_v39  ;;  %21061 = vst [vmem:[#allocation14_spill] sm:$0xff] %v15953_v34  ;;  %v3144_v48 = vcombine.low %v15822_v15, %v2789_v51  ;;  %v3145_v63 = vcombine.high %v15822_v15, %v2789_v51  ;;  %v16032_v34 = vrot.slane %v21067_v6, %v15867_v47 }
 0x31c   : > { %v15975_v55 = vpop.trf.xlu1  ;;  %10201 = vxpose.xlu1.b32.start.end [1/1] (short) (narrow) %v15961_v43, 16  ;;  %21063 = vst [vmem:[#allocation16_spill] sm:$0xff] %v15982_v18 }
 0x31d   : > { %v15985_v3 = vrot.slane %v3144_v48, %v15867_v47  ;;  %v15988_v54 = vrot.slane %v3145_v63, %v15867_v47  ;;  %v16002_v48 = vadd.f32 %v15747_v62, %v15689_v1 }
 0x31e   : > { %v1363_v16 = vpop.trf.xlu0  ;;  %7287 = vxpose.xlu0.b32.start.end [1/1] (short) (narrow) %v7180_v36, 16 }
 0x31f   : > { %21064 = vst [vmem:[#allocation17_spill] sm:$0xff] %v15985_v3  ;;  %21065 = vst [vmem:[#allocation18_spill] sm:$0xff] %v15988_v54 }
 0x320   : > { %v15998_v53 = vpop.trf.xlu1 }
 0x322   : > { %v1364_v63 = vpop.trf.xlu0 }
 0x324   : > { %v16004_v36 = vpop.trf.xlu1  ;;  %10329 = vxpose.xlu1.b32.start.end [1/1] (short) (narrow) %v16002_v48, 16 }
 0x326   : > { %v2884_v15 = vpop.trf.xlu0  ;;  %7383 = vxpose.xlu0.b32.start.end [1/1] (short) (narrow) %v15780_v8, 16  ;;  %v21066_v8 = vcombine.low %v15869_v52, %v15828_v56  ;;  %v16048_v56 = vadd.f32 %v15757_v24, %v15715_v20  ;;  %v21069_v24 = vcombine.high %v15888_v32, %v15834_v60 }
 0x328   : > { %v16008_v51 = vpop.trf.xlu1  ;;  %v16026_v2 = vrot.slane %v21066_v8, %v15867_v47  ;;  %v16068_v6 = vrot.slane %v21069_v24, %v15867_v47 }
 0x32a   : > { %v2885_v46 = vpop.trf.xlu0  ;;  %21070 = vst [vmem:[#allocation19_spill] sm:$0xff] %v16068_v6 }
 0x32c   : > { %v16014_v54 = vpop.trf.xlu1  ;;  %10393 = vxpose.xlu1.b32.start.end [1/1] (short) (narrow) %v16012_v29, 16 }
 0x32e   : > { %v1299_v3 = vpop.trf.xlu0  ;;  %7319 = vxpose.xlu0.b32.start.end [1/1] (short) (narrow) %v15786_v14, 16 }
 0x32f   : > { %v1675_v59 = vcombine.low %v1299_v3, %v1363_v16  ;;  %v1676_v62 = vcombine.high %v1299_v3, %v1363_v16 }
 0x330   : > { %v16034_v39 = vpop.trf.xlu1 }
 0x331   : > { %v16037_v18 = vrot.slane %v1675_v59, %v15867_v47  ;;  %v16040_v14 = vrot.slane %v1676_v62, %v15867_v47  ;;  %v21068_v62 = vcombine.low %v15888_v32, %v15834_v60  ;;  %v21072_v32 = vcombine.low %v15912_v49, %v15842_v9 }
 0x332   : > { %v1300_v52 = vpop.trf.xlu0 }
 0x333   : > { %v16062_v58 = vrot.slane %v21068_v62, %v15867_v47  ;;  %v1743_v8 = vcombine.low %v1300_v52, %v1364_v63  ;;  %v1744_v59 = vcombine.high %v1300_v52, %v1364_v63  ;;  %v16088_v63 = vrot.slane %v21072_v32, %v15867_v47 }
 0x334   : > { %v16070_v45 = vpop.trf.xlu1  ;;  %10457 = vxpose.xlu1.b32.start.end [1/1] (short) (narrow) %v16048_v56, 16  ;;  %v21074_v52 = vcombine.high %v15912_v49, %v15842_v9 }
 0x335   : > { %v16078_v62 = vrot.slane %v1743_v8, %v15867_v47  ;;  %v16081_v42 = vrot.slane %v1744_v59, %v15867_v47  ;;  %21073 = vst [vmem:[#allocation21_spill] sm:$0xff] %v16088_v63  ;;  %v21078_v59 = vcombine.low %v15947_v38, %v15852_v7 }
 0x336   : > { %v2820_v60 = vpop.trf.xlu0  ;;  %7511 = vxpose.xlu0.b32.start.end [1/1] (short) (narrow) %v15792_v10, 16  ;;  %v16094_v24 = vrot.slane %v21074_v52, %v15867_v47  ;;  %v16118_v52 = vadd.f32 %v15753_v5, %v15710_v37  ;;  %v21080_v5 = vcombine.high %v15947_v38, %v15852_v7 }
 0x337   : > { %21071 = vst [vmem:[#allocation20_spill] sm:$0xff] %v16081_v42  ;;  %v3196_v8 = vcombine.low %v2820_v60, %v2884_v15  ;;  %v3197_v3 = vcombine.high %v2820_v60, %v2884_v15  ;;  %v16132_v60 = vrot.slane %v21078_v59, %v15867_v47 }
 0x338   : > { %21075 = vst [vmem:[#allocation22_spill] sm:$0xff] %v16094_v24  ;;  %v16104_v4 = vpop.trf.xlu1  ;;  %v16138_v32 = vrot.slane %v21080_v5, %v15867_v47 }
 0x339   : > { %v16107_v9 = vrot.slane %v3196_v8, %v15867_v47  ;;  %v16110_v49 = vrot.slane %v3197_v3, %v15867_v47  ;;  %21079 = vst [vmem:[#allocation25_spill] sm:$0xff] %v16132_v60 }
 0x33a   : > { %v2821_v16 = vpop.trf.xlu0  ;;  %21081 = vst [vmem:[#allocation26_spill] sm:$0xff] %v16138_v32  ;;  %v8655_v32 = vadd.f32 %v15678_v12, %v15695_v23 }
 0x33b   : > { %21076 = vst [vmem:[#allocation23_spill] sm:$0xff] %v16107_v9  ;;  %21077 = vst [vmem:[#allocation24_spill] sm:$0xff] %v16110_v49  ;;  %v3264_v15 = vcombine.low %v2821_v16, %v2885_v46  ;;  %v3265_v8 = vcombine.high %v2821_v16, %v2885_v46  ;;  %v16172_v46 = vadd.f32 %v15769_v28, %v15689_v1 }
 0x33c   : > { %v16140_v63 = vpop.trf.xlu1  ;;  %10521 = vxpose.xlu1.b32.start.end [1/1] (short) (narrow) %v16118_v52, 16  ;;  %v21086_v1 = vcombine.high %v16014_v54, %v15975_v55  ;;  %v8685_v9 = vcombine.high %v8655_v32, %v8655_v32 }
 0x33d   : > { %v16144_v10 = vrot.slane %v3264_v15, %v15867_v47  ;;  %v16147_v3 = vrot.slane %v3265_v8, %v15867_v47  ;;  %v16162_v8 = vadd.f32 %v15755_v21, %v15686_v17  ;;  %21084 = vst [vmem:[#allocation29_spill] sm:$0xff] %v16172_v46 }
 0x33e   : > { %v1491_v59 = vpop.trf.xlu0  ;;  %7447 = vxpose.xlu0.b32.start.end [1/1] (short) (narrow) %v15798_v11, 16  ;;  %v16189_v28 = vrot.slane %v21086_v1, %v15867_v47 }
 0x33f   : > { %21082 = vst [vmem:[#allocation27_spill] sm:$0xff] %v16144_v10  ;;  %21083 = vst [vmem:[#allocation28_spill] sm:$0xff] %v16147_v3 }
 0x340   : > { %v16158_v15 = vpop.trf.xlu1 }
 0x342   : > { %v1492_v5 = vpop.trf.xlu0 }
 0x344   : > { %v16164_v11 = vpop.trf.xlu1  ;;  %11706 = vxpose.xlu1.b32.start.end [1/1] (short) (narrow) %v16162_v8, 16 }
 0x346   : > { %v3012_v7 = vpop.trf.xlu0  ;;  %8696 = vxpose.xlu0.b32.start.end [1/1] (short) (narrow) %v15806_v13, 16  ;;  %v21085_v13 = vcombine.low %v16014_v54, %v15975_v55 }
 0x348   : > { %v16168_v38 = vpop.trf.xlu1  ;;  %v16183_v3 = vrot.slane %v21085_v13, %v15867_v47  ;;  %v16201_v13 = vadd.f32 %v15763_v25, %v15699_v26  ;;  %v21089_v26 = vcombine.high %v16034_v39, %v15998_v53 }
 0x34a   : > { %v3013_v16 = vpop.trf.xlu0  ;;  %21087 = vst [vmem:[#allocation30_spill] sm:$0xff] %v16201_v13  ;;  %v16221_v25 = vrot.slane %v21089_v26, %v15867_v47 }
 0x34c   : > { %v16176_v17 = vpop.trf.xlu1  ;;  %11834 = vxpose.xlu1.b32.start.end [1/1] (short) (narrow) %v16172_v46, 16  ;;  %21090 = vst [vmem:[#allocation31_spill] sm:$0xff] %v16221_v25  ;;  %v10160_v46 = vadd.f32 %v15739_v61, %v15695_v23 }
 0x34e   : > { %v1427_v21 = vpop.trf.xlu0  ;;  %8760 = vxpose.xlu0.b32.start.end [1/1] (short) (narrow) %v8655_v32, 16  ;;  %v21088_v32 = vcombine.low %v16034_v39, %v15998_v53  ;;  %v21092_v53 = vcombine.low %v16070_v45, %v16004_v36 }
 0x34f   : > { %v1811_v60 = vcombine.low %v1427_v21, %v1491_v59  ;;  %v1812_v12 = vcombine.high %v1427_v21, %v1491_v59 }
 0x350   : > { %v16191_v10 = vpop.trf.xlu1  ;;  %v16215_v21 = vrot.slane %v21088_v32, %v15867_v47  ;;  %v16236_v39 = vrot.slane %v21092_v53, %v15867_v47 }
 0x351   : > { %v16194_v24 = vrot.slane %v1811_v60, %v15867_v47  ;;  %v16197_v49 = vrot.slane %v1812_v12, %v15867_v47 }
 0x352   : > { %v1428_v6 = vpop.trf.xlu0  ;;  %21093 = vst [vmem:[#allocation33_spill] sm:$0xff] %v16236_v39 }
 0x353   : > { %v1879_v1 = vcombine.low %v1428_v6, %v1492_v5  ;;  %v1880_v12 = vcombine.high %v1428_v6, %v1492_v5  ;;  %v21094_v6 = vcombine.high %v16070_v45, %v16004_v36 }
 0x354   : > { %v16223_v54 = vpop.trf.xlu1  ;;  %11898 = vxpose.xlu1.b32.start.end [1/1] (short) (narrow) %v16201_v13, 16 }
 0x355   : > { %v16227_v60 = vrot.slane %v1879_v1, %v15867_v47  ;;  %v16230_v59 = vrot.slane %v1880_v12, %v15867_v47  ;;  %v16242_v5 = vrot.slane %v21094_v6, %v15867_v47 }
 0x356   : > { %v2948_v32 = vpop.trf.xlu0  ;;  %8792 = vxpose.xlu0.b32.start.end [1/1] (short) (narrow) %v8685_v9, 16 }
 0x357   : > { %21091 = vst [vmem:[#allocation32_spill] sm:$0xff] %v16230_v59  ;;  %21095 = vst [vmem:[#allocation34_spill] sm:$0xff] %v16242_v5  ;;  %v3332_v26 = vcombine.low %v2948_v32, %v3012_v7  ;;  %v3333_v1 = vcombine.high %v2948_v32, %v3012_v7  ;;  %v16262_v7 = vadd.f32 %v15776_v33, %v15715_v20 }
 0x358   : > { %v16252_v13 = vpop.trf.xlu1  ;;  %v21101_v20 = vcombine.high %v16104_v4, %v16008_v51 }
 0x359   : > { %v16255_v45 = vrot.slane %v3332_v26, %v15867_v47  ;;  %v16258_v36 = vrot.slane %v3333_v1, %v15867_v47  ;;  %21098 = vst [vmem:[#allocation37_spill] sm:$0xff] %v16262_v7  ;;  %v21099_v1 = vcombine.low %v16104_v4, %v16008_v51 }
 0x35a   : > { %v2949_v32 = vpop.trf.xlu0  ;;  %v16282_v33 = vrot.slane %v21101_v20, %v15867_v47 }
 0x35b   : > { %21096 = vst [vmem:[#allocation35_spill] sm:$0xff] %v16255_v45  ;;  %21097 = vst [vmem:[#allocation36_spill] sm:$0xff] %v16258_v36  ;;  %v16276_v9 = vrot.slane %v21099_v1, %v15867_v47  ;;  %v3400_v6 = vcombine.low %v2949_v32, %v3013_v16  ;;  %v3401_v55 = vcombine.high %v2949_v32, %v3013_v16 }
 0x35c   : > { %21102 = vst [vmem:[#allocation39_spill] sm:$0xff] %v16282_v33  ;;  %v16284_v12 = vpop.trf.xlu1  ;;  %11962 = vxpose.xlu1.b32.start.end [1/1] (short) (narrow) %v16262_v7, 16 }
 0x35d   : > { %21100 = vst [vmem:[#allocation38_spill] sm:$0xff] %v16276_v9  ;;  %v16292_v1 = vrot.slane %v3400_v6, %v15867_v47  ;;  %v16295_v5 = vrot.slane %v3401_v55, %v15867_v47 }
 0x35e   : > { %v4261_v4 = vpop.trf.xlu0  ;;  %8824 = vxpose.xlu0.b32.start.end [1/1] (short) (narrow) %v15818_v50, 16 }
 0x35f   : > { %21103 = vst [vmem:[#allocation40_spill] sm:$0xff] %v16292_v1  ;;  %21104 = vst [vmem:[#allocation41_spill] sm:$0xff] %v16295_v5  ;;  %v4565_v51 = vcombine.low %v16140_v63, %v4261_v4  ;;  %v4566_v16 = vcombine.high %v16140_v63, %v4261_v4  ;;  %v16316_v4 = vadd.f32 %v15772_v31, %v15710_v37  ;;  %v13711_v1 = vmov 1934713408  }
 0x360   : > { %v16308_v53 = vpop.trf.xlu1  ;;  %v1574_v50 = vunpack.c.l.s4 %v13711_v1 }
 0x361   : > { %21105 = vst [vmem:[#allocation42_spill] sm:$0xff] %v16316_v4  ;;  %v16374_v59 = vrot.slane %v4565_v51, %v15867_v47 }
 0x362   : > { %v16318_v32 = vpop.trf.xlu0  ;;  %v1575_v63 = vunpack.c.0.s8 %v1574_v50 }
 0x363   : > { %v4633_v6 = vcombine.low %v16158_v15, %v16318_v32  ;;  %v4634_v55 = vcombine.high %v16158_v15, %v16318_v32 }
 0x364   : > { %v16324_v20 = vpop.trf.xlu1  ;;  %12026 = vxpose.xlu1.b32.start.end [1/1] (short) (narrow) %v16316_v4, 16  ;;  %v16371_v1 = vsub.s32 %v1575_v63, %v15850_v41  ;;  %v21111_v41 = vcombine.low %v16194_v24, %v16183_v3 }
 0x366   : > { %v16331_v37 = vpop.trf.xlu0  ;;  %8888 = vxpose.xlu0.b32.start.end [1/1] (short) (narrow) %v15832_v57, 16  ;;  %v10189_v57 = vcombine.high %v15961_v43, %v15961_v43  ;;  %v16377_v43 = vrot.slane %v4566_v16, %v15867_v47  ;;  %v16391_v63 = vrot.slane %v21111_v41, %v16371_v1 }
 0x367   : > { %v6070_v31 = vcombine.low %v16164_v11, %v16331_v37  ;;  %v6071_v15 = vcombine.high %v16164_v11, %v16331_v37 }
 0x368   : > { %v16338_v32 = vpop.trf.xlu1  ;;  %21109 = vst [vmem:[#allocation46_spill] sm:$0xff] %v16377_v43  ;;  %21112 = vst [vmem:[#allocation47_spill] sm:$0xff] %v16391_v63 }
 0x36a   : > { %v16344_v33 = vpop.trf.xlu0 }
 0x36c   : > { %v16350_v5 = vpop.trf.xlu1 }
 0x36d   : > { %21106 = vst [vmem:[#allocation43_spill] sm:$0xff] %v16350_v5 }
 0x36e   : > { %v4293_v9 = vpop.trf.xlu0  ;;  %8952 = vxpose.xlu0.b32.start.end [1/1] (short) (narrow) %v15846_v35, 16  ;;  %v21110_v35 = vcombine.low %v16037_v18, %v16026_v2 }
 0x370   : > { %v16353_v11 = vpop.trf.xlu1  ;;  %v16385_v7 = vrot.slane %v21110_v35, %v16371_v1 }
 0x371   : > { %21107 = vst [vmem:[#allocation44_spill] sm:$0xff] %v16353_v11  ;;  %v16418_v11 = vrot.slane %v4633_v6, %v15867_v47 }
 0x372   : > { %v4294_v37 = vpop.trf.xlu0 }
 0x373   : > { %21114 = vst [vmem:[#allocation49_spill] sm:$0xff] %v16418_v11 }
 0x374   : > { %v16355_v26 = vpop.trf.xlu1 }
 0x376   : > { %v5798_v36 = vpop.trf.xlu0  ;;  %9016 = vxpose.xlu0.b32.start.end [1/1] (short) (narrow) %v15877_v22, 16 }
 0x378   : > { %v16358_v4 = vpop.trf.xlu1 }
 0x37a   : > { %v16360_v39 = vpop.trf.xlu0 }
 0x37c   : > { %v16364_v45 = vpop.trf.xlu1 }
 0x37d   : > { %21108 = vst [vmem:[#allocation45_spill] sm:$0xff] %v16364_v45 }
 0x37e   : > { %v4229_v22 = vpop.trf.xlu0  ;;  %10233 = vxpose.xlu0.b32.start.end [1/1] (short) (narrow) %v10189_v57, 16  ;;  %v20675_v57 = vmov 0.0  }
 0x37f   : > { %v4581_v25 = vcombine.low %v4229_v22, %v4293_v9  ;;  %v4582_v50 = vcombine.high %v4229_v22, %v4293_v9  ;;  %v1739_v22 = vcombine.high %v16385_v7, %v20675_v57  ;;  %v1875_v61 = vcombine.high %v16391_v63, %v20675_v57 }
 0x380   : > { %v16379_v42 = vpop.trf.xlu1  ;;  %v21123_v63 = vcombine.low %v16168_v38, %v16344_v33 }
 0x381   : > { %v16394_v9 = vrot.slane %v4581_v25, %v15867_v47  ;;  %v16397_v51 = vrot.slane %v4582_v50, %v15867_v47  ;;  %v16437_v25 = vrot.slane %v6070_v31, %v15867_v47  ;;  %v16440_v50 = vrot.slane %v6071_v15, %v15867_v47 }
 0x382   : > { %v4230_v35 = vpop.trf.xlu0 }
 0x383   : > { %21113 = vst [vmem:[#allocation48_spill] sm:$0xff] %v16397_v51  ;;  %v4649_v16 = vcombine.low %v4230_v35, %v4294_v37  ;;  %v4650_v5 = vcombine.high %v4230_v35, %v4294_v37  ;;  %v16427_v37 = vrot.slane %v4634_v55, %v15867_v47  ;;  %21118 = vst [vmem:[#allocation53_spill] sm:$0xff] %v16437_v25 }
 0x384   : > { %v16413_v45 = vpop.trf.xlu1  ;;  %21119 = vst [vmem:[#allocation54_spill] sm:$0xff] %v16440_v50  ;;  %v21134_v50 = vcombine.low %v16284_v12, %v16176_v17 }
 0x385   : > { %21115 = vst [vmem:[#allocation50_spill] sm:$0xff] %v16427_v37  ;;  %v16430_v35 = vrot.slane %v4649_v16, %v15867_v47  ;;  %v16433_v41 = vrot.slane %v4650_v5, %v15867_v47  ;;  %v10190_v16 = vcombine.high %v10160_v46, %v10160_v46  ;;  %v21143_v37 = vcombine.high %v16308_v53, %v16191_v10 }
 0x386   : > { %v5734_v6 = vpop.trf.xlu0  ;;  %10265 = vxpose.xlu0.b32.start.end [1/1] (short) (narrow) %v10160_v46, 16  ;;  %1952 = vrot.lane.b32.xlu1 %v1739_v22, %s21029_s21  ;;  %v21125_v46 = vcombine.high %v16168_v38, %v16344_v33 }
 0x387   : > { %21116 = vst [vmem:[#allocation51_spill] sm:$0xff] %v16430_v35  ;;  %21117 = vst [vmem:[#allocation52_spill] sm:$0xff] %v16433_v41  ;;  %v6086_v57 = vcombine.low %v5734_v6, %v5798_v36  ;;  %v6087_v55 = vcombine.high %v5734_v6, %v5798_v36 }
 0x388   : > { %v16450_v51 = vpop.trf.xlu1 }
 0x389   : > { %v16453_v31 = vrot.slane %v6086_v57, %v15867_v47  ;;  %v16456_v15 = vrot.slane %v6087_v55, %v15867_v47  ;;  %v16483_v57 = vrot.slane %v21123_v63, %v15867_v47  ;;  %v16489_v55 = vrot.slane %v21125_v46, %v15867_v47 }
 0x38a   : > { %v5735_v5 = vpop.trf.xlu0  ;;  %1954 = vrot.lane.b32.xlu1 %v1875_v61, %s21029_s21  ;;  %v21122_v61 = vcombine.high %v15883_v0, %v15891_v19  ;;  %v21129_v63 = vcombine.high %v16037_v18, %v16026_v2  ;;  %v10191_v18 = vcombine.high %v16002_v48, %v16002_v48 }
 0x38b   : > { %21120 = vst [vmem:[#allocation55_spill] sm:$0xff] %v16453_v31  ;;  %21121 = vst [vmem:[#allocation56_spill] sm:$0xff] %v16456_v15  ;;  %v6154_v36 = vcombine.low %v5735_v5, %v16360_v39  ;;  %v6155_v6 = vcombine.high %v5735_v5, %v16360_v39 }
 0x38c   : > { %v16473_v41 = vpop.trf.xlu1  ;;  %v1586_v22 = vrot.slane %v21122_v61, %v16371_v1  ;;  %21124 = vst [vmem:[#allocation57_spill] sm:$0xff] %v16483_v57  ;;  %21126 = vst [vmem:[#allocation58_spill] sm:$0xff] %v16489_v55  ;;  %v16502_v61 = vrot.slane %v21129_v63, %v16371_v1  ;;  %v21130_v63 = vmov 0.0  }
 0x38d   : > { %v16492_v39 = vrot.slane %v6154_v36, %v15867_v47  ;;  %v16495_v5 = vrot.slane %v6155_v6, %v15867_v47  ;;  %v21131_v36 = vcombine.high %v16194_v24, %v16183_v3  ;;  %v21132_v3 = vcombine.low %v16040_v14, %v16032_v34 }
 0x38e   : > { %v4421_v15 = vpop.trf.xlu0  ;;  %10297 = vxpose.xlu0.b32.start.end [1/1] (short) (narrow) %v10190_v16, 16  ;;  %1962 = vrot.lane.b32.xlu1 %v1586_v22, %s21024_s25  ;;  %v1604_v38 = vcombine.high %v1586_v22, %v21130_v63  ;;  %v10192_v22 = vcombine.high %v16012_v29, %v16012_v29 }
 0x38f   : > { %21127 = vst [vmem:[#allocation59_spill] sm:$0xff] %v16492_v39  ;;  %21128 = vst [vmem:[#allocation60_spill] sm:$0xff] %v16495_v5  ;;  %v16525_v33 = vrot.slane %v21131_v36, %v16371_v1  ;;  %v16543_v36 = vrot.slane %v21132_v3, %v16371_v1 }
 0x390   : > { %v16512_v6 = vpop.trf.xlu1 }
 0x391   : > { %v1876_v48 = vcombine.high %v16525_v33, %v21130_v63 }
 0x392   : > { %v4422_v46 = vpop.trf.xlu0  ;;  %1964 = vrot.lane.b32.xlu1 %v16502_v61, %s21024_s25 }
 0x394   : > { %v16518_v2 = vpop.trf.xlu1 }
 0x396   : > { %v5926_v16 = vpop.trf.xlu0  ;;  %10361 = vxpose.xlu0.b32.start.end [1/1] (short) (narrow) %v10191_v18, 16  ;;  %1974 = vrot.lane.b32.xlu1 %v1604_v38, %s21018_s28  ;;  %v21133_v38 = vcombine.low %v15886_v30, %v15894_v27 }
 0x398   : > { %v16528_v5 = vpop.trf.xlu1  ;;  %v16549_v18 = vrot.slane %v21133_v38, %v16371_v1  ;;  %v16561_v38 = vrot.slane %v21134_v50, %v15867_v47 }
 0x39a   : > { %v16532_v55 = vpop.trf.xlu0  ;;  %1978 = vrot.lane.b32.xlu1 %v1876_v48, %s21018_s28  ;;  %21135 = vst [vmem:[#allocation61_spill] sm:$0xff] %v16561_v38  ;;  %v21136_v48 = vcombine.high %v16284_v12, %v16176_v17  ;;  %v10193_v17 = vcombine.high %v16048_v56, %v16048_v56 }
 0x39c   : > { %v16537_v24 = vpop.trf.xlu1  ;;  %v16567_v31 = vrot.slane %v21136_v48, %v15867_v47 }
 0x39e   : > { %v4357_v39 = vpop.trf.xlu0  ;;  %10425 = vxpose.xlu0.b32.start.end [1/1] (short) (narrow) %v10192_v22, 16  ;;  %1988 = vrot.lane.b32.xlu1 %v16543_v36, %s21016_s29  ;;  %21137 = vst [vmem:[#allocation62_spill] sm:$0xff] %v16567_v31  ;;  %v1605_v22 = vcombine.high %v16549_v18, %v21130_v63 }
 0x39f   : > { %v4717_v3 = vcombine.low %v4357_v39, %v4421_v15  ;;  %v4718_v57 = vcombine.high %v4357_v39, %v4421_v15  ;;  %v21138_v15 = vcombine.low %v16197_v49, %v16189_v28 }
 0x3a0   : > { %v16569_v29 = vpop.trf.xlu1 }
 0x3a1   : > { %v16577_v39 = vrot.slane %v21138_v15, %v16371_v1  ;;  %v16580_v50 = vrot.slane %v4717_v3, %v15867_v47  ;;  %v16583_v25 = vrot.slane %v4718_v57, %v15867_v47  ;;  %v21141_v15 = vcombine.low %v16308_v53, %v16191_v10 }
 0x3a2   : > { %v4358_v48 = vpop.trf.xlu0  ;;  %1998 = vrot.lane.b32.xlu1 %v1605_v22, %s20857_s5  ;;  %v16614_v57 = vrot.slane %v21143_v37, %v15867_v47  ;;  %v21148_v10 = vcombine.high %v15886_v30, %v15894_v27  ;;  %v21149_v30 = vcombine.low %v16324_v20, %v16223_v54 }
 0x3a3   : > { %21139 = vst [vmem:[#allocation63_spill] sm:$0xff] %v16580_v50  ;;  %21140 = vst [vmem:[#allocation64_spill] sm:$0xff] %v16583_v25  ;;  %v4785_v12 = vcombine.low %v4358_v48, %v4422_v46  ;;  %v4786_v35 = vcombine.high %v4358_v48, %v4422_v46  ;;  %v1877_v22 = vcombine.high %v16577_v39, %v21130_v63 }
 0x3a4   : > { %v16600_v11 = vpop.trf.xlu1  ;;  %v16608_v3 = vrot.slane %v21141_v15, %v15867_v47  ;;  %21144 = vst [vmem:[#allocation66_spill] sm:$0xff] %v16614_v57  ;;  %v21147_v15 = vcombine.high %v16040_v14, %v16032_v34  ;;  %v16633_v53 = vrot.slane %v21148_v10, %v16371_v1  ;;  %v16649_v27 = vrot.slane %v21149_v30, %v15867_v47 }
 0x3a5   : > { %v16617_v56 = vrot.slane %v4785_v12, %v15867_v47  ;;  %v16620_v46 = vrot.slane %v4786_v35, %v15867_v47  ;;  %v21155_v10 = vcombine.high %v16197_v49, %v16189_v28 }
 0x3a6   : > { %21142 = vst [vmem:[#allocation65_spill] sm:$0xff] %v16608_v3  ;;  %v5862_v48 = vpop.trf.xlu0  ;;  %10489 = vxpose.xlu0.b32.start.end [1/1] (short) (narrow) %v10193_v17, 16  ;;  %2002 = vrot.lane.b32.xlu1 %v1877_v22, %s20857_s5  ;;  %v16627_v43 = vrot.slane %v21147_v15, %v16371_v1  ;;  %21150 = vst [vmem:[#allocation69_spill] sm:$0xff] %v16649_v27  ;;  %v21151_v17 = vcombine.high %v16324_v20, %v16223_v54 }
 0x3a7   : > { %21145 = vst [vmem:[#allocation67_spill] sm:$0xff] %v16617_v56  ;;  %21146 = vst [vmem:[#allocation68_spill] sm:$0xff] %v16620_v46  ;;  %v6222_v25 = vcombine.low %v5862_v48, %v5926_v16  ;;  %v6223_v31 = vcombine.high %v5862_v48, %v5926_v16  ;;  %v16669_v30 = vrot.slane %v21155_v10, %v16371_v1 }
 0x3a8   : > { %v16643_v14 = vpop.trf.xlu1  ;;  %v16655_v12 = vrot.slane %v21151_v17, %v15867_v47  ;;  %v10194_v17 = vcombine.high %v16118_v52, %v16118_v52  ;;  %v1606_v10 = vcombine.high %v16633_v53, %v21130_v63  ;;  %v21156_v54 = vcombine.low %v16338_v32, %v16252_v13 }
 0x3a9   : > { %v16658_v22 = vrot.slane %v6222_v25, %v15867_v47  ;;  %v16661_v48 = vrot.slane %v6223_v31, %v15867_v47  ;;  %v1878_v35 = vcombine.high %v16669_v30, %v21130_v63 }
 0x3aa   : > { %21152 = vst [vmem:[#allocation70_spill] sm:$0xff] %v16655_v12  ;;  %v5863_v15 = vpop.trf.xlu0  ;;  %2012 = vrot.lane.b32.xlu1 %v16627_v43, %s20871_s6  ;;  %v16691_v25 = vrot.slane %v21156_v54, %v15867_v47  ;;  %v21166_v12 = vcombine.high %v15919_v40, %v15925_v44 }
 0x3ab   : > { %21153 = vst [vmem:[#allocation71_spill] sm:$0xff] %v16658_v22  ;;  %21154 = vst [vmem:[#allocation72_spill] sm:$0xff] %v16661_v48  ;;  %v6290_v34 = vcombine.low %v5863_v15, %v16532_v55  ;;  %v6291_v49 = vcombine.high %v5863_v15, %v16532_v55  ;;  %v21158_v55 = vcombine.high %v16338_v32, %v16252_v13 }
 0x3ac   : > { %v16683_v28 = vpop.trf.xlu1  ;;  %21157 = vst [vmem:[#allocation73_spill] sm:$0xff] %v16691_v25  ;;  %v11694_v13 = vcombine.high %v16162_v8, %v16162_v8  ;;  %v21162_v32 = vcombine.low %v15919_v40, %v15925_v44  ;;  %v21164_v8 = vcombine.low %v16227_v60, %v16215_v21  ;;  %v16769_v22 = vrot.slane %v21166_v12, %v16371_v1 }
 0x3ad   : > { %v16701_v15 = vrot.slane %v21158_v55, %v15867_v47  ;;  %v16704_v20 = vrot.slane %v6290_v34, %v15867_v47  ;;  %v16707_v16 = vrot.slane %v6291_v49, %v15867_v47 }
 0x3ae   : > { %v4549_v54 = vpop.trf.xlu0  ;;  %10553 = vxpose.xlu0.b32.start.end [1/1] (short) (narrow) %v10194_v17, 16  ;;  %2022 = vrot.lane.b32.xlu1 %v1606_v10, %s21022_s30  ;;  %v16733_v37 = vrot.slane %v21162_v32, %v16371_v1  ;;  %v21163_v17 = vcombine.low %v16078_v62, %v16062_v58  ;;  %v1672_v46 = vcombine.high %v16769_v22, %v21130_v63 }
 0x3af   : > { %21159 = vst [vmem:[#allocation74_spill] sm:$0xff] %v16701_v15  ;;  %21160 = vst [vmem:[#allocation75_spill] sm:$0xff] %v16704_v20 }
 0x3b0   : > { %21161 = vst [vmem:[#allocation76_spill] sm:$0xff] %v16707_v16  ;;  %v16720_v49 = vpop.trf.xlu1  ;;  %v16741_v52 = vrot.slane %v21163_v17, %v16371_v1  ;;  %v1671_v31 = vcombine.high %v16733_v37, %v21130_v63 }
 0x3b2   : > { %v4550_v55 = vpop.trf.xlu0  ;;  %2026 = vrot.lane.b32.xlu1 %v1878_v35, %s21022_s30  ;;  %v16749_v35 = vrot.slane %v21164_v8, %v16371_v1 }
 0x3b4   : > { %v16735_v34 = vpop.trf.xlu1  ;;  %v1943_v20 = vcombine.high %v16749_v35, %v21130_v63 }
 0x3b6   : > { %v6054_v10 = vpop.trf.xlu0  ;;  %11738 = vxpose.xlu0.b32.start.end [1/1] (short) (narrow) %v11694_v13, 16  ;;  %2036 = vrot.lane.b32.xlu1 %v16741_v52, %s20967_s7  ;;  %v21165_v13 = vld [vmem:[#allocation8_spill] sm:$0xff] }
 0x3b7   : > { %v11665_v17 = vadd.f32 %v21165_v13, %v15695_v23  ;;  %v21167_v23 = vcombine.high %v16227_v60, %v16215_v21 }
 0x3b8   : > { %v16751_v32 = vpop.trf.xlu1 }
 0x3ba   : > { %v16755_v16 = vpop.trf.xlu0  ;;  %2046 = vrot.lane.b32.xlu1 %v1671_v31, %s21020_s8  ;;  %v16775_v31 = vrot.slane %v21167_v23, %v16371_v1 }
 0x3bc   : > { %v16760_v15 = vpop.trf.xlu1 }
 0x3be   : > { %v4485_v8 = vpop.trf.xlu0  ;;  %11770 = vxpose.xlu0.b32.start.end [1/1] (short) (narrow) %v11665_v17, 16  ;;  %2050 = vrot.lane.b32.xlu1 %v1943_v20, %s21020_s8  ;;  %v21168_v20 = vcombine.high %v16078_v62, %v16062_v58  ;;  %v21176_v62 = vld [vmem:[#allocation44_spill] sm:$0xff] }
 0x3bf   : > { %v4853_v25 = vcombine.low %v4485_v8, %v4549_v54  ;;  %v4854_v48 = vcombine.high %v4485_v8, %v4549_v54  ;;  %v21170_v54 = vld [vmem:[#allocation45_spill] sm:$0xff]  ;;  %v21171_v8 = vld [vmem:[#allocation43_spill] sm:$0xff]  ;;  %v21177_v57 = vcombine.low %v16379_v42, %v21176_v62 }
 0x3c0   : > { %v16777_v13 = vpop.trf.xlu1  ;;  %v16783_v27 = vrot.slane %v21168_v20, %v16371_v1  ;;  %v21172_v40 = vcombine.low %v21170_v54, %v21171_v8  ;;  %v21173_v60 = vcombine.high %v21170_v54, %v21171_v8  ;;  %v11695_v8 = vcombine.high %v11665_v17, %v11665_v17 }
 0x3c1   : > { %v16798_v12 = vrot.slane %v4853_v25, %v15867_v47  ;;  %v16801_v23 = vrot.slane %v4854_v48, %v15867_v47  ;;  %v16821_v56 = vrot.slane %v21177_v57, %v15867_v47  ;;  %v21179_v17 = vcombine.high %v16379_v42, %v21176_v62 }
 0x3c2   : > { %21169 = vst [vmem:[#allocation8_spill] sm:$0xff] %v16783_v27  ;;  %v16789_v44 = vrot.slane %v21172_v40, %v15867_v47  ;;  %v16795_v21 = vrot.slane %v21173_v60, %v15867_v47  ;;  %v4486_v58 = vpop.trf.xlu0  ;;  %2060 = vrot.lane.b32.xlu1 %v16783_v27, %s20981_s9  ;;  %v21183_v25 = vcombine.low %v16413_v45, %v16355_v26 }
 0x3c3   : > { %21175 = vst [vmem:[#allocation43_spill] sm:$0xff] %v16801_v23  ;;  %v4921_v48 = vcombine.low %v4486_v58, %v4550_v55  ;;  %v4922_v40 = vcombine.high %v4486_v58, %v4550_v55  ;;  %21178 = vst [vmem:[#allocation44_spill] sm:$0xff] %v16821_v56  ;;  %v1944_v55 = vcombine.high %v16775_v31, %v21130_v63  ;;  %v21195_v56 = vld [vmem:[#allocation19_spill] sm:$0xff] }
 0x3c4   : > { %21174 = vst [vmem:[#allocation45_spill] sm:$0xff] %v16795_v21  ;;  %v16813_v60 = vpop.trf.xlu1  ;;  %v16833_v58 = vrot.slane %v21179_v17, %v15867_v47  ;;  %v16846_v54 = vrot.slane %v21183_v25, %v15867_v47  ;;  %v21185_v42 = vcombine.high %v16413_v45, %v16355_v26  ;;  %v21190_v17 = vld [vmem:[#allocation10_spill] sm:$0xff] }
 0x3c5   : > { %v16836_v20 = vrot.slane %v4921_v48, %v15867_v47  ;;  %v16839_v57 = vrot.slane %v4922_v40, %v15867_v47 }
 0x3c6   : > { %21180 = vst [vmem:[#allocation77_spill] sm:$0xff] %v16833_v58  ;;  %v5990_v3 = vpop.trf.xlu0  ;;  %11802 = vxpose.xlu0.b32.start.end [1/1] (short) (narrow) %v11695_v8, 16  ;;  %2070 = vrot.lane.b32.xlu1 %v1672_v46, %s21031_s10  ;;  %21184 = vst [vmem:[#allocation80_spill] sm:$0xff] %v16846_v54  ;;  %v16852_v62 = vrot.slane %v21185_v42, %v15867_v47  ;;  %v21189_v42 = vld [vmem:[#allocation9_spill] sm:$0xff] }
 0x3c7   : > { %21181 = vst [vmem:[#allocation78_spill] sm:$0xff] %v16836_v20  ;;  %21182 = vst [vmem:[#allocation79_spill] sm:$0xff] %v16839_v57  ;;  %v6358_v48 = vcombine.low %v5990_v3, %v6054_v10  ;;  %v6359_v40 = vcombine.high %v5990_v3, %v6054_v10  ;;  %v21191_v46 = vcombine.low %v21189_v42, %v21190_v17  ;;  %v21193_v57 = vld [vmem:[#allocation29_spill] sm:$0xff] }
 0x3c8   : > { %21186 = vst [vmem:[#allocation81_spill] sm:$0xff] %v16852_v62  ;;  %v16862_v23 = vpop.trf.xlu1  ;;  %v11696_v58 = vcombine.high %v21193_v57, %v21193_v57  ;;  %v21198_v3 = vcombine.low %v16450_v51, %v16358_v4  ;;  %v21200_v57 = vcombine.high %v16450_v51, %v16358_v4  ;;  %v21205_v62 = vld [vmem:[#allocation31_spill] sm:$0xff] }
 0x3c9   : > { %v16865_v45 = vrot.slane %v6358_v48, %v15867_v47  ;;  %v16868_v26 = vrot.slane %v6359_v40, %v15867_v47  ;;  %v16878_v8 = vrot.slane %v21191_v46, %v16371_v1  ;;  %v21194_v48 = vld [vmem:[#allocation20_spill] sm:$0xff] }
 0x3ca   : > { %v5991_v25 = vpop.trf.xlu0  ;;  %2074 = vrot.lane.b32.xlu1 %v1944_v55, %s21031_s10  ;;  %v21196_v21 = vcombine.low %v21194_v48, %v21195_v56  ;;  %v16905_v10 = vrot.slane %v21198_v3, %v15867_v47  ;;  %v21204_v3 = vld [vmem:[#allocation32_spill] sm:$0xff] }
 0x3cb   : > { %21187 = vst [vmem:[#allocation82_spill] sm:$0xff] %v16865_v45  ;;  %21188 = vst [vmem:[#allocation83_spill] sm:$0xff] %v16868_v26  ;;  %v6426_v46 = vcombine.low %v5991_v25, %v16755_v16  ;;  %v6427_v20 = vcombine.high %v5991_v25, %v16755_v16  ;;  %v16911_v26 = vrot.slane %v21200_v57, %v15867_v47 }
 0x3cc   : > { %21192 = vst [vmem:[#allocation9_spill] sm:$0xff] %v16878_v8  ;;  %v16893_v55 = vpop.trf.xlu1  ;;  %v16899_v40 = vrot.slane %v21196_v21, %v16371_v1  ;;  %21199 = vst [vmem:[#allocation29_spill] sm:$0xff] %v16905_v10  ;;  %v21206_v45 = vcombine.low %v21204_v3, %v21205_v62  ;;  %v1673_v4 = vcombine.high %v16878_v8, %v21130_v63 }
 0x3cd   : > { %21201 = vst [vmem:[#allocation20_spill] sm:$0xff] %v16911_v26  ;;  %v16914_v16 = vrot.slane %v6426_v46, %v15867_v47  ;;  %v16917_v25 = vrot.slane %v6427_v20, %v15867_v47 }
 0x3ce   : > { %21197 = vst [vmem:[#allocation10_spill] sm:$0xff] %v16899_v40  ;;  %v7271_v21 = vpop.trf.xlu0  ;;  %11866 = vxpose.xlu0.b32.start.end [1/1] (short) (narrow) %v11696_v58, 16  ;;  %2084 = vrot.lane.b32.xlu1 %v16899_v40, %s20768_s11  ;;  %v16925_v54 = vrot.slane %v21206_v45, %v16371_v1  ;;  %v21208_v45 = vld [vmem:[#allocation30_spill] sm:$0xff]  ;;  %v21211_v58 = vcombine.high %v21194_v48, %v21195_v56  ;;  %s20925_s11 = smov 60  }
 0x3cf   : > { %21202 = vst [vmem:[#allocation19_spill] sm:$0xff] %v16914_v16  ;;  %21203 = vst [vmem:[#allocation84_spill] sm:$0xff] %v16917_v25  ;;  %v11697_v8 = vcombine.high %v21208_v45, %v21208_v45  ;;  %v21209_v45 = vcombine.high %v21189_v42, %v21190_v17  ;;  %v21214_v56 = vcombine.high %v21204_v3, %v21205_v62  ;;  %v21218_v3 = vld [vmem:[#allocation23_spill] sm:$0xff] }
 0x3d0   : > { %21207 = vst [vmem:[#allocation32_spill] sm:$0xff] %v16925_v54  ;;  %v16937_v57 = vpop.trf.xlu1  ;;  %v1945_v20 = vcombine.high %v16925_v54, %v21130_v63  ;;  %v16963_v10 = vrot.slane %v21211_v58, %v16371_v1  ;;  %v21227_v54 = vld [vmem:[#allocation33_spill] sm:$0xff] }
 0x3d1   : > { %v16955_v26 = vrot.slane %v21209_v45, %v16371_v1  ;;  %v16977_v48 = vrot.slane %v21214_v56, %v16371_v1  ;;  %v21219_v56 = vld [vmem:[#allocation21_spill] sm:$0xff] }
 0x3d2   : > { %v7272_v40 = vpop.trf.xlu0  ;;  %2094 = vrot.lane.b32.xlu1 %v1673_v4, %s20766_s20  ;;  %21212 = vst [vmem:[#allocation30_spill] sm:$0xff] %v16963_v10  ;;  %v21220_v46 = vcombine.low %v21218_v3, %v21219_v56 }
 0x3d3   : > { %21210 = vst [vmem:[#allocation31_spill] sm:$0xff] %v16955_v26  ;;  %v1946_v62 = vcombine.high %v16977_v48, %v21130_v63 }
 0x3d4   : > { %v16942_v50 = vpop.trf.xlu1 }
 0x3d6   : > { %v7207_v51 = vpop.trf.xlu0  ;;  %11930 = vxpose.xlu0.b32.start.end [1/1] (short) (narrow) %v11697_v8, 16  ;;  %2098 = vrot.lane.b32.xlu1 %v1945_v20, %s20766_s20  ;;  %s20921_s20 = smov 56   ;;  %v21213_v20 = vld [vmem:[#allocation37_spill] sm:$0xff] }
 0x3d7   : > { %v7575_v25 = vcombine.low %v7207_v51, %v7271_v21  ;;  %v7576_v4 = vcombine.high %v7207_v51, %v7271_v21  ;;  %v11698_v45 = vcombine.high %v21213_v20, %v21213_v20  ;;  %21215 = vst [vmem:[#allocation37_spill] sm:$0xff] %v16977_v48  ;;  %v1674_v21 = vcombine.high %v16955_v26, %v21130_v63  ;;  %v21226_v48 = vld [vmem:[#allocation35_spill] sm:$0xff] }
 0x3d8   : > { %v16957_v16 = vpop.trf.xlu1 }
 0x3da   : > { %v7208_v51 = vpop.trf.xlu0  ;;  %2108 = vrot.lane.b32.xlu1 %v16963_v10, %s20921_s20  ;;  %v16994_v10 = vrot.slane %v21220_v46, %v16371_v1  ;;  %v21228_v46 = vcombine.low %v21226_v48, %v21227_v54 }
 0x3db   : > { %v7643_v17 = vcombine.low %v7208_v51, %v7272_v40  ;;  %v7644_v42 = vcombine.high %v7208_v51, %v7272_v40 }
 0x3dc   : > { %v16979_v58 = vpop.trf.xlu1  ;;  %21221 = vst [vmem:[#allocation23_spill] sm:$0xff] %v16994_v10 }
 0x3dd   : > { %21216 = vst [vmem:[#allocation85_spill] sm:$0xff] %v16979_v58  ;;  %v21230_v58 = vld [vmem:[#allocation42_spill] sm:$0xff] }
 0x3de   : > { %v7303_v8 = vpop.trf.xlu0  ;;  %11994 = vxpose.xlu0.b32.start.end [1/1] (short) (narrow) %v11698_v45, 16  ;;  %2118 = vrot.lane.b32.xlu1 %v1674_v21, %s20925_s11  ;;  %v16997_v45 = vrot.slane %v7575_v25, %v15867_v47  ;;  %v17000_v21 = vrot.slane %v7576_v4, %v15867_v47  ;;  %v3260_v25 = vcombine.high %v16994_v10, %v21130_v63  ;;  %v21235_v10 = vld [vmem:[#allocation11_spill] sm:$0xff] }
 0x3df   : > { %v7591_v40 = vcombine.low %v16473_v41, %v7303_v8  ;;  %v7592_v51 = vcombine.high %v16473_v41, %v7303_v8  ;;  %v17032_v4 = vrot.slane %v7643_v17, %v15867_v47 }
 0x3e0   : > { %v16986_v20 = vpop.trf.xlu1  ;;  %21222 = vst [vmem:[#allocation21_spill] sm:$0xff] %v16997_v45  ;;  %21223 = vst [vmem:[#allocation87_spill] sm:$0xff] %v17000_v21  ;;  %v21236_v21 = vld [vmem:[#allocation13_spill] sm:$0xff] }
 0x3e1   : > { %21217 = vst [vmem:[#allocation86_spill] sm:$0xff] %v16986_v20  ;;  %v17003_v26 = vrot.slane %v7591_v40, %v15867_v47  ;;  %v17006_v41 = vrot.slane %v7592_v51, %v15867_v47  ;;  %v17013_v20 = vrot.slane %v21228_v46, %v16371_v1  ;;  %21231 = vst [vmem:[#allocation33_spill] sm:$0xff] %v17032_v4 }
 0x3e2   : > { %v7304_v8 = vpop.trf.xlu0  ;;  %2122 = vrot.lane.b32.xlu1 %v1946_v62, %s20925_s11  ;;  %v11699_v62 = vcombine.high %v21230_v58, %v21230_v58  ;;  %v17035_v40 = vrot.slane %v7644_v42, %v15867_v47  ;;  %v21237_v17 = vcombine.high %v21235_v10, %v21236_v21 }
 0x3e3   : > { %21224 = vst [vmem:[#allocation88_spill] sm:$0xff] %v17003_v26  ;;  %21225 = vst [vmem:[#allocation89_spill] sm:$0xff] %v17006_v41  ;;  %v7659_v38 = vcombine.low %v16512_v6, %v7304_v8  ;;  %v7660_v46 = vcombine.high %v16512_v6, %v7304_v8  ;;  %v3396_v6 = vcombine.high %v17013_v20, %v21130_v63 }
 0x3e4   : > { %21229 = vst [vmem:[#allocation35_spill] sm:$0xff] %v17013_v20  ;;  %v17027_v27 = vpop.trf.xlu1  ;;  %21232 = vst [vmem:[#allocation42_spill] sm:$0xff] %v17035_v40  ;;  %v17063_v26 = vrot.slane %v21237_v17, %v16371_v1  ;;  %v21239_v40 = vcombine.low %v16537_v24, %v16518_v2  ;;  %v21241_v17 = vcombine.high %v16537_v24, %v16518_v2 }
 0x3e5   : > { %v17038_v51 = vrot.slane %v7659_v38, %v15867_v47  ;;  %v17041_v58 = vrot.slane %v7660_v46, %v15867_v47  ;;  %v21244_v38 = vcombine.high %v21226_v48, %v21227_v54 }
 0x3e6   : > { %v7399_v41 = vpop.trf.xlu0  ;;  %12058 = vxpose.xlu0.b32.start.end [1/1] (short) (narrow) %v11699_v62, 16  ;;  %3473 = vrot.lane.b32.xlu1 %v3260_v25, %s21029_s21  ;;  %21238 = vst [vmem:[#allocation11_spill] sm:$0xff] %v17063_v26  ;;  %v17081_v42 = vrot.slane %v21241_v17, %v15867_v47 }
 0x3e7   : > { %21233 = vst [vmem:[#allocation90_spill] sm:$0xff] %v17038_v51  ;;  %21234 = vst [vmem:[#allocation91_spill] sm:$0xff] %v17041_v58  ;;  %v17075_v51 = vrot.slane %v21239_v40, %v15867_v47  ;;  %v17089_v45 = vrot.slane %v21244_v38, %v16371_v1 }
 0x3e8   : > { %v17054_v46 = vpop.trf.xlu1  ;;  %21242 = vst [vmem:[#allocation92_spill] sm:$0xff] %v17081_v42  ;;  %v21256_v42 = vld [vmem:[#allocation12_spill] sm:$0xff] }
 0x3e9   : > { %21240 = vst [vmem:[#allocation13_spill] sm:$0xff] %v17075_v51  ;;  %21245 = vst [vmem:[#allocation94_spill] sm:$0xff] %v17089_v45 }
 0x3ea   : > { %v7400_v62 = vpop.trf.xlu0  ;;  %3475 = vrot.lane.b32.xlu1 %v3396_v6, %s21029_s21 }
 0x3ec   : > { %v17057_v25 = vpop.trf.xlu1 }
 0x3ee   : > { %v7335_v8 = vpop.trf.xlu0  ;;  %3483 = vrot.lane.b32.xlu1 %v17063_v26, %s21024_s25 }
 0x3ef   : > { %v7711_v58 = vcombine.low %v7335_v8, %v7399_v41  ;;  %v7712_v6 = vcombine.high %v7335_v8, %v7399_v41  ;;  %v21246_v41 = vcombine.high %v21218_v3, %v21219_v56  ;;  %v21250_v3 = vcombine.low %v16569_v29, %v16528_v5 }
 0x3f0   : > { %v17083_v4 = vpop.trf.xlu1 }
 0x3f1   : > { %21243 = vst [vmem:[#allocation93_spill] sm:$0xff] %v17083_v4  ;;  %v17095_v40 = vrot.slane %v21246_v41, %v16371_v1  ;;  %v17098_v8 = vrot.slane %v7711_v58, %v15867_v47  ;;  %v17101_v2 = vrot.slane %v7712_v6, %v15867_v47  ;;  %v17125_v24 = vrot.slane %v21250_v3, %v15867_v47 }
 0x3f2   : > { %v7336_v48 = vpop.trf.xlu0  ;;  %3487 = vrot.lane.b32.xlu1 %v17089_v45, %s21024_s25  ;;  %v21252_v58 = vcombine.high %v16569_v29, %v16528_v5  ;;  %v21262_v5 = vld [vmem:[#allocation34_spill] sm:$0xff]  ;;  %v21265_v29 = vld [vmem:[#allocation24_spill] sm:$0xff] }
 0x3f3   : > { %21247 = vst [vmem:[#allocation95_spill] sm:$0xff] %v17095_v40  ;;  %21248 = vst [vmem:[#allocation96_spill] sm:$0xff] %v17098_v8  ;;  %v7779_v6 = vcombine.low %v7336_v48, %v7400_v62  ;;  %v7780_v17 = vcombine.high %v7336_v48, %v7400_v62  ;;  %v3261_v54 = vcombine.high %v17095_v40, %v21130_v63  ;;  %v21261_v8 = vld [vmem:[#allocation36_spill] sm:$0xff] }
 0x3f4   : > { %21249 = vst [vmem:[#allocation97_spill] sm:$0xff] %v17101_v2  ;;  %v17117_v41 = vpop.trf.xlu1  ;;  %21251 = vst [vmem:[#allocation98_spill] sm:$0xff] %v17125_v24  ;;  %v17131_v56 = vrot.slane %v21252_v58, %v15867_v47  ;;  %v21257_v2 = vld [vmem:[#allocation14_spill] sm:$0xff]  ;;  %v21263_v20 = vcombine.low %v21261_v8, %v21262_v5 }
 0x3f5   : > { %v17134_v38 = vrot.slane %v7779_v6, %v15867_v47  ;;  %v17137_v62 = vrot.slane %v7780_v17, %v15867_v47  ;;  %v21258_v3 = vcombine.low %v21256_v42, %v21257_v2  ;;  %v21266_v58 = vld [vmem:[#allocation22_spill] sm:$0xff] }
 0x3f6   : > { %21253 = vst [vmem:[#allocation99_spill] sm:$0xff] %v17131_v56  ;;  %v7527_v48 = vpop.trf.xlu0  ;;  %3497 = vrot.lane.b32.xlu1 %v3261_v54, %s21018_s28  ;;  %v17164_v45 = vrot.slane %v21263_v20, %v16371_v1  ;;  %v21267_v24 = vcombine.low %v21265_v29, %v21266_v58  ;;  %v21269_v20 = vcombine.low %v16683_v28, %v16600_v11 }
 0x3f7   : > { %21254 = vst [vmem:[#allocation100_spill] sm:$0xff] %v17134_v38  ;;  %21255 = vst [vmem:[#allocation101_spill] sm:$0xff] %v17137_v62  ;;  %v17144_v51 = vrot.slane %v21258_v3, %v16371_v1 }
 0x3f8   : > { %v17154_v17 = vpop.trf.xlu1  ;;  %21264 = vst [vmem:[#allocation36_spill] sm:$0xff] %v17164_v45  ;;  %v17170_v38 = vrot.slane %v21267_v24, %v16371_v1  ;;  %v17182_v40 = vrot.slane %v21269_v20, %v15867_v47  ;;  %v21271_v24 = vcombine.high %v16683_v28, %v16600_v11 }
 0x3f9   : > { %21259 = vst [vmem:[#allocation12_spill] sm:$0xff] %v17144_v51 }
 0x3fa   : > { %v7528_v54 = vpop.trf.xlu0  ;;  %3507 = vrot.lane.b32.xlu1 %v17144_v51, %s21016_s29  ;;  %21268 = vst [vmem:[#allocation34_spill] sm:$0xff] %v17170_v38  ;;  %21270 = vst [vmem:[#allocation24_spill] sm:$0xff] %v17182_v40  ;;  %v17188_v6 = vrot.slane %v21271_v24, %v15867_v47  ;;  %v3262_v56 = vcombine.high %v17170_v38, %v21130_v63  ;;  %v21276_v24 = vcombine.low %v16720_v49, %v16643_v14 }
 0x3fc   : > { %v17158_v3 = vpop.trf.xlu1  ;;  %21272 = vst [vmem:[#allocation22_spill] sm:$0xff] %v17188_v6  ;;  %v17225_v28 = vrot.slane %v21276_v24, %v15867_v47 }
 0x3fd   : > { %21260 = vst [vmem:[#allocation14_spill] sm:$0xff] %v17158_v3 }
 0x3fe   : > { %v7463_v62 = vpop.trf.xlu0  ;;  %3511 = vrot.lane.b32.xlu1 %v17164_v45, %s21016_s29  ;;  %21277 = vst [vmem:[#allocation104_spill] sm:$0xff] %v17225_v28 }
 0x3ff   : > { %v7847_v51 = vcombine.low %v7463_v62, %v7527_v48  ;;  %v7848_v26 = vcombine.high %v7463_v62, %v7527_v48 }
 0x400   : > { %v17190_v4 = vpop.trf.xlu1 }
 0x401   : > { %v17195_v45 = vrot.slane %v7847_v51, %v15867_v47  ;;  %v17198_v62 = vrot.slane %v7848_v26, %v15867_v47  ;;  %v21278_v26 = vcombine.high %v16720_v49, %v16643_v14  ;;  %v21284_v14 = vcombine.high %v21265_v29, %v21266_v58 }
 0x402   : > { %v7464_v11 = vpop.trf.xlu0  ;;  %3521 = vrot.lane.b32.xlu1 %v3262_v56, %s20857_s5  ;;  %v21275_v56 = vcombine.high %v21256_v42, %v21257_v2  ;;  %v21282_v2 = vcombine.high %v21261_v8, %v21262_v5 }
 0x403   : > { %21273 = vst [vmem:[#allocation102_spill] sm:$0xff] %v17195_v45  ;;  %21274 = vst [vmem:[#allocation103_spill] sm:$0xff] %v17198_v62  ;;  %v7915_v38 = vcombine.low %v7464_v11, %v7528_v54  ;;  %v7916_v48 = vcombine.high %v7464_v11, %v7528_v54  ;;  %v17231_v51 = vrot.slane %v21278_v26, %v15867_v47  ;;  %v21298_v45 = vld [vmem:[#allocation38_spill] sm:$0xff] }
 0x404   : > { %v17213_v3 = vpop.trf.xlu1  ;;  %v17219_v20 = vrot.slane %v21275_v56, %v16371_v1  ;;  %v17245_v24 = vrot.slane %v21282_v2, %v16371_v1  ;;  %v17251_v49 = vrot.slane %v21284_v14, %v16371_v1  ;;  %v21287_v2 = vcombine.low %v15883_v0, %v15891_v19 }
 0x405   : > { %21279 = vst [vmem:[#allocation105_spill] sm:$0xff] %v17231_v51  ;;  %v17234_v54 = vrot.slane %v7915_v38, %v15867_v47  ;;  %v17237_v11 = vrot.slane %v7916_v48, %v15867_v47  ;;  %v21289_v51 = vld [vmem:[#allocation15_spill] sm:$0xff] }
 0x406   : > { %v8712_v42 = vpop.trf.xlu0  ;;  %3531 = vrot.lane.b32.xlu1 %v17219_v20, %s20871_s6  ;;  %21283 = vst [vmem:[#allocation108_spill] sm:$0xff] %v17245_v24  ;;  %v3263_v58 = vcombine.high %v17251_v49, %v21130_v63  ;;  %v17273_v14 = vrot.slane %v21287_v2, %v16371_v1 }
 0x407   : > { %21280 = vst [vmem:[#allocation106_spill] sm:$0xff] %v17234_v54  ;;  %21281 = vst [vmem:[#allocation107_spill] sm:$0xff] %v17237_v11  ;;  %v21290_v11 = vld [vmem:[#allocation17_spill] sm:$0xff] }
 0x408   : > { %v17261_v5 = vpop.trf.xlu1  ;;  %21288 = vst [vmem:[#allocation111_spill] sm:$0xff] %v17273_v14  ;;  %v21291_v28 = vcombine.low %v21289_v51, %v21290_v11  ;;  %v1603_v6 = vcombine.high %v17273_v14, %v21130_v63 }
 0x409   : > { %21285 = vst [vmem:[#allocation109_spill] sm:$0xff] %v17261_v5 }
 0x40a   : > { %v8713_v56 = vpop.trf.xlu0  ;;  %3535 = vrot.lane.b32.xlu1 %v17245_v24, %s20871_s6  ;;  %v17282_v54 = vrot.slane %v21291_v28, %v16371_v1  ;;  %v21297_v28 = vld [vmem:[#allocation40_spill] sm:$0xff] }
 0x40b   : > { %v21299_v14 = vcombine.low %v21297_v28, %v21298_v45 }
 0x40c   : > { %v17265_v29 = vpop.trf.xlu1  ;;  %21292 = vst [vmem:[#allocation15_spill] sm:$0xff] %v17282_v54 }
 0x40d   : > { %21286 = vst [vmem:[#allocation110_spill] sm:$0xff] %v17265_v29  ;;  %v17301_v5 = vrot.slane %v21299_v14, %v16371_v1 }
 0x40e   : > { %v8776_v26 = vpop.trf.xlu0  ;;  %3545 = vrot.lane.b32.xlu1 %v3263_v58, %s21022_s30 }
 0x40f   : > { %v9080_v8 = vcombine.low %v8712_v42, %v8776_v26  ;;  %v9081_v48 = vcombine.high %v8712_v42, %v8776_v26  ;;  %v21293_v42 = vld [vmem:[#allocation27_spill] sm:$0xff]  ;;  %v21294_v26 = vld [vmem:[#allocation25_spill] sm:$0xff] }
 0x410   : > { %v17276_v38 = vpop.trf.xlu1  ;;  %v21295_v58 = vcombine.low %v21293_v42, %v21294_v26 }
 0x411   : > { %v17314_v14 = vrot.slane %v9080_v8, %v15867_v47  ;;  %v17317_v24 = vrot.slane %v9081_v48, %v15867_v47 }
 0x412   : > { %v8777_v62 = vpop.trf.xlu0  ;;  %3555 = vrot.lane.b32.xlu1 %v17282_v54, %s20967_s7  ;;  %v17293_v2 = vrot.slane %v21295_v58, %v16371_v1 }
 0x413   : > { %v9148_v0 = vcombine.low %v8713_v56, %v8777_v62  ;;  %v9149_v19 = vcombine.high %v8713_v56, %v8777_v62  ;;  %1950 = vrot.lane.b32.xlu0 %v1603_v6, %s21029_s21  ;;  %21300 = vst [vmem:[#allocation27_spill] sm:$0xff] %v17314_v14  ;;  %21301 = vst [vmem:[#allocation25_spill] sm:$0xff] %v17317_v24  ;;  %v1740_v6 = vcombine.high %v16502_v61, %v21130_v63  ;;  %v21327_v14 = vld [vmem:[#allocation39_spill] sm:$0xff] }
 0x414   : > { %v17295_v40 = vpop.trf.xlu1 }
 0x415   : > { %21296 = vst [vmem:[#allocation17_spill] sm:$0xff] %v17295_v40  ;;  %v3328_v40 = vcombine.high %v17293_v2, %v21130_v63 }
 0x416   : > { %v8808_v62 = vpop.trf.xlu0  ;;  %3559 = vrot.lane.b32.xlu1 %v17301_v5, %s20967_s7 }
 0x417   : > { %v9096_v56 = vcombine.low %v16735_v34, %v8808_v62  ;;  %v9097_v58 = vcombine.high %v16735_v34, %v8808_v62  ;;  %1966 = vrot.lane.b32.xlu0 %v16525_v33, %s21024_s25  ;;  %v17356_v62 = vrot.slane %v9148_v0, %v15867_v47  ;;  %v21311_v0 = vcombine.high %v21297_v28, %v21298_v45 }
 0x418   : > { %v17321_v54 = vpop.trf.xlu1 }
 0x419   : > { %21302 = vst [vmem:[#allocation40_spill] sm:$0xff] %v17321_v54  ;;  %v17326_v29 = vrot.slane %v9096_v56, %v15867_v47  ;;  %v17329_v34 = vrot.slane %v9097_v58, %v15867_v47  ;;  %21306 = vst [vmem:[#allocation113_spill] sm:$0xff] %v17356_v62  ;;  %v17359_v56 = vrot.slane %v9149_v19, %v15867_v47 }
 0x41a   : > { %v8809_v8 = vpop.trf.xlu0  ;;  %3569 = vrot.lane.b32.xlu1 %v3328_v40, %s21020_s8  ;;  %v21305_v40 = vcombine.high %v21289_v51, %v21290_v11  ;;  %v21310_v51 = vcombine.high %v21293_v42, %v21294_v26  ;;  %v17381_v19 = vrot.slane %v21311_v0, %v16371_v1 }
 0x41b   : > { %21303 = vst [vmem:[#allocation38_spill] sm:$0xff] %v17326_v29  ;;  %21304 = vst [vmem:[#allocation112_spill] sm:$0xff] %v17329_v34  ;;  %1976 = vrot.lane.b32.xlu0 %v1740_v6, %s21018_s28  ;;  %v9164_v33 = vcombine.low %v16751_v32, %v8809_v8  ;;  %v9165_v48 = vcombine.high %v16751_v32, %v8809_v8  ;;  %v21326_v29 = vld [vmem:[#allocation41_spill] sm:$0xff] }
 0x41c   : > { %v17347_v54 = vpop.trf.xlu1  ;;  %v17353_v61 = vrot.slane %v21305_v40, %v16371_v1  ;;  %21307 = vst [vmem:[#allocation114_spill] sm:$0xff] %v17359_v56  ;;  %v17373_v11 = vrot.slane %v21310_v51, %v16371_v1  ;;  %v1741_v40 = vcombine.high %v16543_v36, %v21130_v63  ;;  %v21314_v36 = vcombine.high %v16760_v15, %v16813_v60 }
 0x41d   : > { %v17362_v6 = vrot.slane %v9164_v33, %v15867_v47  ;;  %v17365_v58 = vrot.slane %v9165_v48, %v15867_v47 }
 0x41e   : > { %v8840_v32 = vpop.trf.xlu0  ;;  %3579 = vrot.lane.b32.xlu1 %v17353_v61, %s20981_s9  ;;  %v3329_v28 = vcombine.high %v17373_v11, %v21130_v63  ;;  %v17419_v51 = vrot.slane %v21314_v36, %v15867_v47  ;;  %v21323_v36 = vld [vmem:[#allocation26_spill] sm:$0xff] }
 0x41f   : > { %21308 = vst [vmem:[#allocation115_spill] sm:$0xff] %v17362_v6  ;;  %21309 = vst [vmem:[#allocation116_spill] sm:$0xff] %v17365_v58  ;;  %1986 = vrot.lane.b32.xlu0 %v16549_v18, %s21016_s29  ;;  %v21318_v58 = vld [vmem:[#allocation18_spill] sm:$0xff] }
 0x420   : > { %v17391_v8 = vpop.trf.xlu1  ;;  %21315 = vst [vmem:[#allocation118_spill] sm:$0xff] %v17419_v51 }
 0x422   : > { %v8841_v18 = vpop.trf.xlu0  ;;  %3583 = vrot.lane.b32.xlu1 %v17381_v19, %s20981_s9 }
 0x423   : > { %1990 = vrot.lane.b32.xlu0 %v16577_v39, %s21016_s29  ;;  %v21312_v39 = vcombine.low %v16760_v15, %v16813_v60  ;;  %v21322_v60 = vld [vmem:[#allocation28_spill] sm:$0xff]  ;;  %v21331_v15 = vcombine.high %v16777_v13, %v16862_v23 }
 0x424   : > { %v17397_v45 = vpop.trf.xlu1  ;;  %v21324_v6 = vcombine.low %v21322_v60, %v21323_v36 }
 0x425   : > { %v17413_v33 = vrot.slane %v21312_v39, %v15867_v47 }
 0x426   : > { %v8904_v26 = vpop.trf.xlu0  ;;  %3593 = vrot.lane.b32.xlu1 %v3329_v28, %s21031_s10  ;;  %v21317_v28 = vld [vmem:[#allocation16_spill] sm:$0xff]  ;;  %v17443_v62 = vrot.slane %v21324_v6, %v16371_v1 }
 0x427   : > { %v9216_v42 = vcombine.low %v8840_v32, %v8904_v26  ;;  %v9217_v48 = vcombine.high %v8840_v32, %v8904_v26  ;;  %2000 = vrot.lane.b32.xlu0 %v1741_v40, %s20857_s5  ;;  %21313 = vst [vmem:[#allocation117_spill] sm:$0xff] %v17413_v33  ;;  %v21319_v32 = vcombine.low %v21317_v28, %v21318_v58  ;;  %s21325_s5 = smov 48  }
 0x428   : > { %v17421_v0 = vpop.trf.xlu1 }
 0x429   : > { %21316 = vst [vmem:[#allocation119_spill] sm:$0xff] %v17421_v0  ;;  %v17427_v26 = vrot.slane %v21319_v32, %v16371_v1  ;;  %v17430_v40 = vrot.slane %v9216_v42, %v15867_v47  ;;  %v17433_v39 = vrot.slane %v9217_v48, %v15867_v47  ;;  %v21328_v0 = vcombine.low %v21326_v29, %v21327_v14 }
 0x42a   : > { %v8905_v32 = vpop.trf.xlu0  ;;  %v21329_v42 = vcombine.low %v16777_v13, %v16862_v23  ;;  %v21336_v23 = vcombine.high %v21317_v28, %v21318_v58  ;;  %v21338_v58 = vcombine.low %v16893_v55, %v16942_v50 }
 0x42b   : > { %21320 = vst [vmem:[#allocation16_spill] sm:$0xff] %v17430_v40  ;;  %21321 = vst [vmem:[#allocation18_spill] sm:$0xff] %v17433_v39  ;;  %3603 = vrot.lane.b32.xlu1 %v17427_v26, %s21325_s5  ;;  %2010 = vrot.lane.b32.xlu0 %v16633_v53, %s20871_s6  ;;  %v9284_v6 = vcombine.low %v8841_v18, %v8905_v32  ;;  %v9285_v34 = vcombine.high %v8841_v18, %v8905_v32  ;;  %v21361_v39 = vld [vmem:[#allocation9_spill] sm:$0xff] }
 0x42c   : > { %v1953_v24 = vpop.permute.xlu1 %1952  ;;  %v17461_v48 = vrot.slane %v21328_v0, %v16371_v1  ;;  %v17467_v56 = vrot.slane %v21329_v42, %v15867_v47  ;;  %v17473_v53 = vrot.slane %v21331_v15, %v15867_v47  ;;  %v3330_v42 = vcombine.high %v17443_v62, %v21130_v63  ;;  %v21388_v40 = vld [vmem:[#allocation37_spill] sm:$0xff] }
 0x42d   : > { %v17476_v18 = vrot.slane %v9284_v6, %v15867_v47  ;;  %v17479_v32 = vrot.slane %v9285_v34, %v15867_v47  ;;  %v17507_v34 = vrot.slane %v21336_v23, %v16371_v1  ;;  %v17523_v28 = vrot.slane %v21338_v58, %v15867_v47 }
 0x42e   : > { %21330 = vst [vmem:[#allocation28_spill] sm:$0xff] %v17467_v56  ;;  %21332 = vst [vmem:[#allocation26_spill] sm:$0xff] %v17473_v53  ;;  %v8968_v0 = vpop.trf.xlu0  ;;  %v2129_v23 = vsel %vm2127_vm8, %v16385_v7, %v1953_v24 }
 0x42f   : > { %21333 = vst [vmem:[#allocation41_spill] sm:$0xff] %v17476_v18  ;;  %21334 = vst [vmem:[#allocation39_spill] sm:$0xff] %v17479_v32  ;;  %3607 = vrot.lane.b32.xlu1 %v17461_v48, %s21325_s5  ;;  %2014 = vrot.lane.b32.xlu0 %v16669_v30, %s20871_s6  ;;  %v1742_v30 = vcombine.high %v16627_v43, %v21130_v63  ;;  %s21335_s6 = smov 52  }
 0x430   : > { %v17495_v6 = vpop.permute.xlu1 %1954  ;;  %21339 = vst [vmem:[#allocation120_spill] sm:$0xff] %v17523_v28 }
 0x432   : > { %v8969_v51 = vpop.trf.xlu0 }
 0x433   : > { %3617 = vrot.lane.b32.xlu1 %v3330_v42, %s21335_s6  ;;  %2024 = vrot.lane.b32.xlu0 %v1742_v30, %s21022_s30  ;;  %v21337_v42 = vcombine.high %v21322_v60, %v21323_v36  ;;  %v21341_v60 = vcombine.high %v16893_v55, %v16942_v50 }
 0x434   : > { %v17501_v13 = vpop.permute.xlu1 %1962 }
 0x435   : > { %v17517_v30 = vrot.slane %v21337_v42, %v16371_v1  ;;  %v17537_v36 = vrot.slane %v21341_v60, %v15867_v47  ;;  %v1807_v60 = vcombine.high %v16741_v52, %v21130_v63 }
 0x436   : > { %v9032_v15 = vpop.trf.xlu0 }
 0x437   : > { %3627 = vrot.lane.b32.xlu1 %v17507_v34, %s20921_s20  ;;  %v9352_v43 = vcombine.low %v8968_v0, %v9032_v15  ;;  %v9353_v53 = vcombine.high %v8968_v0, %v9032_v15  ;;  %2034 = vrot.lane.b32.xlu0 %v16733_v37, %s20967_s7  ;;  %v21340_v37 = vcombine.high %v21326_v29, %v21327_v14 }
 0x438   : > { %v1965_v32 = vpop.permute.xlu1 %1964  ;;  %21342 = vst [vmem:[#allocation121_spill] sm:$0xff] %v17537_v36  ;;  %v21345_v29 = vcombine.low %v16374_v59, %v16394_v9  ;;  %v21363_v36 = vcombine.high %v16789_v44, %v16798_v12 }
 0x439   : > { %v17531_v0 = vrot.slane %v21340_v37, %v16371_v1  ;;  %v17540_v15 = vrot.slane %v9352_v43, %v15867_v47  ;;  %v17543_v42 = vrot.slane %v9353_v53, %v15867_v47  ;;  %v17546_v7 = vsel %vm2131_vm9, %v2129_v23, %v1965_v32 }
 0x43a   : > { %v9033_v24 = vpop.trf.xlu0  ;;  %v17554_v50 = vrot.slane %v21345_v29, %v16371_v1  ;;  %v3331_v37 = vcombine.high %v17517_v30, %v21130_v63  ;;  %v21347_v29 = vcombine.low %v16937_v57, %v16957_v16 }
 0x43b   : > { %21343 = vst [vmem:[#allocation122_spill] sm:$0xff] %v17540_v15  ;;  %21344 = vst [vmem:[#allocation123_spill] sm:$0xff] %v17543_v42  ;;  %3631 = vrot.lane.b32.xlu1 %v17531_v0, %s20921_s20  ;;  %2038 = vrot.lane.b32.xlu0 %v16749_v35, %s20967_s7  ;;  %v9420_v43 = vcombine.low %v8969_v51, %v9033_v24  ;;  %v9421_v58 = vcombine.high %v8969_v51, %v9033_v24 }
 0x43c   : > { %21346 = vst [vmem:[#allocation124_spill] sm:$0xff] %v17554_v50  ;;  %v17566_v23 = vpop.permute.xlu1 %1974  ;;  %v17576_v53 = vrot.slane %v21347_v29, %v15867_v47  ;;  %v21349_v35 = vcombine.high %v16937_v57, %v16957_v16  ;;  %v4629_v52 = vcombine.high %v17554_v50, %v21130_v63  ;;  %v21353_v16 = vcombine.low %v16789_v44, %v16798_v12  ;;  %v21371_v44 = vld [vmem:[#allocation10_spill] sm:$0xff] }
 0x43d   : > { %v17585_v51 = vrot.slane %v9420_v43, %v15867_v47  ;;  %v17588_v24 = vrot.slane %v9421_v58, %v15867_v47  ;;  %v17650_v42 = vrot.slane %v21363_v36, %v16371_v1  ;;  %v1809_v33 = vcombine.high %v21371_v44, %v21130_v63 }
 0x43e   : > { %21348 = vst [vmem:[#allocation125_spill] sm:$0xff] %v17576_v53  ;;  %v17582_v32 = vrot.slane %v21349_v35, %v15867_v47  ;;  %v10249_v14 = vpop.trf.xlu0  ;;  %v17598_v57 = vrot.slane %v21353_v16, %v16371_v1  ;;  %v21360_v53 = vld [vmem:[#allocation85_spill] sm:$0xff]  ;;  %v21391_v50 = vcombine.low %v21235_v10, %v21236_v21 }
 0x43f   : > { %21351 = vst [vmem:[#allocation127_spill] sm:$0xff] %v17585_v51  ;;  %21352 = vst [vmem:[#allocation128_spill] sm:$0xff] %v17588_v24  ;;  %3641 = vrot.lane.b32.xlu1 %v3331_v37, %s20925_s11  ;;  %2048 = vrot.lane.b32.xlu0 %v1807_v60, %s21020_s8  ;;  %v21358_v24 = vld [vmem:[#allocation63_spill] sm:$0xff] }
 0x440   : > { %21350 = vst [vmem:[#allocation126_spill] sm:$0xff] %v17582_v32  ;;  %21354 = vst [vmem:[#allocation129_spill] sm:$0xff] %v17598_v57  ;;  %v17608_v29 = vpop.permute.xlu1 %1978  ;;  %v4901_v43 = vcombine.high %v17598_v57, %v21130_v63  ;;  %v21389_v57 = vld [vmem:[#allocation30_spill] sm:$0xff] }
 0x442   : > { %v10250_v35 = vpop.trf.xlu0 }
 0x443   : > { %4976 = vrot.lane.b32.xlu1 %v4629_v52, %s21029_s21  ;;  %2058 = vrot.lane.b32.xlu0 %v16769_v22, %s20981_s9  ;;  %v21355_v52 = vcombine.high %v16374_v59, %v16394_v9  ;;  %v21356_v22 = vld [vmem:[#allocation8_spill] sm:$0xff] }
 0x444   : > { %v17613_v16 = vpop.permute.xlu1 %1988  ;;  %v1808_v55 = vcombine.high %v21356_v22, %v21130_v63 }
 0x445   : > { %v17626_v37 = vrot.slane %v21355_v52, %v16371_v1 }
 0x446   : > { %v10281_v58 = vpop.trf.xlu0 }
 0x447   : > { %4980 = vrot.lane.b32.xlu1 %v4901_v43, %s21029_s21  ;;  %2062 = vrot.lane.b32.xlu0 %v16775_v31, %s20981_s9  ;;  %v21357_v31 = vld [vmem:[#allocation61_spill] sm:$0xff]  ;;  %v10585_v59 = vcombine.low %v21360_v53, %v10281_v58  ;;  %v10586_v9 = vcombine.high %v21360_v53, %v10281_v58 }
 0x448   : > { %v17620_v60 = vpop.permute.xlu1 %1998  ;;  %v21359_v56 = vcombine.high %v21357_v31, %v21358_v24 }
 0x449   : > { %v17656_v53 = vrot.slane %v10586_v9, %v15867_v47 }
 0x44a   : > { %v10282_v32 = vpop.trf.xlu0  ;;  %v4748_v18 = vrot.slane %v21359_v56, %v16371_v1  ;;  %v17653_v56 = vrot.slane %v10585_v59, %v15867_v47  ;;  %v21369_v59 = vld [vmem:[#allocation32_spill] sm:$0xff] }
 0x44b   : > { %4988 = vrot.lane.b32.xlu1 %v17626_v37, %s21024_s25  ;;  %2072 = vrot.lane.b32.xlu0 %v1808_v55, %s21031_s10  ;;  %21365 = vst [vmem:[#allocation63_spill] sm:$0xff] %v17656_v53 }
 0x44c   : > { %v17633_v43 = vpop.permute.xlu1 %2002  ;;  %21364 = vst [vmem:[#allocation61_spill] sm:$0xff] %v17653_v56 }
 0x44e   : > { %v10313_v52 = vpop.trf.xlu0 }
 0x44f   : > { %4990 = vrot.lane.b32.xlu1 %v4748_v18, %s21024_s25  ;;  %v10601_v22 = vcombine.low %v10249_v14, %v10313_v52  ;;  %v10602_v51 = vcombine.high %v10249_v14, %v10313_v52  ;;  %2082 = vrot.lane.b32.xlu0 %v21361_v39, %s21325_s5  ;;  %v21368_v39 = vld [vmem:[#allocation86_spill] sm:$0xff] }
 0x450   : > { %v17644_v55 = vpop.permute.xlu1 %2012  ;;  %v10653_v52 = vcombine.low %v21368_v39, %v10282_v32  ;;  %v10654_v28 = vcombine.high %v21368_v39, %v10282_v32  ;;  %v4766_v39 = vcombine.high %v4748_v18, %v21130_v63  ;;  %v21376_v18 = vld [vmem:[#allocation46_spill] sm:$0xff] }
 0x451   : > { %21362 = vst [vmem:[#allocation8_spill] sm:$0xff] %v17644_v55  ;;  %v17659_v58 = vrot.slane %v10601_v22, %v15867_v47  ;;  %v17662_v14 = vrot.slane %v10602_v51, %v15867_v47  ;;  %v21433_v55 = vld [vmem:[#allocation78_spill] sm:$0xff] }
 0x452   : > { %v10314_v15 = vpop.trf.xlu0  ;;  %v17684_v12 = vrot.slane %v10653_v52, %v15867_v47  ;;  %v17687_v36 = vrot.slane %v10654_v28, %v15867_v47  ;;  %v21382_v28 = vld [vmem:[#allocation45_spill] sm:$0xff] }
 0x453   : > { %21366 = vst [vmem:[#allocation85_spill] sm:$0xff] %v17659_v58  ;;  %21367 = vst [vmem:[#allocation9_spill] sm:$0xff] %v17662_v14  ;;  %4992 = vrot.lane.b32.xlu1 %v17650_v42, %s21024_s25  ;;  %2086 = vrot.lane.b32.xlu0 %v21369_v59, %s21325_s5  ;;  %v10669_v32 = vcombine.low %v10250_v35, %v10314_v15  ;;  %v10670_v9 = vcombine.high %v10250_v35, %v10314_v15  ;;  %v21377_v35 = vld [vmem:[#allocation48_spill] sm:$0xff] }
 0x454   : > { %v17678_v22 = vpop.permute.xlu1 %2022  ;;  %21372 = vst [vmem:[#allocation32_spill] sm:$0xff] %v17684_v12  ;;  %21373 = vst [vmem:[#allocation10_spill] sm:$0xff] %v17687_v36  ;;  %v21378_v44 = vcombine.low %v21376_v18, %v21377_v35 }
 0x455   : > { %21370 = vst [vmem:[#allocation86_spill] sm:$0xff] %v17678_v22  ;;  %v17690_v51 = vrot.slane %v10669_v32, %v15867_v47  ;;  %v17693_v59 = vrot.slane %v10670_v9, %v15867_v47  ;;  %v21383_v32 = vld [vmem:[#allocation43_spill] sm:$0xff]  ;;  %v21385_v9 = vld [vmem:[#allocation62_spill] sm:$0xff] }
 0x456   : > { %v10377_v15 = vpop.trf.xlu0  ;;  %v17701_v52 = vrot.slane %v21378_v44, %v16371_v1  ;;  %v21380_v44 = vld [vmem:[#allocation31_spill] sm:$0xff] }
 0x457   : > { %21374 = vst [vmem:[#allocation130_spill] sm:$0xff] %v17690_v51  ;;  %21375 = vst [vmem:[#allocation131_spill] sm:$0xff] %v17693_v59  ;;  %5002 = vrot.lane.b32.xlu1 %v4766_v39, %s21018_s28  ;;  %2096 = vrot.lane.b32.xlu0 %v1809_v33, %s21335_s6  ;;  %v21384_v51 = vcombine.low %v21382_v28, %v21383_v32  ;;  %v21386_v39 = vld [vmem:[#allocation64_spill] sm:$0xff] }
 0x458   : > { %v17711_v14 = vpop.permute.xlu1 %2026  ;;  %v21387_v59 = vcombine.low %v21385_v9, %v21386_v39 }
 0x459   : > { %21379 = vst [vmem:[#allocation46_spill] sm:$0xff] %v17711_v14  ;;  %v17723_v12 = vrot.slane %v21384_v51, %v16371_v1 }
 0x45a   : > { %v10378_v33 = vpop.trf.xlu0  ;;  %v17729_v36 = vrot.slane %v21387_v59, %v16371_v1  ;;  %v17743_v59 = vrot.slane %v21391_v50, %v16371_v1 }
 0x45b   : > { %5012 = vrot.lane.b32.xlu1 %v17701_v52, %s21016_s29  ;;  %2106 = vrot.lane.b32.xlu0 %v21380_v44, %s20921_s20 }
 0x45c   : > { %v17717_v53 = vpop.permute.xlu1 %2036  ;;  %21392 = vst [vmem:[#allocation45_spill] sm:$0xff] %v17743_v59  ;;  %v4767_v14 = vcombine.high %v17729_v36, %v21130_v63 }
 0x45d   : > { %21381 = vst [vmem:[#allocation48_spill] sm:$0xff] %v17717_v53  ;;  %v1810_v53 = vcombine.high %v21389_v57, %v21130_v63 }
 0x45e   : > { %v10441_v58 = vpop.trf.xlu0 }
 0x45f   : > { %5016 = vrot.lane.b32.xlu1 %v17723_v12, %s21016_s29  ;;  %v10737_v56 = vcombine.low %v10377_v15, %v10441_v58  ;;  %v10738_v44 = vcombine.high %v10377_v15, %v10441_v58  ;;  %2110 = vrot.lane.b32.xlu0 %v21388_v40, %s20921_s20  ;;  %v21393_v58 = vcombine.low %v17027_v27, %v17057_v25  ;;  %s21399_s20 = smov 20  }
 0x460   : > { %v17737_v51 = vpop.permute.xlu1 %2046  ;;  %v21395_v40 = vcombine.high %v17027_v27, %v17057_v25  ;;  %v21402_v27 = vld [vmem:[#allocation93_spill] sm:$0xff] }
 0x461   : > { %21390 = vst [vmem:[#allocation31_spill] sm:$0xff] %v17737_v51  ;;  %v17751_v15 = vrot.slane %v21393_v58, %v15867_v47  ;;  %v17760_v51 = vrot.slane %v10737_v56, %v15867_v47  ;;  %v17763_v10 = vrot.slane %v10738_v44, %v15867_v47  ;;  %v3124_v58 = vcombine.high %v17743_v59, %v21130_v63  ;;  %v21429_v59 = vld [vmem:[#allocation67_spill] sm:$0xff] }
 0x462   : > { %v17757_v57 = vrot.slane %v21395_v40, %v15867_v47  ;;  %v10442_v21 = vpop.trf.xlu0 }
 0x463   : > { %21394 = vst [vmem:[#allocation43_spill] sm:$0xff] %v17751_v15  ;;  %21397 = vst [vmem:[#allocation64_spill] sm:$0xff] %v17760_v51  ;;  %5026 = vrot.lane.b32.xlu1 %v4767_v14, %s21399_s20  ;;  %2120 = vrot.lane.b32.xlu0 %v1810_v53, %s20925_s11  ;;  %v10805_v56 = vcombine.low %v10378_v33, %v10442_v21  ;;  %v10806_v44 = vcombine.high %v10378_v33, %v10442_v21  ;;  %s21409_s11 = smov 24  }
 0x464   : > { %21396 = vst [vmem:[#allocation62_spill] sm:$0xff] %v17757_v57  ;;  %21398 = vst [vmem:[#allocation37_spill] sm:$0xff] %v17763_v10  ;;  %v17775_v40 = vpop.permute.xlu1 %2050  ;;  %v21401_v14 = vcombine.high %v21376_v18, %v21377_v35  ;;  %v21403_v51 = vcombine.low %v17054_v46, %v21402_v27  ;;  %v21405_v53 = vcombine.high %v17054_v46, %v21402_v27 }
 0x465   : > { %21400 = vst [vmem:[#allocation30_spill] sm:$0xff] %v17775_v40  ;;  %v17798_v21 = vrot.slane %v10805_v56, %v15867_v47  ;;  %v17801_v18 = vrot.slane %v10806_v44, %v15867_v47  ;;  %v21411_v46 = vcombine.high %v21385_v9, %v21386_v39  ;;  %v21413_v9 = vld [vmem:[#allocation95_spill] sm:$0xff]  ;;  %v21432_v40 = vld [vmem:[#allocation44_spill] sm:$0xff] }
 0x466   : > { %v17781_v50 = vrot.slane %v21401_v14, %v16371_v1  ;;  %v17789_v25 = vrot.slane %v21403_v51, %v15867_v47  ;;  %v17795_v33 = vrot.slane %v21405_v53, %v15867_v47  ;;  %v10505_v35 = vpop.trf.xlu0  ;;  %v21410_v51 = vcombine.high %v21382_v28, %v21383_v32 }
 0x467   : > { %21407 = vst [vmem:[#allocation133_spill] sm:$0xff] %v17798_v21  ;;  %21408 = vst [vmem:[#allocation134_spill] sm:$0xff] %v17801_v18  ;;  %3471 = vrot.lane.b32.xlu0 %v3124_v58, %s21029_s21  ;;  %v17816_v27 = vrot.slane %v21411_v46, %v16371_v1  ;;  %v21415_v46 = vld [vmem:[#allocation11_spill] sm:$0xff]  ;;  %v21416_v18 = vld [vmem:[#allocation94_spill] sm:$0xff]  ;;  %v21434_v22 = vcombine.low %v21432_v40, %v21433_v55 }
 0x468   : > { %21404 = vst [vmem:[#allocation93_spill] sm:$0xff] %v17789_v25  ;;  %21406 = vst [vmem:[#allocation132_spill] sm:$0xff] %v17795_v33  ;;  %5036 = vrot.lane.b32.xlu1 %v17781_v50, %s21409_s11  ;;  %v17810_v14 = vrot.slane %v21410_v51, %v16371_v1  ;;  %v17826_v32 = vpop.permute.xlu1 %2060  ;;  %v3125_v58 = vcombine.high %v21415_v46, %v21130_v63  ;;  %v3397_v33 = vcombine.high %v21416_v18, %v21130_v63  ;;  %v21419_v25 = vld [vmem:[#allocation51_spill] sm:$0xff]  ;;  %v21421_v46 = vld [vmem:[#allocation14_spill] sm:$0xff] }
 0x469   : > { %21412 = vst [vmem:[#allocation135_spill] sm:$0xff] %v17826_v32  ;;  %v4768_v51 = vcombine.high %v17816_v27, %v21130_v63  ;;  %v21422_v15 = vcombine.low %v17117_v41, %v21421_v46 }
 0x46a   : > { %v10506_v53 = vpop.trf.xlu0 }
 0x46b   : > { %3485 = vrot.lane.b32.xlu0 %v21413_v9, %s21024_s25  ;;  %v21418_v9 = vld [vmem:[#allocation49_spill] sm:$0xff] }
 0x46c   : > { %5040 = vrot.lane.b32.xlu1 %v17810_v14, %s21409_s11  ;;  %v17832_v39 = vpop.permute.xlu1 %2070  ;;  %v21420_v10 = vcombine.low %v21418_v9, %v21419_v25 }
 0x46d   : > { %21414 = vst [vmem:[#allocation95_spill] sm:$0xff] %v17832_v39 }
 0x46e   : > { %v10569_v44 = vpop.trf.xlu0  ;;  %v17848_v57 = vrot.slane %v21420_v10, %v16371_v1  ;;  %v21428_v10 = vld [vmem:[#allocation65_spill] sm:$0xff] }
 0x46f   : > { %v10873_v28 = vcombine.low %v10505_v35, %v10569_v44  ;;  %v10874_v56 = vcombine.high %v10505_v35, %v10569_v44  ;;  %3495 = vrot.lane.b32.xlu0 %v3125_v58, %s21018_s28  ;;  %v21424_v35 = vcombine.high %v17117_v41, %v21421_v46  ;;  %v17891_v41 = vrot.slane %v21434_v22, %v16371_v1 }
 0x470   : > { %5050 = vrot.lane.b32.xlu1 %v4768_v51, %s21022_s30  ;;  %v17842_v21 = vpop.permute.xlu1 %2074  ;;  %v17854_v51 = vrot.slane %v21422_v15, %v15867_v47 }
 0x471   : > { %21417 = vst [vmem:[#allocation11_spill] sm:$0xff] %v17842_v21  ;;  %v17860_v44 = vrot.slane %v21424_v35, %v15867_v47  ;;  %v17863_v18 = vrot.slane %v10873_v28, %v15867_v47  ;;  %v17866_v58 = vrot.slane %v10874_v56, %v15867_v47  ;;  %v21430_v21 = vcombine.low %v21428_v10, %v21429_v59 }
 0x472   : > { %21423 = vst [vmem:[#allocation94_spill] sm:$0xff] %v17854_v51  ;;  %v10570_v15 = vpop.trf.xlu0  ;;  %v21435_v28 = vcombine.low %v17154_v17, %v17190_v4  ;;  %v21455_v51 = vld [vmem:[#allocation50_spill] sm:$0xff] }
 0x473   : > { %21425 = vst [vmem:[#allocation49_spill] sm:$0xff] %v17860_v44  ;;  %21426 = vst [vmem:[#allocation51_spill] sm:$0xff] %v17863_v18  ;;  %v17872_v32 = vrot.slane %v21430_v21, %v16371_v1  ;;  %3499 = vrot.lane.b32.xlu0 %v3397_v33, %s21018_s28  ;;  %v10941_v21 = vcombine.low %v10506_v53, %v10570_v15  ;;  %v10942_v35 = vcombine.high %v10506_v53, %v10570_v15  ;;  %v21443_v44 = vld [vmem:[#allocation12_spill] sm:$0xff] }
 0x474   : > { %21427 = vst [vmem:[#allocation14_spill] sm:$0xff] %v17866_v58  ;;  %5060 = vrot.lane.b32.xlu1 %v17848_v57, %s20967_s7  ;;  %v17885_v39 = vpop.permute.xlu1 %2084  ;;  %v17897_v56 = vrot.slane %v21435_v28, %v15867_v47  ;;  %v21437_v33 = vcombine.high %v17154_v17, %v17190_v4  ;;  %v21441_v58 = vld [vmem:[#allocation34_spill] sm:$0xff]  ;;  %v21445_v17 = vcombine.high %v21418_v9, %v21419_v25 }
 0x475   : > { %21431 = vst [vmem:[#allocation65_spill] sm:$0xff] %v17885_v39  ;;  %v17906_v53 = vrot.slane %v10941_v21, %v15867_v47  ;;  %v17909_v15 = vrot.slane %v10942_v35, %v15867_v47  ;;  %v4833_v28 = vcombine.high %v17872_v32, %v21130_v63  ;;  %v21447_v35 = vld [vmem:[#allocation36_spill] sm:$0xff]  ;;  %v21450_v25 = vcombine.high %v21432_v40, %v21433_v55 }
 0x476   : > { %21436 = vst [vmem:[#allocation67_spill] sm:$0xff] %v17897_v56  ;;  %v17903_v46 = vrot.slane %v21437_v33, %v15867_v47  ;;  %v11754_v22 = vpop.trf.xlu0  ;;  %v17937_v21 = vrot.slane %v21445_v17, %v16371_v1  ;;  %v3127_v55 = vcombine.high %v17219_v20, %v21130_v63 }
 0x477   : > { %21439 = vst [vmem:[#allocation78_spill] sm:$0xff] %v17906_v53  ;;  %21440 = vst [vmem:[#allocation136_spill] sm:$0xff] %v17909_v15  ;;  %3509 = vrot.lane.b32.xlu0 %v21441_v58, %s21016_s29  ;;  %v3126_v58 = vcombine.high %v21443_v44, %v21130_v63  ;;  %v3398_v15 = vcombine.high %v21447_v35, %v21130_v63  ;;  %v21448_v44 = vcombine.high %v21428_v10, %v21429_v59 }
 0x478   : > { %21438 = vst [vmem:[#allocation44_spill] sm:$0xff] %v17903_v46  ;;  %5064 = vrot.lane.b32.xlu1 %v17891_v41, %s20967_s7  ;;  %v17925_v33 = vpop.permute.xlu1 %2094  ;;  %21446 = vst [vmem:[#allocation137_spill] sm:$0xff] %v17937_v21  ;;  %v17956_v9 = vrot.slane %v21450_v25, %v16371_v1 }
 0x479   : > { %21442 = vst [vmem:[#allocation34_spill] sm:$0xff] %v17925_v33 }
 0x47a   : > { %v11755_v18 = vpop.trf.xlu0  ;;  %21451 = vst [vmem:[#allocation138_spill] sm:$0xff] %v17956_v9 }
 0x47b   : > { %3519 = vrot.lane.b32.xlu0 %v3126_v58, %s21399_s20 }
 0x47c   : > { %5074 = vrot.lane.b32.xlu1 %v4833_v28, %s21020_s8  ;;  %v17931_v4 = vpop.permute.xlu1 %2098  ;;  %v17948_v28 = vrot.slane %v21448_v44, %v16371_v1 }
 0x47d   : > { %21444 = vst [vmem:[#allocation12_spill] sm:$0xff] %v17931_v4 }
 0x47e   : > { %v11786_v46 = vpop.trf.xlu0  ;;  %v4834_v59 = vcombine.high %v17948_v28, %v21130_v63 }
 0x47f   : > { %3523 = vrot.lane.b32.xlu0 %v3398_v15, %s21399_s20  ;;  %v12090_v10 = vcombine.low %v17213_v3, %v11786_v46  ;;  %v12091_v35 = vcombine.high %v17213_v3, %v11786_v46 }
 0x480   : > { %5084 = vrot.lane.b32.xlu1 %v17937_v21, %s20981_s9  ;;  %v17950_v58 = vpop.permute.xlu1 %2108 }
 0x481   : > { %21449 = vst [vmem:[#allocation36_spill] sm:$0xff] %v17950_v58  ;;  %v21456_v58 = vld [vmem:[#allocation52_spill] sm:$0xff]  ;;  %v17983_v20 = vrot.slane %v12090_v10, %v15867_v47  ;;  %v17986_v46 = vrot.slane %v12091_v35, %v15867_v47 }
 0x482   : > { %v11787_v17 = vpop.trf.xlu0  ;;  %v21457_v4 = vcombine.low %v21455_v51, %v21456_v58 }
 0x483   : > { %3533 = vrot.lane.b32.xlu0 %v17251_v49, %s21409_s11  ;;  %v21453_v49 = vld [vmem:[#allocation108_spill] sm:$0xff]  ;;  %21459 = vst [vmem:[#allocation52_spill] sm:$0xff] %v17983_v20  ;;  %21460 = vst [vmem:[#allocation140_spill] sm:$0xff] %v17986_v46 }
 0x484   : > { %5088 = vrot.lane.b32.xlu1 %v17956_v9, %s20981_s9  ;;  %v17962_v15 = vpop.permute.xlu1 %2118  ;;  %v3399_v53 = vcombine.high %v21453_v49, %v21130_v63  ;;  %v17980_v3 = vrot.slane %v21457_v4, %v16371_v1  ;;  %v21466_v4 = vld [vmem:[#allocation109_spill] sm:$0xff]  ;;  %v21468_v9 = vld [vmem:[#allocation79_spill] sm:$0xff] }
 0x485   : > { %21452 = vst [vmem:[#allocation139_spill] sm:$0xff] %v17962_v15  ;;  %v12158_v39 = vcombine.low %v21466_v4, %v11787_v17  ;;  %v12159_v10 = vcombine.high %v21466_v4, %v11787_v17 }
 0x486   : > { %v11818_v40 = vpop.trf.xlu0  ;;  %21458 = vst [vmem:[#allocation50_spill] sm:$0xff] %v17980_v3 }
 0x487   : > { %v12106_v44 = vcombine.low %v11754_v22, %v11818_v40  ;;  %v12107_v25 = vcombine.high %v11754_v22, %v11818_v40  ;;  %3543 = vrot.lane.b32.xlu0 %v3127_v55, %s21022_s30  ;;  %v21463_v55 = vld [vmem:[#allocation66_spill] sm:$0xff]  ;;  %v21464_v40 = vld [vmem:[#allocation68_spill] sm:$0xff] }
 0x488   : > { %5098 = vrot.lane.b32.xlu1 %v4834_v59, %s21031_s10  ;;  %v17974_v56 = vpop.permute.xlu1 %2122  ;;  %v21465_v49 = vcombine.low %v21463_v55, %v21464_v40 }
 0x489   : > { %21454 = vst [vmem:[#allocation108_spill] sm:$0xff] %v17974_v56  ;;  %v17989_v22 = vrot.slane %v12106_v44, %v15867_v47  ;;  %v17992_v59 = vrot.slane %v12107_v25, %v15867_v47  ;;  %v18022_v44 = vrot.slane %v12158_v39, %v15867_v47  ;;  %v18025_v25 = vrot.slane %v12159_v10, %v15867_v47 }
 0x48a   : > { %v17998_v56 = vrot.slane %v21465_v49, %v16371_v1  ;;  %v11819_v15 = vpop.trf.xlu0  ;;  %v3464_v10 = vcombine.high %v17301_v5, %v21130_v63  ;;  %v21482_v5 = vld [vmem:[#allocation35_spill] sm:$0xff] }
 0x48b   : > { %21461 = vst [vmem:[#allocation141_spill] sm:$0xff] %v17989_v22  ;;  %21462 = vst [vmem:[#allocation142_spill] sm:$0xff] %v17992_v59  ;;  %3547 = vrot.lane.b32.xlu0 %v3399_v53, %s21022_s30  ;;  %v12174_v33 = vcombine.low %v11755_v18, %v11819_v15  ;;  %v12175_v17 = vcombine.high %v11755_v18, %v11819_v15  ;;  %v21474_v59 = vld [vmem:[#allocation15_spill] sm:$0xff] }
 0x48c   : > { %5108 = vrot.lane.b32.xlu1 %v17980_v3, %s21325_s5  ;;  %v18013_v4 = vpop.permute.xlu1 %3473  ;;  %v21467_v3 = vld [vmem:[#allocation77_spill] sm:$0xff]  ;;  %21470 = vst [vmem:[#allocation66_spill] sm:$0xff] %v18022_v44  ;;  %21471 = vst [vmem:[#allocation68_spill] sm:$0xff] %v18025_v25  ;;  %v4835_v39 = vcombine.high %v17998_v56, %v21130_v63  ;;  %v3192_v46 = vcombine.high %v21474_v59, %v21130_v63 }
 0x48d   : > { %v21469_v21 = vcombine.low %v21467_v3, %v21468_v9  ;;  %v18028_v49 = vrot.slane %v12174_v33, %v15867_v47  ;;  %v18031_v53 = vrot.slane %v12175_v17, %v15867_v47  ;;  %v21475_v33 = vcombine.high %v21455_v51, %v21456_v58  ;;  %v21478_v51 = vld [vmem:[#allocation110_spill] sm:$0xff]  ;;  %v21479_v58 = vld [vmem:[#allocation17_spill] sm:$0xff] }
 0x48e   : > { %v11882_v18 = vpop.trf.xlu0 }
 0x48f   : > { %v18019_v35 = vrot.slane %v21469_v21, %v16371_v1  ;;  %21472 = vst [vmem:[#allocation109_spill] sm:$0xff] %v18028_v49  ;;  %21473 = vst [vmem:[#allocation77_spill] sm:$0xff] %v18031_v53  ;;  %3557 = vrot.lane.b32.xlu0 %v17293_v2, %s20967_s7  ;;  %v18057_v21 = vrot.slane %v21475_v33, %v16371_v1  ;;  %s21476_s7 = smov 56   ;;  %v21480_v33 = vcombine.low %v21478_v51, %v21479_v58 }
 0x490   : > { %v3476_v17 = vpop.permute.xlu1 %3475 }
 0x491   : > { %5112 = vrot.lane.b32.xlu1 %v18019_v35, %s21325_s5  ;;  %v18074_v25 = vrot.slane %v21480_v33, %v15867_v47  ;;  %v3650_v49 = vsel %vm2127_vm8, %v21482_v5, %v3476_v17 }
 0x492   : > { %v11883_v2 = vpop.trf.xlu0 }
 0x493   : > { %3567 = vrot.lane.b32.xlu0 %v3192_v46, %s21020_s8  ;;  %v21477_v46 = vcombine.high %v21463_v55, %v21464_v40  ;;  %21481 = vst [vmem:[#allocation79_spill] sm:$0xff] %v18074_v25  ;;  %v21484_v55 = vcombine.high %v21478_v51, %v21479_v58  ;;  %v3465_v25 = vcombine.high %v17381_v19, %v21130_v63 }
 0x494   : > { %v18051_v22 = vpop.permute.xlu1 %3483  ;;  %v3194_v19 = vcombine.high %v17427_v26, %v21130_v63 }
 0x495   : > { %5122 = vrot.lane.b32.xlu1 %v4835_v39, %s21335_s6  ;;  %v18068_v39 = vrot.slane %v21477_v46, %v16371_v1  ;;  %v18088_v40 = vrot.slane %v21484_v55, %v15867_v47 }
 0x496   : > { %v11946_v15 = vpop.trf.xlu0 }
 0x497   : > { %v12242_v59 = vcombine.low %v11882_v18, %v11946_v15  ;;  %v12243_v53 = vcombine.high %v11882_v18, %v11946_v15  ;;  %3571 = vrot.lane.b32.xlu0 %v3464_v10, %s21020_s8  ;;  %v21483_v18 = vcombine.high %v21467_v3, %v21468_v9  ;;  %21485 = vst [vmem:[#allocation15_spill] sm:$0xff] %v18088_v40  ;;  %v21489_v9 = vld [vmem:[#allocation53_spill] sm:$0xff]  ;;  %v21490_v3 = vld [vmem:[#allocation55_spill] sm:$0xff]  ;;  %v21502_v40 = vld [vmem:[#allocation82_spill] sm:$0xff] }
 0x498   : > { %v3488_v44 = vpop.permute.xlu1 %3487  ;;  %v21491_v5 = vcombine.low %v21489_v9, %v21490_v3 }
 0x499   : > { %5132 = vrot.lane.b32.xlu1 %v18057_v21, %s21476_s7  ;;  %v18082_v15 = vrot.slane %v21483_v18, %v16371_v1  ;;  %v18091_v10 = vrot.slane %v12242_v59, %v15867_v47  ;;  %v18094_v46 = vrot.slane %v12243_v53, %v15867_v47  ;;  %v18097_v17 = vsel %vm2131_vm9, %v3650_v49, %v3488_v44  ;;  %v21493_v53 = vld [vmem:[#allocation40_spill] sm:$0xff] }
 0x49a   : > { %21488 = vst [vmem:[#allocation35_spill] sm:$0xff] %v18097_v17  ;;  %v11947_v33 = vpop.trf.xlu0  ;;  %v18105_v51 = vrot.slane %v21491_v5, %v16371_v1  ;;  %v4836_v5 = vcombine.high %v18068_v39, %v21130_v63  ;;  %v3193_v59 = vcombine.high %v17353_v61, %v21130_v63  ;;  %v21494_v44 = vcombine.low %v17276_v38, %v21493_v53 }
 0x49b   : > { %21486 = vst [vmem:[#allocation110_spill] sm:$0xff] %v18091_v10  ;;  %21487 = vst [vmem:[#allocation17_spill] sm:$0xff] %v18094_v46  ;;  %3581 = vrot.lane.b32.xlu0 %v17373_v11, %s20981_s9  ;;  %v12310_v58 = vcombine.low %v11883_v2, %v11947_v33  ;;  %v12311_v18 = vcombine.high %v11883_v2, %v11947_v33  ;;  %v21496_v11 = vcombine.high %v17276_v38, %v21493_v53  ;;  %s21500_s9 = smov 60  }
 0x49c   : > { %21492 = vst [vmem:[#allocation53_spill] sm:$0xff] %v18105_v51  ;;  %v18117_v55 = vpop.permute.xlu1 %3497  ;;  %v18127_v10 = vrot.slane %v21494_v44, %v15867_v47  ;;  %v6134_v61 = vcombine.high %v18105_v51, %v21130_v63  ;;  %v21501_v44 = vld [vmem:[#allocation80_spill] sm:$0xff]  ;;  %v4630_v51 = vcombine.high %v17626_v37, %v21130_v63  ;;  %v4902_v37 = vcombine.high %v17650_v42, %v21130_v63 }
 0x49d   : > { %5136 = vrot.lane.b32.xlu1 %v18082_v15, %s21476_s7  ;;  %v18133_v49 = vrot.slane %v21496_v11, %v15867_v47  ;;  %v18136_v2 = vrot.slane %v12310_v58, %v15867_v47  ;;  %v18139_v33 = vrot.slane %v12311_v18, %v15867_v47  ;;  %v21503_v38 = vcombine.low %v21501_v44, %v21502_v40 }
 0x49e   : > { %21495 = vst [vmem:[#allocation55_spill] sm:$0xff] %v18127_v10  ;;  %v12010_v46 = vpop.trf.xlu0 }
 0x49f   : > { %21497 = vst [vmem:[#allocation40_spill] sm:$0xff] %v18133_v49  ;;  %21498 = vst [vmem:[#allocation143_spill] sm:$0xff] %v18136_v2  ;;  %3591 = vrot.lane.b32.xlu0 %v3193_v59, %s21031_s10  ;;  %v18149_v53 = vrot.slane %v21503_v38, %v16371_v1  ;;  %v21508_v49 = vcombine.low %v17347_v54, %v17397_v45  ;;  %v21516_v2 = vld [vmem:[#allocation71_spill] sm:$0xff] }
 0x4a0   : > { %21499 = vst [vmem:[#allocation144_spill] sm:$0xff] %v18139_v33  ;;  %v18159_v11 = vpop.permute.xlu1 %3507 }
 0x4a1   : > { %5146 = vrot.lane.b32.xlu1 %v4836_v5, %s21500_s9  ;;  %21504 = vst [vmem:[#allocation80_spill] sm:$0xff] %v18149_v53  ;;  %v6406_v18 = vcombine.high %v18149_v53, %v21130_v63 }
 0x4a2   : > { %v12011_v20 = vpop.trf.xlu0 }
 0x4a3   : > { %3595 = vrot.lane.b32.xlu0 %v3465_v25, %s21031_s10  ;;  %v21507_v25 = vcombine.high %v21489_v9, %v21490_v3 }
 0x4a4   : > { %v18165_v38 = vpop.permute.xlu1 %3511 }
 0x4a5   : > { %6481 = vrot.lane.b32.xlu1 %v6134_v61, %s21029_s21  ;;  %21505 = vst [vmem:[#allocation82_spill] sm:$0xff] %v18165_v38  ;;  %v6117_v61 = vrot.slane %v21507_v25, %v16371_v1 }
 0x4a6   : > { %v12074_v58 = vpop.trf.xlu0 }
 0x4a7   : > { %v12378_v5 = vcombine.low %v12010_v46, %v12074_v58  ;;  %v12379_v59 = vcombine.high %v12010_v46, %v12074_v58  ;;  %3605 = vrot.lane.b32.xlu0 %v17443_v62, %s21325_s5  ;;  %v21510_v62 = vcombine.high %v17347_v54, %v17397_v45  ;;  %v21518_v54 = vld [vmem:[#allocation119_spill] sm:$0xff] }
 0x4a8   : > { %v18174_v33 = vpop.permute.xlu1 %3521 }
 0x4a9   : > { %6485 = vrot.lane.b32.xlu1 %v6406_v18, %s21029_s21  ;;  %21506 = vst [vmem:[#allocation145_spill] sm:$0xff] %v18174_v33  ;;  %v18184_v18 = vrot.slane %v21508_v49, %v15867_v47  ;;  %v18190_v46 = vrot.slane %v21510_v62, %v15867_v47  ;;  %v18193_v26 = vrot.slane %v12378_v5, %v15867_v47  ;;  %v21515_v62 = vld [vmem:[#allocation69_spill] sm:$0xff] }
 0x4aa   : > { %v18196_v58 = vrot.slane %v12379_v59, %v15867_v47  ;;  %v12075_v9 = vpop.trf.xlu0  ;;  %v21517_v10 = vcombine.high %v21515_v62, %v21516_v2  ;;  %v3466_v49 = vcombine.high %v17461_v48, %v21130_v63  ;;  %v6135_v48 = vcombine.high %v6117_v61, %v21130_v63 }
 0x4ab   : > { %21509 = vst [vmem:[#allocation146_spill] sm:$0xff] %v18184_v18  ;;  %21511 = vst [vmem:[#allocation147_spill] sm:$0xff] %v18190_v46  ;;  %3615 = vrot.lane.b32.xlu0 %v3194_v19, %s21335_s6  ;;  %v12446_v5 = vcombine.low %v12011_v20, %v12075_v9  ;;  %v12447_v59 = vcombine.high %v12011_v20, %v12075_v9  ;;  %v21521_v20 = vcombine.high %v17391_v8, %v21518_v54  ;;  %v21539_v46 = vld [vmem:[#allocation83_spill] sm:$0xff] }
 0x4ac   : > { %21512 = vst [vmem:[#allocation148_spill] sm:$0xff] %v18193_v26  ;;  %21513 = vst [vmem:[#allocation149_spill] sm:$0xff] %v18196_v58  ;;  %v18208_v25 = vpop.permute.xlu1 %3531  ;;  %v18214_v3 = vrot.slane %v21517_v10, %v16371_v1  ;;  %v21519_v26 = vcombine.low %v17391_v8, %v21518_v54  ;;  %v21525_v8 = vcombine.high %v21501_v44, %v21502_v40  ;;  %v21532_v54 = vld [vmem:[#allocation54_spill] sm:$0xff] }
 0x4ad   : > { %6493 = vrot.lane.b32.xlu1 %v6117_v61, %s21024_s25  ;;  %21514 = vst [vmem:[#allocation150_spill] sm:$0xff] %v18208_v25  ;;  %v18228_v19 = vrot.slane %v21521_v20, %v15867_v47  ;;  %v18231_v9 = vrot.slane %v12446_v5, %v15867_v47  ;;  %v18234_v10 = vrot.slane %v12447_v59, %v15867_v47  ;;  %v21530_v5 = vld [vmem:[#allocation72_spill] sm:$0xff] }
 0x4ae   : > { %v18222_v45 = vrot.slane %v21519_v26, %v15867_v47  ;;  %v18236_v58 = vpop.permute.xlu0 %1950  ;;  %v18246_v26 = vrot.slane %v21525_v8, %v16371_v1  ;;  %v3195_v20 = vcombine.high %v17507_v34, %v21130_v63  ;;  %v3467_v34 = vcombine.high %v17531_v0, %v21130_v63  ;;  %v21538_v0 = vld [vmem:[#allocation81_spill] sm:$0xff] }
 0x4af   : > { %21522 = vst [vmem:[#allocation71_spill] sm:$0xff] %v18228_v19  ;;  %21523 = vst [vmem:[#allocation119_spill] sm:$0xff] %v18231_v9  ;;  %3619 = vrot.lane.b32.xlu0 %v3466_v49, %s21335_s6  ;;  %v21540_v18 = vcombine.low %v21538_v0, %v21539_v46 }
 0x4b0   : > { %21520 = vst [vmem:[#allocation69_spill] sm:$0xff] %v18222_v45  ;;  %21524 = vst [vmem:[#allocation151_spill] sm:$0xff] %v18234_v10  ;;  %v18256_v59 = vpop.permute.xlu1 %3535  ;;  %v6407_v44 = vcombine.high %v18246_v26, %v21130_v63  ;;  %v21533_v10 = vld [vmem:[#allocation56_spill] sm:$0xff] }
 0x4b1   : > { %6495 = vrot.lane.b32.xlu1 %v18214_v3, %s21024_s25  ;;  %21526 = vst [vmem:[#allocation152_spill] sm:$0xff] %v18256_v59  ;;  %v21534_v19 = vcombine.low %v21532_v54, %v21533_v10  ;;  %v18308_v53 = vrot.slane %v21540_v18, %v16371_v1 }
 0x4b2   : > { %v18258_v61 = vpop.permute.xlu0 %1966 }
 0x4b3   : > { %3629 = vrot.lane.b32.xlu0 %v17517_v30, %s21476_s7  ;;  %v18285_v9 = vrot.slane %v21534_v19, %v16371_v1 }
 0x4b4   : > { %v18263_v40 = vpop.permute.xlu1 %3545 }
 0x4b5   : > { %6505 = vrot.lane.b32.xlu1 %v6135_v48, %s21018_s28  ;;  %21527 = vst [vmem:[#allocation153_spill] sm:$0xff] %v18263_v40  ;;  %v21529_v48 = vld [vmem:[#allocation70_spill] sm:$0xff]  ;;  %v6136_v19 = vcombine.high %v18285_v9, %v21130_v63 }
 0x4b6   : > { %v18269_v8 = vpop.permute.xlu0 %1976  ;;  %v21531_v30 = vcombine.low %v21529_v48, %v21530_v5 }
 0x4b7   : > { %3639 = vrot.lane.b32.xlu0 %v3195_v20, %s21500_s9 }
 0x4b8   : > { %v18273_v49 = vpop.permute.xlu1 %3555  ;;  %v18279_v47 = vrot.slane %v21531_v30, %v16371_v1 }
 0x4b9   : > { %6509 = vrot.lane.b32.xlu1 %v6407_v44, %s21018_s28  ;;  %21528 = vst [vmem:[#allocation154_spill] sm:$0xff] %v18273_v49  ;;  %v21535_v44 = vcombine.low %v21357_v31, %v21358_v24 }
 0x4ba   : > { %v18295_v45 = vpop.permute.xlu0 %1986 }
 0x4bb   : > { %v18293_v20 = vrot.slane %v21535_v44, %v16371_v1  ;;  %3643 = vrot.lane.b32.xlu0 %v3467_v34, %s21500_s9  ;;  %v6408_v44 = vcombine.high %v18308_v53, %v21130_v63 }
 0x4bc   : > { %v18300_v30 = vpop.permute.xlu1 %3559 }
 0x4bd   : > { %21536 = vst [vmem:[#allocation70_spill] sm:$0xff] %v18293_v20  ;;  %6519 = vrot.lane.b32.xlu1 %v18279_v47, %s21016_s29  ;;  %21537 = vst [vmem:[#allocation72_spill] sm:$0xff] %v18300_v30  ;;  %v4765_v24 = vcombine.high %v18293_v20, %v21130_v63  ;;  %v21544_v20 = vcombine.high %v21532_v54, %v21533_v10  ;;  %v21546_v10 = vcombine.high %v21538_v0, %v21539_v46  ;;  %v21548_v46 = vld [vmem:[#allocation57_spill] sm:$0xff]  ;;  %v21549_v0 = vld [vmem:[#allocation59_spill] sm:$0xff] }
 0x4be   : > { %v18312_v31 = vpop.permute.xlu0 %1990 }
 0x4bf   : > { %4978 = vrot.lane.b32.xlu0 %v4765_v24, %s21029_s21  ;;  %v18355_v54 = vrot.slane %v21546_v10, %v16371_v1 }
 0x4c0   : > { %v18316_v34 = vpop.permute.xlu1 %3569 }
 0x4c1   : > { %6529 = vrot.lane.b32.xlu1 %v6136_v19, %s21399_s20  ;;  %21541 = vst [vmem:[#allocation54_spill] sm:$0xff] %v18316_v34  ;;  %v21543_v19 = vcombine.high %v21529_v48, %v21530_v5  ;;  %v18338_v34 = vrot.slane %v21544_v20, %v16371_v1  ;;  %v6409_v20 = vcombine.high %v18355_v54, %v21130_v63 }
 0x4c2   : > { %v18322_v30 = vpop.permute.xlu0 %2000 }
 0x4c3   : > { %5000 = vrot.lane.b32.xlu0 %v4630_v51, %s21018_s28  ;;  %v18332_v24 = vrot.slane %v21543_v19, %v16371_v1  ;;  %v6137_v5 = vcombine.high %v18338_v34, %v21130_v63  ;;  %v4631_v19 = vcombine.high %v17701_v52, %v21130_v63  ;;  %v4903_v52 = vcombine.high %v17723_v12, %v21130_v63 }
 0x4c4   : > { %v18326_v18 = vpop.permute.xlu1 %3579 }
 0x4c5   : > { %6533 = vrot.lane.b32.xlu1 %v6408_v44, %s21399_s20  ;;  %21542 = vst [vmem:[#allocation56_spill] sm:$0xff] %v18326_v18 }
 0x4c6   : > { %v18342_v44 = vpop.permute.xlu0 %2010 }
 0x4c7   : > { %5004 = vrot.lane.b32.xlu0 %v4902_v37, %s21018_s28  ;;  %s21564_s28 = smov 40  }
 0x4c8   : > { %v18347_v51 = vpop.permute.xlu1 %3583 }
 0x4c9   : > { %6543 = vrot.lane.b32.xlu1 %v18332_v24, %s21409_s11  ;;  %21545 = vst [vmem:[#allocation81_spill] sm:$0xff] %v18347_v51  ;;  %v21552_v51 = vld [vmem:[#allocation73_spill] sm:$0xff] }
 0x4ca   : > { %v18357_v48 = vpop.permute.xlu0 %2014 }
 0x4cb   : > { %5014 = vrot.lane.b32.xlu0 %v17729_v36, %s21016_s29  ;;  %s21555_s29 = smov 32  }
 0x4cc   : > { %v18362_v42 = vpop.permute.xlu1 %3593 }
 0x4cd   : > { %6553 = vrot.lane.b32.xlu1 %v6137_v5, %s21022_s30  ;;  %21547 = vst [vmem:[#allocation83_spill] sm:$0xff] %v18362_v42  ;;  %v21550_v5 = vcombine.low %v21548_v46, %v21549_v0  ;;  %v21553_v42 = vld [vmem:[#allocation75_spill] sm:$0xff] }
 0x4ce   : > { %v18368_v37 = vpop.permute.xlu0 %2024  ;;  %v21554_v18 = vcombine.low %v21552_v51, %v21553_v42 }
 0x4cf   : > { %5024 = vrot.lane.b32.xlu0 %v4631_v19, %s21399_s20  ;;  %v18376_v10 = vrot.slane %v21550_v5, %v16371_v1  ;;  %v21556_v19 = vld [vmem:[#allocation29_spill] sm:$0xff]  ;;  %v21557_v5 = vld [vmem:[#allocation19_spill] sm:$0xff] }
 0x4d0   : > { %v18378_v36 = vpop.permute.xlu1 %3603  ;;  %v18384_v49 = vrot.slane %v21554_v18, %v16371_v1 }
 0x4d1   : > { %6557 = vrot.lane.b32.xlu1 %v6409_v20, %s21022_s30  ;;  %21551 = vst [vmem:[#allocation57_spill] sm:$0xff] %v18378_v36  ;;  %v21558_v36 = vcombine.low %v21556_v19, %v21557_v5  ;;  %v6202_v18 = vcombine.high %v18376_v10, %v21130_v63 }
 0x4d2   : > { %v18388_v20 = vpop.permute.xlu0 %2034 }
 0x4d3   : > { %5028 = vrot.lane.b32.xlu0 %v4903_v52, %s21399_s20  ;;  %v18397_v59 = vrot.slane %v21558_v36, %v16371_v1  ;;  %v4632_v36 = vcombine.high %v17781_v50, %v21130_v63  ;;  %v21563_v50 = vcombine.high %v21552_v51, %v21553_v42 }
 0x4d4   : > { %v18399_v40 = vpop.permute.xlu1 %3607 }
 0x4d5   : > { %6567 = vrot.lane.b32.xlu1 %v18384_v49, %s21555_s29  ;;  %21559 = vst [vmem:[#allocation59_spill] sm:$0xff] %v18399_v40  ;;  %v6474_v52 = vcombine.high %v18397_v59, %v21130_v63  ;;  %v18433_v33 = vrot.slane %v21563_v50, %v16371_v1 }
 0x4d6   : > { %v18403_v25 = vpop.permute.xlu0 %2038 }
 0x4d7   : > { %5038 = vrot.lane.b32.xlu0 %v17816_v27, %s21409_s11  ;;  %v21562_v27 = vld [vmem:[#allocation111_spill] sm:$0xff] }
 0x4d8   : > { %v18408_v12 = vpop.permute.xlu1 %3617 }
 0x4d9   : > { %6577 = vrot.lane.b32.xlu1 %v6202_v18, %s21020_s8  ;;  %21560 = vst [vmem:[#allocation73_spill] sm:$0xff] %v18408_v12  ;;  %v21561_v18 = vcombine.high %v21548_v46, %v21549_v0  ;;  %v2128_v12 = vsel %vm2127_vm8, %v21562_v27, %v18236_v58  ;;  %v21565_v58 = vcombine.high %v21556_v19, %v21557_v5  ;;  %v21566_v0 = vld [vmem:[#allocation47_spill] sm:$0xff] }
 0x4da   : > { %v18414_v38 = vpop.permute.xlu0 %2048  ;;  %v2132_v46 = vsel %vm2131_vm9, %v2128_v12, %v17501_v13 }
 0x4db   : > { %5048 = vrot.lane.b32.xlu0 %v4632_v36, %s21022_s30  ;;  %v18422_v40 = vrot.slane %v21561_v18, %v16371_v1  ;;  %v18446_v51 = vrot.slane %v21565_v58, %v16371_v1  ;;  %v2130_v18 = vsel %vm2127_vm8, %v21566_v0, %v17495_v6  ;;  %v2136_v13 = vsel %vm2135_vm10, %v2132_v46, %v17566_v23  ;;  %v21570_v0 = vld [vmem:[#allocation74_spill] sm:$0xff] }
 0x4dc   : > { %v18427_v17 = vpop.permute.xlu1 %3627  ;;  %v2134_v19 = vsel %vm2131_vm9, %v2130_v18, %v18258_v61  ;;  %v2140_v5 = vsel %vm2139_vm11, %v2136_v13, %v18295_v45  ;;  %v4697_v23 = vcombine.high %v17848_v57, %v21130_v63  ;;  %v21571_v18 = vld [vmem:[#allocation76_spill] sm:$0xff] }
 0x4dd   : > { %6581 = vrot.lane.b32.xlu1 %v6474_v52, %s21020_s8  ;;  %v4904_v52 = vcombine.high %v17810_v14, %v21130_v63  ;;  %v6203_v14 = vcombine.high %v18422_v40, %v21130_v63  ;;  %v6475_v6 = vcombine.high %v18446_v51, %v21130_v63  ;;  %v2138_v50 = vsel %vm2135_vm10, %v2134_v19, %v17608_v29  ;;  %v21567_v29 = vld [vmem:[#allocation58_spill] sm:$0xff] }
 0x4de   : > { %v2059_v36 = vpop.permute.xlu0 %2058  ;;  %v2144_v61 = vsel %vm2143_vm12, %v2140_v5, %v17620_v60  ;;  %v21568_v60 = vld [vmem:[#allocation60_spill] sm:$0xff]  ;;  %v21573_v19 = vld [vmem:[#allocation86_spill] sm:$0xff] }
 0x4df   : > { %5052 = vrot.lane.b32.xlu0 %v4904_v52, %s21022_s30  ;;  %v2142_v52 = vsel %vm2139_vm11, %v2138_v50, %v18312_v31  ;;  %v2148_v57 = vsel %vm2147_vm13, %v2144_v61, %v18342_v44  ;;  %v21569_v46 = vcombine.low %v21567_v29, %v21568_v60  ;;  %v4969_v31 = vcombine.high %v17891_v41, %v21130_v63  ;;  %v21575_v50 = vld [vmem:[#allocation84_spill] sm:$0xff] }
 0x4e0   : > { %v18448_v42 = vpop.permute.xlu1 %3631  ;;  %v2146_v13 = vsel %vm2143_vm12, %v2142_v52, %v17633_v43  ;;  %v2152_v5 = vsel %vm2151_vm14, %v2148_v57, %v21573_v19  ;;  %v21574_v43 = vld [vmem:[#allocation20_spill] sm:$0xff] }
 0x4e1   : > { %6591 = vrot.lane.b32.xlu1 %v18433_v33, %s21564_s28  ;;  %v18489_v58 = vrot.slane %v21569_v46, %v16371_v1  ;;  %v2150_v41 = vsel %vm2147_vm13, %v2146_v13, %v18357_v48  ;;  %v21576_v61 = vcombine.low %v21574_v43, %v21575_v50  ;;  %v21578_v48 = vld [vmem:[#allocation46_spill] sm:$0xff] }
 0x4e2   : > { %v2063_v12 = vpop.permute.xlu0 %2062 }
 0x4e3   : > { %5062 = vrot.lane.b32.xlu0 %v17872_v32, %s21555_s29  ;;  %v2137_v32 = vsel %vm2135_vm10, %v17546_v7, %v18269_v8  ;;  %v21572_v7 = vcombine.low %v21570_v0, %v21571_v18  ;;  %v6204_v57 = vcombine.high %v18489_v58, %v21130_v63 }
 0x4e4   : > { %v18464_v27 = vpop.permute.xlu1 %3641  ;;  %v2141_v44 = vsel %vm2139_vm11, %v2137_v32, %v17613_v16  ;;  %v2156_v16 = vsel %vm2155_vm15, %v2152_v5, %v18388_v20  ;;  %v18518_v32 = vrot.slane %v21576_v61, %v16371_v1  ;;  %v21579_v20 = vld [vmem:[#allocation31_spill] sm:$0xff] }
 0x4e5   : > { %6601 = vrot.lane.b32.xlu1 %v6203_v14, %s21031_s10  ;;  %v18495_v8 = vrot.slane %v21572_v7, %v16371_v1  ;;  %v2154_v7 = vsel %vm2151_vm14, %v2150_v41, %v21578_v48 }
 0x4e6   : > { %v18474_v45 = vpop.permute.xlu0 %2072  ;;  %v2158_v19 = vsel %vm2155_vm15, %v2154_v7, %v18403_v25  ;;  %v6476_v61 = vcombine.high %v18518_v32, %v21130_v63  ;;  %v21582_v25 = vld [vmem:[#allocation48_spill] sm:$0xff] }
 0x4e7   : > { %5072 = vrot.lane.b32.xlu0 %v4697_v23, %s21020_s8  ;;  %v2145_v23 = vsel %vm2143_vm12, %v2141_v44, %v18322_v30  ;;  %v21577_v30 = vld [vmem:[#allocation8_spill] sm:$0xff] }
 0x4e8   : > { %v4977_v14 = vpop.permute.xlu1 %4976  ;;  %v2149_v46 = vsel %vm2147_vm13, %v2145_v23, %v21577_v30  ;;  %v21580_v23 = vld [vmem:[#allocation124_spill] sm:$0xff] }
 0x4e9   : > { %6605 = vrot.lane.b32.xlu1 %v6475_v6, %s21031_s10  ;;  %v2153_v13 = vsel %vm2151_vm14, %v2149_v46, %v18368_v37  ;;  %v5153_v41 = vsel %vm2127_vm8, %v21580_v23, %v4977_v14  ;;  %v21583_v46 = vld [vmem:[#allocation30_spill] sm:$0xff] }
 0x4ea   : > { %v2083_v6 = vpop.permute.xlu0 %2082  ;;  %v2162_v48 = vsel %vm2159_vm0, %v2158_v19, %v21583_v46  ;;  %v21591_v46 = vcombine.high %v21574_v43, %v21575_v50  ;;  %v21595_v50 = vld [vmem:[#allocation65_spill] sm:$0xff] }
 0x4eb   : > { %5076 = vrot.lane.b32.xlu0 %v4969_v31, %s21020_s8  ;;  %v2160_v31 = vsel %vm2159_vm0, %v2156_v16, %v21579_v20  ;;  %s13516_s8 = smul.u32 96, %s14037_s24 }
 0x4ec   : > { %v4981_v52 = vpop.permute.xlu1 %4980  ;;  %v2164_v5 = vsel %vm2163_vm1, %v2160_v31, %v2059_v36  ;;  %v2157_v36 = vsel %vm2155_vm15, %v2153_v13, %v21582_v25  ;;  %v2166_v31 = vsel %vm2163_vm1, %v2162_v48, %v2063_v12  ;;  %v21585_v13 = vcombine.high %v21567_v29, %v21568_v60  ;;  %v21587_v12 = vld [vmem:[#allocation138_spill] sm:$0xff] }
 0x4ed   : > { %6615 = vrot.lane.b32.xlu1 %v18495_v8, %s21325_s5  ;;  %v2161_v20 = vsel %vm2159_vm0, %v2157_v36, %v18414_v38  ;;  %v18591_v48 = vrot.slane %v21591_v46, %v16371_v1  ;;  %s18599_s30 = scalar_lea.vmem [#allocation3], %s13516_s8  ;;  %s21620_s8 = smov 12  }
 0x4ee   : > { %v2087_v44 = vpop.permute.xlu0 %2086  ;;  %v18562_v19 = vrot.slane %v21585_v13, %v16371_v1  ;;  %v21596_v13 = vld [vmem:[#allocation12_spill] sm:$0xff] }
 0x4ef   : > { %5086 = vrot.lane.b32.xlu0 %v17948_v28, %s21564_s28  ;;  %v21584_v28 = vld [vmem:[#allocation95_spill] sm:$0xff] }
 0x4f0   : > { %v4989_v16 = vpop.permute.xlu1 %4988  ;;  %v2168_v14 = vsel %vm2167_vm2, %v2164_v5, %v21584_v28  ;;  %v21592_v28 = vld [vmem:[#allocation129_spill] sm:$0xff] }
 0x4f1   : > { %6625 = vrot.lane.b32.xlu1 %v6204_v57, %s21335_s6  ;;  %v21581_v57 = vld [vmem:[#allocation137_spill] sm:$0xff]  ;;  %v18543_v37 = vsel %vm2131_vm9, %v5153_v41, %v4989_v16  ;;  %v2172_v23 = vsel %vm2171_vm3, %v2168_v14, %v2083_v6  ;;  %v21586_v41 = vcombine.high %v21570_v0, %v21571_v18  ;;  %v4970_v6 = vcombine.high %v21587_v12, %v21130_v63  ;;  %v21588_v16 = vld [vmem:[#allocation135_spill] sm:$0xff] }
 0x4f2   : > { %v4698_v30 = vcombine.high %v21581_v57, %v21130_v63  ;;  %v2097_v7 = vpop.permute.xlu0 %2096  ;;  %v21589_v57 = vld [vmem:[#allocation11_spill] sm:$0xff]  ;;  %v5155_v14 = vsel %vm2127_vm8, %v21592_v28, %v4981_v52 }
 0x4f3   : > { %v18570_v38 = vrot.slane %v21586_v41, %v16371_v1  ;;  %v2170_v29 = vsel %vm2167_vm2, %v2166_v31, %v21589_v57 }
 0x4f4   : > { %5096 = vrot.lane.b32.xlu0 %v4698_v30, %s21031_s10  ;;  %v18564_v5 = vpop.permute.xlu1 %4990  ;;  %v21590_v30 = vld [vmem:[#allocation34_spill] sm:$0xff]  ;;  %v2174_v18 = vsel %vm2171_vm3, %v2170_v29, %v2087_v44  ;;  %v6477_v29 = vcombine.high %v18591_v48, %v21130_v63 }
 0x4f5   : > { %6629 = vrot.lane.b32.xlu1 %v6476_v61, %s21335_s6  ;;  %v2165_v61 = vsel %vm2163_vm1, %v2161_v20, %v21588_v16  ;;  %v2176_v25 = vsel %vm2175_vm4, %v2172_v23, %v21590_v30  ;;  %v21593_v20 = vld [vmem:[#allocation139_spill] sm:$0xff]  ;;  %v2178_v41 = vsel %vm2175_vm4, %v2174_v18, %v21596_v13  ;;  %v21597_v16 = vld [vmem:[#allocation108_spill] sm:$0xff]  ;;  %v21599_v30 = vld [vmem:[#allocation13_spill] sm:$0xff] }
 0x4f6   : > { %v2107_v60 = vpop.permute.xlu0 %2106  ;;  %v2169_v0 = vsel %vm2167_vm2, %v2165_v61, %v18474_v45  ;;  %v6205_v45 = vcombine.high %v18562_v19, %v21130_v63 }
 0x4f7   : > { %v2180_v36 = vsel %vm2179_vm5, %v2176_v25, %v2107_v60  ;;  %v2173_v44 = vsel %vm2171_vm3, %v2169_v0, %v21595_v50  ;;  %v21598_v60 = vld [vmem:[#allocation96_spill] sm:$0xff] }
 0x4f8   : > { %5100 = vrot.lane.b32.xlu0 %v4970_v6, %s21031_s10  ;;  %v2184_v31 = vsel %vm2183_vm6, %v2180_v36, %v21593_v20  ;;  %v4993_v23 = vpop.permute.xlu1 %4992  ;;  %v2177_v12 = vsel %vm2175_vm4, %v2173_v44, %v2097_v7  ;;  %v21600_v25 = vcombine.low %v21598_v60, %v21599_v30  ;;  %v21602_v7 = vld [vmem:[#allocation50_spill] sm:$0xff]  ;;  %v21603_v36 = vld [vmem:[#allocation36_spill] sm:$0xff]  ;;  %v4971_v44 = vcombine.high %v18019_v35, %v21130_v63  ;;  %v21611_v35 = vld [vmem:[#allocation21_spill] sm:$0xff]  ;;  %s21655_s10 = smov 36  }
 0x4f9   : > { %6639 = vrot.lane.b32.xlu1 %v18570_v38, %s21476_s7  ;;  %2188 = vst.msk [vmem:[%s18599_s30] sm:$0xf] %vm2187_vm7, %v2184_v31  ;;  %v18604_v43 = vsel %vm2131_vm9, %v5155_v14, %v4993_v23  ;;  %v4699_v18 = vcombine.high %v21602_v7, %v21130_v63  ;;  %v2181_v46 = vsel %vm2179_vm5, %v2177_v12, %v21603_v36  ;;  %v21605_v31 = vld [vmem:[#allocation102_spill] sm:$0xff]  ;;  %v21606_v23 = vld [vmem:[#allocation24_spill] sm:$0xff] }
 0x4fa   : > { %21594 = vst [vmem:[#allocation75_spill] sm:$0xff] %v18604_v43  ;;  %v2111_v52 = vpop.permute.xlu0 %2110  ;;  %v18625_v0 = vrot.slane %v21600_v25, %v16371_v1  ;;  %v4700_v25 = vcombine.high %v18057_v21, %v21130_v63  ;;  %v4972_v36 = vcombine.high %v18082_v15, %v21130_v63  ;;  %v21616_v21 = vcombine.low %v21515_v62, %v21516_v2 }
 0x4fb   : > { %v2182_v6 = vsel %vm2179_vm5, %v2178_v41, %v2111_v52  ;;  %v21619_v15 = vcombine.high %v21605_v31, %v21606_v23 }
 0x4fc   : > { %5110 = vrot.lane.b32.xlu0 %v17998_v56, %s21325_s5  ;;  %v2186_v61 = vsel %vm2183_vm6, %v2182_v6, %v21597_v16  ;;  %v18617_v57 = vpop.permute.xlu1 %5002  ;;  %21601 = vst [vmem:[#allocation29_spill] sm:$0xff] %v18625_v0  ;;  %v7775_v20 = vcombine.high %v18625_v0, %v21130_v63  ;;  %v21612_v16 = vld [vmem:[#allocation88_spill] sm:$0xff] }
 0x4fd   : > { %6649 = vrot.lane.b32.xlu1 %v6205_v45, %s21500_s9  ;;  %2190 = vst.msk [vmem:[%s18599_s30 + $0x40] sm:$0xf] %vm2187_vm7, %v2186_v61  ;;  %v21607_v45 = vcombine.low %v21605_v31, %v21606_v23  ;;  %v21613_v61 = vcombine.high %v21611_v35, %v21612_v16  ;;  %v21623_v23 = vld [vmem:[#allocation97_spill] sm:$0xff] }
 0x4fe   : > { %v2121_v56 = vpop.permute.xlu0 %2120 }
 0x4ff   : > { %v2185_v28 = vsel %vm2183_vm6, %v2181_v46, %v2121_v56  ;;  %v18646_v50 = vrot.slane %v21607_v45, %v16371_v1  ;;  %v18689_v46 = vrot.slane %v21616_v21, %v16371_v1 }
 0x500   : > { %5120 = vrot.lane.b32.xlu0 %v4699_v18, %s21335_s6  ;;  %2189 = vst.msk [vmem:[%s18599_s30 + $0x20] sm:$0xf] %vm2187_vm7, %v2185_v28  ;;  %v18638_v14 = vpop.permute.xlu1 %5012 }
 0x501   : > { %6653 = vrot.lane.b32.xlu1 %v6477_v29, %s21500_s9  ;;  %21604 = vst [vmem:[#allocation19_spill] sm:$0xff] %v18638_v14  ;;  %21608 = vst [vmem:[#allocation111_spill] sm:$0xff] %v18646_v50  ;;  %v7911_v41 = vcombine.high %v18646_v50, %v21130_v63  ;;  %v7622_v29 = vrot.slane %v21613_v61, %v16371_v1  ;;  %v6270_v2 = vcombine.high %v18689_v46, %v21130_v63  ;;  %v21624_v61 = vld [vmem:[#allocation92_spill] sm:$0xff]  ;;  %v21632_v50 = vld [vmem:[#allocation22_spill] sm:$0xff] }
 0x502   : > { %v18650_v52 = vpop.permute.xlu0 %3471  ;;  %21617 = vst [vmem:[#allocation74_spill] sm:$0xff] %v18689_v46 }
 0x504   : > { %5124 = vrot.lane.b32.xlu0 %v4971_v44, %s21335_s6  ;;  %v18654_v13 = vpop.permute.xlu1 %5016 }
 0x505   : > { %7988 = vrot.lane.b32.xlu1 %v7775_v20, %s21029_s21  ;;  %21609 = vst [vmem:[#allocation47_spill] sm:$0xff] %v18654_v13 }
 0x506   : > { %v18658_v12 = vpop.permute.xlu0 %3485 }
 0x508   : > { %5134 = vrot.lane.b32.xlu0 %v18068_v39, %s21476_s7  ;;  %v18663_v6 = vpop.permute.xlu1 %5026  ;;  %v21615_v39 = vcombine.high %v21598_v60, %v21599_v30  ;;  %v7640_v60 = vcombine.high %v7622_v29, %v21130_v63  ;;  %v18703_v30 = vrot.slane %v21619_v15, %v16371_v1  ;;  %v6271_v15 = vcombine.high %v18214_v3, %v21130_v63 }
 0x509   : > { %7990 = vrot.lane.b32.xlu1 %v7911_v41, %s21029_s21  ;;  %21610 = vst [vmem:[#allocation58_spill] sm:$0xff] %v18663_v6 }
 0x50a   : > { %v18671_v7 = vpop.permute.xlu0 %3495  ;;  %v18681_v56 = vrot.slane %v21615_v39, %v16371_v1  ;;  %v7912_v44 = vcombine.high %v18703_v30, %v21130_v63  ;;  %v21626_v39 = vld [vmem:[#allocation87_spill] sm:$0xff] }
 0x50c   : > { %5144 = vrot.lane.b32.xlu0 %v4700_v25, %s21500_s9  ;;  %v18675_v18 = vpop.permute.xlu1 %5036 }
 0x50d   : > { %7998 = vrot.lane.b32.xlu1 %v7622_v29, %s21024_s25  ;;  %21614 = vst [vmem:[#allocation60_spill] sm:$0xff] %v18675_v18  ;;  %v21625_v29 = vcombine.low %v21623_v23, %v21624_v61  ;;  %v21652_v18 = vld [vmem:[#allocation104_spill] sm:$0xff] }
 0x50e   : > { %v18691_v28 = vpop.permute.xlu0 %3499 }
 0x50f   : > { %v18726_v25 = vrot.slane %v21625_v29, %v16371_v1  ;;  %v21631_v29 = vld [vmem:[#allocation103_spill] sm:$0xff] }
 0x510   : > { %5148 = vrot.lane.b32.xlu0 %v4972_v36, %s21500_s9  ;;  %v18696_v20 = vpop.permute.xlu1 %5040  ;;  %v21627_v36 = vld [vmem:[#allocation89_spill] sm:$0xff] }
 0x511   : > { %8000 = vrot.lane.b32.xlu1 %v18681_v56, %s21024_s25  ;;  %21618 = vst [vmem:[#allocation76_spill] sm:$0xff] %v18696_v20  ;;  %v21628_v21 = vcombine.low %v21626_v39, %v21627_v36 }
 0x512   : > { %v18707_v62 = vpop.permute.xlu0 %3509 }
 0x514   : > { %6483 = vrot.lane.b32.xlu0 %v6270_v2, %s21029_s21  ;;  %v18711_v45 = vpop.permute.xlu1 %5050  ;;  %s21640_s21 = smov 28  }
 0x515   : > { %8010 = vrot.lane.b32.xlu1 %v7640_v60, %s21620_s8  ;;  %21621 = vst [vmem:[#allocation86_spill] sm:$0xff] %v18711_v45  ;;  %v18732_v60 = vrot.slane %v21628_v21, %v16371_v1  ;;  %v21633_v21 = vcombine.low %v21631_v29, %v21632_v50 }
 0x516   : > { %v18715_v41 = vpop.permute.xlu0 %3519 }
 0x517   : > { %v18749_v46 = vrot.slane %v21633_v21, %v16371_v1 }
 0x518   : > { %6497 = vrot.lane.b32.xlu0 %v18246_v26, %s21024_s25  ;;  %v18720_v31 = vpop.permute.xlu1 %5060  ;;  %s21629_s25 = smov 16  }
 0x519   : > { %8014 = vrot.lane.b32.xlu1 %v7912_v44, %s21620_s8  ;;  %21622 = vst [vmem:[#allocation20_spill] sm:$0xff] %v18720_v31  ;;  %v7641_v44 = vcombine.high %v18732_v60, %v21130_v63 }
 0x51a   : > { %v18736_v2 = vpop.permute.xlu0 %3523 }
 0x51c   : > { %6507 = vrot.lane.b32.xlu0 %v6271_v15, %s21620_s8  ;;  %v18741_v26 = vpop.permute.xlu1 %5064  ;;  %v7913_v15 = vcombine.high %v18749_v46, %v21130_v63 }
 0x51d   : > { %8024 = vrot.lane.b32.xlu1 %v18726_v25, %s21629_s25  ;;  %21630 = vst [vmem:[#allocation84_spill] sm:$0xff] %v18741_v26 }
 0x51e   : > { %v3534_v0 = vpop.permute.xlu0 %3533 }
 0x520   : > { %6517 = vrot.lane.b32.xlu0 %v18285_v9, %s21629_s25  ;;  %v18754_v3 = vpop.permute.xlu1 %5074  ;;  %v21637_v9 = vcombine.high %v21626_v39, %v21627_v36 }
 0x521   : > { %8034 = vrot.lane.b32.xlu1 %v7641_v44, %s21399_s20  ;;  %21634 = vst [vmem:[#allocation8_spill] sm:$0xff] %v18754_v3  ;;  %v21636_v44 = vcombine.high %v21623_v23, %v21624_v61  ;;  %v21639_v61 = vcombine.high %v21631_v29, %v21632_v50  ;;  %v21642_v50 = vld [vmem:[#allocation33_spill] sm:$0xff]  ;;  %v21643_v29 = vld [vmem:[#allocation90_spill] sm:$0xff] }
 0x522   : > { %v18758_v26 = vpop.permute.xlu0 %3543  ;;  %v18775_v3 = vrot.slane %v21637_v9, %v16371_v1 }
 0x523   : > { %v18769_v31 = vrot.slane %v21636_v44, %v16371_v1  ;;  %v18792_v39 = vrot.slane %v21639_v61, %v16371_v1 }
 0x524   : > { %6521 = vrot.lane.b32.xlu0 %v18308_v53, %s21629_s25  ;;  %v18763_v21 = vpop.permute.xlu1 %5084  ;;  %v7642_v23 = vcombine.high %v18775_v3, %v21130_v63 }
 0x525   : > { %8038 = vrot.lane.b32.xlu1 %v7913_v15, %s21399_s20  ;;  %21635 = vst [vmem:[#allocation46_spill] sm:$0xff] %v18763_v21  ;;  %v6272_v15 = vcombine.high %v18279_v47, %v21130_v63  ;;  %v7914_v44 = vcombine.high %v18792_v39, %v21130_v63 }
 0x526   : > { %v18779_v20 = vpop.permute.xlu0 %3547 }
 0x528   : > { %6531 = vrot.lane.b32.xlu0 %v6272_v15, %s21399_s20  ;;  %v18784_v53 = vpop.permute.xlu1 %5088  ;;  %v21644_v15 = vcombine.low %v21642_v50, %v21643_v29 }
 0x529   : > { %8048 = vrot.lane.b32.xlu1 %v18769_v31, %s21409_s11  ;;  %21638 = vst [vmem:[#allocation31_spill] sm:$0xff] %v18784_v53  ;;  %v21647_v53 = vld [vmem:[#allocation98_spill] sm:$0xff] }
 0x52a   : > { %v3558_v36 = vpop.permute.xlu0 %3557  ;;  %v18808_v61 = vrot.slane %v21644_v15, %v16371_v1 }
 0x52c   : > { %6541 = vrot.lane.b32.xlu0 %v18338_v34, %s21409_s11  ;;  %v18797_v47 = vpop.permute.xlu1 %5098  ;;  %v21646_v34 = vld [vmem:[#allocation100_spill] sm:$0xff]  ;;  %v7707_v15 = vcombine.high %v18808_v61, %v21130_v63 }
 0x52d   : > { %8058 = vrot.lane.b32.xlu1 %v7642_v23, %s21640_s21  ;;  %21641 = vst [vmem:[#allocation124_spill] sm:$0xff] %v18797_v47  ;;  %v21648_v47 = vcombine.low %v21646_v34, %v21647_v53 }
 0x52e   : > { %v3568_v9 = vpop.permute.xlu0 %3567 }
 0x52f   : > { %v18816_v21 = vrot.slane %v21648_v47, %v16371_v1 }
 0x530   : > { %6545 = vrot.lane.b32.xlu0 %v18355_v54, %s21409_s11  ;;  %v18810_v23 = vpop.permute.xlu1 %5108 }
 0x531   : > { %8062 = vrot.lane.b32.xlu1 %v7914_v44, %s21640_s21  ;;  %21645 = vst [vmem:[#allocation137_spill] sm:$0xff] %v18810_v23  ;;  %21649 = vst [vmem:[#allocation48_spill] sm:$0xff] %v18816_v21  ;;  %v6273_v44 = vcombine.high %v18332_v24, %v21130_v63  ;;  %v21651_v23 = vld [vmem:[#allocation106_spill] sm:$0xff]  ;;  %v21654_v24 = vld [vmem:[#allocation23_spill] sm:$0xff] }
 0x532   : > { %v18820_v45 = vpop.permute.xlu0 %3571  ;;  %v21653_v47 = vcombine.low %v21651_v23, %v21652_v18  ;;  %v3649_v43 = vsel %vm2127_vm8, %v21654_v24, %v18013_v4 }
 0x533   : > { %v3652_v14 = vsel %vm2131_vm9, %v3649_v43, %v18658_v12 }
 0x534   : > { %6555 = vrot.lane.b32.xlu0 %v6273_v44, %s21640_s21  ;;  %v18825_v54 = vpop.permute.xlu1 %5112  ;;  %v18833_v13 = vrot.slane %v21653_v47, %v16371_v1  ;;  %v21656_v44 = vld [vmem:[#allocation45_spill] sm:$0xff] }
 0x535   : > { %8072 = vrot.lane.b32.xlu1 %v18816_v21, %s21555_s29  ;;  %21650 = vst [vmem:[#allocation30_spill] sm:$0xff] %v18825_v54  ;;  %v3648_v54 = vsel %vm2127_vm8, %v21656_v44, %v18650_v52  ;;  %v21657_v52 = vcombine.high %v21642_v50, %v21643_v29  ;;  %v21660_v29 = vld [vmem:[#allocation35_spill] sm:$0xff] }
 0x536   : > { %v3582_v6 = vpop.permute.xlu0 %3581  ;;  %v7979_v47 = vcombine.high %v18833_v13, %v21130_v63  ;;  %v3651_v4 = vsel %vm2131_vm9, %v3648_v54, %v18051_v22  ;;  %v3656_v44 = vsel %vm2135_vm10, %v21660_v29, %v18691_v28  ;;  %v21667_v29 = vld [vmem:[#allocation154_spill] sm:$0xff] }
 0x537   : > { %v3654_v43 = vsel %vm2135_vm10, %v3651_v4, %v18671_v7  ;;  %v18865_v22 = vrot.slane %v21657_v52, %v16371_v1  ;;  %v6338_v7 = vcombine.high %v18384_v49, %v21130_v63 }
 0x538   : > { %6565 = vrot.lane.b32.xlu0 %v18376_v10, %s21555_s29  ;;  %v18846_v21 = vpop.permute.xlu1 %5122 }
 0x539   : > { %8082 = vrot.lane.b32.xlu1 %v7707_v15, %s21655_s10  ;;  %v3655_v15 = vsel %vm2135_vm10, %v3652_v14, %v18117_v55  ;;  %v21658_v55 = vcombine.high %v21646_v34, %v21647_v53 }
 0x53a   : > { %v3592_v24 = vpop.permute.xlu0 %3591  ;;  %v3658_v10 = vsel %vm2139_vm11, %v3655_v15, %v18707_v62  ;;  %v21659_v62 = vld [vmem:[#allocation145_spill] sm:$0xff]  ;;  %v21662_v15 = vld [vmem:[#allocation82_spill] sm:$0xff] }
 0x53b   : > { %v18873_v14 = vrot.slane %v21658_v55, %v16371_v1  ;;  %v3661_v54 = vsel %vm2143_vm12, %v3658_v10, %v21659_v62  ;;  %v3659_v28 = vsel %vm2139_vm11, %v3656_v44, %v21662_v15  ;;  %v21666_v62 = vld [vmem:[#allocation152_spill] sm:$0xff] }
 0x53c   : > { %6569 = vrot.lane.b32.xlu0 %v18397_v59, %s21555_s29  ;;  %v18867_v12 = vpop.permute.xlu1 %5132  ;;  %v3657_v59 = vsel %vm2139_vm11, %v3654_v43, %v18159_v11  ;;  %v3664_v34 = vsel %vm2147_vm13, %v3661_v54, %v3534_v0  ;;  %v7708_v11 = vcombine.high %v18865_v22, %v21130_v63  ;;  %v21663_v43 = vld [vmem:[#allocation150_spill] sm:$0xff]  ;;  %v21664_v0 = vld [vmem:[#allocation153_spill] sm:$0xff]  ;;  %v3662_v55 = vsel %vm2143_vm12, %v3659_v28, %v18736_v2 }
 0x53d   : > { %8086 = vrot.lane.b32.xlu1 %v7979_v47, %s21655_s10  ;;  %v3660_v53 = vsel %vm2143_vm12, %v3657_v59, %v18715_v41  ;;  %v21661_v47 = vcombine.high %v21651_v23, %v21652_v18  ;;  %v3667_v10 = vsel %vm2151_vm14, %v3664_v34, %v21664_v0  ;;  %v3665_v54 = vsel %vm2147_vm13, %v3662_v55, %v21666_v62  ;;  %v21668_v2 = vld [vmem:[#allocation54_spill] sm:$0xff]  ;;  %v21673_v0 = vld [vmem:[#allocation99_spill] sm:$0xff] }
 0x53e   : > { %v3596_v50 = vpop.permute.xlu0 %3595  ;;  %v3663_v41 = vsel %vm2147_vm13, %v3660_v53, %v21663_v43  ;;  %v3670_v23 = vsel %vm2155_vm15, %v3667_v10, %v3558_v36 }
 0x53f   : > { %v18898_v4 = vrot.slane %v21661_v47, %v16371_v1  ;;  %v3666_v18 = vsel %vm2151_vm14, %v3663_v41, %v18758_v26  ;;  %v3673_v53 = vsel %vm2159_vm0, %v3670_v23, %v21668_v2  ;;  %v21670_v47 = vld [vmem:[#allocation91_spill] sm:$0xff]  ;;  %v21672_v41 = vld [vmem:[#allocation101_spill] sm:$0xff] }
 0x540   : > { %6579 = vrot.lane.b32.xlu0 %v6338_v7, %s21655_s10  ;;  %v18890_v49 = vpop.permute.xlu1 %5136  ;;  %v3669_v44 = vsel %vm2155_vm15, %v3666_v18, %v21667_v29  ;;  %v3676_v34 = vsel %vm2163_vm1, %v3673_v53, %v3582_v6  ;;  %v21674_v10 = vcombine.low %v21672_v41, %v21673_v0  ;;  %v21675_v6 = vld [vmem:[#allocation72_spill] sm:$0xff]  ;;  %v21677_v23 = vld [vmem:[#allocation83_spill] sm:$0xff] }
 0x541   : > { %8096 = vrot.lane.b32.xlu1 %v18873_v14, %s21564_s28  ;;  %v7980_v59 = vcombine.high %v18898_v4, %v21130_v63  ;;  %v3672_v36 = vsel %vm2159_vm0, %v3669_v44, %v3568_v9  ;;  %v21678_v53 = vld [vmem:[#allocation107_spill] sm:$0xff] }
 0x542   : > { %v3606_v52 = vpop.permute.xlu0 %3605  ;;  %v18941_v55 = vrot.slane %v21674_v10, %v16371_v1 }
 0x544   : > { %6589 = vrot.lane.b32.xlu0 %v18422_v40, %s21564_s28  ;;  %v18914_v7 = vpop.permute.xlu1 %5146  ;;  %v3668_v40 = vsel %vm2151_vm14, %v3665_v54, %v18779_v20  ;;  %v6339_v20 = vcombine.high %v18433_v33, %v21130_v63 }
 0x545   : > { %8106 = vrot.lane.b32.xlu1 %v7708_v11, %s21665_s0  ;;  %v21669_v11 = vld [vmem:[#allocation42_spill] sm:$0xff]  ;;  %v3671_v9 = vsel %vm2155_vm15, %v3668_v40, %v21675_v6  ;;  %v21679_v40 = vld [vmem:[#allocation105_spill] sm:$0xff] }
 0x546   : > { %v3616_v26 = vpop.permute.xlu0 %3615  ;;  %v21671_v15 = vcombine.low %v21669_v11, %v21670_v47  ;;  %v3674_v54 = vsel %vm2159_vm0, %v3671_v9, %v18820_v45 }
 0x548   : > { %6593 = vrot.lane.b32.xlu0 %v18446_v51, %s21564_s28  ;;  %v18935_v28 = vrot.slane %v21671_v15, %v16371_v1  ;;  %v6482_v43 = vpop.permute.xlu1 %6481  ;;  %v21676_v51 = vld [vmem:[#allocation56_spill] sm:$0xff]  ;;  %v21681_v15 = vld [vmem:[#allocation81_spill] sm:$0xff] }
 0x549   : > { %8110 = vrot.lane.b32.xlu1 %v7980_v59, %s21665_s0  ;;  %v3675_v18 = vsel %vm2163_vm1, %v3672_v36, %v21676_v51  ;;  %v3679_v59 = vsel %vm2167_vm2, %v3676_v34, %v21677_v23  ;;  %v21680_v36 = vcombine.low %v21678_v53, %v21679_v40  ;;  %v3677_v45 = vsel %vm2163_vm1, %v3674_v54, %v21681_v15  ;;  %v21684_v23 = vld [vmem:[#allocation53_spill] sm:$0xff] }
 0x54a   : > { %v3620_v62 = vpop.permute.xlu0 %3619  ;;  %v3678_v29 = vsel %vm2167_vm2, %v3675_v18, %v3592_v24  ;;  %v3682_v33 = vsel %vm2171_vm3, %v3679_v59, %v3606_v52  ;;  %v7709_v2 = vcombine.high %v18935_v28, %v21130_v63  ;;  %v21682_v24 = vld [vmem:[#allocation57_spill] sm:$0xff]  ;;  %v3680_v9 = vsel %vm2167_vm2, %v3677_v45, %v3596_v50 }
 0x54b   : > { %v18966_v34 = vrot.slane %v21680_v36, %v16371_v1  ;;  %v3681_v52 = vsel %vm2171_vm3, %v3678_v29, %v21682_v24  ;;  %v6658_v59 = vsel %vm2127_vm8, %v21684_v23, %v6482_v43  ;;  %v21686_v15 = vcombine.high %v21669_v11, %v21670_v47 }
 0x54c   : > { %6603 = vrot.lane.b32.xlu0 %v6339_v20, %s21665_s0  ;;  %v18958_v44 = vpop.permute.xlu1 %6485  ;;  %v21683_v20 = vld [vmem:[#allocation73_spill] sm:$0xff]  ;;  %v3684_v51 = vsel %vm2175_vm4, %v3681_v52, %v3616_v26  ;;  %v21685_v26 = vld [vmem:[#allocation59_spill] sm:$0xff]  ;;  %v6340_v52 = vcombine.high %v18495_v8, %v21130_v63  ;;  %v21688_v8 = vcombine.high %v21678_v53, %v21679_v40 }
 0x54d   : > { %8120 = vrot.lane.b32.xlu1 %v18941_v55, %s21325_s5  ;;  %v3685_v6 = vsel %vm2175_vm4, %v3682_v33, %v21683_v20  ;;  %v7981_v33 = vcombine.high %v18966_v34, %v21130_v63  ;;  %v19002_v45 = vrot.slane %v21686_v15, %v16371_v1  ;;  %v21690_v53 = vld [vmem:[#allocation117_spill] sm:$0xff]  ;;  %v21704_v15 = vld [vmem:[#allocation38_spill] sm:$0xff] }
 0x54e   : > { %v3630_v10 = vpop.permute.xlu0 %3629 }
 0x54f   : > { %v3688_v18 = vsel %vm2179_vm5, %v3685_v6, %v3630_v10 }
 0x550   : > { %6613 = vrot.lane.b32.xlu0 %v18489_v58, %s21325_s5  ;;  %v3691_v54 = vsel %vm2183_vm6, %v3688_v18, %v18464_v27  ;;  %v6494_v29 = vpop.permute.xlu1 %6493  ;;  %v3687_v58 = vsel %vm2179_vm5, %v3684_v51, %v18427_v17  ;;  %v21687_v17 = vcombine.high %v21672_v41, %v21673_v0  ;;  %v7710_v41 = vcombine.high %v19002_v45, %v21130_v63  ;;  %v21689_v51 = vld [vmem:[#allocation16_spill] sm:$0xff] }
 0x551   : > { %8130 = vrot.lane.b32.xlu1 %v7709_v2, %s21335_s6  ;;  %3694 = vst.msk [vmem:[%s18599_s30 + $0x24] sm:$0xf] %vm2187_vm7, %v3691_v54  ;;  %v6661_v50 = vsel %vm2131_vm9, %v6658_v59, %v6494_v29  ;;  %v3683_v2 = vsel %vm2171_vm3, %v3680_v9, %v21685_v26  ;;  %v19030_v0 = vrot.slane %v21688_v8, %v16371_v1  ;;  %v21694_v54 = vld [vmem:[#allocation122_spill] sm:$0xff]  ;;  %v21695_v29 = vld [vmem:[#allocation120_spill] sm:$0xff] }
 0x552   : > { %v3640_v36 = vpop.permute.xlu0 %3639  ;;  %v3686_v27 = vsel %vm2175_vm4, %v3683_v2, %v3620_v62  ;;  %v19012_v62 = vrot.slane %v21687_v17, %v16371_v1  ;;  %v21691_v40 = vcombine.low %v21689_v51, %v21690_v53  ;;  %v6341_v26 = vcombine.high %v18570_v38, %v21130_v63 }
 0x553   : > { %v3690_v43 = vsel %vm2183_vm6, %v3687_v58, %v3640_v36  ;;  %v3689_v10 = vsel %vm2179_vm5, %v3686_v27, %v18448_v42  ;;  %v7982_v9 = vcombine.high %v19030_v0, %v21130_v63  ;;  %v21698_v2 = vcombine.low %v21611_v35, %v21612_v16  ;;  %v21703_v16 = vld [vmem:[#allocation27_spill] sm:$0xff] }
 0x554   : > { %6617 = vrot.lane.b32.xlu0 %v18518_v32, %s21325_s5  ;;  %3693 = vst.msk [vmem:[%s18599_s30 + $0x4] sm:$0xf] %vm2187_vm7, %v3690_v43  ;;  %v19006_v24 = vpop.permute.xlu1 %6495  ;;  %v19048_v18 = vrot.slane %v21691_v40, %v16371_v1  ;;  %v21705_v17 = vcombine.high %v21703_v16, %v21704_v15 }
 0x555   : > { %8134 = vrot.lane.b32.xlu1 %v7981_v33, %s21335_s6  ;;  %v21696_v33 = vcombine.low %v21694_v54, %v21695_v29  ;;  %v19071_v36 = vrot.slane %v21698_v2, %v16371_v1 }
 0x556   : > { %v3644_v32 = vpop.permute.xlu0 %3643  ;;  %21692 = vst [vmem:[#allocation95_spill] sm:$0xff] %v19048_v18 }
 0x557   : > { %v3692_v11 = vsel %vm2183_vm6, %v3689_v10, %v3644_v32  ;;  %21699 = vst [vmem:[#allocation11_spill] sm:$0xff] %v19071_v36  ;;  %v7639_v38 = vcombine.high %v19071_v36, %v21130_v63 }
 0x558   : > { %6627 = vrot.lane.b32.xlu0 %v6340_v52, %s21335_s6  ;;  %3695 = vst.msk [vmem:[%s18599_s30 + $0x44] sm:$0xf] %vm2187_vm7, %v3692_v11  ;;  %v6506_v47 = vpop.permute.xlu1 %6505  ;;  %v19093_v52 = vrot.slane %v21705_v17, %v16371_v1  ;;  %v21708_v11 = vcombine.high %v21694_v54, %v21695_v29 }
 0x559   : > { %8144 = vrot.lane.b32.xlu1 %v19012_v62, %s21476_s7  ;;  %v19033_v42 = vsel %vm2135_vm10, %v6661_v50, %v6506_v47  ;;  %v19063_v50 = vrot.slane %v21696_v33, %v16371_v1 }
 0x55a   : > { %v19035_v20 = vpop.permute.xlu0 %4978  ;;  %v19107_v47 = vrot.slane %v21708_v11, %v16371_v1  ;;  %v21719_v11 = vld [vmem:[#allocation18_spill] sm:$0xff] }
 0x55b   : > { %21697 = vst [vmem:[#allocation135_spill] sm:$0xff] %v19063_v50  ;;  %v9416_v27 = vcombine.high %v19063_v50, %v21130_v63 }
 0x55c   : > { %6637 = vrot.lane.b32.xlu0 %v18562_v19, %s21476_s7  ;;  %v19040_v6 = vpop.permute.xlu1 %6509  ;;  %v9280_v19 = vcombine.high %v19048_v18, %v21130_v63 }
 0x55d   : > { %8154 = vrot.lane.b32.xlu1 %v7710_v41, %s21500_s9  ;;  %v21709_v41 = vcombine.high %v21689_v51, %v21690_v53  ;;  %v21713_v53 = vld [vmem:[#allocation112_spill] sm:$0xff] }
 0x55e   : > { %v19050_v23 = vpop.permute.xlu0 %5000 }
 0x55f   : > { %v19113_v8 = vrot.slane %v21709_v41, %v16371_v1  ;;  %v21720_v41 = vld [vmem:[#allocation118_spill] sm:$0xff] }
 0x560   : > { %6641 = vrot.lane.b32.xlu0 %v18591_v48, %s21476_s7  ;;  %v19055_v59 = vpop.permute.xlu1 %6519 }
 0x561   : > { %8158 = vrot.lane.b32.xlu1 %v7982_v9, %s21500_s9  ;;  %21693 = vst [vmem:[#allocation138_spill] sm:$0xff] %v19055_v59  ;;  %v7776_v9 = vcombine.high %v18681_v56, %v21130_v63  ;;  %v21712_v56 = vld [vmem:[#allocation25_spill] sm:$0xff] }
 0x562   : > { %v19073_v48 = vpop.permute.xlu0 %5004  ;;  %v21714_v29 = vcombine.low %v21712_v56, %v21713_v53 }
 0x564   : > { %6651 = vrot.lane.b32.xlu0 %v6341_v26, %s21500_s9  ;;  %v19077_v58 = vpop.permute.xlu1 %6529  ;;  %v19135_v33 = vrot.slane %v21714_v29, %v16371_v1  ;;  %v7777_v29 = vcombine.high %v18726_v25, %v21130_v63  ;;  %v21724_v25 = vcombine.high %v21712_v56, %v21713_v53  ;;  %v21727_v56 = vcombine.high %v21719_v11, %v21720_v41 }
 0x565   : > { %9493 = vrot.lane.b32.xlu1 %v9280_v19, %s21700_s1  ;;  %21701 = vst [vmem:[#allocation34_spill] sm:$0xff] %v19077_v58  ;;  %v9281_v19 = vcombine.high %v19113_v8, %v21130_v63  ;;  %v21748_v58 = vld [vmem:[#allocation86_spill] sm:$0xff] }
 0x566   : > { %v19083_v43 = vpop.permute.xlu0 %5014  ;;  %v19177_v50 = vrot.slane %v21724_v25, %v16371_v1  ;;  %v19195_v53 = vrot.slane %v21727_v56, %v16371_v1  ;;  %v7778_v25 = vcombine.high %v18769_v31, %v21130_v63  ;;  %v21731_v56 = vld [vmem:[#allocation113_spill] sm:$0xff] }
 0x568   : > { %7986 = vrot.lane.b32.xlu0 %v7639_v38, %s21700_s1  ;;  %v19087_v35 = vpop.permute.xlu1 %6533 }
 0x569   : > { %9495 = vrot.lane.b32.xlu1 %v9416_v27, %s21700_s1  ;;  %21702 = vst [vmem:[#allocation129_spill] sm:$0xff] %v19087_v35  ;;  %v21717_v27 = vld [vmem:[#allocation121_spill] sm:$0xff] }
 0x56a   : > { %v19095_v32 = vpop.permute.xlu0 %5024 }
 0x56c   : > { %8002 = vrot.lane.b32.xlu0 %v18703_v30, %s21706_s2  ;;  %v19101_v10 = vpop.permute.xlu1 %6543 }
 0x56d   : > { %9503 = vrot.lane.b32.xlu1 %v19093_v52, %s21706_s2  ;;  %21707 = vst [vmem:[#allocation139_spill] sm:$0xff] %v19101_v10 }
 0x56e   : > { %v19117_v40 = vpop.permute.xlu0 %5028 }
 0x570   : > { %8012 = vrot.lane.b32.xlu0 %v7776_v9, %s21620_s8  ;;  %v19122_v30 = vpop.permute.xlu1 %6553  ;;  %v21721_v9 = vcombine.low %v21719_v11, %v21720_v41  ;;  %v9283_v11 = vcombine.high %v19195_v53, %v21130_v63 }
 0x571   : > { %9507 = vrot.lane.b32.xlu1 %v19107_v47, %s21706_s2  ;;  %21710 = vst [vmem:[#allocation65_spill] sm:$0xff] %v19122_v30 }
 0x572   : > { %v5039_v54 = vpop.permute.xlu0 %5038 }
 0x574   : > { %8022 = vrot.lane.b32.xlu0 %v18732_v60, %s21629_s25  ;;  %v19129_v51 = vpop.permute.xlu1 %6557  ;;  %v21716_v60 = vld [vmem:[#allocation123_spill] sm:$0xff] }
 0x575   : > { %9517 = vrot.lane.b32.xlu1 %v9281_v19, %s21620_s8  ;;  %21711 = vst [vmem:[#allocation12_spill] sm:$0xff] %v19129_v51  ;;  %v21718_v38 = vcombine.low %v21716_v60, %v21717_v27  ;;  %v19155_v19 = vrot.slane %v21721_v9, %v16371_v1 }
 0x576   : > { %v19137_v26 = vpop.permute.xlu0 %5048 }
 0x577   : > { %v19149_v17 = vrot.slane %v21718_v38, %v16371_v1  ;;  %v9282_v38 = vcombine.high %v19155_v19, %v21130_v63 }
 0x578   : > { %8026 = vrot.lane.b32.xlu0 %v18749_v46, %s21629_s25  ;;  %v19143_v2 = vpop.permute.xlu1 %6567 }
 0x579   : > { %9527 = vrot.lane.b32.xlu1 %v19135_v33, %s21629_s25  ;;  %21715 = vst [vmem:[#allocation108_spill] sm:$0xff] %v19143_v2 }
 0x57a   : > { %v19159_v18 = vpop.permute.xlu0 %5052 }
 0x57c   : > { %8036 = vrot.lane.b32.xlu0 %v7777_v29, %s21399_s20  ;;  %v19164_v46 = vpop.permute.xlu1 %6577 }
 0x57d   : > { %9531 = vrot.lane.b32.xlu1 %v19149_v17, %s21629_s25  ;;  %21722 = vst [vmem:[#allocation96_spill] sm:$0xff] %v19164_v46  ;;  %v21740_v46 = vld [vmem:[#allocation28_spill] sm:$0xff] }
 0x57e   : > { %v5063_v36 = vpop.permute.xlu0 %5062 }
 0x580   : > { %8046 = vrot.lane.b32.xlu0 %v18775_v3, %s21409_s11  ;;  %v19171_v9 = vpop.permute.xlu1 %6581  ;;  %v21726_v3 = vcombine.high %v21716_v60, %v21717_v27 }
 0x581   : > { %9541 = vrot.lane.b32.xlu1 %v9282_v38, %s21399_s20  ;;  %21723 = vst [vmem:[#allocation13_spill] sm:$0xff] %v19171_v9 }
 0x582   : > { %v5073_v29 = vpop.permute.xlu0 %5072  ;;  %v19189_v38 = vrot.slane %v21726_v3, %v16371_v1 }
 0x584   : > { %8050 = vrot.lane.b32.xlu0 %v18792_v39, %s21409_s11  ;;  %v19183_v2 = vpop.permute.xlu1 %6591  ;;  %v21728_v39 = vld [vmem:[#allocation70_spill] sm:$0xff] }
 0x585   : > { %9551 = vrot.lane.b32.xlu1 %v19177_v50, %s21409_s11  ;;  %21725 = vst [vmem:[#allocation50_spill] sm:$0xff] %v19183_v2  ;;  %v5154_v60 = vsel %vm2127_vm8, %v21728_v39, %v19035_v20 }
 0x586   : > { %v5077_v9 = vpop.permute.xlu0 %5076  ;;  %v5157_v31 = vsel %vm2131_vm9, %v5154_v60, %v18564_v5  ;;  %v5159_v5 = vsel %vm2135_vm10, %v18543_v37, %v19050_v23  ;;  %v21742_v37 = vld [vmem:[#allocation48_spill] sm:$0xff] }
 0x587   : > { %v5160_v2 = vsel %vm2135_vm10, %v5157_v31, %v18617_v57  ;;  %v7843_v23 = vcombine.high %v21742_v37, %v21130_v63 }
 0x588   : > { %8060 = vrot.lane.b32.xlu0 %v7778_v25, %s21640_s21  ;;  %v19205_v27 = vpop.permute.xlu1 %6601  ;;  %v21732_v25 = vld [vmem:[#allocation115_spill] sm:$0xff] }
 0x589   : > { %9555 = vrot.lane.b32.xlu1 %v19189_v38, %s21409_s11  ;;  %21729 = vst [vmem:[#allocation36_spill] sm:$0xff] %v19205_v27  ;;  %v21733_v20 = vcombine.low %v21731_v56, %v21732_v25 }
 0x58a   : > { %v5087_v41 = vpop.permute.xlu0 %5086 }
 0x58b   : > { %v19220_v39 = vrot.slane %v21733_v20, %v16371_v1  ;;  %v21736_v20 = vld [vmem:[#allocation125_spill] sm:$0xff] }
 0x58c   : > { %8070 = vrot.lane.b32.xlu0 %v18808_v61, %s21555_s29  ;;  %v19214_v3 = vpop.permute.xlu1 %6605  ;;  %v5163_v61 = vsel %vm2139_vm11, %v5160_v2, %v19083_v43  ;;  %v21743_v43 = vld [vmem:[#allocation19_spill] sm:$0xff]  ;;  %v21744_v2 = vld [vmem:[#allocation58_spill] sm:$0xff] }
 0x58d   : > { %9565 = vrot.lane.b32.xlu1 %v9283_v11, %s21640_s21  ;;  %21730 = vst [vmem:[#allocation102_spill] sm:$0xff] %v19214_v3  ;;  %v21735_v11 = vld [vmem:[#allocation127_spill] sm:$0xff]  ;;  %v21739_v3 = vld [vmem:[#allocation41_spill] sm:$0xff] }
 0x58e   : > { %v5097_v27 = vpop.permute.xlu0 %5096  ;;  %v21737_v57 = vcombine.low %v21735_v11, %v21736_v20  ;;  %v21741_v51 = vcombine.low %v21739_v3, %v21740_v46 }
 0x590   : > { %8074 = vrot.lane.b32.xlu0 %v18833_v13, %s21555_s29  ;;  %v19233_v60 = vpop.permute.xlu1 %6615  ;;  %v19239_v31 = vrot.slane %v21737_v57, %v16371_v1  ;;  %v19245_v10 = vrot.slane %v21741_v51, %v16371_v1  ;;  %v5162_v13 = vsel %vm2139_vm11, %v5159_v5, %v21743_v43  ;;  %v21745_v57 = vld [vmem:[#allocation75_spill] sm:$0xff] }
 0x591   : > { %9575 = vrot.lane.b32.xlu1 %v19220_v39, %s21555_s29  ;;  %21734 = vst [vmem:[#allocation24_spill] sm:$0xff] %v19233_v60  ;;  %v5166_v60 = vsel %vm2143_vm12, %v5163_v61, %v21744_v2  ;;  %v5161_v35 = vsel %vm2135_vm10, %v21745_v57, %v19073_v48  ;;  %v5165_v51 = vsel %vm2143_vm12, %v5162_v13, %v19095_v32  ;;  %v21746_v61 = vld [vmem:[#allocation47_spill] sm:$0xff]  ;;  %v21747_v2 = vld [vmem:[#allocation60_spill] sm:$0xff] }
 0x592   : > { %21738 = vst [vmem:[#allocation21_spill] sm:$0xff] %v19239_v31  ;;  %v5101_v30 = vpop.permute.xlu0 %5100  ;;  %v5169_v59 = vsel %vm2147_vm13, %v5166_v60, %v5039_v54  ;;  %v9348_v5 = vcombine.high %v19245_v10, %v21130_v63  ;;  %v5164_v43 = vsel %vm2139_vm11, %v5161_v35, %v21746_v61  ;;  %v21753_v61 = vcombine.high %v21735_v11, %v21736_v20 }
 0x593   : > { %v5172_v48 = vsel %vm2151_vm14, %v5169_v59, %v21748_v58  ;;  %v5167_v32 = vsel %vm2143_vm12, %v5164_v43, %v19117_v40  ;;  %v21749_v59 = vcombine.high %v21731_v56, %v21732_v25  ;;  %v21751_v40 = vld [vmem:[#allocation20_spill] sm:$0xff] }
 0x594   : > { %8084 = vrot.lane.b32.xlu0 %v7843_v23, %s21655_s10  ;;  %v19262_v37 = vpop.permute.xlu1 %6625  ;;  %v5175_v60 = vsel %vm2155_vm15, %v5172_v48, %v5063_v36  ;;  %v21750_v23 = vld [vmem:[#allocation76_spill] sm:$0xff]  ;;  %v19308_v43 = vrot.slane %v21753_v61, %v16371_v1  ;;  %v21756_v48 = vld [vmem:[#allocation46_spill] sm:$0xff] }
 0x595   : > { %9579 = vrot.lane.b32.xlu1 %v19239_v31, %s21555_s29  ;;  %v5168_v31 = vsel %vm2147_vm13, %v5165_v51, %v21747_v2  ;;  %v19286_v58 = vrot.slane %v21749_v59, %v16371_v1  ;;  %v5170_v13 = vsel %vm2147_vm13, %v5167_v32, %v21750_v23  ;;  %v21754_v2 = vcombine.high %v21739_v3, %v21740_v46  ;;  %v21758_v23 = vld [vmem:[#allocation31_spill] sm:$0xff] }
 0x596   : > { %v5111_v57 = vpop.permute.xlu0 %5110  ;;  %v5171_v54 = vsel %vm2151_vm14, %v5168_v31, %v19137_v26  ;;  %v21752_v26 = vld [vmem:[#allocation8_spill] sm:$0xff] }
 0x597   : > { %v5174_v51 = vsel %vm2155_vm15, %v5171_v54, %v21751_v40  ;;  %v5178_v36 = vsel %vm2159_vm0, %v5175_v60, %v21752_v26  ;;  %v21757_v54 = vld [vmem:[#allocation124_spill] sm:$0xff]  ;;  %v21759_v40 = vld [vmem:[#allocation137_spill] sm:$0xff] }
 0x598   : > { %8094 = vrot.lane.b32.xlu0 %v18865_v22, %s21564_s28  ;;  %v19280_v35 = vpop.permute.xlu1 %6629  ;;  %v5173_v22 = vsel %vm2151_vm14, %v5170_v13, %v19159_v18  ;;  %v5177_v56 = vsel %vm2159_vm0, %v5174_v51, %v5073_v29  ;;  %v5181_v25 = vsel %vm2163_vm1, %v5178_v36, %v5087_v41  ;;  %v19314_v18 = vrot.slane %v21754_v2, %v16371_v1  ;;  %v21755_v41 = vld [vmem:[#allocation84_spill] sm:$0xff] }
 0x599   : > { %9589 = vrot.lane.b32.xlu1 %v9348_v5, %s21655_s10  ;;  %v7844_v29 = vcombine.high %v18873_v14, %v21130_v63  ;;  %v5180_v32 = vsel %vm2163_vm1, %v5177_v56, %v21756_v48  ;;  %v5184_v11 = vsel %vm2167_vm2, %v5181_v25, %v21757_v54  ;;  %v21760_v25 = vld [vmem:[#allocation114_spill] sm:$0xff]  ;;  %v21764_v48 = vld [vmem:[#allocation128_spill] sm:$0xff] }
 0x59a   : > { %v5121_v31 = vpop.permute.xlu0 %5120  ;;  %v5183_v3 = vsel %vm2167_vm2, %v5180_v32, %v5097_v27  ;;  %v5187_v60 = vsel %vm2171_vm3, %v5184_v11, %v5111_v57  ;;  %v9349_v59 = vcombine.high %v19314_v18, %v21130_v63  ;;  %v21765_v32 = vld [vmem:[#allocation126_spill] sm:$0xff] }
 0x59b   : > { %v5186_v51 = vsel %vm2171_vm3, %v5183_v3, %v21759_v40  ;;  %v21766_v54 = vcombine.low %v21764_v48, %v21765_v32 }
 0x59c   : > { %8098 = vrot.lane.b32.xlu0 %v18898_v4, %s21564_s28  ;;  %v19302_v5 = vpop.permute.xlu1 %6639  ;;  %v5176_v4 = vsel %vm2155_vm15, %v5173_v22, %v21755_v41  ;;  %v5189_v57 = vsel %vm2175_vm4, %v5186_v51, %v5121_v31 }
 0x59d   : > { %9599 = vrot.lane.b32.xlu1 %v19286_v58, %s21564_s28  ;;  %v5179_v46 = vsel %vm2159_vm0, %v5176_v4, %v5077_v9  ;;  %v5190_v9 = vsel %vm2175_vm4, %v5187_v60, %v18846_v21  ;;  %v21761_v21 = vld [vmem:[#allocation116_spill] sm:$0xff]  ;;  %v19374_v11 = vrot.slane %v21766_v54, %v16371_v1 }
 0x59e   : > { %v5125_v20 = vpop.permute.xlu0 %5124  ;;  %v5182_v13 = vsel %vm2163_vm1, %v5179_v46, %v21758_v23  ;;  %v21762_v61 = vcombine.low %v21760_v25, %v21761_v21  ;;  %v21768_v46 = vld [vmem:[#allocation26_spill] sm:$0xff] }
 0x59f   : > { %v5185_v27 = vsel %vm2167_vm2, %v5182_v13, %v5101_v30  ;;  %v21763_v30 = vld [vmem:[#allocation30_spill] sm:$0xff] }
 0x5a0   : > { %8108 = vrot.lane.b32.xlu0 %v7844_v29, %s21665_s0  ;;  %v19330_v14 = vpop.permute.xlu1 %6649  ;;  %v19354_v2 = vrot.slane %v21762_v61, %v16371_v1  ;;  %v5188_v31 = vsel %vm2171_vm3, %v5185_v27, %v21763_v30  ;;  %v21771_v27 = vld [vmem:[#allocation29_spill] sm:$0xff]  ;;  %v7846_v61 = vcombine.high %v19012_v62, %v21130_v63  ;;  %v21774_v30 = vcombine.low %v21703_v16, %v21704_v15 }
 0x5a1   : > { %9603 = vrot.lane.b32.xlu1 %v19308_v43, %s21564_s28 }
 0x5a2   : > { %v5135_v26 = vpop.permute.xlu0 %5134 }
 0x5a3   : > { %v5193_v36 = vsel %vm2179_vm5, %v5190_v9, %v5135_v26 }
 0x5a4   : > { %8118 = vrot.lane.b32.xlu0 %v18935_v28, %s21325_s5  ;;  %v5196_v22 = vsel %vm2183_vm6, %v5193_v36, %v18914_v7  ;;  %v19348_v56 = vpop.permute.xlu1 %6653  ;;  %v5192_v28 = vsel %vm2179_vm5, %v5189_v57, %v18867_v12  ;;  %v5191_v7 = vsel %vm2175_vm4, %v5188_v31, %v5125_v20  ;;  %v21767_v12 = vld [vmem:[#allocation39_spill] sm:$0xff]  ;;  %v7845_v20 = vcombine.high %v18941_v55, %v21130_v63 }
 0x5a5   : > { %9613 = vrot.lane.b32.xlu1 %v9349_v59, %s21665_s0  ;;  %5199 = vst.msk [vmem:[%s18599_s30 + $0x28] sm:$0xf] %vm2187_vm7, %v5196_v22  ;;  %v21769_v3 = vcombine.low %v21767_v12, %v21768_v46  ;;  %v21770_v55 = vcombine.high %v21760_v25, %v21761_v21  ;;  %v21772_v36 = vcombine.high %v21764_v48, %v21765_v32 }
 0x5a6   : > { %v5145_v29 = vpop.permute.xlu0 %5144  ;;  %v21773_v25 = vcombine.high %v21767_v12, %v21768_v46  ;;  %v19438_v31 = vrot.slane %v21774_v30, %v16371_v1  ;;  %v21780_v12 = vld [vmem:[#allocation94_spill] sm:$0xff]  ;;  %v21781_v46 = vld [vmem:[#allocation51_spill] sm:$0xff] }
 0x5a7   : > { %v5195_v41 = vsel %vm2183_vm6, %v5192_v28, %v5145_v29  ;;  %v19380_v60 = vrot.slane %v21769_v3, %v16371_v1  ;;  %v19407_v26 = vrot.slane %v21770_v55, %v16371_v1  ;;  %v19421_v22 = vrot.slane %v21772_v36, %v16371_v1 }
 0x5a8   : > { %8122 = vrot.lane.b32.xlu0 %v18966_v34, %s21325_s5  ;;  %5198 = vst.msk [vmem:[%s18599_s30 + $0x8] sm:$0xf] %vm2187_vm7, %v5195_v41  ;;  %v7989_v4 = vpop.permute.xlu1 %7988  ;;  %v5194_v34 = vsel %vm2179_vm5, %v5191_v7, %v18890_v49  ;;  %v19427_v21 = vrot.slane %v21773_v25, %v16371_v1  ;;  %21775 = vst [vmem:[#allocation88_spill] sm:$0xff] %v19438_v31  ;;  %v21776_v7 = vld [vmem:[#allocation61_spill] sm:$0xff]  ;;  %v9144_v16 = vcombine.high %v19438_v31, %v21130_v63  ;;  %v21786_v25 = vld [vmem:[#allocation43_spill] sm:$0xff] }
 0x5a9   : > { %9623 = vrot.lane.b32.xlu1 %v19354_v2, %s21325_s5  ;;  %v9350_v40 = vcombine.high %v19380_v60, %v21130_v63  ;;  %v8164_v57 = vsel %vm2127_vm8, %v21771_v27, %v7989_v4  ;;  %v21777_v41 = vld [vmem:[#allocation85_spill] sm:$0xff]  ;;  %v21782_v3 = vcombine.low %v21780_v12, %v21781_v46  ;;  %v9147_v31 = vcombine.high %v19177_v50, %v21130_v63 }
 0x5aa   : > { %v5149_v59 = vpop.permute.xlu0 %5148  ;;  %v9351_v62 = vcombine.high %v19427_v21, %v21130_v63  ;;  %v21778_v4 = vcombine.low %v21776_v7, %v21777_v41 }
 0x5ab   : > { %v5197_v23 = vsel %vm2183_vm6, %v5194_v34, %v5149_v59 }
 0x5ac   : > { %8132 = vrot.lane.b32.xlu0 %v7845_v20, %s21335_s6  ;;  %5200 = vst.msk [vmem:[%s18599_s30 + $0x48] sm:$0xf] %vm2187_vm7, %v5197_v23  ;;  %v19392_v13 = vpop.permute.xlu1 %7990  ;;  %v19453_v48 = vrot.slane %v21778_v4, %v16371_v1  ;;  %v19469_v20 = vrot.slane %v21782_v3, %v16371_v1 }
 0x5ad   : > { %9627 = vrot.lane.b32.xlu1 %v19374_v11, %s21325_s5 }
 0x5ae   : > { %v19396_v51 = vpop.permute.xlu0 %6483  ;;  %21779 = vst [vmem:[#allocation97_spill] sm:$0xff] %v19453_v48  ;;  %v10649_v54 = vcombine.high %v19453_v48, %v21130_v63  ;;  %21783 = vst [vmem:[#allocation92_spill] sm:$0xff] %v19469_v20  ;;  %v10921_v23 = vcombine.high %v19469_v20, %v21130_v63  ;;  %v21801_v20 = vld [vmem:[#allocation37_spill] sm:$0xff] }
 0x5b0   : > { %8142 = vrot.lane.b32.xlu0 %v19002_v45, %s21476_s7  ;;  %v19401_v49 = vpop.permute.xlu1 %7998 }
 0x5b1   : > { %9637 = vrot.lane.b32.xlu1 %v9350_v40, %s21335_s6  ;;  %v9145_v40 = vcombine.high %v19093_v52, %v21130_v63 }
 0x5b2   : > { %v19409_v9 = vpop.permute.xlu0 %6497 }
 0x5b4   : > { %8146 = vrot.lane.b32.xlu0 %v19030_v0, %s21476_s7  ;;  %v8001_v45 = vpop.permute.xlu1 %8000 }
 0x5b5   : > { %9647 = vrot.lane.b32.xlu1 %v19407_v26, %s21476_s7  ;;  %v19432_v0 = vsel %vm2131_vm9, %v8164_v57, %v8001_v45  ;;  %v9417_v45 = vcombine.high %v19107_v47, %v21130_v63 }
 0x5b6   : > { %v19440_v29 = vpop.permute.xlu0 %6507 }
 0x5b8   : > { %8156 = vrot.lane.b32.xlu0 %v7846_v61, %s21500_s9  ;;  %v19445_v28 = vpop.permute.xlu1 %8010  ;;  %v21787_v61 = vld [vmem:[#allocation64_spill] sm:$0xff] }
 0x5b9   : > { %9651 = vrot.lane.b32.xlu1 %v19421_v22, %s21476_s7  ;;  %v21788_v30 = vcombine.high %v21786_v25, %v21787_v61 }
 0x5ba   : > { %v19457_v15 = vpop.permute.xlu0 %6517 }
 0x5bc   : > { %9491 = vrot.lane.b32.xlu0 %v9144_v16, %s21700_s1  ;;  %v19461_v32 = vpop.permute.xlu1 %8014  ;;  %v9146_v16 = vcombine.high %v19135_v33, %v21130_v63 }
 0x5bd   : > { %9661 = vrot.lane.b32.xlu1 %v9351_v62, %s21500_s9  ;;  %v10768_v62 = vrot.slane %v21788_v30, %v16371_v1 }
 0x5be   : > { %v19471_v59 = vpop.permute.xlu0 %6521 }
 0x5c0   : > { %9505 = vrot.lane.b32.xlu0 %v19113_v8, %s21706_s2  ;;  %v19476_v34 = vpop.permute.xlu1 %8024  ;;  %v21784_v8 = vcombine.high %v21776_v7, %v21777_v41  ;;  %v21790_v7 = vcombine.high %v21780_v12, %v21781_v46  ;;  %v21793_v46 = vld [vmem:[#allocation63_spill] sm:$0xff] }
 0x5c1   : > { %10996 = vrot.lane.b32.xlu1 %v10649_v54, %s21700_s1 }
 0x5c2   : > { %v19482_v55 = vpop.permute.xlu0 %6531  ;;  %v19492_v57 = vrot.slane %v21784_v8, %v16371_v1  ;;  %v19516_v41 = vrot.slane %v21790_v7, %v16371_v1  ;;  %v21798_v7 = vld [vmem:[#allocation14_spill] sm:$0xff] }
 0x5c4   : > { %9515 = vrot.lane.b32.xlu0 %v9145_v40, %s21620_s8  ;;  %v19486_v27 = vpop.permute.xlu1 %8034  ;;  %v21794_v40 = vld [vmem:[#allocation9_spill] sm:$0xff] }
 0x5c5   : > { %11000 = vrot.lane.b32.xlu1 %v10921_v23, %s21700_s1  ;;  %v9418_v23 = vcombine.high %v19149_v17, %v21130_v63  ;;  %v21795_v8 = vcombine.low %v21793_v46, %v21794_v40 }
 0x5c6   : > { %v6542_v36 = vpop.permute.xlu0 %6541 }
 0x5c8   : > { %9519 = vrot.lane.b32.xlu0 %v9417_v45, %s21620_s8  ;;  %v19499_v52 = vpop.permute.xlu1 %8038  ;;  %v19538_v45 = vrot.slane %v21795_v8, %v16371_v1 }
 0x5c9   : > { %11008 = vrot.lane.b32.xlu1 %v19492_v57, %s21706_s2  ;;  %21785 = vst [vmem:[#allocation87_spill] sm:$0xff] %v19499_v52 }
 0x5ca   : > { %v19505_v4 = vpop.permute.xlu0 %6545 }
 0x5cc   : > { %9529 = vrot.lane.b32.xlu0 %v19155_v19, %s21629_s25  ;;  %v19510_v47 = vpop.permute.xlu1 %8048  ;;  %v10786_v19 = vcombine.high %v10768_v62, %v21130_v63 }
 0x5cd   : > { %11010 = vrot.lane.b32.xlu1 %v10768_v62, %s21706_s2  ;;  %21789 = vst [vmem:[#allocation89_spill] sm:$0xff] %v19510_v47  ;;  %v21797_v62 = vld [vmem:[#allocation49_spill] sm:$0xff]  ;;  %v21804_v47 = vcombine.high %v21793_v46, %v21794_v40 }
 0x5ce   : > { %v19520_v54 = vpop.permute.xlu0 %6555 }
 0x5d0   : > { %9539 = vrot.lane.b32.xlu0 %v9146_v16, %s21399_s20  ;;  %v19525_v3 = vpop.permute.xlu1 %8058  ;;  %v21799_v16 = vcombine.low %v21797_v62, %v21798_v7 }
 0x5d1   : > { %11012 = vrot.lane.b32.xlu1 %v19516_v41, %s21706_s2  ;;  %21791 = vst [vmem:[#allocation103_spill] sm:$0xff] %v19525_v3 }
 0x5d2   : > { %v6566_v12 = vpop.permute.xlu0 %6565 }
 0x5d4   : > { %9543 = vrot.lane.b32.xlu0 %v9418_v23, %s21399_s20  ;;  %v19532_v33 = vpop.permute.xlu1 %8062  ;;  %v21800_v23 = vld [vmem:[#allocation62_spill] sm:$0xff] }
 0x5d5   : > { %11022 = vrot.lane.b32.xlu1 %v10786_v19, %s21620_s8  ;;  %21792 = vst [vmem:[#allocation22_spill] sm:$0xff] %v19532_v33  ;;  %v19550_v19 = vrot.slane %v21799_v16, %v16371_v1  ;;  %v21802_v8 = vcombine.low %v21800_v23, %v21801_v20 }
 0x5d6   : > { %v6570_v30 = vpop.permute.xlu0 %6569 }
 0x5d7   : > { %v19556_v48 = vrot.slane %v21802_v8, %v16371_v1 }
 0x5d8   : > { %9553 = vrot.lane.b32.xlu0 %v19195_v53, %s21409_s11  ;;  %v19544_v17 = vpop.permute.xlu1 %8072 }
 0x5d9   : > { %11032 = vrot.lane.b32.xlu1 %v19538_v45, %s21629_s25  ;;  %21796 = vst [vmem:[#allocation33_spill] sm:$0xff] %v19544_v17  ;;  %v10787_v16 = vcombine.high %v19556_v48, %v21130_v63  ;;  %v9419_v17 = vcombine.high %v19189_v38, %v21130_v63  ;;  %v21806_v38 = vld [vmem:[#allocation74_spill] sm:$0xff] }
 0x5da   : > { %v19560_v33 = vpop.permute.xlu0 %6579 }
 0x5dc   : > { %9563 = vrot.lane.b32.xlu0 %v9147_v31, %s21640_s21  ;;  %v19565_v53 = vpop.permute.xlu1 %8082  ;;  %v19579_v31 = vrot.slane %v21804_v47, %v16371_v1  ;;  %v6667_v47 = vsel %vm2139_vm11, %v19033_v42, %v19457_v15  ;;  %v9212_v42 = vcombine.high %v19220_v39, %v21130_v63 }
 0x5dd   : > { %11036 = vrot.lane.b32.xlu1 %v19550_v19, %s21629_s25  ;;  %21803 = vst [vmem:[#allocation90_spill] sm:$0xff] %v19565_v53  ;;  %v21805_v53 = vld [vmem:[#allocation80_spill] sm:$0xff] }
 0x5de   : > { %v6590_v8 = vpop.permute.xlu0 %6589  ;;  %v6660_v3 = vsel %vm2127_vm8, %v21805_v53, %v18958_v44  ;;  %v21807_v44 = vcombine.high %v21797_v62, %v21798_v7  ;;  %v21810_v53 = vld [vmem:[#allocation21_spill] sm:$0xff] }
 0x5e0   : > { %9567 = vrot.lane.b32.xlu0 %v9419_v17, %s21640_s21  ;;  %v19573_v50 = vpop.permute.xlu1 %8086  ;;  %v6659_v17 = vsel %vm2127_vm8, %v21806_v38, %v19396_v51  ;;  %v19602_v40 = vrot.slane %v21807_v44, %v16371_v1  ;;  %v21808_v51 = vcombine.high %v21800_v23, %v21801_v20  ;;  %v9484_v38 = vcombine.high %v21810_v53, %v21130_v63  ;;  %v21813_v44 = vld [vmem:[#allocation65_spill] sm:$0xff]  ;;  %v21818_v53 = vld [vmem:[#allocation12_spill] sm:$0xff] }
 0x5e1   : > { %11046 = vrot.lane.b32.xlu1 %v10787_v16, %s21399_s20  ;;  %v6663_v16 = vsel %vm2131_vm9, %v6660_v3, %v19409_v9  ;;  %v21809_v3 = vld [vmem:[#allocation34_spill] sm:$0xff] }
 0x5e2   : > { %v6594_v52 = vpop.permute.xlu0 %6593  ;;  %v19608_v9 = vrot.slane %v21808_v51, %v16371_v1  ;;  %v6666_v15 = vsel %vm2135_vm10, %v6663_v16, %v19040_v6  ;;  %v6670_v62 = vsel %vm2143_vm12, %v6667_v47, %v21809_v3  ;;  %v21812_v47 = vld [vmem:[#allocation129_spill] sm:$0xff]  ;;  %v21814_v3 = vld [vmem:[#allocation32_spill] sm:$0xff] }
 0x5e3   : > { %v6669_v23 = vsel %vm2139_vm11, %v6666_v15, %v19471_v59  ;;  %v6673_v39 = vsel %vm2147_vm13, %v6670_v62, %v6542_v36  ;;  %v21815_v62 = vld [vmem:[#allocation130_spill] sm:$0xff] }
 0x5e4   : > { %9577 = vrot.lane.b32.xlu0 %v19245_v10, %s21555_s29  ;;  %v19596_v46 = vpop.permute.xlu1 %8096  ;;  %v6662_v10 = vsel %vm2131_vm9, %v6659_v17, %v19006_v24  ;;  %v10788_v6 = vcombine.high %v19608_v9, %v21130_v63  ;;  %v21811_v17 = vld [vmem:[#allocation138_spill] sm:$0xff]  ;;  %v6676_v59 = vsel %vm2151_vm14, %v6673_v39, %v21813_v44  ;;  %v21817_v39 = vld [vmem:[#allocation139_spill] sm:$0xff] }
 0x5e5   : > { %11056 = vrot.lane.b32.xlu1 %v19579_v31, %s21409_s11  ;;  %v6665_v20 = vsel %vm2135_vm10, %v6662_v10, %v19440_v29  ;;  %v6672_v29 = vsel %vm2143_vm12, %v6669_v23, %v21812_v47  ;;  %v6679_v10 = vsel %vm2155_vm15, %v6676_v59, %v6566_v12  ;;  %v21820_v44 = vld [vmem:[#allocation67_spill] sm:$0xff]  ;;  %v21821_v59 = vld [vmem:[#allocation78_spill] sm:$0xff] }
 0x5e6   : > { %v6604_v7 = vpop.permute.xlu0 %6603  ;;  %v6668_v16 = vsel %vm2139_vm11, %v6665_v20, %v21811_v17  ;;  %v21816_v20 = vcombine.low %v21814_v3, %v21815_v62  ;;  %v21819_v17 = vld [vmem:[#allocation96_spill] sm:$0xff] }
 0x5e7   : > { %v6671_v51 = vsel %vm2143_vm12, %v6668_v16, %v19482_v55 }
 0x5e8   : > { %9587 = vrot.lane.b32.xlu0 %v9212_v42, %s21655_s10  ;;  %v19626_v24 = vpop.permute.xlu1 %8106  ;;  %v6675_v42 = vsel %vm2147_vm13, %v6672_v29, %v19505_v4  ;;  %v19651_v23 = vrot.slane %v21816_v20, %v16371_v1  ;;  %v6682_v4 = vsel %vm2159_vm0, %v6679_v10, %v21819_v17  ;;  %v21823_v10 = vld [vmem:[#allocation93_spill] sm:$0xff] }
 0x5e9   : > { %11060 = vrot.lane.b32.xlu1 %v19602_v40, %s21409_s11  ;;  %v6678_v55 = vsel %vm2151_vm14, %v6675_v42, %v21818_v53  ;;  %v6685_v47 = vsel %vm2163_vm1, %v6682_v4, %v6590_v8  ;;  %v21824_v20 = vld [vmem:[#allocation133_spill] sm:$0xff]  ;;  %v21826_v8 = vld [vmem:[#allocation108_spill] sm:$0xff] }
 0x5ea   : > { %v6614_v36 = vpop.permute.xlu0 %6613  ;;  %v6681_v16 = vsel %vm2155_vm15, %v6678_v55, %v6570_v30  ;;  %v9213_v30 = vcombine.high %v19286_v58, %v21130_v63  ;;  %v21828_v55 = vld [vmem:[#allocation36_spill] sm:$0xff] }
 0x5eb   : > { %v6688_v17 = vsel %vm2167_vm2, %v6685_v47, %v21828_v55  ;;  %v9485_v47 = vcombine.high %v19308_v43, %v21130_v63  ;;  %v21830_v55 = vld [vmem:[#allocation102_spill] sm:$0xff] }
 0x5ec   : > { %9591 = vrot.lane.b32.xlu0 %v9484_v38, %s21655_s10  ;;  %v19645_v15 = vpop.permute.xlu1 %8110  ;;  %v6691_v58 = vsel %vm2171_vm3, %v6688_v17, %v6614_v36 }
 0x5ed   : > { %11070 = vrot.lane.b32.xlu1 %v10788_v6, %s21640_s21  ;;  %v6674_v6 = vsel %vm2147_vm13, %v6671_v51, %v21817_v39  ;;  %v21822_v51 = vcombine.low %v21820_v44, %v21821_v59  ;;  %v21825_v39 = vcombine.low %v21823_v10, %v21824_v20  ;;  %v6694_v36 = vsel %vm2175_vm4, %v6691_v58, %v19262_v37 }
 0x5ee   : > { %v6618_v12 = vpop.permute.xlu0 %6617  ;;  %v6677_v38 = vsel %vm2151_vm14, %v6674_v6, %v19520_v54  ;;  %v21827_v6 = vld [vmem:[#allocation13_spill] sm:$0xff]  ;;  %v21831_v37 = vcombine.high %v21814_v3, %v21815_v62 }
 0x5ef   : > { %v19673_v42 = vrot.slane %v21822_v51, %v16371_v1  ;;  %v19679_v54 = vrot.slane %v21825_v39, %v16371_v1  ;;  %v6684_v53 = vsel %vm2159_vm0, %v6681_v16, %v21827_v6 }
 0x5f0   : > { %9601 = vrot.lane.b32.xlu0 %v19314_v18, %s21564_s28  ;;  %v19667_v29 = vpop.permute.xlu1 %8120  ;;  %v6680_v18 = vsel %vm2155_vm15, %v6677_v38, %v21826_v8  ;;  %v6687_v39 = vsel %vm2163_vm1, %v6684_v53, %v6594_v52  ;;  %v21829_v8 = vld [vmem:[#allocation50_spill] sm:$0xff] }
 0x5f1   : > { %11080 = vrot.lane.b32.xlu1 %v19651_v23, %s21555_s29  ;;  %v6683_v51 = vsel %vm2159_vm0, %v6680_v18, %v19560_v33  ;;  %v10853_v16 = vcombine.high %v19679_v54, %v21130_v63  ;;  %v6690_v33 = vsel %vm2167_vm2, %v6687_v39, %v21830_v55  ;;  %v21835_v55 = vld [vmem:[#allocation10_spill] sm:$0xff] }
 0x5f2   : > { %v6628_v4 = vpop.permute.xlu0 %6627  ;;  %v6686_v6 = vsel %vm2163_vm1, %v6683_v51, %v21829_v8  ;;  %v6693_v18 = vsel %vm2171_vm3, %v6690_v33, %v6618_v12  ;;  %v19721_v51 = vrot.slane %v21831_v37, %v16371_v1  ;;  %v21836_v33 = vld [vmem:[#allocation131_spill] sm:$0xff] }
 0x5f3   : > { %v6696_v58 = vsel %vm2175_vm4, %v6693_v18, %v19280_v35  ;;  %v21833_v35 = vcombine.high %v21820_v44, %v21821_v59  ;;  %v21838_v18 = vld [vmem:[#allocation44_spill] sm:$0xff] }
 0x5f4   : > { %9611 = vrot.lane.b32.xlu0 %v9213_v30, %s21665_s0  ;;  %v19696_v38 = vpop.permute.xlu1 %8130  ;;  %v6689_v30 = vsel %vm2167_vm2, %v6686_v6, %v6604_v7  ;;  %v21832_v7 = vld [vmem:[#allocation24_spill] sm:$0xff] }
 0x5f5   : > { %11084 = vrot.lane.b32.xlu1 %v19673_v42, %s21555_s29  ;;  %v6692_v12 = vsel %vm2171_vm3, %v6689_v30, %v21832_v7  ;;  %v21841_v7 = vld [vmem:[#allocation132_spill] sm:$0xff] }
 0x5f6   : > { %v6638_v52 = vpop.permute.xlu0 %6637 }
 0x5f7   : > { %v6697_v53 = vsel %vm2179_vm5, %v6694_v36, %v6638_v52  ;;  %v21837_v52 = vcombine.low %v21835_v55, %v21836_v33 }
 0x5f8   : > { %9615 = vrot.lane.b32.xlu0 %v9485_v47, %s21665_s0  ;;  %v6700_v43 = vsel %vm2183_vm6, %v6697_v53, %v19330_v14  ;;  %v19715_v17 = vpop.permute.xlu1 %8134  ;;  %v6695_v14 = vsel %vm2175_vm4, %v6692_v12, %v6628_v4  ;;  %v19743_v47 = vrot.slane %v21833_v35, %v16371_v1  ;;  %v21834_v4 = vcombine.high %v21823_v10, %v21824_v20  ;;  %v21839_v53 = vld [vmem:[#allocation136_spill] sm:$0xff]  ;;  %v21842_v12 = vld [vmem:[#allocation134_spill] sm:$0xff] }
 0x5f9   : > { %11094 = vrot.lane.b32.xlu1 %v10853_v16, %s21655_s10  ;;  %6703 = vst.msk [vmem:[%s18599_s30 + $0xc] sm:$0xf] %vm2187_vm7, %v6700_v43  ;;  %v6698_v6 = vsel %vm2179_vm5, %v6695_v14, %v19302_v5  ;;  %v19779_v36 = vrot.slane %v21837_v52, %v16371_v1  ;;  %v21840_v43 = vcombine.low %v21838_v18, %v21839_v53 }
 0x5fa   : > { %v6642_v39 = vpop.permute.xlu0 %6641  ;;  %v19749_v8 = vrot.slane %v21834_v4, %v16371_v1  ;;  %v9215_v14 = vcombine.high %v19407_v26, %v21130_v63  ;;  %v9487_v35 = vcombine.high %v19421_v22, %v21130_v63  ;;  %v21844_v4 = vcombine.low %v21786_v25, %v21787_v61  ;;  %v21847_v61 = vld [vmem:[#allocation135_spill] sm:$0xff] }
 0x5fb   : > { %v6699_v16 = vsel %vm2179_vm5, %v6696_v58, %v6642_v39  ;;  %v19793_v37 = vrot.slane %v21840_v43, %v16371_v1  ;;  %v21843_v39 = vcombine.low %v21841_v7, %v21842_v12  ;;  %v21849_v52 = vcombine.high %v21841_v7, %v21842_v12  ;;  %v21850_v7 = vld [vmem:[#allocation52_spill] sm:$0xff]  ;;  %v21851_v12 = vld [vmem:[#allocation141_spill] sm:$0xff] }
 0x5fc   : > { %9625 = vrot.lane.b32.xlu0 %v19380_v60, %s21325_s5  ;;  %v6702_v3 = vsel %vm2183_vm6, %v6699_v16, %v19348_v56  ;;  %v19737_v62 = vpop.permute.xlu1 %8144  ;;  %v9214_v60 = vcombine.high %v19354_v2, %v21130_v63  ;;  %v10854_v10 = vcombine.high %v19749_v8, %v21130_v63  ;;  %v9486_v2 = vcombine.high %v19374_v11, %v21130_v63 }
 0x5fd   : > { %11104 = vrot.lane.b32.xlu1 %v19721_v51, %s21564_s28  ;;  %6705 = vst.msk [vmem:[%s18599_s30 + $0x4c] sm:$0xf] %vm2187_vm7, %v6702_v3  ;;  %v19799_v58 = vrot.slane %v21843_v39, %v16371_v1  ;;  %v19849_v43 = vrot.slane %v21849_v52, %v16371_v1  ;;  %v10650_v39 = vcombine.high %v19492_v57, %v21130_v63 }
 0x5fe   : > { %v6652_v56 = vpop.permute.xlu0 %6651 }
 0x5ff   : > { %v6701_v44 = vsel %vm2183_vm6, %v6698_v6, %v6652_v56  ;;  %v10855_v3 = vcombine.high %v19799_v58, %v21130_v63  ;;  %v21846_v6 = vcombine.high %v21835_v55, %v21836_v33  ;;  %v21848_v55 = vcombine.high %v21838_v18, %v21839_v53 }
 0x600   : > { %9635 = vrot.lane.b32.xlu0 %v9214_v60, %s21335_s6  ;;  %6704 = vst.msk [vmem:[%s18599_s30 + $0x2c] sm:$0xf] %vm2187_vm7, %v6701_v44  ;;  %v19763_v59 = vpop.permute.xlu1 %8154  ;;  %v19816_v60 = vrot.slane %v21844_v4, %v16371_v1  ;;  %v10856_v53 = vcombine.high %v19849_v43, %v21130_v63 }
 0x601   : > { %11108 = vrot.lane.b32.xlu1 %v19743_v47, %s21564_s28  ;;  %v19828_v44 = vrot.slane %v21846_v6, %v16371_v1  ;;  %v19843_v33 = vrot.slane %v21848_v55, %v16371_v1 }
 0x602   : > { %v19769_v20 = vpop.permute.xlu0 %7986  ;;  %21845 = vst [vmem:[#allocation100_spill] sm:$0xff] %v19816_v60  ;;  %v10785_v22 = vcombine.high %v19816_v60, %v21130_v63 }
 0x604   : > { %9639 = vrot.lane.b32.xlu0 %v9486_v2, %s21335_s6  ;;  %v19773_v5 = vpop.permute.xlu1 %8158 }
 0x605   : > { %11118 = vrot.lane.b32.xlu1 %v10854_v10, %s21665_s0 }
 0x606   : > { %v19781_v30 = vpop.permute.xlu0 %8002 }
 0x608   : > { %9649 = vrot.lane.b32.xlu0 %v19427_v21, %s21476_s7  ;;  %v19787_v11 = vpop.permute.xlu1 %9493 }
 0x609   : > { %11128 = vrot.lane.b32.xlu1 %v19779_v36, %s21325_s5 }
 0x60a   : > { %v19803_v16 = vpop.permute.xlu0 %8012 }
 0x60c   : > { %9659 = vrot.lane.b32.xlu0 %v9215_v14, %s21500_s9  ;;  %v9496_v21 = vpop.permute.xlu1 %9495 }
 0x60d   : > { %11132 = vrot.lane.b32.xlu1 %v19793_v37, %s21325_s5  ;;  %v9670_v10 = vsel %vm2127_vm8, %v21847_v61, %v9496_v21  ;;  %v21854_v61 = vld [vmem:[#allocation146_spill] sm:$0xff] }
 0x60e   : > { %v19818_v26 = vpop.permute.xlu0 %8022 }
 0x610   : > { %9663 = vrot.lane.b32.xlu0 %v9487_v35, %s21500_s9  ;;  %v19822_v56 = vpop.permute.xlu1 %9503  ;;  %v10922_v35 = vcombine.high %v19516_v41, %v21130_v63 }
 0x611   : > { %11142 = vrot.lane.b32.xlu1 %v10855_v3, %s21335_s6  ;;  %v21852_v3 = vcombine.low %v21850_v7, %v21851_v12 }
 0x612   : > { %v19832_v25 = vpop.permute.xlu0 %8026 }
 0x613   : > { %v19869_v57 = vrot.slane %v21852_v3, %v16371_v1 }
 0x614   : > { %10998 = vrot.lane.b32.xlu0 %v10785_v22, %s21700_s1  ;;  %v9508_v2 = vpop.permute.xlu1 %9507 }
 0x615   : > { %11152 = vrot.lane.b32.xlu1 %v19828_v44, %s21476_s7  ;;  %v19854_v14 = vsel %vm2131_vm9, %v9670_v10, %v9508_v2  ;;  %21853 = vst [vmem:[#allocation98_spill] sm:$0xff] %v19869_v57  ;;  %v12154_v22 = vcombine.high %v19869_v57, %v21130_v63  ;;  %v21855_v10 = vld [vmem:[#allocation148_spill] sm:$0xff] }
 0x616   : > { %v19856_v21 = vpop.permute.xlu0 %8036  ;;  %v21856_v2 = vcombine.low %v21854_v61, %v21855_v10 }
 0x618   : > { %11020 = vrot.lane.b32.xlu0 %v10650_v39, %s21620_s8  ;;  %v19861_v18 = vpop.permute.xlu1 %9517  ;;  %v19883_v55 = vrot.slane %v21856_v2, %v16371_v1  ;;  %v10923_v2 = vcombine.high %v19550_v19, %v21130_v63 }
 0x619   : > { %11156 = vrot.lane.b32.xlu1 %v19843_v33, %s21476_s7 }
 0x61a   : > { %v8047_v4 = vpop.permute.xlu0 %8046  ;;  %21857 = vst [vmem:[#allocation106_spill] sm:$0xff] %v19883_v55  ;;  %v12426_v39 = vcombine.high %v19883_v55, %v21130_v63 }
 0x61c   : > { %11024 = vrot.lane.b32.xlu0 %v10922_v35, %s21620_s8  ;;  %v19875_v6 = vpop.permute.xlu1 %9527 }
 0x61d   : > { %11166 = vrot.lane.b32.xlu1 %v10856_v53, %s21500_s9  ;;  %v10651_v53 = vcombine.high %v19538_v45, %v21130_v63 }
 0x61e   : > { %v19885_v52 = vpop.permute.xlu0 %8050 }
 0x620   : > { %11034 = vrot.lane.b32.xlu0 %v19556_v48, %s21629_s25  ;;  %v19890_v41 = vpop.permute.xlu1 %9531  ;;  %v21860_v48 = vcombine.high %v21850_v7, %v21851_v12  ;;  %v21867_v12 = vcombine.high %v21854_v61, %v21855_v10  ;;  %v10924_v10 = vcombine.high %v19602_v40, %v21130_v63 }
 0x621   : > { %12501 = vrot.lane.b32.xlu1 %v12154_v22, %s21700_s1  ;;  %21858 = vst [vmem:[#allocation104_spill] sm:$0xff] %v19890_v41 }
 0x622   : > { %v19896_v3 = vpop.permute.xlu0 %8060  ;;  %v12137_v22 = vrot.slane %v21860_v48, %v16371_v1  ;;  %v19929_v48 = vrot.slane %v21867_v12, %v16371_v1 }
 0x624   : > { %11044 = vrot.lane.b32.xlu0 %v10651_v53, %s21399_s20  ;;  %v19900_v35 = vpop.permute.xlu1 %9541  ;;  %v21863_v53 = vld [vmem:[#allocation110_spill] sm:$0xff]  ;;  %v12155_v7 = vcombine.high %v12137_v22, %v21130_v63  ;;  %21868 = vst [vmem:[#allocation82_spill] sm:$0xff] %v19929_v48  ;;  %v12427_v61 = vcombine.high %v19929_v48, %v21130_v63 }
 0x625   : > { %12505 = vrot.lane.b32.xlu1 %v12426_v39, %s21700_s1  ;;  %21859 = vst [vmem:[#allocation23_spill] sm:$0xff] %v19900_v35  ;;  %v21862_v39 = vld [vmem:[#allocation79_spill] sm:$0xff] }
 0x626   : > { %v8071_v55 = vpop.permute.xlu0 %8070  ;;  %v21864_v57 = vcombine.high %v21862_v39, %v21863_v53 }
 0x628   : > { %11048 = vrot.lane.b32.xlu0 %v10923_v2, %s21399_s20  ;;  %v19910_v45 = vpop.permute.xlu1 %9551  ;;  %v19916_v60 = vrot.slane %v21864_v57, %v16371_v1  ;;  %v10652_v57 = vcombine.high %v19579_v31, %v21130_v63 }
 0x629   : > { %12513 = vrot.lane.b32.xlu1 %v12137_v22, %s21706_s2  ;;  %21861 = vst [vmem:[#allocation45_spill] sm:$0xff] %v19910_v45  ;;  %v21876_v45 = vld [vmem:[#allocation142_spill] sm:$0xff] }
 0x62a   : > { %21865 = vst [vmem:[#allocation145_spill] sm:$0xff] %v19916_v60  ;;  %v8075_v35 = vpop.permute.xlu0 %8074 }
 0x62c   : > { %11058 = vrot.lane.b32.xlu0 %v19608_v9, %s21409_s11  ;;  %v19922_v19 = vpop.permute.xlu1 %9555  ;;  %v21869_v9 = vld [vmem:[#allocation11_spill] sm:$0xff] }
 0x62d   : > { %12515 = vrot.lane.b32.xlu1 %v19916_v60, %s21706_s2  ;;  %21866 = vst [vmem:[#allocation35_spill] sm:$0xff] %v19922_v19  ;;  %v8163_v19 = vsel %vm2127_vm8, %v21869_v9, %v19769_v20  ;;  %v21872_v20 = vld [vmem:[#allocation15_spill] sm:$0xff]  ;;  %v21875_v60 = vld [vmem:[#allocation140_spill] sm:$0xff] }
 0x62e   : > { %v19933_v2 = vpop.permute.xlu0 %8084  ;;  %v8166_v31 = vsel %vm2131_vm9, %v8163_v19, %v19401_v49  ;;  %v21877_v40 = vcombine.low %v21875_v60, %v21876_v45 }
 0x62f   : > { %v8169_v19 = vsel %vm2135_vm10, %v8166_v31, %v19445_v28  ;;  %v21880_v28 = vld [vmem:[#allocation147_spill] sm:$0xff]  ;;  %v21881_v31 = vld [vmem:[#allocation149_spill] sm:$0xff] }
 0x630   : > { %11068 = vrot.lane.b32.xlu0 %v10652_v57, %s21640_s21  ;;  %v19940_v22 = vpop.permute.xlu1 %9565  ;;  %v21873_v57 = vld [vmem:[#allocation17_spill] sm:$0xff]  ;;  %v19962_v48 = vrot.slane %v21877_v40, %v16371_v1 }
 0x631   : > { %12525 = vrot.lane.b32.xlu1 %v12155_v7, %s21620_s8  ;;  %21870 = vst [vmem:[#allocation150_spill] sm:$0xff] %v19940_v22  ;;  %v21874_v9 = vcombine.low %v21872_v20, %v21873_v57 }
 0x632   : > { %v8095_v12 = vpop.permute.xlu0 %8094 }
 0x633   : > { %v19956_v22 = vrot.slane %v21874_v9, %v16371_v1 }
 0x634   : > { %11072 = vrot.lane.b32.xlu0 %v10924_v10, %s21640_s21  ;;  %v19950_v7 = vpop.permute.xlu1 %9575 }
 0x635   : > { %12529 = vrot.lane.b32.xlu1 %v12427_v61, %s21620_s8  ;;  %21871 = vst [vmem:[#allocation153_spill] sm:$0xff] %v19950_v7  ;;  %v21878_v61 = vld [vmem:[#allocation111_spill] sm:$0xff]  ;;  %v8172_v7 = vsel %vm2139_vm11, %v8169_v19, %v19818_v26  ;;  %v8170_v19 = vsel %vm2135_vm10, %v19432_v0, %v19803_v16 }
 0x636   : > { %v8165_v49 = vsel %vm2127_vm8, %v21878_v61, %v19392_v13  ;;  %v8099_v10 = vpop.permute.xlu0 %8098  ;;  %v12156_v13 = vcombine.high %v19962_v48, %v21130_v63  ;;  %v21882_v61 = vcombine.low %v21880_v28, %v21881_v31  ;;  %v21884_v16 = vld [vmem:[#allocation103_spill] sm:$0xff] }
 0x637   : > { %v8168_v9 = vsel %vm2131_vm9, %v8165_v49, %v19781_v30  ;;  %v10717_v30 = vcombine.high %v19651_v23, %v21130_v63 }
 0x638   : > { %11082 = vrot.lane.b32.xlu0 %v19679_v54, %s21555_s29  ;;  %v19977_v40 = vpop.permute.xlu1 %9579  ;;  %v19985_v41 = vrot.slane %v21882_v61, %v16371_v1  ;;  %v8171_v26 = vsel %vm2135_vm10, %v8168_v9, %v19461_v32  ;;  %v8175_v54 = vsel %vm2143_vm12, %v8172_v7, %v19486_v27  ;;  %v10989_v27 = vcombine.high %v19673_v42, %v21130_v63  ;;  %v21883_v9 = vld [vmem:[#allocation87_spill] sm:$0xff] }
 0x639   : > { %12539 = vrot.lane.b32.xlu1 %v19956_v22, %s21629_s25  ;;  %21879 = vst [vmem:[#allocation152_spill] sm:$0xff] %v19977_v40  ;;  %v8174_v61 = vsel %vm2139_vm11, %v8171_v26, %v19832_v25  ;;  %v8178_v40 = vsel %vm2147_vm13, %v8175_v54, %v8047_v4  ;;  %v8173_v7 = vsel %vm2139_vm11, %v8170_v19, %v19476_v34  ;;  %v21887_v19 = vld [vmem:[#allocation89_spill] sm:$0xff] }
 0x63a   : > { %v8109_v49 = vpop.permute.xlu0 %8108  ;;  %v12428_v32 = vcombine.high %v19985_v41, %v21130_v63  ;;  %v8177_v0 = vsel %vm2143_vm12, %v8174_v61, %v21883_v9  ;;  %v8181_v25 = vsel %vm2151_vm14, %v8178_v40, %v21884_v16  ;;  %v21885_v26 = vcombine.high %v21872_v20, %v21873_v57 }
 0x63b   : > { %v8184_v42 = vsel %vm2155_vm15, %v8181_v25, %v8071_v55  ;;  %v21886_v54 = vcombine.high %v21875_v60, %v21876_v45  ;;  %v21888_v55 = vld [vmem:[#allocation22_spill] sm:$0xff] }
 0x63c   : > { %11092 = vrot.lane.b32.xlu0 %v10717_v30, %s21655_s10  ;;  %v20001_v23 = vpop.permute.xlu1 %9589  ;;  %v8180_v30 = vsel %vm2147_vm13, %v8177_v0, %v19885_v52  ;;  %v20026_v40 = vrot.slane %v21885_v26, %v16371_v1  ;;  %v21890_v0 = vcombine.high %v21880_v28, %v21881_v31 }
 0x63d   : > { %12549 = vrot.lane.b32.xlu1 %v12156_v13, %s21399_s20  ;;  %v8176_v13 = vsel %vm2143_vm12, %v8173_v7, %v19856_v21  ;;  %v20032_v21 = vrot.slane %v21886_v54, %v16371_v1  ;;  %v8183_v61 = vsel %vm2151_vm14, %v8180_v30, %v21888_v55 }
 0x63e   : > { %v8119_v4 = vpop.permute.xlu0 %8118  ;;  %v8179_v52 = vsel %vm2147_vm13, %v8176_v13, %v21887_v19  ;;  %v8186_v60 = vsel %vm2155_vm15, %v8183_v61, %v8075_v35  ;;  %v20056_v16 = vrot.slane %v21890_v0, %v16371_v1  ;;  %v21891_v35 = vld [vmem:[#allocation33_spill] sm:$0xff] }
 0x63f   : > { %v8182_v20 = vsel %vm2151_vm14, %v8179_v52, %v19896_v3  ;;  %v12157_v9 = vcombine.high %v20032_v21, %v21130_v63  ;;  %v10718_v3 = vcombine.high %v19721_v51, %v21130_v63  ;;  %v21893_v52 = vld [vmem:[#allocation143_spill] sm:$0xff]  ;;  %v21896_v61 = vld [vmem:[#allocation109_spill] sm:$0xff] }
 0x640   : > { %11096 = vrot.lane.b32.xlu0 %v10989_v27, %s21655_s10  ;;  %v20020_v34 = vpop.permute.xlu1 %9599 }
 0x641   : > { %12553 = vrot.lane.b32.xlu1 %v12428_v32, %s21399_s20  ;;  %v21889_v32 = vld [vmem:[#allocation90_spill] sm:$0xff] }
 0x642   : > { %v8187_v27 = vsel %vm2159_vm0, %v8184_v42, %v21889_v32  ;;  %v8123_v7 = vpop.permute.xlu0 %8122 }
 0x643   : > { %v8190_v45 = vsel %vm2163_vm1, %v8187_v27, %v8095_v12  ;;  %v8185_v12 = vsel %vm2155_vm15, %v8182_v20, %v21891_v35 }
 0x644   : > { %11106 = vrot.lane.b32.xlu0 %v19749_v8, %s21564_s28  ;;  %v20048_v57 = vpop.permute.xlu1 %9603  ;;  %v8189_v8 = vsel %vm2159_vm0, %v8186_v60, %v19573_v50  ;;  %v8193_v25 = vsel %vm2167_vm2, %v8190_v45, %v19626_v24  ;;  %v8188_v28 = vsel %vm2159_vm0, %v8185_v12, %v19933_v2  ;;  %v12429_v50 = vcombine.high %v20056_v16, %v21130_v63 }
 0x645   : > { %12563 = vrot.lane.b32.xlu1 %v20026_v40, %s21409_s11  ;;  %v8192_v31 = vsel %vm2163_vm1, %v8189_v8, %v8099_v10  ;;  %v8196_v30 = vsel %vm2171_vm3, %v8193_v25, %v8119_v4  ;;  %v10990_v24 = vcombine.high %v19743_v47, %v21130_v63  ;;  %v8191_v42 = vsel %vm2163_vm1, %v8188_v28, %v19596_v46 }
 0x646   : > { %v8133_v13 = vpop.permute.xlu0 %8132  ;;  %v8195_v2 = vsel %vm2167_vm2, %v8192_v31, %v19645_v15  ;;  %v8199_v4 = vsel %vm2175_vm4, %v8196_v30, %v19696_v38  ;;  %v8194_v26 = vsel %vm2167_vm2, %v8191_v42, %v8109_v49  ;;  %v21892_v15 = vld [vmem:[#allocation55_spill] sm:$0xff]  ;;  %v21895_v49 = vld [vmem:[#allocation66_spill] sm:$0xff]  ;;  %v10719_v8 = vcombine.high %v19779_v36, %v21130_v63 }
 0x647   : > { %v8198_v54 = vsel %vm2171_vm3, %v8195_v2, %v8123_v7  ;;  %v21894_v38 = vcombine.low %v21892_v15, %v21893_v52  ;;  %v21897_v32 = vcombine.low %v21895_v49, %v21896_v61  ;;  %v10991_v36 = vcombine.high %v19793_v37, %v21130_v63  ;;  %v21903_v37 = vld [vmem:[#allocation95_spill] sm:$0xff] }
 0x648   : > { %11116 = vrot.lane.b32.xlu0 %v10718_v3, %s21665_s0  ;;  %v20072_v51 = vpop.permute.xlu1 %9613  ;;  %v8201_v20 = vsel %vm2175_vm4, %v8198_v54, %v19715_v17  ;;  %v21898_v17 = vld [vmem:[#allocation69_spill] sm:$0xff]  ;;  %v21899_v3 = vld [vmem:[#allocation119_spill] sm:$0xff]  ;;  %v21901_v30 = vcombine.high %v21892_v15, %v21893_v52  ;;  %v9669_v2 = vsel %vm2127_vm8, %v21903_v37, %v19787_v11 }
 0x649   : > { %12573 = vrot.lane.b32.xlu1 %v12157_v9, %s21640_s21  ;;  %v20097_v55 = vrot.slane %v21894_v38, %v16371_v1  ;;  %v20103_v27 = vrot.slane %v21897_v32, %v16371_v1  ;;  %v21900_v35 = vcombine.low %v21898_v17, %v21899_v3  ;;  %v21905_v15 = vcombine.high %v21898_v17, %v21899_v3  ;;  %v21910_v17 = vld [vmem:[#allocation104_spill] sm:$0xff]  ;;  %v21912_v3 = vld [vmem:[#allocation77_spill] sm:$0xff] }
 0x64a   : > { %v8143_v10 = vpop.permute.xlu0 %8142  ;;  %v10720_v38 = vcombine.high %v19828_v44, %v21130_v63  ;;  %v10992_v44 = vcombine.high %v19843_v33, %v21130_v63 }
 0x64b   : > { %v8202_v19 = vsel %vm2179_vm5, %v8199_v4, %v8143_v10  ;;  %v20127_v12 = vrot.slane %v21900_v35, %v16371_v1  ;;  %v21904_v4 = vld [vmem:[#allocation88_spill] sm:$0xff]  ;;  %v20182_v52 = vrot.slane %v21905_v15, %v16371_v1 }
 0x64c   : > { %11120 = vrot.lane.b32.xlu0 %v10990_v24, %s21665_s0  ;;  %v8205_v46 = vsel %vm2183_vm6, %v8202_v19, %v19763_v59  ;;  %v20091_v47 = vpop.permute.xlu1 %9623  ;;  %v8197_v59 = vsel %vm2171_vm3, %v8194_v26, %v19667_v29  ;;  %v12222_v29 = vcombine.high %v20103_v27, %v21130_v63  ;;  %v21902_v24 = vcombine.high %v21895_v49, %v21896_v61 }
 0x64d   : > { %12577 = vrot.lane.b32.xlu1 %v12429_v50, %s21640_s21  ;;  %8208 = vst.msk [vmem:[%s18599_s30 + $0x10] sm:$0xf] %vm2187_vm7, %v8205_v46  ;;  %v8200_v60 = vsel %vm2175_vm4, %v8197_v59, %v8133_v13  ;;  %v12494_v28 = vcombine.high %v20127_v12, %v21130_v63  ;;  %v20154_v50 = vrot.slane %v21901_v30, %v16371_v1  ;;  %v21915_v30 = vld [vmem:[#allocation71_spill] sm:$0xff] }
 0x64e   : > { %v8147_v7 = vpop.permute.xlu0 %8146  ;;  %v20160_v42 = vrot.slane %v21902_v24, %v16371_v1  ;;  %v12495_v32 = vcombine.high %v20182_v52, %v21130_v63  ;;  %v21916_v24 = vld [vmem:[#allocation151_spill] sm:$0xff] }
 0x64f   : > { %v8204_v45 = vsel %vm2179_vm5, %v8201_v20, %v8147_v7  ;;  %v21917_v37 = vcombine.low %v21915_v30, %v21916_v24 }
 0x650   : > { %11130 = vrot.lane.b32.xlu0 %v19799_v58, %s21325_s5  ;;  %v8207_v9 = vsel %vm2183_vm6, %v8204_v45, %v19773_v5  ;;  %v20119_v0 = vpop.permute.xlu1 %9627  ;;  %v8203_v5 = vsel %vm2179_vm5, %v8200_v60, %v19737_v62  ;;  %v12223_v46 = vcombine.high %v20160_v42, %v21130_v63 }
 0x651   : > { %12587 = vrot.lane.b32.xlu1 %v20097_v55, %s21555_s29  ;;  %8210 = vst.msk [vmem:[%s18599_s30 + $0x50] sm:$0xf] %vm2187_vm7, %v8207_v9  ;;  %v21908_v9 = vld [vmem:[#allocation144_spill] sm:$0xff] }
 0x652   : > { %v8157_v58 = vpop.permute.xlu0 %8156 }
 0x653   : > { %v8206_v25 = vsel %vm2183_vm6, %v8203_v5, %v8157_v58 }
 0x654   : > { %11140 = vrot.lane.b32.xlu0 %v10719_v8, %s21335_s6  ;;  %8209 = vst.msk [vmem:[%s18599_s30 + $0x30] sm:$0xf] %vm2187_vm7, %v8206_v25  ;;  %v20140_v13 = vpop.permute.xlu1 %9637 }
 0x655   : > { %12597 = vrot.lane.b32.xlu1 %v12222_v29, %s21655_s10 }
 0x656   : > { %v9492_v31 = vpop.permute.xlu0 %9491 }
 0x657   : > { %v9668_v26 = vsel %vm2127_vm8, %v21904_v4, %v9492_v31 }
 0x658   : > { %11144 = vrot.lane.b32.xlu0 %v10991_v36, %s21335_s6  ;;  %v20148_v62 = vpop.permute.xlu1 %9647  ;;  %v21914_v36 = vld [vmem:[#allocation23_spill] sm:$0xff] }
 0x659   : > { %12601 = vrot.lane.b32.xlu1 %v12494_v28, %s21655_s10 }
 0x65a   : > { %v9506_v10 = vpop.permute.xlu0 %9505 }
 0x65b   : > { %v9672_v54 = vsel %vm2131_vm9, %v9669_v2, %v9506_v10  ;;  %v20237_v2 = vrot.slane %v21917_v37, %v16371_v1 }
 0x65c   : > { %11154 = vrot.lane.b32.xlu0 %v19849_v43, %s21476_s7  ;;  %v20172_v19 = vpop.permute.xlu1 %9651  ;;  %v9675_v11 = vsel %vm2135_vm10, %v9672_v54, %v19861_v18  ;;  %v9671_v43 = vsel %vm2131_vm9, %v9668_v26, %v19822_v56  ;;  %v21906_v56 = vcombine.low %v21862_v39, %v21863_v53  ;;  %v21911_v53 = vld [vmem:[#allocation68_spill] sm:$0xff]  ;;  %v21918_v26 = vld [vmem:[#allocation82_spill] sm:$0xff]  ;;  %v21919_v54 = vld [vmem:[#allocation97_spill] sm:$0xff] }
 0x65d   : > { %12611 = vrot.lane.b32.xlu1 %v20154_v50, %s21564_s28  ;;  %v21913_v35 = vcombine.low %v21911_v53, %v21912_v3  ;;  %v12496_v15 = vcombine.high %v20237_v2, %v21130_v63 }
 0x65e   : > { %v9516_v49 = vpop.permute.xlu0 %9515  ;;  %v20203_v7 = vrot.slane %v21906_v56, %v16371_v1 }
 0x65f   : > { %v9674_v61 = vsel %vm2135_vm10, %v9671_v43, %v9516_v49  ;;  %v20221_v8 = vrot.slane %v21913_v35, %v16371_v1  ;;  %v21921_v43 = vld [vmem:[#allocation145_spill] sm:$0xff] }
 0x660   : > { %11164 = vrot.lane.b32.xlu0 %v10720_v38, %s21500_s9  ;;  %v20191_v18 = vpop.permute.xlu1 %9661  ;;  %v9677_v59 = vsel %vm2139_vm11, %v9674_v61, %v19875_v6  ;;  %v21907_v6 = vld [vmem:[#allocation40_spill] sm:$0xff]  ;;  %v21920_v38 = vld [vmem:[#allocation45_spill] sm:$0xff]  ;;  %v12291_v61 = vcombine.high %v21921_v43, %v21130_v63 }
 0x661   : > { %12621 = vrot.lane.b32.xlu1 %v12223_v46, %s21665_s0  ;;  %v21909_v29 = vcombine.low %v21907_v6, %v21908_v9  ;;  %v12224_v28 = vcombine.high %v20221_v8, %v21130_v63 }
 0x662   : > { %v9520_v20 = vpop.permute.xlu0 %9519 }
 0x663   : > { %v9676_v60 = vsel %vm2135_vm10, %v19854_v14, %v9520_v20  ;;  %v20213_v33 = vrot.slane %v21909_v29, %v16371_v1  ;;  %v12290_v14 = vcombine.high %v20203_v7, %v21130_v63  ;;  %v21922_v20 = vcombine.high %v21907_v6, %v21908_v9  ;;  %v21925_v6 = vld [vmem:[#allocation92_spill] sm:$0xff] }
 0x664   : > { %11168 = vrot.lane.b32.xlu0 %v10992_v44, %s21500_s9  ;;  %v10997_v45 = vpop.permute.xlu1 %10996  ;;  %v9679_v39 = vsel %vm2139_vm11, %v9676_v60, %v21910_v17  ;;  %v21924_v17 = vcombine.high %v21911_v53, %v21912_v3  ;;  %v21927_v3 = vcombine.high %v21915_v30, %v21916_v24  ;;  %v12292_v30 = vcombine.high %v19956_v22, %v21130_v63 }
 0x665   : > { %12625 = vrot.lane.b32.xlu1 %v12495_v32, %s21665_s0  ;;  %v11173_v46 = vsel %vm2127_vm8, %v21919_v54, %v10997_v45  ;;  %v20263_v60 = vrot.slane %v21922_v20, %v16371_v1  ;;  %v21923_v45 = vld [vmem:[#allocation35_spill] sm:$0xff] }
 0x666   : > { %v9530_v58 = vpop.permute.xlu0 %9529  ;;  %v20271_v35 = vrot.slane %v21924_v17, %v16371_v1  ;;  %v12358_v17 = vcombine.high %v20097_v55, %v21130_v63  ;;  %v12359_v55 = vcombine.high %v20154_v50, %v21130_v63 }
 0x667   : > { %v9678_v5 = vsel %vm2139_vm11, %v9675_v11, %v9530_v58 }
 0x668   : > { %12503 = vrot.lane.b32.xlu0 %v12290_v14, %s21700_s1  ;;  %v11001_v25 = vpop.permute.xlu1 %11000  ;;  %v9681_v31 = vsel %vm2143_vm12, %v9678_v5, %v21914_v36  ;;  %v12225_v5 = vcombine.high %v20271_v35, %v21130_v63  ;;  %v20288_v36 = vrot.slane %v21927_v3, %v16371_v1 }
 0x669   : > { %12635 = vrot.lane.b32.xlu1 %v20213_v33, %s21325_s5  ;;  %v11175_v9 = vsel %vm2127_vm8, %v21925_v6, %v11001_v25 }
 0x66a   : > { %v9540_v10 = vpop.permute.xlu0 %9539 }
 0x66b   : > { %v9680_v4 = vsel %vm2143_vm12, %v9677_v59, %v9540_v10  ;;  %v12497_v10 = vcombine.high %v20288_v36, %v21130_v63 }
 0x66c   : > { %12517 = vrot.lane.b32.xlu0 %v21918_v26, %s21706_s2  ;;  %v11009_v11 = vpop.permute.xlu1 %11008  ;;  %v9683_v49 = vsel %vm2147_vm13, %v9680_v4, %v21920_v38  ;;  %v21928_v4 = vld [vmem:[#allocation153_spill] sm:$0xff] }
 0x66d   : > { %12645 = vrot.lane.b32.xlu1 %v12224_v28, %s21335_s6  ;;  %v20252_v32 = vsel %vm2131_vm9, %v11173_v46, %v11009_v11  ;;  %v21926_v28 = vld [vmem:[#allocation150_spill] sm:$0xff] }
 0x66e   : > { %v9544_v59 = vpop.permute.xlu0 %9543 }
 0x66f   : > { %v9682_v44 = vsel %vm2143_vm12, %v9679_v39, %v9544_v59 }
 0x670   : > { %12527 = vrot.lane.b32.xlu0 %v12291_v61, %s21620_s8  ;;  %v20257_v56 = vpop.permute.xlu1 %11010  ;;  %v9685_v29 = vsel %vm2147_vm13, %v9682_v44, %v21923_v45  ;;  %v12293_v44 = vcombine.high %v20026_v40, %v21130_v63 }
 0x671   : > { %12649 = vrot.lane.b32.xlu1 %v12496_v15, %s21335_s6 }
 0x672   : > { %v9554_v39 = vpop.permute.xlu0 %9553 }
 0x673   : > { %v9684_v14 = vsel %vm2147_vm13, %v9681_v31, %v9554_v39 }
 0x674   : > { %12537 = vrot.lane.b32.xlu0 %v19962_v48, %s21629_s25  ;;  %v11013_v58 = vpop.permute.xlu1 %11012  ;;  %v9687_v53 = vsel %vm2151_vm14, %v9684_v14, %v21926_v28 }
 0x675   : > { %12659 = vrot.lane.b32.xlu1 %v20263_v60, %s21476_s7  ;;  %v20291_v31 = vsel %vm2131_vm9, %v11175_v9, %v11013_v58 }
 0x676   : > { %v9564_v48 = vpop.permute.xlu0 %9563 }
 0x677   : > { %v9686_v25 = vsel %vm2151_vm14, %v9683_v49, %v9564_v48 }
 0x678   : > { %12541 = vrot.lane.b32.xlu0 %v19985_v41, %s21629_s25  ;;  %v20297_v37 = vpop.permute.xlu1 %11022  ;;  %v9689_v1 = vsel %vm2155_vm15, %v9686_v25, %v21928_v4  ;;  %v21929_v41 = vld [vmem:[#allocation152_spill] sm:$0xff] }
 0x679   : > { %12669 = vrot.lane.b32.xlu1 %v12225_v5, %s21500_s9 }
 0x67a   : > { %v9568_v24 = vpop.permute.xlu0 %9567 }
 0x67b   : > { %v9688_v26 = vsel %vm2151_vm14, %v9685_v29, %v9568_v24 }
 0x67c   : > { %12551 = vrot.lane.b32.xlu0 %v12292_v30, %s21399_s20  ;;  %v20308_v54 = vpop.permute.xlu1 %11032  ;;  %v9691_v46 = vsel %vm2155_vm15, %v9688_v26, %v21929_v41 }
 0x67d   : > { %12673 = vrot.lane.b32.xlu1 %v12497_v10, %s21500_s9 }
 0x67e   : > { %v9578_v11 = vpop.permute.xlu0 %9577 }
 0x67f   : > { %v9690_v15 = vsel %vm2155_vm15, %v9687_v53, %v9578_v11 }
 0x680   : > { %12561 = vrot.lane.b32.xlu0 %v20032_v21, %s21409_s11  ;;  %v20315_v38 = vpop.permute.xlu1 %11036  ;;  %v9693_v22 = vsel %vm2159_vm0, %v9690_v15, %v20001_v23 }
 0x682   : > { %v9588_v49 = vpop.permute.xlu0 %9587 }
 0x683   : > { %v9692_v43 = vsel %vm2159_vm0, %v9689_v1, %v9588_v49 }
 0x684   : > { %12565 = vrot.lane.b32.xlu0 %v20056_v16, %s21409_s11  ;;  %v20322_v61 = vpop.permute.xlu1 %11046  ;;  %v9695_v59 = vsel %vm2163_vm1, %v9692_v43, %v20020_v34 }
 0x686   : > { %v9592_v21 = vpop.permute.xlu0 %9591 }
 0x687   : > { %v9694_v20 = vsel %vm2159_vm0, %v9691_v46, %v9592_v21  ;;  %v21930_v46 = vld [vmem:[#allocation100_spill] sm:$0xff] }
 0x688   : > { %12575 = vrot.lane.b32.xlu0 %v12293_v44, %s21640_s21  ;;  %v20330_v23 = vpop.permute.xlu1 %11056  ;;  %v9697_v45 = vsel %vm2163_vm1, %v9694_v20, %v20048_v57 }
 0x68a   : > { %v9602_v29 = vpop.permute.xlu0 %9601 }
 0x68b   : > { %v9696_v9 = vsel %vm2163_vm1, %v9693_v22, %v9602_v29 }
 0x68c   : > { %12585 = vrot.lane.b32.xlu0 %v20103_v27, %s21555_s29  ;;  %v20336_v16 = vpop.permute.xlu1 %11060  ;;  %v9699_v58 = vsel %vm2167_vm2, %v9696_v9, %v20072_v51 }
 0x68e   : > { %v9612_v34 = vpop.permute.xlu0 %9611 }
 0x690   : > { %12589 = vrot.lane.b32.xlu0 %v20127_v12, %s21555_s29  ;;  %v20340_v40 = vpop.permute.xlu1 %11070 }
 0x692   : > { %v9616_v39 = vpop.permute.xlu0 %9615 }
 0x693   : > { %v9700_v48 = vsel %vm2167_vm2, %v9697_v45, %v9616_v39 }
 0x694   : > { %12599 = vrot.lane.b32.xlu0 %v12358_v17, %s21655_s10  ;;  %v20345_v14 = vpop.permute.xlu1 %11080  ;;  %v21931_v17 = vld [vmem:[#allocation98_spill] sm:$0xff] }
 0x696   : > { %v9626_v57 = vpop.permute.xlu0 %9625 }
 0x697   : > { %v9702_v28 = vsel %vm2171_vm3, %v9699_v58, %v9626_v57 }
 0x698   : > { %12609 = vrot.lane.b32.xlu0 %v20160_v42, %s21564_s28  ;;  %v20349_v27 = vpop.permute.xlu1 %11084  ;;  %v9698_v42 = vsel %vm2167_vm2, %v9695_v59, %v9612_v34  ;;  %v9705_v50 = vsel %vm2175_vm4, %v9702_v28, %v20140_v13 }
 0x69a   : > { %v9636_v6 = vpop.permute.xlu0 %9635 }
 0x69c   : > { %12613 = vrot.lane.b32.xlu0 %v20182_v52, %s21564_s28  ;;  %v20354_v12 = vpop.permute.xlu1 %11094  ;;  %v9701_v52 = vsel %vm2171_vm3, %v9698_v42, %v20091_v47  ;;  %v9703_v47 = vsel %vm2171_vm3, %v9700_v48, %v20119_v0 }
 0x69d   : > { %v9704_v51 = vsel %vm2175_vm4, %v9701_v52, %v9636_v6 }
 0x69e   : > { %v9640_v5 = vpop.permute.xlu0 %9639  ;;  %v9707_v1 = vsel %vm2179_vm5, %v9704_v51, %v20148_v62 }
 0x69f   : > { %v9706_v30 = vsel %vm2175_vm4, %v9703_v47, %v9640_v5 }
 0x6a0   : > { %12623 = vrot.lane.b32.xlu0 %v12359_v55, %s21665_s0  ;;  %v20363_v53 = vpop.permute.xlu1 %11104  ;;  %v9709_v0 = vsel %vm2179_vm5, %v9706_v30, %v20172_v19  ;;  %s12727_s0 = scalar_lea.sflag [#allocation4], %s14037_s24 }
 0x6a2   : > { %v9650_v3 = vpop.permute.xlu0 %9649 }
 0x6a3   : > { %v9708_v25 = vsel %vm2179_vm5, %v9705_v50, %v9650_v3 }
 0x6a4   : > { %12633 = vrot.lane.b32.xlu0 %v20221_v8, %s21325_s5  ;;  %v9711_v10 = vsel %vm2183_vm6, %v9708_v25, %v20191_v18  ;;  %v20376_v4 = vpop.permute.xlu1 %11108  ;;  %v12360_v8 = vcombine.high %v20213_v33, %v21130_v63 }
 0x6a5   : > { %9714 = vst.msk [vmem:[%s18599_s30 + $0x34] sm:$0xf] %vm2187_vm7, %v9711_v10 }
 0x6a6   : > { %v9660_v13 = vpop.permute.xlu0 %9659 }
 0x6a7   : > { %v9710_v24 = vsel %vm2183_vm6, %v9707_v1, %v9660_v13 }
 0x6a8   : > { %12637 = vrot.lane.b32.xlu0 %v20237_v2, %s21325_s5  ;;  %9713 = vst.msk [vmem:[%s18599_s30 + $0x14] sm:$0xf] %vm2187_vm7, %v9710_v24  ;;  %v20390_v18 = vpop.permute.xlu1 %11118 }
 0x6aa   : > { %v9664_v26 = vpop.permute.xlu0 %9663 }
 0x6ab   : > { %v9712_v62 = vsel %vm2183_vm6, %v9709_v0, %v9664_v26 }
 0x6ac   : > { %12647 = vrot.lane.b32.xlu0 %v12360_v8, %s21335_s6  ;;  %9715 = vst.msk [vmem:[%s18599_s30 + $0x54] sm:$0xf] %vm2187_vm7, %v9712_v62  ;;  %v20400_v41 = vpop.permute.xlu1 %11128 }
 0x6ae   : > { %v10999_v2 = vpop.permute.xlu0 %10998 }
 0x6af   : > { %v11174_v11 = vsel %vm2127_vm8, %v21930_v46, %v10999_v2 }
 0x6b0   : > { %12657 = vrot.lane.b32.xlu0 %v20271_v35, %s21476_s7  ;;  %v11177_v33 = vsel %vm2131_vm9, %v11174_v11, %v20257_v56  ;;  %v20408_v15 = vpop.permute.xlu1 %11132  ;;  %v12361_v35 = vcombine.high %v20263_v60, %v21130_v63 }
 0x6b1   : > { %v11180_v19 = vsel %vm2135_vm10, %v11177_v33, %v20297_v37 }
 0x6b2   : > { %v11021_v22 = vpop.permute.xlu0 %11020 }
 0x6b3   : > { %v11179_v49 = vsel %vm2135_vm10, %v20252_v32, %v11021_v22 }
 0x6b4   : > { %12661 = vrot.lane.b32.xlu0 %v20288_v36, %s21476_s7  ;;  %v11143_v43 = vpop.permute.xlu1 %11142  ;;  %v11182_v59 = vsel %vm2139_vm11, %v11179_v49, %v20308_v54 }
 0x6b6   : > { %v11025_v56 = vpop.permute.xlu0 %11024 }
 0x6b7   : > { %v11181_v44 = vsel %vm2135_vm10, %v20291_v31, %v11025_v56 }
 0x6b8   : > { %12671 = vrot.lane.b32.xlu0 %v12361_v35, %s21500_s9  ;;  %v20423_v37 = vpop.permute.xlu1 %11152  ;;  %v11184_v32 = vsel %vm2139_vm11, %v11181_v44, %v20315_v38 }
 0x6ba   : > { %v11035_v21 = vpop.permute.xlu0 %11034 }
 0x6bb   : > { %v11183_v52 = vsel %vm2139_vm11, %v11180_v19, %v11035_v21 }
 0x6bc   : > { %v20427_v36 = vpop.permute.xlu1 %11156  ;;  %v11186_v50 = vsel %vm2143_vm12, %v11183_v52, %v20322_v61 }
 0x6be   : > { %v11045_v20 = vpop.permute.xlu0 %11044 }
 0x6bf   : > { %v11185_v51 = vsel %vm2143_vm12, %v11182_v59, %v11045_v20 }
 0x6c0   : > { %v11167_v45 = vpop.permute.xlu1 %11166  ;;  %v11188_v47 = vsel %vm2147_vm13, %v11185_v51, %v20330_v23 }
 0x6c2   : > { %v11049_v54 = vpop.permute.xlu0 %11048 }
 0x6c3   : > { %v11187_v30 = vsel %vm2143_vm12, %v11184_v32, %v11049_v54 }
 0x6c4   : > { %v12502_v29 = vpop.permute.xlu1 %12501  ;;  %v11190_v8 = vsel %vm2147_vm13, %v11187_v30, %v20336_v16 }
 0x6c5   : > { %v12678_v31 = vsel %vm2127_vm8, %v21931_v17, %v12502_v29 }
 0x6c6   : > { %v11059_v34 = vpop.permute.xlu0 %11058 }
 0x6c7   : > { %v11189_v25 = vsel %vm2147_vm13, %v11186_v50, %v11059_v34 }
 0x6c8   : > { %v20429_v63 = vpop.permute.xlu1 %12505  ;;  %v11192_v13 = vsel %vm2151_vm14, %v11189_v25, %v20340_v40 }
 0x6ca   : > { %v11069_v60 = vpop.permute.xlu0 %11068 }
 0x6cb   : > { %v11191_v24 = vsel %vm2151_vm14, %v11188_v47, %v11069_v60 }
 0x6cc   : > { %v12514_v39 = vpop.permute.xlu1 %12513  ;;  %v11194_v26 = vsel %vm2155_vm15, %v11191_v24, %v20345_v14  ;;  %v21932_v24 = vld [vmem:[#allocation106_spill] sm:$0xff] }
 0x6cd   : > { %v20434_v57 = vsel %vm2131_vm9, %v12678_v31, %v12514_v39 }
 0x6ce   : > { %v11073_v6 = vpop.permute.xlu0 %11072 }
 0x6cf   : > { %v11193_v62 = vsel %vm2151_vm14, %v11190_v8, %v11073_v6 }
 0x6d0   : > { %v12516_v55 = vpop.permute.xlu1 %12515  ;;  %v11196_v11 = vsel %vm2155_vm15, %v11193_v62, %v20349_v27 }
 0x6d2   : > { %v11083_v38 = vpop.permute.xlu0 %11082 }
 0x6d3   : > { %v11195_v61 = vsel %vm2155_vm15, %v11192_v13, %v11083_v38 }
 0x6d4   : > { %v20436_v5 = vpop.permute.xlu1 %12525  ;;  %v11198_v0 = vsel %vm2159_vm0, %v11195_v61, %v20354_v12  ;;  %v12680_v61 = vsel %vm2127_vm8, %v21932_v24, %v20429_v63 }
 0x6d5   : > { %v12684_v8 = vsel %vm2135_vm10, %v20434_v57, %v20436_v5 }
 0x6d6   : > { %v11093_v9 = vpop.permute.xlu0 %11092 }
 0x6d7   : > { %v11197_v40 = vsel %vm2159_vm0, %v11194_v26, %v11093_v9 }
 0x6d8   : > { %v20439_v3 = vpop.permute.xlu1 %12529  ;;  %v11200_v16 = vsel %vm2163_vm1, %v11197_v40, %v20363_v53 }
 0x6da   : > { %v11097_v58 = vpop.permute.xlu0 %11096 }
 0x6db   : > { %v11199_v12 = vsel %vm2159_vm0, %v11196_v11, %v11097_v58 }
 0x6dc   : > { %v20445_v10 = vpop.permute.xlu1 %12539  ;;  %v11202_v59 = vsel %vm2163_vm1, %v11199_v12, %v20376_v4 }
 0x6de   : > { %v11107_v42 = vpop.permute.xlu0 %11106 }
 0x6df   : > { %v11201_v2 = vsel %vm2163_vm1, %v11198_v0, %v11107_v42 }
 0x6e0   : > { %v12550_v46 = vpop.permute.xlu1 %12549  ;;  %v11204_v14 = vsel %vm2167_vm2, %v11201_v2, %v20390_v18 }
 0x6e2   : > { %v11117_v28 = vpop.permute.xlu0 %11116 }
 0x6e3   : > { %v11203_v19 = vsel %vm2167_vm2, %v11200_v16, %v11117_v28 }
 0x6e4   : > { %v12554_v49 = vpop.permute.xlu1 %12553  ;;  %v11206_v27 = vsel %vm2171_vm3, %v11203_v19, %v20400_v41 }
 0x6e6   : > { %v11121_v48 = vpop.permute.xlu0 %11120 }
 0x6e7   : > { %v11205_v18 = vsel %vm2167_vm2, %v11202_v59, %v11121_v48 }
 0x6e8   : > { %v11208_v4 = vsel %vm2171_vm3, %v11205_v18, %v20408_v15  ;;  %v12564_v20 = vpop.permute.xlu1 %12563 }
 0x6ea   : > { %v11131_v1 = vpop.permute.xlu0 %11130 }
 0x6eb   : > { %v11207_v22 = vsel %vm2171_vm3, %v11204_v14, %v11131_v1 }
 0x6ec   : > { %v11210_v53 = vsel %vm2175_vm4, %v11207_v22, %v11143_v43  ;;  %v12574_v15 = vpop.permute.xlu1 %12573 }
 0x6ee   : > { %v11141_v23 = vpop.permute.xlu0 %11140 }
 0x6ef   : > { %v11209_v56 = vsel %vm2175_vm4, %v11206_v27, %v11141_v23 }
 0x6f0   : > { %v11212_v41 = vsel %vm2179_vm5, %v11209_v56, %v20423_v37  ;;  %v12578_v39 = vpop.permute.xlu1 %12577 }
 0x6f2   : > { %v11145_v33 = vpop.permute.xlu0 %11144 }
 0x6f3   : > { %v11211_v43 = vsel %vm2175_vm4, %v11208_v4, %v11145_v33 }
 0x6f4   : > { %v12588_v38 = vpop.permute.xlu1 %12587 }
 0x6f6   : > { %v11155_v35 = vpop.permute.xlu0 %11154 }
 0x6f7   : > { %v11213_v44 = vsel %vm2179_vm5, %v11210_v53, %v11155_v35 }
 0x6f8   : > { %v11216_v32 = vsel %vm2183_vm6, %v11213_v44, %v11167_v45  ;;  %v11214_v45 = vsel %vm2179_vm5, %v11211_v43, %v20427_v36  ;;  %v12598_v42 = vpop.permute.xlu1 %12597 }
 0x6f9   : > { %11219 = vst.msk [vmem:[%s18599_s30 + $0x38] sm:$0xf] %vm2187_vm7, %v11216_v32 }
 0x6fa   : > { %v11165_v21 = vpop.permute.xlu0 %11164 }
 0x6fb   : > { %v11215_v54 = vsel %vm2183_vm6, %v11212_v41, %v11165_v21 }
 0x6fc   : > { %11218 = vst.msk [vmem:[%s18599_s30 + $0x18] sm:$0xf] %vm2187_vm7, %v11215_v54  ;;  %v12602_v36 = vpop.permute.xlu1 %12601 }
 0x6fe   : > { %v11169_v29 = vpop.permute.xlu0 %11168 }
 0x6ff   : > { %v11217_v34 = vsel %vm2183_vm6, %v11214_v45, %v11169_v29 }
 0x700   : > { %11220 = vst.msk [vmem:[%s18599_s30 + $0x58] sm:$0xf] %vm2187_vm7, %v11217_v34  ;;  %v12612_v48 = vpop.permute.xlu1 %12611 }
 0x702   : > { %v12504_v60 = vpop.permute.xlu0 %12503 }
 0x703   : > { %v12679_v37 = vsel %vm2127_vm8, %v20203_v7, %v12504_v60 }
 0x704   : > { %v12682_v17 = vsel %vm2131_vm9, %v12679_v37, %v12516_v55  ;;  %v12622_v25 = vpop.permute.xlu1 %12621 }
 0x706   : > { %v12518_v31 = vpop.permute.xlu0 %12517 }
 0x707   : > { %v12683_v0 = vsel %vm2131_vm9, %v12680_v61, %v12518_v31 }
 0x708   : > { %v12626_v1 = vpop.permute.xlu1 %12625  ;;  %v12686_v40 = vsel %vm2135_vm10, %v12683_v0, %v20439_v3 }
 0x70a   : > { %v12528_v6 = vpop.permute.xlu0 %12527 }
 0x70b   : > { %v12685_v16 = vsel %vm2135_vm10, %v12682_v17, %v12528_v6 }
 0x70c   : > { %v12636_v30 = vpop.permute.xlu1 %12635  ;;  %v12688_v57 = vsel %vm2139_vm11, %v12685_v16, %v20445_v10 }
 0x70e   : > { %v12538_v9 = vpop.permute.xlu0 %12537 }
 0x70f   : > { %v12687_v23 = vsel %vm2139_vm11, %v12684_v8, %v12538_v9 }
 0x710   : > { %v12646_v62 = vpop.permute.xlu1 %12645  ;;  %v12690_v2 = vsel %vm2143_vm12, %v12687_v23, %v12550_v46 }
 0x712   : > { %v12542_v58 = vpop.permute.xlu0 %12541 }
 0x713   : > { %v12689_v63 = vsel %vm2139_vm11, %v12686_v40, %v12542_v58 }
 0x714   : > { %v12650_v33 = vpop.permute.xlu1 %12649  ;;  %v12692_v5 = vsel %vm2143_vm12, %v12689_v63, %v12554_v49 }
 0x716   : > { %v12552_v28 = vpop.permute.xlu0 %12551 }
 0x717   : > { %v12691_v3 = vsel %vm2143_vm12, %v12688_v57, %v12552_v28 }
 0x718   : > { %v12694_v59 = vsel %vm2147_vm13, %v12691_v3, %v12564_v20  ;;  %v12660_v18 = vpop.permute.xlu1 %12659 }
 0x71a   : > { %v12562_v52 = vpop.permute.xlu0 %12561 }
 0x71b   : > { %v12693_v14 = vsel %vm2147_vm13, %v12690_v2, %v12562_v52 }
 0x71c   : > { %v12696_v12 = vsel %vm2151_vm14, %v12693_v14, %v12574_v15  ;;  %v12670_v54 = vpop.permute.xlu1 %12669 }
 0x71e   : > { %v12566_v50 = vpop.permute.xlu0 %12565 }
 0x71f   : > { %v12695_v46 = vsel %vm2147_vm13, %v12692_v5, %v12566_v50 }
 0x720   : > { %v12698_v27 = vsel %vm2151_vm14, %v12695_v46, %v12578_v39  ;;  %v12674_v9 = vpop.permute.xlu1 %12673 }
 0x722   : > { %v12576_v51 = vpop.permute.xlu0 %12575 }
 0x723   : > { %v12697_v10 = vsel %vm2151_vm14, %v12694_v59, %v12576_v51 }
 0x724   : > { %v12700_v44 = vsel %vm2155_vm15, %v12697_v10, %v12588_v38 }
 0x726   : > { %v12586_v47 = vpop.permute.xlu0 %12585 }
 0x727   : > { %v12699_v22 = vsel %vm2155_vm15, %v12696_v12, %v12586_v47 }
 0x728   : > { %v12702_v35 = vsel %vm2159_vm0, %v12699_v22, %v12598_v42 }
 0x72a   : > { %v12590_v13 = vpop.permute.xlu0 %12589 }
 0x72b   : > { %v12701_v49 = vsel %vm2155_vm15, %v12698_v27, %v12590_v13 }
 0x72c   : > { %v12704_v32 = vsel %vm2159_vm0, %v12701_v49, %v12602_v36 }
 0x72e   : > { %v12600_v7 = vpop.permute.xlu0 %12599 }
 0x72f   : > { %v12703_v41 = vsel %vm2159_vm0, %v12700_v44, %v12600_v7 }
 0x730   : > { %v12706_v29 = vsel %vm2163_vm1, %v12703_v41, %v12612_v48 }
 0x732   : > { %v12610_v55 = vpop.permute.xlu0 %12609 }
 0x733   : > { %v12705_v56 = vsel %vm2163_vm1, %v12702_v35, %v12610_v55 }
 0x734   : > { %v12708_v4 = vsel %vm2167_vm2, %v12705_v56, %v12622_v25 }
 0x736   : > { %v12614_v26 = vpop.permute.xlu0 %12613 }
 0x737   : > { %v12707_v20 = vsel %vm2163_vm1, %v12704_v32, %v12614_v26 }
 0x738   : > { %v12710_v45 = vsel %vm2167_vm2, %v12707_v20, %v12626_v1 }
 0x73a   : > { %v12624_v11 = vpop.permute.xlu0 %12623 }
 0x73b   : > { %v12709_v60 = vsel %vm2167_vm2, %v12706_v29, %v12624_v11 }
 0x73c   : > { %v12712_v39 = vsel %vm2171_vm3, %v12709_v60, %v12636_v30 }
 0x73e   : > { %v12634_v19 = vpop.permute.xlu0 %12633 }
 0x73f   : > { %v12711_v43 = vsel %vm2171_vm3, %v12708_v4, %v12634_v19 }
 0x740   : > { %v12714_v15 = vsel %vm2175_vm4, %v12711_v43, %v12646_v62 }
 0x742   : > { %v12638_v53 = vpop.permute.xlu0 %12637 }
 0x743   : > { %v12713_v37 = vsel %vm2171_vm3, %v12710_v45, %v12638_v53 }
 0x744   : > { %v12716_v38 = vsel %vm2175_vm4, %v12713_v37, %v12650_v33 }
 0x746   : > { %v12648_v21 = vpop.permute.xlu0 %12647 }
 0x747   : > { %v12715_v58 = vsel %vm2175_vm4, %v12712_v39, %v12648_v21 }
 0x748   : > { %v12718_v52 = vsel %vm2179_vm5, %v12715_v58, %v12660_v18 }
 0x74a   : > { %v12658_v34 = vpop.permute.xlu0 %12657 }
 0x74b   : > { %v12717_v17 = vsel %vm2179_vm5, %v12714_v15, %v12658_v34 }
 0x74c   : > { %v12720_v31 = vsel %vm2183_vm6, %v12717_v17, %v12670_v54 }
 0x74d   : > { %12723 = vst.msk [vmem:[%s18599_s30 + $0x1c] sm:$0xf] %vm2187_vm7, %v12720_v31 }
 0x74e   : > { %v12662_v6 = vpop.permute.xlu0 %12661 }
 0x74f   : > { %v12719_v42 = vsel %vm2179_vm5, %v12716_v38, %v12662_v6 }
 0x750   : > { %v12722_v28 = vsel %vm2183_vm6, %v12719_v42, %v12674_v9 }
 0x751   : > { %12725 = vst.msk [vmem:[%s18599_s30 + $0x5c] sm:$0xf] %vm2187_vm7, %v12722_v28 }
 0x752   : > { %v12672_v36 = vpop.permute.xlu0 %12671 }
 0x753   : > { %v12721_v50 = vsel %vm2183_vm6, %v12718_v52, %v12672_v36 }
 0x754   : > { %12724 = vst.msk [vmem:[%s18599_s30 + $0x3c] sm:$0xf] %vm2187_vm7, %v12721_v50 }
 0x755   : > { %s12909_s1 = sshll.u32 %s13691_s15, 2  ;;  %s13517_s2 = smul.u32 24, %s13695_s16 }
 0x756   : > { %s12758_s21 = sshll.u32 %s18599_s30, 4  ;;  %s13728_s29 = smov 512   ;;  %s12759_s21 = int_to_ptr.vmem [resolvable:$true] %s12758_s21 }
 0x757   : > { %s12739_s25 = sadd.s32 %s13517_s2, %s12909_s1  ;;  %13518 = sst [smem:[#allocation6]] (%p13815_p8), %s13728_s29 }
 0x758   : > { %s12910_s28 = sshll.u32 %s12739_s25, 7  ;;  %s13729_s7 = smov 1024  }
 0x759   : > { %s12741_s6 = scalar_lea.hbm %s20604_s3, %s12910_s28  ;;  %13519 = sst [smem:[#allocation6 + $0x1]] (%p13815_p8), %s13729_s7 }
 0x75a   : > { %s13730_s9 = smov 4   ;;  %s13731_s15 = smov 128  }
 0x75b   : > { %13520 = sst [smem:[#allocation6 + $0x2]] (%p13815_p8), %s13730_s9  ;;  %s13732_s16 = smov 8  }
 0x75c   : > { %13521 = sst [smem:[#allocation6 + $0x3]] (%p13815_p8), %s13731_s15  ;;  %s13733_s30 = smov [#allocation5]  }
 0x75d   : > { %13522 = sst [smem:[#allocation6 + $0x4]] (%p13815_p8), %s13731_s15  ;;  %s13734_s10 = smov 0  }
 0x75e   : > { %13523 = sst [smem:[#allocation6 + $0x5]] (%p13815_p8), %s13732_s16 }
 0x75f   : > { %13524 = dma.general (%p13815_p8), %s12759_s21, 1536, %s12741_s6, %s12727_s0, %s13733_s30, [#allocation6], %s13734_s10, 0  }
 0x760 PF: > { %p13530_p1 = scmp.ge.s32.totalorder %s13707_s19, 2  ;;  %s12786_s11 = sand.u32 1, %s13679_s12  }
 0x761   : > { %s12787_s20 = scalar_lea.sflag [#allocation4], %s12786_s11 }
 0x762   : > { %p13527_p2 = pnand %p13530_p1, %p13819_p9 }
 0x764   : > { %13674 = dma.done.wait (!%p13527_p2), %s12787_s20, 1536  }
 0x765   : > { %13676 = vsyncadd (!%p13527_p2), %s12787_s20, 4294965760  ;;  %s16_s19 = sadd.s32 1, %s13707_s19   ;;  %s21933_s12 = smov %s13683_s13 }
 0x766   : > { %p13_p3 = scmp.ge.s32.totalorder %s16_s19, 6   ;;  %s21934_s13 = smov %s13687_s14 }
 0x767   : > { %s21935_s14 = smov %s13827_s4  ;;  %s21936_s15 = smov %s13699_s17 }
 0x768   : > { %s21937_s16 = smov %s13703_s18  ;;  %s21938_s17 = smov %s21941_s22 }
 0x769   : > { %s21939_s18 = smov %s21945_s23  ;;  %15 = sbr.rel (!%p13_p3) target bundleno = 9 (0x9), region = 115 }
 0x770   :  { %12792 = vsyncpa [#allocation4], 1 }
 0x771   :  { %12794 = vsyncpa [#allocation4 + $0x1], 1 }

// kernel: tpu_custom_call.1
= control target key start
LH: loop header
LB: loop body
LE: loop exit
PB: predicated region body
PF: predicated region fallthrough
CT: control target
= control target key end

     0   :  { %8 = vsyncpa [#allocation3], 0  ;;  %s1088_s0 = inlined_call_operand.hbm [shape: f32[2,96,256], index: 0, kind: input, shape index: {}]   ;;  %s1089_s1 = inlined_call_operand.vmem [shape: f32[48,96], index: 1, kind: input, shape index: {}]   ;;  %s1090_s2 = inlined_call_operand.vmem [shape: f32[48,1], index: 2, kind: input, shape index: {}]   ;;  %s1091_s3 = inlined_call_operand.hbm [shape: f32[2,48,256], index: 3, kind: output, shape index: {}]  }
   0x1   :  { %10 = vsyncpa [#allocation3 + $0x1], 0 }
   0x2   :  { %11 = vsyncpa [#allocation4], 0 }
   0x3   :  { %13 = vsyncpa [#allocation4 + $0x1], 0  ;;  %s836_s12 = smov 0   ;;  %s838_s13 = smov 0  }
   0x4   :  { %s840_s14 = smov 0   ;;  %s842_s15 = smov 0  }
   0x5   :  { %s844_s16 = smov 0   ;;  %s846_s17 = smov 0  }
   0x6   :  { %s848_s18 = smov 0   ;;  %s850_s19 = smov 0  }
   0x7 LB: > { %s483_s20 = sadd.s32 4294967295, %s805_s19   ;;  %s484_s21 = sadd.s32 4294967294, %s805_s19   ;;  %s805_s19 = sphi %s850_s19, %s19_s19   ;;  %s801_s18 = sphi %s848_s18, %s1106_s18   ;;  %s797_s17 = sphi %s846_s17, %s1105_s17   ;;  %s793_s16 = sphi %s844_s16, %s1104_s16   ;;  %s789_s15 = sphi %s842_s15, %s1103_s15   ;;  %s785_s14 = sphi %s840_s14, %s1102_s14   ;;  %s781_s13 = sphi %s838_s13, %s1101_s13   ;;  %s777_s12 = sphi %s836_s12, %s1100_s12  }
   0x8   : > { %s28_s22 = sadd.s32 1, %s797_s17  ;;  %s31_s23 = sadd.s32 1, %s801_s18 }
   0x9   : > { %p29_p0 = scmp.ge.s32.totalorder %s28_s22, 2  ;;  %s40_s24 = sadd.s32 1, %s785_s14 }
   0xa   : > { %p47_p1 = scmp.ne.s32.totalorder %s785_s14, %s781_s13  ;;  %p48_p2 = scmp.eq.s32.totalorder %s805_s19, 0 }
   0xb   : > { %s1108_s22 = smov (%p29_p0, %s28_s22), 0  ;;  %s1110_s23 = smov (!%p29_p0, %s31_s23), %s801_s18 }
   0xc   : > { %s36_s25 = ssub.s32 %s797_s17, %s1108_s22  ;;  %p889_p3 = por %p48_p2, %p47_p1 }
   0xd   : > { %p33_p4 = scmp.ge.s32.totalorder %s1110_s23, 2  ;;  %p53_p5 = scmp.ne.s32.totalorder %s781_s13, %s777_s12 }
   0xe   : > { %p54_p6 = scmp.eq.s32.totalorder %s483_s20, 0  ;;  %p121_p7 = scmp.eq.s32.totalorder %s483_s20, 3 }
   0xf   : > { %s1112_s23 = smov (%p33_p4, %s1110_s23), 0  ;;  %p127_p10 = scmp.eq.s32.totalorder %s484_s21, 3 }
  0x10   : > { %p897_p8 = por %p54_p6, %p53_p5  ;;  %p901_p9 = por %p121_p7, %p47_p1 }
  0x11   : > { %s35_s29 = ssub.s32 %s801_s18, %s1112_s23  ;;  %p907_p12 = por %p127_p10, %p53_p5 }
  0x12   : > { %s1095_s28 = scalar_select %p901_p9, 1, 0 }
  0x13   : > { %s37_s30 = sor.u32 %s36_s25, %s35_s29  ;;  %p602_p13 = scmp.lt.s32.totalorder %s805_s19, 4 }
  0x14   : > { %p38_p11 = scmp.eq.s32.totalorder %s37_s30, 0  ;;  %s153_s5 = sand.u32 1, %s785_s14  }
  0x15   : > { %s1096_s4 = scalar_select %p907_p12, 1, 0 }
  0x16   : > { %s914_s6 = scalar_select %p38_p11, %s785_s14, %s40_s24  }
  0x17   : > { %s585_s7 = smul.u32 96, %s153_s5  ;;  %p919_p0 = pnand %p602_p13, %p889_p3 }
  0x18   : > { %s586_s8 = smul.u32 24, %s801_s18  ;;  %s931_s26 = scalar_lea.sflag [#allocation3], %s153_s5 }
  0x19   : > { %s157_s11 = scalar_lea.vmem [#allocation2], %s585_s7  ;;  %p679_p2 = pneg %p919_p0 }
  0x1a   : > { %s162_s10 = sadd.s32 %s797_s17, %s586_s8  ;;  %s165_s20 = sshll.u32 %s157_s11, 4  ;;  %s924_s20 = int_to_ptr.vmem [resolvable:$true] %s165_s20 }
  0x1b   : > { %s487_s21 = sshll.u32 %s162_s10, 7  ;;  %s682_s10 = scalar_lea.hbm %s1088_s0, 6144 }
  0x1c   : > { %s929_s24 = scalar_lea.hbm %s1088_s0, %s487_s21 }
  0x1d   : > { %s677_s30 = scalar_lea.hbm %s929_s24, 1536  ;;  %p683_p5 = scmp.lt.u32.totalorder %s929_s24, %s1088_s0 }
  0x1e   : > { %p678_p1 = scmp.ne.s32.totalorder %s929_s24, %s677_s30  ;;  %p684_p6 = scmp.lt.u32.totalorder %s682_s10, %s677_s30 }
  0x1f   : > { %p686_p10 = scmp.lt.u32.totalorder %s677_s30, %s929_s24 }
  0x20   : > { %p680_p3 = pnand %p679_p2, %p678_p1  ;;  %p685_p7 = por %p684_p6, %p683_p5 }
  0x22   : > { %p681_p4 = pneg %p680_p3  ;;  %p687_p11 = por %p686_p10, %p685_p7 }
  0x24   : > { %p688_p13 = pnand %p687_p11, %p681_p4 }
  0x26   : > { %691 = shalt.err (!%p688_p13)
}
  0x27   : > { %s692_s5 = scalar_lea.vmem %s924_s20, 1536  ;;  %s807_s25 = smov [#allocation2]  }
  0x28   : > { %p693_p1 = scmp.ne.s32.totalorder %s924_s20, %s692_s5  ;;  %s697_s29 = sshll.u32 %s807_s25, 4  ;;  %s698_s29 = int_to_ptr.vmem [resolvable:$false] %s697_s29 }
  0x29   : > { %s699_s7 = scalar_lea.vmem %s698_s29, 3072  ;;  %p700_p9 = scmp.lt.s32.totalorder %s924_s20, %s698_s29 }
  0x2a   : > { %p695_p3 = pnand %p693_p1, %p679_p2  ;;  %p701_p5 = scmp.lt.s32.totalorder %s699_s7, %s692_s5 }
  0x2c   : > { %p696_p12 = pneg %p695_p3  ;;  %p702_p6 = por %p701_p5, %p700_p9 }
  0x2e   : > { %p703_p7 = pnand %p702_p6, %p696_p12 }
  0x30   : > { %706 = shalt.err (!%p703_p7)
}
  0x31   : > { %s808_s30 = smov 256   ;;  %s809_s8 = smov 128  }
  0x32   : > { %s810_s10 = smov 8   ;;  %p488_p2 = scmp.ge.s32.totalorder %s805_s19, 1 }
  0x33   : > { %597 = dma.hbm_to_vmem [thread:$0]  (!%p919_p0), %s929_s24, 1536, %s924_s20, %s931_s26, %s808_s30, %s809_s8, %s810_s10  }
  0x34   : > { %p173_p4 = scmp.lt.s32.totalorder %s805_s19, 5 }
  0x36   : > { %p174_p10 = pnand %p488_p2, %p173_p4 }
  0x37   : > { %s962_s11 = sand.u32 (!%p174_p10), 1, %s781_s13  }
  0x38   : > { %177 = sbr.rel (%p174_p10) target bundleno = 326 (0x146), region = 32  ;;  %s180_s5 = scalar_lea.sflag (!%p174_p10), [#allocation3], %s962_s11 }
  0x39   : > { %s587_s21 = smul.u32 (!%p174_p10), 96, %s962_s11 }
  0x3b   : > { %s966_s25 = scalar_lea.vmem (!%p174_p10), [#allocation2], %s587_s21 }
  0x3f   : > { %768 = dma.done.wait (%p897_p8), %s180_s5, 1536  }
  0x40   : > { %770 = vsyncadd (%p897_p8), %s180_s5, 4294965760  ;;  %v811_v0 = vmov 0   ;;  %v212_v1 = vld [vmem:[%s966_s25] sm:$0xff]  ;;  %v213_v2 = vld [vmem:[%s966_s25 + $0x8] sm:$0xff]  ;;  %vm260_vm0 = vcmask 785408   ;;  %s589_s5 = smul.u32 12, %s793_s16 }
  0x41   : > { %676 = vset.pattern.permute.xlu1 %v811_v0  ;;  %675 = vset.pattern.permute.xlu0 %v811_v0  ;;  %v214_v3 = vld [vmem:[%s966_s25 + $0x10] sm:$0xff]  ;;  %v549_v4 = vpack.c.bf16 %v213_v2, %v212_v1  ;;  %v215_v5 = vld [vmem:[%s966_s25 + $0x18] sm:$0xff]  ;;  %v216_v7 = vld [vmem:[%s966_s25 + $0x20] sm:$0xff]  ;;  %s588_s27 = smul.u32 48, %s962_s11  ;;  %p1098_p9 = scmp.ne.s32.totalorder %s1095_s28, 0 }
  0x42   : > { %v553_v6 = vpack.c.bf16 %v215_v5, %v214_v3  ;;  %v217_v8 = vld [vmem:[%s966_s25 + $0x28] sm:$0xff]  ;;  %v206_v9 = vld [vmem:[%s1089_s1] sm:$0xff]  ;;  %v208_v10 = vld [vmem:[%s1089_s1 + $0x10] sm:$0xff]  ;;  %s392_s9 = sadd.s32 %s789_s15, %s589_s5  ;;  %s812_s30 = smov [#allocation5]  }
  0x43   : > { %550 = vmatprep.subr.bf16.mxu0 %v549_v4  ;;  %573 = vmatprep.subr.bf16.mxu1 %v549_v4  ;;  %v557_v11 = vpack.c.bf16 %v217_v8, %v216_v7  ;;  %v218_v12 = vld [vmem:[%s966_s25 + $0x30] sm:$0xff]  ;;  %v219_v13 = vld [vmem:[%s966_s25 + $0x38] sm:$0xff]  ;;  %v224_v15 = vld [vmem:[%s1090_s2] sm:$0xff]  ;;  %s205_s20 = scalar_lea.vmem [#allocation5], %s588_s27  ;;  %s495_s26 = sshll.u32 %s392_s9, 7 }
  0x44   : > { %552 = vmatpush3.bf16.msra.mxu0 %v549_v4  ;;  %579 = vmatpush3.bf16.msra.mxu1 %v549_v4  ;;  %v226_v14 = vld [vmem:[%s1090_s2 + $0x10] sm:$0xff]  ;;  %v227_v16 = vld [vmem:[%s1090_s2 + $0x18] sm:$0xff]  ;;  %v225_v17 = vld [vmem:[%s1090_s2 + $0x8] sm:$0xff]  ;;  %v561_v18 = vpack.c.bf16 %v219_v13, %v218_v12  ;;  %s395_s24 = sshll.u32 %s205_s20, 4  ;;  %s1034_s29 = scalar_lea.hbm %s1091_s3, %s495_s26  ;;  %s1029_s24 = int_to_ptr.vmem [resolvable:$true] %s395_s24 }
  0x45   : > { %554 = vmatprep.subr.bf16.mxu0 %v553_v6  ;;  %574 = vmatprep.subr.bf16.mxu1 %v553_v6  ;;  %v220_v19 = vld [vmem:[%s966_s25 + $0x40] sm:$0xff]  ;;  %v221_v20 = vld [vmem:[%s966_s25 + $0x48] sm:$0xff]  ;;  %v222_v24 = vld [vmem:[%s966_s25 + $0x50] sm:$0xff]  ;;  %s707_s7 = scalar_lea.vmem %s1029_s24, 768  ;;  %s711_s8 = sshll.u32 %s812_s30, 4  ;;  %s712_s8 = int_to_ptr.vmem [resolvable:$false] %s711_s8 }
  0x46   : > { %540 = vmatprep.mubr.msk.f32.mxu0 %vm260_vm0, %v206_v9  ;;  %543 = vmatprep.mubr.msk.f32.mxu1 %vm260_vm0, %v208_v10  ;;  %v229_v21 = vld [vmem:[%s1090_s2 + $0x28] sm:$0xff]  ;;  %v228_v22 = vld [vmem:[%s1090_s2 + $0x20] sm:$0xff]  ;;  %v565_v23 = vpack.c.bf16 %v221_v20, %v220_v19  ;;  %v223_v25 = vld [vmem:[%s966_s25 + $0x58] sm:$0xff]  ;;  %s381_s25 = scalar_lea.sflag [#allocation4], %s962_s11  ;;  %p708_p8 = scmp.ne.s32.totalorder %s1029_s24, %s707_s7 }
  0x47   : > { %242 = vperm.xlu1 %676, %v226_v14   ;;  %232 = vperm.xlu0 %675, %v224_v15   ;;  %v569_v26 = vpack.c.bf16 %v223_v25, %v222_v24  ;;  %v207_v27 = vld [vmem:[%s1089_s1 + $0x8] sm:$0xff]  ;;  %v209_v28 = vld [vmem:[%s1089_s1 + $0x18] sm:$0xff]  ;;  %v210_v29 = vld [vmem:[%s1089_s1 + $0x20] sm:$0xff]  ;;  %s713_s10 = scalar_lea.vmem %s712_s8, 1536  ;;  %p714_p11 = scmp.lt.s32.totalorder %s1029_s24, %s712_s8 }
  0x48   : > { %556 = vmatpush3.bf16.msra.mxu0 %v553_v6  ;;  %580 = vmatpush3.bf16.msra.mxu1 %v553_v6  ;;  %v211_v30 = vld [vmem:[%s1089_s1 + $0x28] sm:$0xff]  ;;  %p709_p12 = pnand %p708_p8, %p1098_p9  ;;  %p715_p13 = scmp.lt.s32.totalorder %s713_s10, %s707_s7 }
  0x49   : > { %558 = vmatprep.subr.bf16.mxu0 %v557_v11  ;;  %575 = vmatprep.subr.bf16.mxu1 %v557_v11 }
  0x4a   : > { %p710_p0 = pneg %p709_p12  ;;  %p716_p1 = por %p715_p13, %p714_p11 }
  0x4b   : > { %247 = vperm.xlu1 %676, %v227_v16   ;;  %237 = vperm.xlu0 %675, %v225_v17  }
  0x4c   : > { %560 = vmatpush3.bf16.msra.mxu0 %v557_v11  ;;  %581 = vmatpush3.bf16.msra.mxu1 %v557_v11  ;;  %p717_p3 = pnand %p716_p1, %p710_p0 }
  0x4d   : > { %562 = vmatprep.subr.bf16.mxu0 %v561_v18  ;;  %576 = vmatprep.subr.bf16.mxu1 %v561_v18 }
  0x4f   : > { %257 = vperm.xlu1 %676, %v229_v21   ;;  %252 = vperm.xlu0 %675, %v228_v22  }
  0x50   : > { %564 = vmatpush3.bf16.msra.mxu0 %v561_v18  ;;  %582 = vmatpush3.bf16.msra.mxu1 %v561_v18 }
  0x51   : > { %566 = vmatprep.subr.bf16.mxu0 %v565_v23  ;;  %577 = vmatprep.subr.bf16.mxu1 %v565_v23 }
  0x54   : > { %568 = vmatpush3.bf16.msra.mxu0 %v565_v23  ;;  %583 = vmatpush3.bf16.msra.mxu1 %v565_v23 }
  0x55   : > { %570 = vmatprep.subr.bf16.mxu0 %v569_v26  ;;  %578 = vmatprep.subr.bf16.mxu1 %v569_v26 }
  0x58   : > { %572 = vmatpush3.bf16.msra.mxu0 %v569_v26  ;;  %584 = vmatpush3.bf16.msra.mxu1 %v569_v26 }
  0x5b   : > { %541 = vmatmul.mubr.msk.f32.vlgmr.msra.gmra.mrb[0].mxu0 %vm260_vm0, %v207_v27  ;;  %544 = vmatmul.mubr.msk.f32.vlgmr.msra.gmra.mrb[0].mxu1 %vm260_vm0, %v209_v28 }
  0x5c   : > { %546 = vmatprep.mubr.msk.f32.mxu1 %vm260_vm0, %v210_v29 }
  0x5f   : > { %547 = vmatmul.mubr.msk.f32.gmra.mrb[2].mxu1 %vm260_vm0, %v211_v30 }
  0xc6   : > { %v243_v31 = vpop.permute.xlu1 %242  ;;  %v233_v32 = vpop.permute.xlu0 %232 }
  0xca   : > { %v248_v33 = vpop.permute.xlu1 %247  ;;  %v238_v34 = vpop.permute.xlu0 %237 }
  0xce   : > { %v258_v43 = vpop.permute.xlu1 %257  ;;  %v253_v45 = vpop.permute.xlu0 %252 }
 0x12e   : > { %v542_v35 = vpop.f32.mrb[0].mxu0  ;;  %v545_v36 = vpop.f32.mrb[0].mxu1 }
 0x12f   : > { %v351_v37 = vadd.f32 %v542_v35, %v238_v34  ;;  %v361_v38 = vadd.f32 %v545_v36, %v248_v33  ;;  %v345_v39 = vpop.f32.mrb[1].mxu0  ;;  %v355_v40 = vpop.f32.mrb[1].mxu1 }
 0x130   : > { %v346_v41 = vadd.f32 %v345_v39, %v233_v32  ;;  %v356_v42 = vadd.f32 %v355_v40, %v243_v31 }
 0x131   : > { %375 = vst [vmem:[%s205_s20 + $0x8] sm:$0xff] %v351_v37  ;;  %377 = vst [vmem:[%s205_s20 + $0x18] sm:$0xff] %v361_v38 }
 0x132   : > { %374 = vst [vmem:[%s205_s20] sm:$0xff] %v346_v41  ;;  %376 = vst [vmem:[%s205_s20 + $0x10] sm:$0xff] %v356_v42  ;;  %v548_v44 = vpop.f32.mrb[2].mxu1 }
 0x133   : > { %v371_v46 = vadd.f32 %v548_v44, %v258_v43  ;;  %v365_v47 = vpop.f32.mrb[3].mxu1 }
 0x134   : > { %v366_v48 = vadd.f32 %v365_v47, %v253_v45 }
 0x135   : > { %379 = vst [vmem:[%s205_s20 + $0x28] sm:$0xff] %v371_v46 }
 0x136   : > { %378 = vst [vmem:[%s205_s20 + $0x20] sm:$0xff] %v366_v48 }
 0x137   : > { %720 = shalt.err (!%p717_p3)
}
 0x138   : > { %s721_s21 = scalar_lea.hbm %s1034_s29, 768  ;;  %s725_s9 = scalar_lea.hbm %s1091_s3, 3072 }
 0x139   : > { %p722_p5 = scmp.ne.s32.totalorder %s1034_s29, %s721_s21  ;;  %p726_p2 = scmp.lt.u32.totalorder %s1034_s29, %s1091_s3 }
 0x13a   : > { %p727_p4 = scmp.lt.u32.totalorder %s725_s9, %s721_s21  ;;  %p729_p8 = scmp.lt.u32.totalorder %s721_s21, %s1034_s29 }
 0x13b   : > { %p723_p6 = pnand %p722_p5, %p1098_p9 }
 0x13c   : > { %p728_p10 = por %p727_p4, %p726_p2 }
 0x13d   : > { %p724_p7 = pneg %p723_p6 }
 0x13e   : > { %p730_p12 = por %p729_p8, %p728_p10 }
 0x140   : > { %p731_p0 = pnand %p730_p12, %p724_p7 }
 0x142   : > { %734 = shalt.err (!%p731_p0)
}
 0x143   : > { %s813_s15 = smov 128   ;;  %s814_s16 = smov 256  }
 0x144   : > { %s815_s7 = smov 8  }
 0x145   : > { %592 = dma.vmem_to_hbm [thread:$0]  (%p1098_p9), %s1029_s24, 768, %s1034_s29, %s381_s25, %s813_s15, %s814_s16, %s815_s7  }
 0x146 PF: > { %p603_p11 = scmp.ge.s32.totalorder %s805_s19, 2  ;;  %s410_s30 = sand.u32 1, %s777_s12  }
 0x147   : > { %p1099_p13 = scmp.ne.s32.totalorder %s1096_s4, 0  ;;  %s411_s8 = scalar_lea.sflag [#allocation4], %s410_s30 }
 0x149   : > { %p599_p1 = pnand %p603_p11, %p1099_p13 }
 0x14b   : > { %772 = dma.done.wait (!%p599_p1), %s411_s8, 768  }
 0x14c   : > { %774 = vsyncadd (!%p599_p1), %s411_s8, 4294966528  ;;  %s19_s19 = sadd.s32 1, %s805_s19   ;;  %s1100_s12 = smov %s781_s13 }
 0x14d   : > { %p16_p3 = scmp.ge.s32.totalorder %s19_s19, 6   ;;  %s1101_s13 = smov %s785_s14 }
 0x14e   : > { %s1102_s14 = smov %s914_s6  ;;  %s1103_s15 = smov %s797_s17 }
 0x14f   : > { %s1104_s16 = smov %s801_s18  ;;  %s1105_s17 = smov %s1108_s22 }
 0x150   : > { %s1106_s18 = smov %s1112_s23  ;;  %18 = sbr.rel (!%p16_p3) target bundleno = 7 (0x7), region = 77 }
 0x157   :  { %416 = vsyncpa [#allocation3], 1 }
 0x158   :  { %418 = vsyncpa [#allocation3 + $0x1], 1 }
 0x159   :  { %419 = vsyncpa [#allocation4], 1 }
 0x15a   :  { %421 = vsyncpa [#allocation4 + $0x1], 1 }

</bundles_post_ra>
